<compile_context>
chip_gen: v7x
topology: tpu7x:2x2x1
jax: 0.10.0
libtpu: 0.0.40
codegen_flags: <defaults>
</compile_context>

<pallas_src>
import jax
import jax.numpy as jnp
from jax.experimental import pallas as pl
from jax.experimental.pallas import tpu as pltpu

# ------------------------- configuration (small demo) -------------------------
NUM_HEROES = 128
NUM_ROLES = 8
NUM_ATTRS = 4
HERO_DIM = 8          # hero_embedding_dim (small-shape demo of the module)
ROLE_DIM = 4          # role_embedding_dim
ATTR_DIM = 4          # attr_embedding_dim

SINGLE = HERO_DIM + ATTR_DIM + ROLE_DIM               # per-slot embedding width
TOTAL = SINGLE * 4                                    # encoder input width (64)
H1, H2, H3, H4 = TOTAL * 2, TOTAL * 4, TOTAL * 8, TOTAL * 16
ENC_DIMS = [TOTAL, H1, H2, H3, H4, H3, H2, H1]        # 7 encoder Linear layers
LAYER_DIMS = list(zip(ENC_DIMS[:-1], ENC_DIMS[1:])) + [(H1, NUM_HEROES)]  # + decoder
OUT_WIDTHS = [n for (_, n) in LAYER_DIMS]             # [128,256,512,1024,512,256,128,128]
BIAS_TOTAL = sum(OUT_WIDTHS)                          # 2944; all offsets % 128 == 0
BN_EPS = 1e-5
LEAKY_SLOPE = 0.01                                    # nn.LeakyReLU default

BATCH = 200           # serving-style batch; exercises the padded last tile
TILE_B = 128          # batch tile: 128 (v5e) — raise to 256 on v6e / v7x

# Group layers by output width -> one packed bf16 weight buffer per width.
_groups = {}
for _li, (_k, _n) in enumerate(LAYER_DIMS):
    _groups.setdefault(_n, []).append(_li)
PACK_WIDTHS = tuple(sorted(_groups))                  # (128, 256, 512, 1024)
NUM_PACKS = len(PACK_WIDTHS)
LAYER_SLICES = [None] * len(LAYER_DIMS)               # layer -> (pack_idx, row_off, rows)
for _pi, _w in enumerate(PACK_WIDTHS):
    _off = 0
    for _li in _groups[_w]:
        _rows = LAYER_DIMS[_li][0]
        LAYER_SLICES[_li] = (_pi, _off, _rows)        # offsets are multiples of 64 (>= bf16 tile 16)
        _off += _rows


# ------------------------------ kernel -----------------------------------
def hero_recommender_kernel(x_ref, ids_ref, bias_ref, *rest):
    """rest = [pack128, pack256, pack512, pack1024 (bf16, BN-folded), out_ref]."""
    packs = rest[:NUM_PACKS]
    out_ref = rest[-1]

    h = x_ref[...]                                    # (TILE_B, TOTAL) bf16
    col = 0
    scores = None
    for layer in range(len(LAYER_DIMS)):
        pidx, roff, rows = LAYER_SLICES[layer]
        n = OUT_WIDTHS[layer]
        w = packs[pidx][roff:roff + rows, :]          # static, tile-aligned slice (bf16)
        z = jnp.dot(h, w, preferred_element_type=jnp.float32)
        z = z + bias_ref[:, col:col + n]              # (1, n) f32 bias, lane-aligned slice
        col += n
        if layer < len(LAYER_DIMS) - 1:
            # LeakyReLU (slope 0.01) in f32 on the VPU; Dropout = identity (eval).
            h = jnp.maximum(z, LEAKY_SLOPE * z).astype(jnp.bfloat16)
        else:
            scores = z                                # decoder output, f32

    # masked_fill: already-picked heroes (id > 0) and padding hero 0 -> -100
    ids = ids_ref[...]                                # (TILE_B, 4) int32
    hero_cols = jax.lax.broadcasted_iota(jnp.int32, scores.shape, 1)
    mask = hero_cols == 0
    for j in range(4):
        idj = ids[:, j:j + 1]                         # (TILE_B, 1)
        mask = mask | ((hero_cols == idj) & (idj > 0))
    out_ref[...] = jnp.where(mask, jnp.float32(-100.0), scores)


# --------------------- one-time parameter preparation ----------------------
def prepare_params(params):
    """Fold eval-mode BatchNorm into each Linear, cast to bf16, pack weights by
    output width (4 buffers) and all biases into one (1, BIAS_TOTAL) f32 array.
    Call once and cache; do NOT redo per forward call."""
    folded_w, folded_b = [], []
    for (W, b, gamma, beta, mean, var) in params["encoder"]:
        s = gamma / jnp.sqrt(var + BN_EPS)            # f32 fold
        folded_w.append((W * s[None, :]).astype(jnp.bfloat16))
        folded_b.append(b * s + (beta - mean * s))
    Wd, bd = params["decoder"]
    folded_w.append(Wd.astype(jnp.bfloat16))
    folded_b.append(bd)

    packs = tuple(
        jnp.concatenate([folded_w[li] for li in _groups[w]], axis=0)
        for w in PACK_WIDTHS)
    bias_pack = jnp.concatenate(folded_b).reshape(1, BIAS_TOTAL).astype(jnp.float32)
    return packs, bias_pack


# ------------------------------ wrapper -----------------------------------
def embed_inputs(hero_ids, attr_ids, role_ids, params):
    hero_e = params["hero_emb"][hero_ids]             # (B, 4, HERO_DIM)
    attr_e = params["attr_emb"][attr_ids]             # (B, 4, ATTR_DIM)
    role_e = params["role_emb"][role_ids]             # (B, 4, ROLE_DIM)
    B = hero_ids.shape[0]
    x = jnp.concatenate([hero_e, attr_e, role_e], axis=-1).reshape(B, TOTAL)
    return x.astype(jnp.bfloat16)                     # bf16 straight from the wrapper


@jax.jit
def hero_recommender_forward(hero_ids, attr_ids, role_ids, params, packs, bias_pack):
    B = hero_ids.shape[0]
    x = embed_inputs(hero_ids, attr_ids, role_ids, params)
    ids = hero_ids.astype(jnp.int32)

    # Pad the batch to a multiple of TILE_B; padded rows are sliced off below.
    B_pad = -(-B // TILE_B) * TILE_B
    if B_pad != B:
        x = jnp.pad(x, ((0, B_pad - B), (0, 0)))
        ids = jnp.pad(ids, ((0, B_pad - B), (0, 0)))

    in_specs = [
        pl.BlockSpec((TILE_B, TOTAL), lambda i: (i, 0)),       # x (batch-tiled, bf16)
        pl.BlockSpec((TILE_B, 4), lambda i: (i, 0)),           # hero_ids (batch-tiled)
        pl.BlockSpec((1, BIAS_TOTAL), lambda i: (0, 0)),       # packed biases
    ] + [
        # Constant block index -> each weight pack is DMA'd once and stays
        # VMEM-resident across all batch tiles.
        pl.BlockSpec(p.shape, lambda i: (0, 0)) for p in packs
    ]
    out_spec = pl.BlockSpec((TILE_B, NUM_HEROES), lambda i: (i, 0))

    out = pl.pallas_call(
        hero_recommender_kernel,
        out_shape=jax.ShapeDtypeStruct((B_pad, NUM_HEROES), jnp.float32),
        grid=(B_pad // TILE_B,),
        in_specs=in_specs,
        out_specs=out_spec,
        compiler_params=pltpu.CompilerParams(
            dimension_semantics=("parallel",),   # shards batch tiles across v7x's 2 TCs
            vmem_limit_bytes=32 << 20,
        ),
    )(x, ids, bias_pack, *packs)
    return out[:B]


# ------------------- pure-JAX reference (same numerics) --------------------
def reference_forward(hero_ids, attr_ids, role_ids, params, packs, bias_pack):
    h = embed_inputs(hero_ids, attr_ids, role_ids, params)
    col = 0
    scores = None
    for layer in range(len(LAYER_DIMS)):
        pidx, roff, rows = LAYER_SLICES[layer]
        n = OUT_WIDTHS[layer]
        w = packs[pidx][roff:roff + rows, :]
        z = jnp.dot(h, w, preferred_element_type=jnp.float32) + bias_pack[:, col:col + n]
        col += n
        if layer < len(LAYER_DIMS) - 1:
            h = jnp.maximum(z, LEAKY_SLOPE * z).astype(jnp.bfloat16)
        else:
            scores = z
    cols = jnp.arange(NUM_HEROES)[None, :]
    mask = cols == 0
    ids = hero_ids.astype(jnp.int32)
    for j in range(4):
        idj = ids[:, j:j + 1]
        mask = mask | ((cols == idj) & (idj > 0))
    return jnp.where(mask, jnp.float32(-100.0), scores)


# --------------------------- deterministic init ----------------------------
def init_params(key):
    ks = jax.random.split(key, 3 + 2 * (len(ENC_DIMS) - 1) + 2)
    it = iter(ks)

    # nn.Embedding default: N(0,1); padding_idx=0 zeros hero row 0.
    hero_emb = jax.random.normal(next(it), (NUM_HEROES, HERO_DIM), jnp.float32)
    hero_emb = hero_emb.at[0].set(0.0)
    role_emb = jax.random.normal(next(it), (NUM_ROLES, ROLE_DIM), jnp.float32)
    attr_emb = jax.random.normal(next(it), (NUM_ATTRS, ATTR_DIM), jnp.float32)

    def linear(kw, kb, fan_in, fan_out):
        bound = 1.0 / jnp.sqrt(jnp.float32(fan_in))
        W = jax.random.uniform(kw, (fan_in, fan_out), jnp.float32, -bound, bound)
        b = jax.random.uniform(kb, (fan_out,), jnp.float32, -bound, bound)
        return W, b

    encoder = []
    for i in range(len(ENC_DIMS) - 1):
        d_in, d_out = ENC_DIMS[i], ENC_DIMS[i + 1]
        W, b = linear(next(it), next(it), d_in, d_out)
        # BatchNorm1d defaults: gamma=1, beta=0, running_mean=0, running_var=1
        gamma = jnp.ones((d_out,), jnp.float32)
        beta = jnp.zeros((d_out,), jnp.float32)
        mean = jnp.zeros((d_out,), jnp.float32)
        var = jnp.ones((d_out,), jnp.float32)
        encoder.append((W, b, gamma, beta, mean, var))

    Wd, bd = linear(next(it), next(it), H1, NUM_HEROES)

    return {"hero_emb": hero_emb, "role_emb": role_emb, "attr_emb": attr_emb,
            "encoder": encoder, "decoder": (Wd, bd)}


# ------------------------------- main --------------------------------------
if __name__ == "__main__":
    key = jax.random.PRNGKey(0)
    k1, k2, k3, kp = jax.random.split(key, 4)
    hero_ids = jax.random.randint(k1, (BATCH, 4), 0, NUM_HEROES, dtype=jnp.int32)
    attr_ids = jax.random.randint(k2, (BATCH, 4), 0, NUM_ATTRS, dtype=jnp.int32)
    role_ids = jax.random.randint(k3, (BATCH, 4), 0, NUM_ROLES, dtype=jnp.int32)

    params = init_params(kp)
    packs, bias_pack = prepare_params(params)       # one-time prep / cache

    scores = hero_recommender_forward(hero_ids, attr_ids, role_ids,
                                      params, packs, bias_pack)
    scores = jax.block_until_ready(scores)

    assert scores.shape == (BATCH, NUM_HEROES)
    assert scores.dtype == jnp.float32
    # padding hero (col 0) must always be masked to -100
    assert bool(jnp.all(scores[:, 0] == -100.0))
    # every picked hero with id > 0 must be masked to -100
    picked_vals = jnp.take_along_axis(scores, hero_ids, axis=1)
    assert bool(jnp.all(jnp.where(hero_ids > 0, picked_vals == -100.0, True)))
    # same-numerics pure-JAX reference (bf16 weights/activations, f32 accumulation)
    ref = reference_forward(hero_ids, attr_ids, role_ids, params, packs, bias_pack)
    assert bool(jnp.allclose(scores, ref, rtol=5e-2, atol=5e-2))
    print("KERNEL_OK")
</pallas_src>

<mosaic_0001>
module attributes {stable_mosaic.version = 11 : i64} {
  func.func @hero_recommender_kernel(%arg0: i32, %arg1: memref<128x64xbf16, #tpu.memory_space<vmem>>, %arg2: memref<128x4xi32, #tpu.memory_space<vmem>>, %arg3: memref<1x2944xf32, #tpu.memory_space<vmem>>, %arg4: memref<448x128xbf16, #tpu.memory_space<vmem>>, %arg5: memref<640x256xbf16, #tpu.memory_space<vmem>>, %arg6: memref<1280x512xbf16, #tpu.memory_space<vmem>>, %arg7: memref<512x1024xbf16, #tpu.memory_space<vmem>>, %arg8: memref<128x128xf32, #tpu.memory_space<vmem>>) attributes {dimension_semantics = [#tpu.dimension_semantics<parallel>], iteration_bounds = array<i64: 2>, scalar_prefetch = 0 : i64, scratch_operands = 0 : i64, tpu.core_type = #tpu.core_type<tc>, window_params = [{transform_indices = @transform_0, window_bounds = array<i64: 128, 64>}, {transform_indices = @transform_1, window_bounds = array<i64: 128, 4>}, {pipeline_mode = #tpu.pipeline_mode<synchronous>, transform_indices = @transform_2, window_bounds = array<i64: 1, 2944>}, {pipeline_mode = #tpu.pipeline_mode<synchronous>, transform_indices = @transform_3, window_bounds = array<i64: 448, 128>}, {pipeline_mode = #tpu.pipeline_mode<synchronous>, transform_indices = @transform_4, window_bounds = array<i64: 640, 256>}, {pipeline_mode = #tpu.pipeline_mode<synchronous>, transform_indices = @transform_5, window_bounds = array<i64: 1280, 512>}, {pipeline_mode = #tpu.pipeline_mode<synchronous>, transform_indices = @transform_6, window_bounds = array<i64: 512, 1024>}, {transform_indices = @transform_7, window_bounds = array<i64: 128, 128>}]} {
    %c0 = arith.constant 0 : index
    %c0_0 = arith.constant 0 : index
    %0 = vector.load %arg1[%c0, %c0_0] : memref<128x64xbf16, #tpu.memory_space<vmem>>, vector<128x64xbf16>
    %c0_1 = arith.constant 0 : index
    %c0_2 = arith.constant 0 : index
    %1 = vector.load %arg4[%c0_1, %c0_2] : memref<448x128xbf16, #tpu.memory_space<vmem>>, vector<64x128xbf16>
    %cst = arith.constant dense<0.000000e+00> : vector<128x128xf32>
    %2 = tpu.matmul %0, %1, %cst {dimension_numbers = #tpu.dot_dimension_numbers<[1], [0], [0], [1], [0, 0, 1, 1], [], []>} : vector<128x64xbf16>, vector<64x128xbf16>, vector<128x128xf32> -> vector<128x128xf32>
    %c0_3 = arith.constant 0 : index
    %c0_4 = arith.constant 0 : index
    %3 = vector.load %arg3[%c0_3, %c0_4] : memref<1x2944xf32, #tpu.memory_space<vmem>>, vector<1x128xf32>
    %4 = vector.broadcast %3 : vector<1x128xf32> to vector<128x128xf32>
    %5 = arith.addf %2, %4 : vector<128x128xf32>
    %cst_5 = arith.constant 0.00999999977 : f32
    %6 = vector.broadcast %cst_5 : f32 to vector<128x128xf32>
    %7 = arith.mulf %6, %5 : vector<128x128xf32>
    %8 = arith.maximumf %5, %7 : vector<128x128xf32>
    %9 = arith.truncf %8 : vector<128x128xf32> to vector<128x128xbf16>
    %c0_6 = arith.constant 0 : index
    %c0_7 = arith.constant 0 : index
    %10 = vector.load %arg5[%c0_6, %c0_7] : memref<640x256xbf16, #tpu.memory_space<vmem>>, vector<128x256xbf16>
    %cst_8 = arith.constant dense<0.000000e+00> : vector<128x256xf32>
    %11 = tpu.matmul %9, %10, %cst_8 {dimension_numbers = #tpu.dot_dimension_numbers<[1], [0], [0], [1], [0, 0, 1, 1], [], []>} : vector<128x128xbf16>, vector<128x256xbf16>, vector<128x256xf32> -> vector<128x256xf32>
    %c0_9 = arith.constant 0 : index
    %c128 = arith.constant 128 : index
    %12 = vector.load %arg3[%c0_9, %c128] : memref<1x2944xf32, #tpu.memory_space<vmem>>, vector<1x256xf32>
    %13 = vector.broadcast %12 : vector<1x256xf32> to vector<128x256xf32>
    %14 = arith.addf %11, %13 : vector<128x256xf32>
    %cst_10 = arith.constant 0.00999999977 : f32
    %15 = vector.broadcast %cst_10 : f32 to vector<128x256xf32>
    %16 = arith.mulf %15, %14 : vector<128x256xf32>
    %17 = arith.maximumf %14, %16 : vector<128x256xf32>
    %18 = arith.truncf %17 : vector<128x256xf32> to vector<128x256xbf16>
    %c0_11 = arith.constant 0 : index
    %c0_12 = arith.constant 0 : index
    %19 = vector.load %arg6[%c0_11, %c0_12] : memref<1280x512xbf16, #tpu.memory_space<vmem>>, vector<256x512xbf16>
    %cst_13 = arith.constant dense<0.000000e+00> : vector<128x512xf32>
    %20 = tpu.matmul %18, %19, %cst_13 {dimension_numbers = #tpu.dot_dimension_numbers<[1], [0], [0], [1], [0, 0, 1, 1], [], []>} : vector<128x256xbf16>, vector<256x512xbf16>, vector<128x512xf32> -> vector<128x512xf32>
    %c0_14 = arith.constant 0 : index
    %c384 = arith.constant 384 : index
    %21 = vector.load %arg3[%c0_14, %c384] : memref<1x2944xf32, #tpu.memory_space<vmem>>, vector<1x512xf32>
    %22 = vector.broadcast %21 : vector<1x512xf32> to vector<128x512xf32>
    %23 = arith.addf %20, %22 : vector<128x512xf32>
    %cst_15 = arith.constant 0.00999999977 : f32
    %24 = vector.broadcast %cst_15 : f32 to vector<128x512xf32>
    %25 = arith.mulf %24, %23 : vector<128x512xf32>
    %26 = arith.maximumf %23, %25 : vector<128x512xf32>
    %27 = arith.truncf %26 : vector<128x512xf32> to vector<128x512xbf16>
    %c0_16 = arith.constant 0 : index
    %c0_17 = arith.constant 0 : index
    %28 = vector.load %arg7[%c0_16, %c0_17] : memref<512x1024xbf16, #tpu.memory_space<vmem>>, vector<512x1024xbf16>
    %cst_18 = arith.constant dense<0.000000e+00> : vector<128x1024xf32>
    %29 = tpu.matmul %27, %28, %cst_18 {dimension_numbers = #tpu.dot_dimension_numbers<[1], [0], [0], [1], [0, 0, 1, 1], [], []>} : vector<128x512xbf16>, vector<512x1024xbf16>, vector<128x1024xf32> -> vector<128x1024xf32>
    %c0_19 = arith.constant 0 : index
    %c896 = arith.constant 896 : index
    %30 = vector.load %arg3[%c0_19, %c896] : memref<1x2944xf32, #tpu.memory_space<vmem>>, vector<1x1024xf32>
    %31 = vector.broadcast %30 : vector<1x1024xf32> to vector<128x1024xf32>
    %32 = arith.addf %29, %31 : vector<128x1024xf32>
    %cst_20 = arith.constant 0.00999999977 : f32
    %33 = vector.broadcast %cst_20 : f32 to vector<128x1024xf32>
    %34 = arith.mulf %33, %32 : vector<128x1024xf32>
    %35 = arith.maximumf %32, %34 : vector<128x1024xf32>
    %36 = arith.truncf %35 : vector<128x1024xf32> to vector<128x1024xbf16>
    %c256 = arith.constant 256 : index
    %c0_21 = arith.constant 0 : index
    %37 = vector.load %arg6[%c256, %c0_21] : memref<1280x512xbf16, #tpu.memory_space<vmem>>, vector<1024x512xbf16>
    %cst_22 = arith.constant dense<0.000000e+00> : vector<128x512xf32>
    %38 = tpu.matmul %36, %37, %cst_22 {dimension_numbers = #tpu.dot_dimension_numbers<[1], [0], [0], [1], [0, 0, 1, 1], [], []>} : vector<128x1024xbf16>, vector<1024x512xbf16>, vector<128x512xf32> -> vector<128x512xf32>
    %c0_23 = arith.constant 0 : index
    %c1920 = arith.constant 1920 : index
    %39 = vector.load %arg3[%c0_23, %c1920] : memref<1x2944xf32, #tpu.memory_space<vmem>>, vector<1x512xf32>
    %40 = vector.broadcast %39 : vector<1x512xf32> to vector<128x512xf32>
    %41 = arith.addf %38, %40 : vector<128x512xf32>
    %cst_24 = arith.constant 0.00999999977 : f32
    %42 = vector.broadcast %cst_24 : f32 to vector<128x512xf32>
    %43 = arith.mulf %42, %41 : vector<128x512xf32>
    %44 = arith.maximumf %41, %43 : vector<128x512xf32>
    %45 = arith.truncf %44 : vector<128x512xf32> to vector<128x512xbf16>
    %c128_25 = arith.constant 128 : index
    %c0_26 = arith.constant 0 : index
    %46 = vector.load %arg5[%c128_25, %c0_26] : memref<640x256xbf16, #tpu.memory_space<vmem>>, vector<512x256xbf16>
    %cst_27 = arith.constant dense<0.000000e+00> : vector<128x256xf32>
    %47 = tpu.matmul %45, %46, %cst_27 {dimension_numbers = #tpu.dot_dimension_numbers<[1], [0], [0], [1], [0, 0, 1, 1], [], []>} : vector<128x512xbf16>, vector<512x256xbf16>, vector<128x256xf32> -> vector<128x256xf32>
    %c0_28 = arith.constant 0 : index
    %c2432 = arith.constant 2432 : index
    %48 = vector.load %arg3[%c0_28, %c2432] : memref<1x2944xf32, #tpu.memory_space<vmem>>, vector<1x256xf32>
    %49 = vector.broadcast %48 : vector<1x256xf32> to vector<128x256xf32>
    %50 = arith.addf %47, %49 : vector<128x256xf32>
    %cst_29 = arith.constant 0.00999999977 : f32
    %51 = vector.broadcast %cst_29 : f32 to vector<128x256xf32>
    %52 = arith.mulf %51, %50 : vector<128x256xf32>
    %53 = arith.maximumf %50, %52 : vector<128x256xf32>
    %54 = arith.truncf %53 : vector<128x256xf32> to vector<128x256xbf16>
    %c64 = arith.constant 64 : index
    %c0_30 = arith.constant 0 : index
    %55 = vector.load %arg4[%c64, %c0_30] : memref<448x128xbf16, #tpu.memory_space<vmem>>, vector<256x128xbf16>
    %cst_31 = arith.constant dense<0.000000e+00> : vector<128x128xf32>
    %56 = tpu.matmul %54, %55, %cst_31 {dimension_numbers = #tpu.dot_dimension_numbers<[1], [0], [0], [1], [0, 0, 1, 1], [], []>} : vector<128x256xbf16>, vector<256x128xbf16>, vector<128x128xf32> -> vector<128x128xf32>
    %c0_32 = arith.constant 0 : index
    %c2688 = arith.constant 2688 : index
    %57 = vector.load %arg3[%c0_32, %c2688] : memref<1x2944xf32, #tpu.memory_space<vmem>>, vector<1x128xf32>
    %58 = vector.broadcast %57 : vector<1x128xf32> to vector<128x128xf32>
    %59 = arith.addf %56, %58 : vector<128x128xf32>
    %cst_33 = arith.constant 0.00999999977 : f32
    %60 = vector.broadcast %cst_33 : f32 to vector<128x128xf32>
    %61 = arith.mulf %60, %59 : vector<128x128xf32>
    %62 = arith.maximumf %59, %61 : vector<128x128xf32>
    %63 = arith.truncf %62 : vector<128x128xf32> to vector<128x128xbf16>
    %c320 = arith.constant 320 : index
    %c0_34 = arith.constant 0 : index
    %64 = vector.load %arg4[%c320, %c0_34] : memref<448x128xbf16, #tpu.memory_space<vmem>>, vector<128x128xbf16>
    %cst_35 = arith.constant dense<0.000000e+00> : vector<128x128xf32>
    %65 = tpu.matmul %63, %64, %cst_35 {dimension_numbers = #tpu.dot_dimension_numbers<[1], [0], [0], [1], [0, 0, 1, 1], [], []>} : vector<128x128xbf16>, vector<128x128xbf16>, vector<128x128xf32> -> vector<128x128xf32>
    %c0_36 = arith.constant 0 : index
    %c2816 = arith.constant 2816 : index
    %66 = vector.load %arg3[%c0_36, %c2816] : memref<1x2944xf32, #tpu.memory_space<vmem>>, vector<1x128xf32>
    %67 = vector.broadcast %66 : vector<1x128xf32> to vector<128x128xf32>
    %68 = arith.addf %65, %67 : vector<128x128xf32>
    %c0_37 = arith.constant 0 : index
    %c0_38 = arith.constant 0 : index
    %69 = vector.load %arg2[%c0_37, %c0_38] : memref<128x4xi32, #tpu.memory_space<vmem>>, vector<128x4xi32>
    %70 = tpu.iota {dimensions = array<i32: 1>} : vector<128x128xi32>
    %c0_i32 = arith.constant 0 : i32
    %71 = vector.broadcast %c0_i32 : i32 to vector<128x128xi32>
    %72 = arith.cmpi eq, %70, %71 : vector<128x128xi32>
    %73 = vector.extract_strided_slice %69 {offsets = [0, 0], sizes = [128, 1], strides = [1, 1]} : vector<128x4xi32> to vector<128x1xi32>
    %74 = vector.broadcast %73 : vector<128x1xi32> to vector<128x128xi32>
    %75 = arith.cmpi eq, %70, %74 : vector<128x128xi32>
    %c0_i32_39 = arith.constant 0 : i32
    %76 = vector.broadcast %c0_i32_39 : i32 to vector<128x1xi32>
    %77 = arith.cmpi sgt, %73, %76 : vector<128x1xi32>
    %78 = vector.broadcast %77 : vector<128x1xi1> to vector<128x128xi1>
    %79 = arith.andi %75, %78 : vector<128x128xi1>
    %80 = arith.ori %72, %79 : vector<128x128xi1>
    %81 = vector.extract_strided_slice %69 {offsets = [0, 1], sizes = [128, 1], strides = [1, 1]} : vector<128x4xi32> to vector<128x1xi32>
    %82 = vector.broadcast %81 : vector<128x1xi32> to vector<128x128xi32>
    %83 = arith.cmpi eq, %70, %82 : vector<128x128xi32>
    %c0_i32_40 = arith.constant 0 : i32
    %84 = vector.broadcast %c0_i32_40 : i32 to vector<128x1xi32>
    %85 = arith.cmpi sgt, %81, %84 : vector<128x1xi32>
    %86 = vector.broadcast %85 : vector<128x1xi1> to vector<128x128xi1>
    %87 = arith.andi %83, %86 : vector<128x128xi1>
    %88 = arith.ori %80, %87 : vector<128x128xi1>
    %89 = vector.extract_strided_slice %69 {offsets = [0, 2], sizes = [128, 1], strides = [1, 1]} : vector<128x4xi32> to vector<128x1xi32>
    %90 = vector.broadcast %89 : vector<128x1xi32> to vector<128x128xi32>
    %91 = arith.cmpi eq, %70, %90 : vector<128x128xi32>
    %c0_i32_41 = arith.constant 0 : i32
    %92 = vector.broadcast %c0_i32_41 : i32 to vector<128x1xi32>
    %93 = arith.cmpi sgt, %89, %92 : vector<128x1xi32>
    %94 = vector.broadcast %93 : vector<128x1xi1> to vector<128x128xi1>
    %95 = arith.andi %91, %94 : vector<128x128xi1>
    %96 = arith.ori %88, %95 : vector<128x128xi1>
    %97 = vector.extract_strided_slice %69 {offsets = [0, 3], sizes = [128, 1], strides = [1, 1]} : vector<128x4xi32> to vector<128x1xi32>
    %98 = vector.broadcast %97 : vector<128x1xi32> to vector<128x128xi32>
    %99 = arith.cmpi eq, %70, %98 : vector<128x128xi32>
    %c0_i32_42 = arith.constant 0 : i32
    %100 = vector.broadcast %c0_i32_42 : i32 to vector<128x1xi32>
    %101 = arith.cmpi sgt, %97, %100 : vector<128x1xi32>
    %102 = vector.broadcast %101 : vector<128x1xi1> to vector<128x128xi1>
    %103 = arith.andi %99, %102 : vector<128x128xi1>
    %104 = arith.ori %96, %103 : vector<128x128xi1>
    %cst_43 = arith.constant -1.000000e+02 : f32
    %105 = vector.broadcast %cst_43 : f32 to vector<128x128xf32>
    %106 = arith.select %104, %105, %68 : vector<128x128xi1>, vector<128x128xf32>
    %c0_44 = arith.constant 0 : index
    %c0_45 = arith.constant 0 : index
    %107 = vector.load %arg8[%c0_44, %c0_45] : memref<128x128xf32, #tpu.memory_space<vmem>>, vector<128x128xf32>
    tpu.vector_store %arg8[%c0_44, %c0_45], %106 {strides = array<i32>} : memref<128x128xf32, #tpu.memory_space<vmem>>, vector<128x128xf32>,
    return
  }
  func.func @transform_0(%arg0: i32) -> (i32, i32) {
    %c0_i32 = arith.constant 0 : i32
    %c0_i32_0 = arith.constant 0 : i32
    return %arg0, %c0_i32 : i32, i32
  }
  func.func @transform_1(%arg0: i32) -> (i32, i32) {
    %c0_i32 = arith.constant 0 : i32
    %c0_i32_0 = arith.constant 0 : i32
    return %arg0, %c0_i32 : i32, i32
  }
  func.func @transform_2(%arg0: i32) -> (i32, i32) {
    %c0_i32 = arith.constant 0 : i32
    %c0_i32_0 = arith.constant 0 : i32
    %c0_i32_1 = arith.constant 0 : i32
    return %c0_i32, %c0_i32_0 : i32, i32
  }
  func.func @transform_3(%arg0: i32) -> (i32, i32) {
    %c0_i32 = arith.constant 0 : i32
    %c0_i32_0 = arith.constant 0 : i32
    %c0_i32_1 = arith.constant 0 : i32
    return %c0_i32, %c0_i32_0 : i32, i32
  }
  func.func @transform_4(%arg0: i32) -> (i32, i32) {
    %c0_i32 = arith.constant 0 : i32
    %c0_i32_0 = arith.constant 0 : i32
    %c0_i32_1 = arith.constant 0 : i32
    return %c0_i32, %c0_i32_0 : i32, i32
  }
  func.func @transform_5(%arg0: i32) -> (i32, i32) {
    %c0_i32 = arith.constant 0 : i32
    %c0_i32_0 = arith.constant 0 : i32
    %c0_i32_1 = arith.constant 0 : i32
    return %c0_i32, %c0_i32_0 : i32, i32
  }
  func.func @transform_6(%arg0: i32) -> (i32, i32) {
    %c0_i32 = arith.constant 0 : i32
    %c0_i32_0 = arith.constant 0 : i32
    %c0_i32_1 = arith.constant 0 : i32
    return %c0_i32, %c0_i32_0 : i32, i32
  }
  func.func @transform_7(%arg0: i32) -> (i32, i32) {
    %c0_i32 = arith.constant 0 : i32
    %c0_i32_0 = arith.constant 0 : i32
    return %arg0, %c0_i32 : i32, i32
  }
}

</mosaic_0001>

<bundles_post_ra>
// kernel: hero_recommender_forward.1
= control target key start
LH: loop header
LB: loop body
LE: loop exit
PB: predicated region body
PF: predicated region fallthrough
CT: control target
= control target key end

     0   :  { %s11167_s24 = smov 0   ;;  %s15863_s0 = inlined_call_operand.vmem [shape: bf16[256,64], index: 0, kind: input, shape index: {}]   ;;  %s15864_s1 = inlined_call_operand.vmem [shape: s32[256,4], index: 1, kind: input, shape index: {}]   ;;  %s15865_s2 = inlined_call_operand.vmem [shape: f32[1,2944], index: 2, kind: input, shape index: {}]   ;;  %s15866_s3 = inlined_call_operand.vmem [shape: bf16[448,128], index: 3, kind: input, shape index: {}]   ;;  %s15867_s4 = inlined_call_operand.vmem [shape: bf16[640,256], index: 4, kind: input, shape index: {}]   ;;  %s15868_s5 = inlined_call_operand.vmem [shape: bf16[1280,512], index: 5, kind: input, shape index: {}]   ;;  %s15869_s6 = inlined_call_operand.vmem [shape: bf16[512,1024], index: 6, kind: input, shape index: {}]   ;;  %s15870_s7 = inlined_call_operand.vmem [shape: f32[256,128], index: 7, kind: output, shape index: {}]  }
   0x1 LB: > { %s9012_s25 = sadd.s32 4294967295, %s11121_s24   ;;  %p9016_p0 = scmp.ge.s32.totalorder %s11121_s24, 1  ;;  %s11121_s24 = sphi %s11167_s24, %s17_s24  }
   0x2   : > { %p249_p1 = scmp.lt.s32.totalorder %s11121_s24, 3 }
   0x4   : > { %p250_p2 = pnand %p9016_p0, %p249_p1 }
   0x6   : > { %253 = sbr.rel (%p250_p2) target bundleno = 2212 (0x8a4), region = 48 }
   0xd   : > { %v10472_v0 = vld [vmem:[%s15866_s3] sm:$0xff]   ;;  %s9017_s28 = sshll.u32 %s9012_s25, 4  ;;  %v10473_v1 = vld [vmem:[%s15866_s3 + $0x8] sm:$0xff]   ;;  %v10474_v2 = vld [vmem:[%s15866_s3 + $0x10] sm:$0xff]   ;;  %vm400_vm0 = vcmask 523264   ;;  %v15872_v28 = vmov 0  }
   0xe   : > { %p287_p3 = scmp.lt.s32.totalorder %s9017_s28, 31  ;;  %9820 = vmatprep.subr.bf16.mxu0 %v10472_v0  ;;  %v10484_v3 = vld [vmem:[%s15867_s4 + $0x4] ss:$8 sps:$4 sm:$0xff]   ;;  %v10486_v4 = vld [vmem:[%s15867_s4] ss:$8 sps:$4 sm:$0xff]   ;;  %v10475_v8 = vld [vmem:[%s15866_s3 + $0x18] sm:$0xff]   ;;  %702 = vmatprep.mubr.bf16.mxu1 %v15872_v28 }
   0xf   : > { %9821 = vmatpush3.bf16.msra.mxu0 %v10472_v0  ;;  %670 = vmatprep.subr.bf16.mxu1 %v10484_v3  ;;  %v10487_v5 = vld [vmem:[%s15867_s4 + $0x14] ss:$8 sps:$4 sm:$0xff]   ;;  %v10489_v6 = vld [vmem:[%s15867_s4 + $0x10] ss:$8 sps:$4 sm:$0xff]   ;;  %v10490_v11 = vld [vmem:[%s15867_s4 + $0x24] ss:$8 sps:$4 sm:$0xff]  }
  0x10   : > { %s16350_s28 = smov (!%p287_p3, %s9017_s28), 31  ;;  %9822 = vmatprep.subr.bf16.mxu0 %v10473_v1  ;;  %671 = vmatpush1.bf16.msra.mxu1 %v10486_v4  ;;  %v10492_v12 = vld [vmem:[%s15867_s4 + $0x20] ss:$8 sps:$4 sm:$0xff]   ;;  %v10493_v13 = vld [vmem:[%s15867_s4 + $0x34] ss:$8 sps:$4 sm:$0xff]  }
  0x11   : > { %s9018_s12 = sshll.u32 %s16350_s28, 2  ;;  %672 = vmatprep.subr.bf16.mxu1 %v10487_v5  ;;  %v10495_v14 = vld [vmem:[%s15867_s4 + $0x30] ss:$8 sps:$4 sm:$0xff]   ;;  %v10496_v15 = vld [vmem:[%s15867_s4 + $0x44] ss:$8 sps:$4 sm:$0xff]   ;;  %10465 = vset.pattern.permute.xlu1 %v15872_v28  ;;  %s9020_s19 = sshll.u32 %s16350_s28, 3 }
  0x12   : > { %s11196_s17 = scalar_lea.vmem %s15863_s0, %s9018_s12  ;;  %v10498_v17 = vld [vmem:[%s15867_s4 + $0x40] ss:$8 sps:$4 sm:$0xff]   ;;  %v10499_v22 = vld [vmem:[%s15867_s4 + $0x54] ss:$8 sps:$4 sm:$0xff]   ;;  %v10501_v23 = vld [vmem:[%s15867_s4 + $0x50] ss:$8 sps:$4 sm:$0xff]   ;;  %10464 = vset.pattern.permute.xlu0 %v15872_v28  ;;  %s14278_s22 = scalar_lea.vmem %s15864_s1, %s9020_s19 }
  0x13   : > { %9823 = vmatpush3.bf16.msra.mxu0 %v10473_v1  ;;  %v10476_v7 = vld [vmem:[%s11196_s17] sm:$0xff]   ;;  %v10477_v9 = vld [vmem:[%s11196_s17 + $0x8] sm:$0xff]   ;;  %v10478_v10 = vld [vmem:[%s11196_s17 + $0x10] sm:$0xff]   ;;  %s15724_s25 = scalar_lea.vmem %s15870_s7, %s9020_s19 }
  0x14   : > { %9824 = vmatprep.subr.bf16.mxu0 %v10474_v2  ;;  %9828 = vmatprep.mubr.msk.bf16.mxu0 %vm400_vm0, %v10476_v7  ;;  %v10479_v16 = vld [vmem:[%s11196_s17 + $0x18] sm:$0xff]   ;;  %v10480_v18 = vld [vmem:[%s11196_s17 + $0x20] sm:$0xff]   ;;  %v10481_v19 = vld [vmem:[%s11196_s17 + $0x28] sm:$0xff]  }
  0x15   : > { %673 = vmatpush1.bf16.msra.mxu1 %v10489_v6  ;;  %v10482_v20 = vld [vmem:[%s11196_s17 + $0x30] sm:$0xff]   ;;  %v10483_v21 = vld [vmem:[%s11196_s17 + $0x38] sm:$0xff]   ;;  %v10502_v24 = vld [vmem:[%s15867_s4 + $0x64] ss:$8 sps:$4 sm:$0xff]  }
  0x16   : > { %674 = vmatprep.subr.bf16.mxu1 %v10490_v11  ;;  %v10504_v25 = vld [vmem:[%s15867_s4 + $0x60] ss:$8 sps:$4 sm:$0xff]   ;;  %v10505_v26 = vld [vmem:[%s15867_s4 + $0x74] ss:$8 sps:$4 sm:$0xff]   ;;  %v10507_v27 = vld [vmem:[%s15867_s4 + $0x70] ss:$8 sps:$4 sm:$0xff]  }
  0x17   : > { %9825 = vmatpush3.bf16.msra.mxu0 %v10474_v2  ;;  %v10508_v29 = vld [vmem:[%s15868_s5] ss:$16 sps:$4 sm:$0xff]   ;;  %v10510_v30 = vld [vmem:[%s15868_s5 + $0x4] ss:$16 sps:$4 sm:$0xff]   ;;  %v10513_v31 = vld [vmem:[%s15868_s5 + $0xc] ss:$16 sps:$4 sm:$0xff]  }
  0x18   : > { %9826 = vmatprep.subr.bf16.mxu0 %v10475_v8  ;;  %v10516_v32 = vld [vmem:[%s15868_s5 + $0x24] ss:$16 sps:$4 sm:$0xff]   ;;  %v10514_v33 = vld [vmem:[%s15868_s5 + $0x20] ss:$16 sps:$4 sm:$0xff]  }
  0x19   : > { %675 = vmatpush1.bf16.msra.mxu1 %v10492_v12  ;;  %v10522_v34 = vld [vmem:[%s15868_s5 + $0x44] ss:$16 sps:$4 sm:$0xff]   ;;  %v10520_v35 = vld [vmem:[%s15868_s5 + $0x40] ss:$16 sps:$4 sm:$0xff]  }
  0x1a   : > { %676 = vmatprep.subr.bf16.mxu1 %v10493_v13  ;;  %v10528_v36 = vld [vmem:[%s15868_s5 + $0x64] ss:$16 sps:$4 sm:$0xff]   ;;  %v10526_v37 = vld [vmem:[%s15868_s5 + $0x60] ss:$16 sps:$4 sm:$0xff]   ;;  %v10511_v13 = vld [vmem:[%s15868_s5 + $0x8] ss:$16 sps:$4 sm:$0xff]  }
  0x1b   : > { %9827 = vmatpush3.bf16.msra.mxu0 %v10475_v8  ;;  %v10534_v38 = vld [vmem:[%s15868_s5 + $0x84] ss:$16 sps:$4 sm:$0xff]   ;;  %v10532_v39 = vld [vmem:[%s15868_s5 + $0x80] ss:$16 sps:$4 sm:$0xff]  }
  0x1c   : > { %1269 = vmatprep.subr.bf16.mxu0 %v10510_v30  ;;  %v10540_v40 = vld [vmem:[%s15868_s5 + $0xa4] ss:$16 sps:$4 sm:$0xff]   ;;  %v10538_v41 = vld [vmem:[%s15868_s5 + $0xa0] ss:$16 sps:$4 sm:$0xff]  }
  0x1d   : > { %677 = vmatpush1.bf16.msra.mxu1 %v10495_v14  ;;  %v10546_v42 = vld [vmem:[%s15868_s5 + $0xc4] ss:$16 sps:$4 sm:$0xff]   ;;  %v10544_v43 = vld [vmem:[%s15868_s5 + $0xc0] ss:$16 sps:$4 sm:$0xff]  }
  0x1e   : > { %9829 = vmatmul.mubr.msk.bf16.vlgmr.msra.gmra.mrb[0].mxu0 %vm400_vm0, %v10477_v9  ;;  %678 = vmatprep.subr.bf16.mxu1 %v10496_v15  ;;  %v10552_v44 = vld [vmem:[%s15868_s5 + $0xe4] ss:$16 sps:$4 sm:$0xff]   ;;  %v10550_v45 = vld [vmem:[%s15868_s5 + $0xe0] ss:$16 sps:$4 sm:$0xff]  }
  0x1f   : > { %9832 = vmatprep.mubr.msk.bf16.mxu0 %vm400_vm0, %v10478_v10  ;;  %1270 = vmatpush1.bf16.msra.mxu0 %v10508_v29  ;;  %v10558_v46 = vld [vmem:[%s15868_s5 + $0x104] ss:$16 sps:$4 sm:$0xff]   ;;  %v10556_v47 = vld [vmem:[%s15868_s5 + $0x100] ss:$16 sps:$4 sm:$0xff]   ;;  %v10525_v29 = vld [vmem:[%s15868_s5 + $0x4c] ss:$16 sps:$4 sm:$0xff]  }
  0x20   : > { %1271 = vmatprep.subr.bf16.mxu0 %v10516_v32  ;;  %v10564_v48 = vld [vmem:[%s15868_s5 + $0x124] ss:$16 sps:$4 sm:$0xff]   ;;  %v10562_v49 = vld [vmem:[%s15868_s5 + $0x120] ss:$16 sps:$4 sm:$0xff]  }
  0x21   : > { %679 = vmatpush1.bf16.msra.mxu1 %v10498_v17  ;;  %v10570_v50 = vld [vmem:[%s15868_s5 + $0x144] ss:$16 sps:$4 sm:$0xff]   ;;  %v10568_v51 = vld [vmem:[%s15868_s5 + $0x140] ss:$16 sps:$4 sm:$0xff]   ;;  %v10519_v17 = vld [vmem:[%s15868_s5 + $0x2c] ss:$16 sps:$4 sm:$0xff]  }
  0x22   : > { %680 = vmatprep.subr.bf16.mxu1 %v10499_v22  ;;  %v10576_v52 = vld [vmem:[%s15868_s5 + $0x164] ss:$16 sps:$4 sm:$0xff]   ;;  %v10574_v53 = vld [vmem:[%s15868_s5 + $0x160] ss:$16 sps:$4 sm:$0xff]  }
  0x23   : > { %1272 = vmatpush1.bf16.msra.mxu0 %v10514_v33  ;;  %v10582_v54 = vld [vmem:[%s15868_s5 + $0x184] ss:$16 sps:$4 sm:$0xff]   ;;  %v10580_v55 = vld [vmem:[%s15868_s5 + $0x180] ss:$16 sps:$4 sm:$0xff]  }
  0x24   : > { %1273 = vmatprep.subr.bf16.mxu0 %v10522_v34  ;;  %v11346_v56 = vld [vmem:[%s15865_s2] ss:$0 sm:$0xff] }
  0x25   : > { %681 = vmatpush1.bf16.msra.mxu1 %v10501_v23 }
  0x26   : > { %9833 = vmatmul.mubr.msk.bf16.gmra.mrb[4].mxu0 %vm400_vm0, %v10479_v16  ;;  %682 = vmatprep.subr.bf16.mxu1 %v10502_v24 }
  0x27   : > { %9836 = vmatprep.mubr.msk.bf16.mxu0 %vm400_vm0, %v10480_v18  ;;  %1274 = vmatpush1.bf16.msra.mxu0 %v10520_v35 }
  0x28   : > { %1275 = vmatprep.subr.bf16.mxu0 %v10528_v36  ;;  %v10523_v36 = vld [vmem:[%s15868_s5 + $0x48] ss:$16 sps:$4 sm:$0xff]  }
  0x29   : > { %683 = vmatpush1.bf16.msra.mxu1 %v10504_v25  ;;  %v10517_v25 = vld [vmem:[%s15868_s5 + $0x28] ss:$16 sps:$4 sm:$0xff]  }
  0x2a   : > { %684 = vmatprep.subr.bf16.mxu1 %v10505_v26 }
  0x2b   : > { %1276 = vmatpush1.bf16.msra.mxu0 %v10526_v37 }
  0x2c   : > { %1277 = vmatprep.subr.bf16.mxu0 %v10534_v38 }
  0x2d   : > { %685 = vmatpush1.bf16.msra.mxu1 %v10507_v27 }
  0x2e   : > { %9837 = vmatmul.mubr.msk.bf16.gmra.mrb[8].mxu0 %vm400_vm0, %v10481_v19  ;;  %1382 = vmatprep.subr.bf16.mxu1 %v10513_v31 }
  0x2f   : > { %9840 = vmatprep.mubr.msk.bf16.mxu0 %vm400_vm0, %v10482_v20  ;;  %1278 = vmatpush1.bf16.msra.mxu0 %v10532_v39 }
  0x30   : > { %1279 = vmatprep.subr.bf16.mxu0 %v10540_v40  ;;  %v10531_v40 = vld [vmem:[%s15868_s5 + $0x6c] ss:$16 sps:$4 sm:$0xff]  }
  0x33   : > { %1280 = vmatpush1.bf16.msra.mxu0 %v10538_v41 }
  0x34   : > { %1281 = vmatprep.subr.bf16.mxu0 %v10546_v42 }
  0x36   : > { %9841 = vmatmul.mubr.msk.bf16.gmra.mrb[12].mxu0 %vm400_vm0, %v10483_v21 }
  0x37   : > { %1282 = vmatpush1.bf16.msra.mxu0 %v10544_v43 }
  0x38   : > { %1283 = vmatprep.subr.bf16.mxu0 %v10552_v44 }
  0x3b   : > { %1284 = vmatpush1.bf16.msra.mxu0 %v10550_v45 }
  0x3c   : > { %1285 = vmatprep.subr.bf16.mxu0 %v10558_v46 }
  0x3f   : > { %1286 = vmatpush1.bf16.msra.mxu0 %v10556_v47 }
  0x40   : > { %1287 = vmatprep.subr.bf16.mxu0 %v10564_v48  ;;  %v10529_v48 = vld [vmem:[%s15868_s5 + $0x68] ss:$16 sps:$4 sm:$0xff]  }
  0x43   : > { %1288 = vmatpush1.bf16.msra.mxu0 %v10562_v49 }
  0x44   : > { %1289 = vmatprep.subr.bf16.mxu0 %v10570_v50 }
  0x47   : > { %1290 = vmatpush1.bf16.msra.mxu0 %v10568_v51  ;;  %v10537_v51 = vld [vmem:[%s15868_s5 + $0x8c] ss:$16 sps:$4 sm:$0xff]  }
  0x48   : > { %1291 = vmatprep.subr.bf16.mxu0 %v10576_v52 }
  0x4b   : > { %1292 = vmatpush1.bf16.msra.mxu0 %v10574_v53 }
  0x4c   : > { %1293 = vmatprep.subr.bf16.mxu0 %v10582_v54 }
  0x4f   : > { %1294 = vmatpush1.bf16.msra.mxu0 %v10580_v55 }
  0xf1   : > { %v9830_v57 = vpop.f32.mrb[0].mxu0 }
  0xf2   : > { %v468_v58 = vadd.f32 %v9830_v57, %v11346_v56  ;;  %v459_v59 = vpop.f32.mrb[1].mxu0 }
  0xf3   : > { %v460_v60 = vadd.f32 %v11346_v56, %v459_v59  ;;  %v9831_v61 = vpop.f32.mrb[2].mxu0  ;;  %v10535_v59 = vld [vmem:[%s15868_s5 + $0x88] ss:$16 sps:$4 sm:$0xff]  }
  0xf4   : > { %v524_v62 = vmul.f32 0.01, %v468_v58  ;;  %v471_v63 = vadd.f32 %v9831_v61, %v11346_v56  ;;  %v462_v0 = vpop.f32.mrb[3].mxu0 }
  0xf5   : > { %v522_v1 = vmul.f32 0.01, %v460_v60  ;;  %v463_v2 = vadd.f32 %v11346_v56, %v462_v0 }
  0xf6   : > { %v525_v3 = vmul.f32 0.01, %v471_v63  ;;  %v540_v5 = vmax.f32 %v468_v58, %v524_v62 }
  0xf7   : > { %v523_v4 = vmul.f32 0.01, %v463_v2  ;;  %v538_v7 = vmax.f32 %v460_v60, %v522_v1 }
  0xf8   : > { %v541_v6 = vmax.f32 %v471_v63, %v525_v3  ;;  %v10543_v63 = vld [vmem:[%s15868_s5 + $0xac] ss:$16 sps:$4 sm:$0xff]  }
  0xf9   : > { %v539_v8 = vmax.f32 %v463_v2, %v523_v4  ;;  %v9834_v9 = vpop.f32.mrb[4].mxu0 }
  0xfa   : > { %v484_v10 = vadd.f32 %v9834_v9, %v11346_v56  ;;  %v475_v11 = vpop.f32.mrb[5].mxu0  ;;  %v555_v12 = vpack.c.bf16 %v541_v6, %v540_v5 }
  0xfb   : > { %v476_v14 = vadd.f32 %v11346_v56, %v475_v11  ;;  %v554_v15 = vpack.c.bf16 %v539_v8, %v538_v7  ;;  %v9835_v16 = vpop.f32.mrb[6].mxu0  ;;  %v10541_v7 = vld [vmem:[%s15868_s5 + $0xa8] ss:$16 sps:$4 sm:$0xff]  }
  0xfc   : > { %v528_v18 = vmul.f32 0.01, %v484_v10  ;;  %v487_v19 = vadd.f32 %v9835_v16, %v11346_v56  ;;  %v478_v20 = vpop.f32.mrb[7].mxu0  ;;  %v10553_v16 = vld [vmem:[%s15868_s5 + $0xe8] ss:$16 sps:$4 sm:$0xff]  }
  0xfd   : > { %v526_v21 = vmul.f32 0.01, %v476_v14  ;;  %703 = vmatmul.mubr.bf16.vlgmr.msra.gmra.mrb[0].mxu1 %v554_v15  ;;  %v479_v22 = vadd.f32 %v11346_v56, %v478_v20  ;;  %v10555_v15 = vld [vmem:[%s15868_s5 + $0xec] ss:$16 sps:$4 sm:$0xff]   ;;  %v10565_v20 = vld [vmem:[%s15868_s5 + $0x128] ss:$16 sps:$4 sm:$0xff]  }
  0xfe   : > { %v544_v23 = vmax.f32 %v484_v10, %v528_v18  ;;  %v529_v24 = vmul.f32 0.01, %v487_v19  ;;  %712 = vmatprep.mubr.bf16.mxu1 %v15872_v28  ;;  %1383 = vmatpush1.bf16.msra.mxu1 %v10511_v13  ;;  %v10549_v10 = vld [vmem:[%s15868_s5 + $0xcc] ss:$16 sps:$4 sm:$0xff]   ;;  %v10559_v18 = vld [vmem:[%s15868_s5 + $0x108] ss:$16 sps:$4 sm:$0xff]  }
  0xff   : > { %v542_v26 = vmax.f32 %v476_v14, %v526_v21  ;;  %v527_v27 = vmul.f32 0.01, %v479_v22  ;;  %1384 = vmatprep.subr.bf16.mxu1 %v10519_v17  ;;  %v10561_v17 = vld [vmem:[%s15868_s5 + $0x10c] ss:$16 sps:$4 sm:$0xff]  }
 0x100   : > { %v545_v30 = vmax.f32 %v487_v19, %v529_v24  ;;  %v10567_v19 = vld [vmem:[%s15868_s5 + $0x12c] ss:$16 sps:$4 sm:$0xff]   ;;  %v10577_v24 = vld [vmem:[%s15868_s5 + $0x168] ss:$16 sps:$4 sm:$0xff]  }
 0x101   : > { %v543_v31 = vmax.f32 %v479_v22, %v527_v27  ;;  %v9838_v32 = vpop.f32.mrb[8].mxu0  ;;  %v10573_v21 = vld [vmem:[%s15868_s5 + $0x14c] ss:$16 sps:$4 sm:$0xff]   ;;  %v10571_v22 = vld [vmem:[%s15868_s5 + $0x148] ss:$16 sps:$4 sm:$0xff]  }
 0x102   : > { %v500_v33 = vadd.f32 %v9838_v32, %v11346_v56  ;;  %v491_v34 = vpop.f32.mrb[9].mxu0  ;;  %v557_v35 = vpack.c.bf16 %v545_v30, %v544_v23  ;;  %1385 = vmatpush1.bf16.msra.mxu1 %v10517_v25  ;;  %v10579_v23 = vld [vmem:[%s15868_s5 + $0x16c] ss:$16 sps:$4 sm:$0xff]   ;;  %v10588_v27 = vld [vmem:[%s15868_s5 + $0x1a4] ss:$16 sps:$4 sm:$0xff]  }
 0x103   : > { %v492_v37 = vadd.f32 %v11346_v56, %v491_v34  ;;  %v556_v38 = vpack.c.bf16 %v543_v31, %v542_v26  ;;  %v9839_v39 = vpop.f32.mrb[10].mxu0  ;;  %1386 = vmatprep.subr.bf16.mxu1 %v10525_v29  ;;  %v10585_v25 = vld [vmem:[%s15868_s5 + $0x18c] ss:$16 sps:$4 sm:$0xff]   ;;  %v10583_v26 = vld [vmem:[%s15868_s5 + $0x188] ss:$16 sps:$4 sm:$0xff]   ;;  %1295 = vmatprep.subr.bf16.mxu0 %v10588_v27 }
 0x104   : > { %v532_v41 = vmul.f32 0.01, %v500_v33  ;;  %v503_v42 = vadd.f32 %v9839_v39, %v11346_v56  ;;  %v494_v43 = vpop.f32.mrb[11].mxu0  ;;  %v10591_v29 = vld [vmem:[%s15868_s5 + $0x1ac] ss:$16 sps:$4 sm:$0xff]  }
 0x105   : > { %713 = vmatmul.mubr.bf16.gmra.mrb[4].mxu1 %v555_v12  ;;  %v530_v44 = vmul.f32 0.01, %v492_v37  ;;  %v495_v45 = vadd.f32 %v11346_v56, %v494_v43  ;;  %v10586_v30 = vld [vmem:[%s15868_s5 + $0x1a0] ss:$16 sps:$4 sm:$0xff]   ;;  %v10589_v31 = vld [vmem:[%s15868_s5 + $0x1a8] ss:$16 sps:$4 sm:$0xff]  }
 0x106   : > { %v548_v46 = vmax.f32 %v500_v33, %v532_v41  ;;  %722 = vmatprep.mubr.bf16.mxu1 %v15872_v28  ;;  %v533_v47 = vmul.f32 0.01, %v503_v42  ;;  %1387 = vmatpush1.bf16.msra.mxu1 %v10523_v36  ;;  %v10594_v32 = vld [vmem:[%s15868_s5 + $0x1c4] ss:$16 sps:$4 sm:$0xff]   ;;  %v10597_v33 = vld [vmem:[%s15868_s5 + $0x1cc] ss:$16 sps:$4 sm:$0xff]  }
 0x107   : > { %v546_v49 = vmax.f32 %v492_v37, %v530_v44  ;;  %v531_v50 = vmul.f32 0.01, %v495_v45  ;;  %1388 = vmatprep.subr.bf16.mxu1 %v10531_v40  ;;  %1296 = vmatpush1.bf16.msra.mxu0 %v10586_v30  ;;  %v10592_v34 = vld [vmem:[%s15868_s5 + $0x1c0] ss:$16 sps:$4 sm:$0xff]   ;;  %v10600_v36 = vld [vmem:[%s15868_s5 + $0x1e4] ss:$16 sps:$4 sm:$0xff]  }
 0x108   : > { %v549_v52 = vmax.f32 %v503_v42, %v533_v47  ;;  %1297 = vmatprep.subr.bf16.mxu0 %v10594_v32  ;;  %v10603_v37 = vld [vmem:[%s15868_s5 + $0x1ec] ss:$16 sps:$4 sm:$0xff]   ;;  %v10601_v39 = vld [vmem:[%s15868_s5 + $0x1e8] ss:$16 sps:$4 sm:$0xff]   ;;  %v1655_v40 = vld [vmem:[%s15869_s6] sm:$0xff] }
 0x109   : > { %v547_v53 = vmax.f32 %v495_v45, %v531_v50  ;;  %v9842_v54 = vpop.f32.mrb[12].mxu0  ;;  %v1659_v41 = vld [vmem:[%s15869_s6 + $0x20] sm:$0xff]  ;;  %v1656_v42 = vld [vmem:[%s15869_s6 + $0x8] sm:$0xff] }
 0x10a   : > { %v516_v55 = vadd.f32 %v9842_v54, %v11346_v56  ;;  %v507_v57 = vpop.f32.mrb[13].mxu0  ;;  %v559_v58 = vpack.c.bf16 %v549_v52, %v548_v46  ;;  %1389 = vmatpush1.bf16.msra.mxu1 %v10529_v48  ;;  %v9124_v43 = vcombine.low %v1655_v40, %v1659_v41  ;;  %v9125_v44 = vcombine.high %v1655_v40, %v1659_v41  ;;  %v1660_v45 = vld [vmem:[%s15869_s6 + $0x28] sm:$0xff] }
 0x10b   : > { %v508_v60 = vadd.f32 %v11346_v56, %v507_v57  ;;  %v558_v61 = vpack.c.bf16 %v547_v53, %v546_v49  ;;  %v9843_v62 = vpop.f32.mrb[14].mxu0  ;;  %1390 = vmatprep.subr.bf16.mxu1 %v10537_v51  ;;  %1298 = vmatpush1.bf16.msra.mxu0 %v10592_v34  ;;  %v9126_v46 = vcombine.low %v1656_v42, %v1660_v45  ;;  %v15871_v48 = vlaneseq  ;;  %v578_v51 = vld [vmem:[%s15865_s2 + $0x1] sm:$0x3]  ;;  %v1672_v27 = vld [vmem:[%s15869_s6 + $0x88] sm:$0xff] }
 0x10c   : > { %v536_v0 = vmul.f32 0.01, %v516_v55  ;;  %v519_v1 = vadd.f32 %v9843_v62, %v11346_v56  ;;  %v510_v2 = vpop.f32.mrb[15].mxu0  ;;  %1299 = vmatprep.subr.bf16.mxu0 %v10600_v36  ;;  %v9127_v47 = vcombine.high %v1656_v42, %v1660_v45  ;;  %v1683_v42 = vld [vmem:[%s15869_s6 + $0xe0] sm:$0xff] }
 0x10d   : > { %723 = vmatmul.mubr.bf16.gmra.mrb[8].mxu1 %v556_v38  ;;  %v534_v3 = vmul.f32 0.01, %v508_v60  ;;  %v511_v4 = vadd.f32 %v11346_v56, %v510_v2  ;;  %v10547_v56 = vld [vmem:[%s15868_s5 + $0xc8] ss:$16 sps:$4 sm:$0xff]   ;;  %v10598_v38 = vld [vmem:[%s15868_s5 + $0x1e0] ss:$16 sps:$4 sm:$0xff]  }
 0x10e   : > { %732 = vmatprep.mubr.bf16.mxu1 %v15872_v28  ;;  %v552_v5 = vmax.f32 %v516_v55, %v536_v0  ;;  %v537_v6 = vmul.f32 0.01, %v519_v1  ;;  %1391 = vmatpush1.bf16.msra.mxu1 %v10535_v59  ;;  %v11495_v49 = vshrl.u32 %v15871_v48, 7  ;;  %v11951_v48 = vld [vmem:[%s15869_s6 + $0x5e8] sm:$0xff] }
 0x10f   : > { %v550_v8 = vmax.f32 %v508_v60, %v534_v3  ;;  %v535_v9 = vmul.f32 0.01, %v511_v4  ;;  %1392 = vmatprep.subr.bf16.mxu1 %v10543_v63  ;;  %1300 = vmatpush1.bf16.msra.mxu0 %v10598_v38  ;;  %v1679_v38 = vld [vmem:[%s15869_s6 + $0xc0] sm:$0xff]  ;;  %15968 = vst [vmem:[#allocation12_spill] sm:$0xff] %v11951_v48 }
 0x110   : > { %v553_v11 = vmax.f32 %v519_v1, %v537_v6  ;;  %3233 = vmatprep.subr.bf16.mxu0 %v9125_v44  ;;  %15958 = vst [vmem:[#allocation2_spill] sm:$0xff] %v11495_v49  ;;  %v11498_v50 = vsub.s32 0, %v11495_v49  ;;  %v11504_v52 = vsub.s32 1, %v11495_v49  ;;  %v1663_v6 = vld [vmem:[%s15869_s6 + $0x40] sm:$0xff]  ;;  %v1684_v44 = vld [vmem:[%s15869_s6 + $0xe8] sm:$0xff] }
 0x111   : > { %v551_v12 = vmax.f32 %v511_v4, %v535_v9 }
 0x112   : > { %v561_v13 = vpack.c.bf16 %v553_v11, %v552_v5  ;;  %1393 = vmatpush1.bf16.msra.mxu1 %v10541_v7  ;;  %15959 = vst [vmem:[#allocation3_spill] sm:$0xff] %v11498_v50  ;;  %15960 = vst [vmem:[#allocation4_spill] sm:$0xff] %v11504_v52  ;;  %v11507_v53 = vrot.slane %v578_v51, %v11498_v50  ;;  %v11510_v54 = vrot.slane %v578_v51, %v11504_v52  ;;  %v1664_v11 = vld [vmem:[%s15869_s6 + $0x48] sm:$0xff] }
 0x113   : > { %v560_v14 = vpack.c.bf16 %v551_v12, %v550_v8  ;;  %1394 = vmatprep.subr.bf16.mxu1 %v10549_v10  ;;  %v1667_v10 = vld [vmem:[%s15869_s6 + $0x60] sm:$0xff]  ;;  %v1668_v12 = vld [vmem:[%s15869_s6 + $0x68] sm:$0xff] }
 0x114   : > { %v9132_v32 = vcombine.low %v1663_v6, %v1667_v10 }
 0x115   : > { %733 = vmatmul.mubr.bf16.gmra.mrb[12].mxu1 %v557_v35  ;;  %v10595_v35 = vld [vmem:[%s15868_s5 + $0x1c8] ss:$16 sps:$4 sm:$0xff]  }
 0x116   : > { %742 = vmatprep.mubr.bf16.mxu1 %v15872_v28  ;;  %1395 = vmatpush1.bf16.msra.mxu1 %v10547_v56 }
 0x117   : > { %1396 = vmatprep.subr.bf16.mxu1 %v10555_v15 }
 0x11a   : > { %1397 = vmatpush1.bf16.msra.mxu1 %v10553_v16 }
 0x11b   : > { %1398 = vmatprep.subr.bf16.mxu1 %v10561_v17 }
 0x11d   : > { %743 = vmatmul.mubr.bf16.gmra.mrb[16].mxu1 %v558_v61 }
 0x11e   : > { %752 = vmatprep.mubr.bf16.mxu1 %v15872_v28  ;;  %1399 = vmatpush1.bf16.msra.mxu1 %v10559_v18 }
 0x11f   : > { %1400 = vmatprep.subr.bf16.mxu1 %v10567_v19 }
 0x122   : > { %1401 = vmatpush1.bf16.msra.mxu1 %v10565_v20 }
 0x123   : > { %1402 = vmatprep.subr.bf16.mxu1 %v10573_v21  ;;  %v9133_v21 = vcombine.high %v1663_v6, %v1667_v10  ;;  %v1692_v6 = vld [vmem:[%s15869_s6 + $0x128] sm:$0xff] }
 0x125   : > { %753 = vmatmul.mubr.bf16.gmra.mrb[20].mxu1 %v559_v58 }
 0x126   : > { %762 = vmatprep.mubr.bf16.mxu1 %v15872_v28  ;;  %1403 = vmatpush1.bf16.msra.mxu1 %v10571_v22  ;;  %v9135_v22 = vcombine.high %v1664_v11, %v1668_v12 }
 0x127   : > { %1404 = vmatprep.subr.bf16.mxu1 %v10579_v23  ;;  %v1671_v23 = vld [vmem:[%s15869_s6 + $0x80] sm:$0xff] }
 0x12a   : > { %1405 = vmatpush1.bf16.msra.mxu1 %v10577_v24  ;;  %v1675_v24 = vld [vmem:[%s15869_s6 + $0xa0] sm:$0xff] }
 0x12b   : > { %1406 = vmatprep.subr.bf16.mxu1 %v10585_v25  ;;  %v9141_v34 = vcombine.high %v1671_v23, %v1675_v24  ;;  %v9140_v51 = vcombine.low %v1671_v23, %v1675_v24 }
 0x12d   : > { %763 = vmatmul.mubr.bf16.gmra.mrb[24].mxu1 %v560_v14 }
 0x12e   : > { %772 = vmatprep.mubr.bf16.mxu1 %v15872_v28  ;;  %1407 = vmatpush1.bf16.msra.mxu1 %v10583_v26 }
 0x12f   : > { %1408 = vmatprep.subr.bf16.mxu1 %v10591_v29  ;;  %v1676_v29 = vld [vmem:[%s15869_s6 + $0xa8] sm:$0xff] }
 0x132   : > { %1409 = vmatpush1.bf16.msra.mxu1 %v10589_v31 }
 0x133   : > { %1410 = vmatprep.subr.bf16.mxu1 %v10597_v33  ;;  %v9134_v33 = vcombine.low %v1664_v11, %v1668_v12 }
 0x135   : > { %773 = vmatmul.mubr.bf16.gmra.mrb[28].mxu1 %v561_v13 }
 0x136   : > { %1411 = vmatpush1.bf16.msra.mxu1 %v10595_v35 }
 0x137   : > { %1412 = vmatprep.subr.bf16.mxu1 %v10603_v37  ;;  %v9143_v37 = vcombine.high %v1672_v27, %v1676_v29 }
 0x13a   : > { %1413 = vmatpush1.bf16.msra.mxu1 %v10601_v39 }
 0x13b   : > { %3459 = vmatprep.subr.bf16.mxu1 %v9127_v47 }
 0x1d0   : > { %v704_v55 = vpop.f32.mrb[0].mxu1 }
 0x1d1   : > { %v705_v57 = vadd.f32 %v704_v55, %v11507_v53  ;;  %v706_v58 = vpop.f32.mrb[1].mxu1 }
 0x1d2   : > { %v707_v59 = vadd.f32 %v706_v58, %v11510_v54  ;;  %v708_v60 = vpop.f32.mrb[2].mxu1 }
 0x1d3   : > { %v783_v61 = vmul.f32 0.01, %v705_v57  ;;  %v709_v62 = vadd.f32 %v708_v60, %v11507_v53  ;;  %v710_v63 = vpop.f32.mrb[3].mxu1 }
 0x1d4   : > { %v784_v0 = vmul.f32 0.01, %v707_v59  ;;  %v711_v1 = vadd.f32 %v710_v63, %v11510_v54  ;;  %v9149_v63 = vcombine.high %v1679_v38, %v1683_v42 }
 0x1d5   : > { %v785_v2 = vmul.f32 0.01, %v709_v62  ;;  %v815_v4 = vmax.f32 %v705_v57, %v783_v61 }
 0x1d6   : > { %v786_v3 = vmul.f32 0.01, %v711_v1  ;;  %v816_v7 = vmax.f32 %v707_v59, %v784_v0  ;;  %v9142_v59 = vcombine.low %v1672_v27, %v1676_v29 }
 0x1d7   : > { %v817_v5 = vmax.f32 %v709_v62, %v785_v2  ;;  %v1691_v2 = vld [vmem:[%s15869_s6 + $0x120] sm:$0xff] }
 0x1d8   : > { %v818_v8 = vmax.f32 %v711_v1, %v786_v3  ;;  %v714_v9 = vpop.f32.mrb[4].mxu1  ;;  %v1687_v1 = vld [vmem:[%s15869_s6 + $0x100] sm:$0xff] }
 0x1d9   : > { %v847_v13 = vpack.c.bf16 %v817_v5, %v815_v4  ;;  %v715_v56 = vadd.f32 %v714_v9, %v11507_v53  ;;  %v716_v14 = vpop.f32.mrb[5].mxu1  ;;  %v1688_v5 = vld [vmem:[%s15869_s6 + $0x108] sm:$0xff]  ;;  %v9148_v9 = vcombine.low %v1679_v38, %v1683_v42  ;;  %v9157_v11 = vcombine.high %v1687_v1, %v1691_v2 }
 0x1da   : > { %v717_v15 = vadd.f32 %v716_v14, %v11510_v54  ;;  %v718_v16 = vpop.f32.mrb[6].mxu1  ;;  %v848_v17 = vpack.c.bf16 %v818_v8, %v816_v7  ;;  %v1695_v14 = vld [vmem:[%s15869_s6 + $0x140] sm:$0xff]  ;;  %v9156_v24 = vcombine.low %v1687_v1, %v1691_v2  ;;  %v9158_v29 = vcombine.low %v1688_v5, %v1692_v6 }
 0x1db   : > { %v787_v18 = vmul.f32 0.01, %v715_v56  ;;  %v719_v19 = vadd.f32 %v718_v16, %v11507_v53  ;;  %v720_v20 = vpop.f32.mrb[7].mxu1 }
 0x1dc   : > { %v788_v25 = vmul.f32 0.01, %v717_v15  ;;  %v721_v26 = vadd.f32 %v720_v20, %v11510_v54  ;;  %1301 = vmatprep.mubr.bf16.mxu0 %v848_v17  ;;  %1414 = vmatprep.mubr.bf16.mxu1 %v848_v17  ;;  %v1700_v20 = vld [vmem:[%s15869_s6 + $0x168] sm:$0xff] }
 0x1dd   : > { %v789_v30 = vmul.f32 0.01, %v719_v19  ;;  %1302 = vmatmul.mubr.bf16.vlgmr.msra.gmra.mrb[16].mxu0 %v847_v13  ;;  %1415 = vmatmul.mubr.bf16.vlgmr.msra.gmra.mrb[32].mxu1 %v847_v13  ;;  %v819_v35 = vmax.f32 %v715_v56, %v787_v18  ;;  %v9159_v56 = vcombine.high %v1688_v5, %v1692_v6  ;;  %v1699_v18 = vld [vmem:[%s15869_s6 + $0x160] sm:$0xff] }
 0x1de   : > { %v790_v31 = vmul.f32 0.01, %v721_v26  ;;  %3234 = vmatpush1.bf16.msra.mxu0 %v9124_v43  ;;  %3460 = vmatpush1.bf16.msra.mxu1 %v9126_v46  ;;  %v820_v39 = vmax.f32 %v717_v15, %v788_v25  ;;  %v1680_v43 = vld [vmem:[%s15869_s6 + $0xc8] sm:$0xff] }
 0x1df   : > { %v821_v36 = vmax.f32 %v719_v19, %v789_v30  ;;  %3235 = vmatprep.subr.bf16.mxu0 %v9133_v21  ;;  %3461 = vmatprep.subr.bf16.mxu1 %v9135_v22  ;;  %v9151_v0 = vcombine.high %v1680_v43, %v1684_v44  ;;  %v9150_v10 = vcombine.low %v1680_v43, %v1684_v44  ;;  %v1696_v19 = vld [vmem:[%s15869_s6 + $0x148] sm:$0xff] }
 0x1e0   : > { %v822_v40 = vmax.f32 %v721_v26, %v790_v31  ;;  %v724_v41 = vpop.f32.mrb[8].mxu1  ;;  %v9164_v43 = vcombine.low %v1695_v14, %v1699_v18  ;;  %v9166_v44 = vcombine.low %v1696_v19, %v1700_v20 }
 0x1e1   : > { %v725_v45 = vadd.f32 %v724_v41, %v11507_v53  ;;  %v726_v46 = vpop.f32.mrb[9].mxu1  ;;  %v849_v47 = vpack.c.bf16 %v821_v36, %v819_v35  ;;  %v1703_v35 = vld [vmem:[%s15869_s6 + $0x180] sm:$0xff] }
 0x1e2   : > { %v727_v55 = vadd.f32 %v726_v46, %v11510_v54  ;;  %v728_v57 = vpop.f32.mrb[10].mxu1  ;;  %v850_v58 = vpack.c.bf16 %v822_v40, %v820_v39  ;;  %3236 = vmatpush1.bf16.msra.mxu0 %v9132_v32  ;;  %3462 = vmatpush1.bf16.msra.mxu1 %v9134_v33  ;;  %v9165_v33 = vcombine.high %v1695_v14, %v1699_v18  ;;  %v1707_v36 = vld [vmem:[%s15869_s6 + $0x1a0] sm:$0xff]  ;;  %v1704_v39 = vld [vmem:[%s15869_s6 + $0x188] sm:$0xff] }
 0x1e3   : > { %v791_v60 = vmul.f32 0.01, %v725_v45  ;;  %v729_v61 = vadd.f32 %v728_v57, %v11507_v53  ;;  %v730_v62 = vpop.f32.mrb[11].mxu1  ;;  %3237 = vmatprep.subr.bf16.mxu0 %v9141_v34  ;;  %3463 = vmatprep.subr.bf16.mxu1 %v9143_v37  ;;  %v9167_v34 = vcombine.high %v1696_v19, %v1700_v20  ;;  %v1708_v40 = vld [vmem:[%s15869_s6 + $0x1a8] sm:$0xff]  ;;  %v9172_v2 = vcombine.low %v1703_v35, %v1707_v36 }
 0x1e4   : > { %v792_v3 = vmul.f32 0.01, %v727_v55  ;;  %v731_v4 = vadd.f32 %v730_v62, %v11510_v54  ;;  %1311 = vmatprep.mubr.bf16.mxu0 %v850_v58  ;;  %1424 = vmatprep.mubr.bf16.mxu1 %v850_v58  ;;  %v1716_v62 = vld [vmem:[%s15869_s6 + $0x1e8] sm:$0xff]  ;;  %v9174_v6 = vcombine.low %v1704_v39, %v1708_v40 }
 0x1e5   : > { %v793_v7 = vmul.f32 0.01, %v729_v61  ;;  %1312 = vmatmul.mubr.bf16.gmra.mrb[20].mxu0 %v849_v47  ;;  %1425 = vmatmul.mubr.bf16.gmra.mrb[36].mxu1 %v849_v47  ;;  %v823_v12 = vmax.f32 %v725_v45, %v791_v60  ;;  %v9173_v45 = vcombine.high %v1703_v35, %v1707_v36  ;;  %v1715_v60 = vld [vmem:[%s15869_s6 + $0x1e0] sm:$0xff] }
 0x1e6   : > { %v794_v8 = vmul.f32 0.01, %v731_v4  ;;  %3238 = vmatpush1.bf16.msra.mxu0 %v9140_v51  ;;  %3464 = vmatpush1.bf16.msra.mxu1 %v9142_v59  ;;  %v824_v15 = vmax.f32 %v727_v55, %v792_v3  ;;  %v9175_v51 = vcombine.high %v1704_v39, %v1708_v40  ;;  %v1711_v55 = vld [vmem:[%s15869_s6 + $0x1c0] sm:$0xff] }
 0x1e7   : > { %v825_v13 = vmax.f32 %v729_v61, %v793_v7  ;;  %3239 = vmatprep.subr.bf16.mxu0 %v9149_v63  ;;  %3465 = vmatprep.subr.bf16.mxu1 %v9151_v0  ;;  %v1712_v61 = vld [vmem:[%s15869_s6 + $0x1c8] sm:$0xff]  ;;  %v9180_v19 = vcombine.low %v1711_v55, %v1715_v60 }
 0x1e8   : > { %v826_v16 = vmax.f32 %v731_v4, %v794_v8  ;;  %v734_v17 = vpop.f32.mrb[12].mxu1  ;;  %v9182_v20 = vcombine.low %v1712_v61, %v1716_v62 }
 0x1e9   : > { %v735_v21 = vadd.f32 %v734_v17, %v11507_v53  ;;  %v736_v22 = vpop.f32.mrb[13].mxu1  ;;  %v851_v23 = vpack.c.bf16 %v825_v13, %v823_v12  ;;  %v1719_v12 = vld [vmem:[%s15869_s6 + $0x200] sm:$0xff] }
 0x1ea   : > { %v737_v25 = vadd.f32 %v736_v22, %v11510_v54  ;;  %v738_v26 = vpop.f32.mrb[14].mxu1  ;;  %v852_v27 = vpack.c.bf16 %v826_v16, %v824_v15  ;;  %3240 = vmatpush1.bf16.msra.mxu0 %v9148_v9  ;;  %3466 = vmatpush1.bf16.msra.mxu1 %v9150_v10  ;;  %v9181_v10 = vcombine.high %v1711_v55, %v1715_v60  ;;  %v1723_v13 = vld [vmem:[%s15869_s6 + $0x220] sm:$0xff]  ;;  %v1720_v15 = vld [vmem:[%s15869_s6 + $0x208] sm:$0xff] }
 0x1eb   : > { %v795_v30 = vmul.f32 0.01, %v735_v21  ;;  %v739_v31 = vadd.f32 %v738_v26, %v11507_v53  ;;  %v740_v32 = vpop.f32.mrb[15].mxu1  ;;  %3241 = vmatprep.subr.bf16.mxu0 %v9157_v11  ;;  %3467 = vmatprep.subr.bf16.mxu1 %v9159_v56  ;;  %v9183_v11 = vcombine.high %v1712_v61, %v1716_v62  ;;  %v1724_v16 = vld [vmem:[%s15869_s6 + $0x228] sm:$0xff]  ;;  %v9188_v36 = vcombine.low %v1719_v12, %v1723_v13 }
 0x1ec   : > { %v796_v37 = vmul.f32 0.01, %v737_v25  ;;  %v741_v38 = vadd.f32 %v740_v32, %v11510_v54  ;;  %1321 = vmatprep.mubr.bf16.mxu0 %v852_v27  ;;  %1434 = vmatprep.mubr.bf16.mxu1 %v852_v27  ;;  %v1732_v32 = vld [vmem:[%s15869_s6 + $0x268] sm:$0xff]  ;;  %v9190_v40 = vcombine.low %v1720_v15, %v1724_v16 }
 0x1ed   : > { %v797_v41 = vmul.f32 0.01, %v739_v31  ;;  %1322 = vmatmul.mubr.bf16.gmra.mrb[24].mxu0 %v851_v23  ;;  %1435 = vmatmul.mubr.bf16.gmra.mrb[40].mxu1 %v851_v23  ;;  %v827_v46 = vmax.f32 %v735_v21, %v795_v30  ;;  %v9189_v21 = vcombine.high %v1719_v12, %v1723_v13  ;;  %v1731_v30 = vld [vmem:[%s15869_s6 + $0x260] sm:$0xff] }
 0x1ee   : > { %v798_v42 = vmul.f32 0.01, %v741_v38  ;;  %3242 = vmatpush1.bf16.msra.mxu0 %v9156_v24  ;;  %3468 = vmatpush1.bf16.msra.mxu1 %v9158_v29  ;;  %v828_v57 = vmax.f32 %v737_v25, %v796_v37  ;;  %v9191_v24 = vcombine.high %v1720_v15, %v1724_v16  ;;  %v1727_v25 = vld [vmem:[%s15869_s6 + $0x240] sm:$0xff] }
 0x1ef   : > { %v829_v47 = vmax.f32 %v739_v31, %v797_v41  ;;  %3243 = vmatprep.subr.bf16.mxu0 %v9165_v33  ;;  %3469 = vmatprep.subr.bf16.mxu1 %v9167_v34  ;;  %v1728_v31 = vld [vmem:[%s15869_s6 + $0x248] sm:$0xff]  ;;  %v9196_v61 = vcombine.low %v1727_v25, %v1731_v30 }
 0x1f0   : > { %v830_v58 = vmax.f32 %v741_v38, %v798_v42  ;;  %v744_v59 = vpop.f32.mrb[16].mxu1  ;;  %v9198_v62 = vcombine.low %v1728_v31, %v1732_v32 }
 0x1f1   : > { %v745_v63 = vadd.f32 %v744_v59, %v11507_v53  ;;  %v746_v0 = vpop.f32.mrb[17].mxu1  ;;  %v853_v1 = vpack.c.bf16 %v829_v47, %v827_v46  ;;  %v1735_v46 = vld [vmem:[%s15869_s6 + $0x280] sm:$0xff] }
 0x1f2   : > { %v747_v3 = vadd.f32 %v746_v0, %v11510_v54  ;;  %v748_v4 = vpop.f32.mrb[18].mxu1  ;;  %v854_v5 = vpack.c.bf16 %v830_v58, %v828_v57  ;;  %3244 = vmatpush1.bf16.msra.mxu0 %v9164_v43  ;;  %3470 = vmatpush1.bf16.msra.mxu1 %v9166_v44  ;;  %v9197_v44 = vcombine.high %v1727_v25, %v1731_v30  ;;  %v1739_v47 = vld [vmem:[%s15869_s6 + $0x2a0] sm:$0xff]  ;;  %v1736_v57 = vld [vmem:[%s15869_s6 + $0x288] sm:$0xff] }
 0x1f3   : > { %v799_v7 = vmul.f32 0.01, %v745_v63  ;;  %v749_v8 = vadd.f32 %v748_v4, %v11507_v53  ;;  %v750_v9 = vpop.f32.mrb[19].mxu1  ;;  %3245 = vmatprep.subr.bf16.mxu0 %v9173_v45  ;;  %3471 = vmatprep.subr.bf16.mxu1 %v9175_v51  ;;  %v9199_v45 = vcombine.high %v1728_v31, %v1732_v32  ;;  %v1740_v58 = vld [vmem:[%s15869_s6 + $0x2a8] sm:$0xff]  ;;  %v9204_v13 = vcombine.low %v1735_v46, %v1739_v47 }
 0x1f4   : > { %v800_v56 = vmul.f32 0.01, %v747_v3  ;;  %v751_v14 = vadd.f32 %v750_v9, %v11510_v54  ;;  %1331 = vmatprep.mubr.bf16.mxu0 %v854_v5  ;;  %1444 = vmatprep.mubr.bf16.mxu1 %v854_v5  ;;  %v1748_v9 = vld [vmem:[%s15869_s6 + $0x2e8] sm:$0xff]  ;;  %v9206_v16 = vcombine.low %v1736_v57, %v1740_v58 }
 0x1f5   : > { %v801_v17 = vmul.f32 0.01, %v749_v8  ;;  %1332 = vmatmul.mubr.bf16.gmra.mrb[28].mxu0 %v853_v1  ;;  %1445 = vmatmul.mubr.bf16.gmra.mrb[44].mxu1 %v853_v1  ;;  %v831_v22 = vmax.f32 %v745_v63, %v799_v7  ;;  %v9205_v63 = vcombine.high %v1735_v46, %v1739_v47  ;;  %v1747_v7 = vld [vmem:[%s15869_s6 + $0x2e0] sm:$0xff] }
 0x1f6   : > { %v802_v18 = vmul.f32 0.01, %v751_v14  ;;  %3246 = vmatpush1.bf16.msra.mxu0 %v9172_v2  ;;  %3472 = vmatpush1.bf16.msra.mxu1 %v9174_v6  ;;  %v832_v26 = vmax.f32 %v747_v3, %v800_v56  ;;  %v9207_v2 = vcombine.high %v1736_v57, %v1740_v58  ;;  %v1743_v3 = vld [vmem:[%s15869_s6 + $0x2c0] sm:$0xff] }
 0x1f7   : > { %v833_v23 = vmax.f32 %v749_v8, %v801_v17  ;;  %3247 = vmatprep.subr.bf16.mxu0 %v9181_v10  ;;  %3473 = vmatprep.subr.bf16.mxu1 %v9183_v11  ;;  %v1744_v8 = vld [vmem:[%s15869_s6 + $0x2c8] sm:$0xff]  ;;  %v9212_v31 = vcombine.low %v1743_v3, %v1747_v7 }
 0x1f8   : > { %v834_v27 = vmax.f32 %v751_v14, %v802_v18  ;;  %v754_v29 = vpop.f32.mrb[20].mxu1  ;;  %v9214_v32 = vcombine.low %v1744_v8, %v1748_v9 }
 0x1f9   : > { %v755_v33 = vadd.f32 %v754_v29, %v11507_v53  ;;  %v756_v34 = vpop.f32.mrb[21].mxu1  ;;  %v855_v35 = vpack.c.bf16 %v833_v23, %v831_v22  ;;  %v1751_v22 = vld [vmem:[%s15869_s6 + $0x300] sm:$0xff] }
 0x1fa   : > { %v757_v37 = vadd.f32 %v756_v34, %v11510_v54  ;;  %v758_v38 = vpop.f32.mrb[22].mxu1  ;;  %v856_v39 = vpack.c.bf16 %v834_v27, %v832_v26  ;;  %3248 = vmatpush1.bf16.msra.mxu0 %v9180_v19  ;;  %3474 = vmatpush1.bf16.msra.mxu1 %v9182_v20  ;;  %v9213_v20 = vcombine.high %v1743_v3, %v1747_v7  ;;  %v1755_v23 = vld [vmem:[%s15869_s6 + $0x320] sm:$0xff]  ;;  %v1752_v26 = vld [vmem:[%s15869_s6 + $0x308] sm:$0xff] }
 0x1fb   : > { %v803_v41 = vmul.f32 0.01, %v755_v33  ;;  %v759_v42 = vadd.f32 %v758_v38, %v11507_v53  ;;  %v760_v43 = vpop.f32.mrb[23].mxu1  ;;  %3249 = vmatprep.subr.bf16.mxu0 %v9189_v21  ;;  %3475 = vmatprep.subr.bf16.mxu1 %v9191_v24  ;;  %v9215_v21 = vcombine.high %v1744_v8, %v1748_v9  ;;  %v1756_v27 = vld [vmem:[%s15869_s6 + $0x328] sm:$0xff]  ;;  %v1763_v3 = vld [vmem:[%s15869_s6 + $0x360] sm:$0xff] }
 0x1fc   : > { %v804_v51 = vmul.f32 0.01, %v757_v37  ;;  %v761_v55 = vadd.f32 %v760_v43, %v11510_v54  ;;  %1341 = vmatprep.mubr.bf16.mxu0 %v856_v39  ;;  %1454 = vmatprep.mubr.bf16.mxu1 %v856_v39  ;;  %v9220_v43 = vcombine.low %v1751_v22, %v1755_v23  ;;  %v9222_v47 = vcombine.low %v1752_v26, %v1756_v27 }
 0x1fd   : > { %v805_v59 = vmul.f32 0.01, %v759_v42  ;;  %1342 = vmatmul.mubr.bf16.gmra.mrb[32].mxu0 %v855_v35  ;;  %1455 = vmatmul.mubr.bf16.gmra.mrb[48].mxu1 %v855_v35  ;;  %v835_v0 = vmax.f32 %v755_v33, %v803_v41  ;;  %v9221_v33 = vcombine.high %v1751_v22, %v1755_v23 }
 0x1fe   : > { %v806_v60 = vmul.f32 0.01, %v761_v55  ;;  %3250 = vmatpush1.bf16.msra.mxu0 %v9188_v36  ;;  %3476 = vmatpush1.bf16.msra.mxu1 %v9190_v40  ;;  %v836_v4 = vmax.f32 %v757_v37, %v804_v51  ;;  %v9223_v36 = vcombine.high %v1752_v26, %v1756_v27  ;;  %v11732_v26 = vld [vmem:[%s15869_s6 + $0x420] sm:$0xff]  ;;  %v11737_v27 = vld [vmem:[%s15869_s6 + $0x408] sm:$0xff] }
 0x1ff   : > { %v837_v1 = vmax.f32 %v759_v42, %v805_v59  ;;  %3251 = vmatprep.subr.bf16.mxu0 %v9197_v44  ;;  %3477 = vmatprep.subr.bf16.mxu1 %v9199_v45 }
 0x200   : > { %v838_v5 = vmax.f32 %v761_v55, %v806_v60  ;;  %v764_v6 = vpop.f32.mrb[24].mxu1 }
 0x201   : > { %v765_v10 = vadd.f32 %v764_v6, %v11507_v53  ;;  %v766_v11 = vpop.f32.mrb[25].mxu1  ;;  %v857_v12 = vpack.c.bf16 %v837_v1, %v835_v0  ;;  %v1764_v6 = vld [vmem:[%s15869_s6 + $0x368] sm:$0xff] }
 0x202   : > { %v767_v56 = vadd.f32 %v766_v11, %v11510_v54  ;;  %v768_v14 = vpop.f32.mrb[26].mxu1  ;;  %v858_v15 = vpack.c.bf16 %v838_v5, %v836_v4  ;;  %3252 = vmatpush1.bf16.msra.mxu0 %v9196_v61  ;;  %3478 = vmatpush1.bf16.msra.mxu1 %v9198_v62  ;;  %v1760_v4 = vld [vmem:[%s15869_s6 + $0x348] sm:$0xff]  ;;  %v1771_v11 = vld [vmem:[%s15869_s6 + $0x3a0] sm:$0xff] }
 0x203   : > { %v807_v17 = vmul.f32 0.01, %v765_v10  ;;  %v769_v18 = vadd.f32 %v768_v14, %v11507_v53  ;;  %v770_v19 = vpop.f32.mrb[27].mxu1  ;;  %3253 = vmatprep.subr.bf16.mxu0 %v9205_v63  ;;  %3479 = vmatprep.subr.bf16.mxu1 %v9207_v2  ;;  %v9230_v8 = vcombine.low %v1760_v4, %v1764_v6  ;;  %v9231_v9 = vcombine.high %v1760_v4, %v1764_v6 }
 0x204   : > { %v808_v24 = vmul.f32 0.01, %v767_v56  ;;  %v771_v25 = vadd.f32 %v770_v19, %v11510_v54  ;;  %1351 = vmatprep.mubr.bf16.mxu0 %v858_v15  ;;  %1464 = vmatprep.mubr.bf16.mxu1 %v858_v15  ;;  %v1776_v19 = vld [vmem:[%s15869_s6 + $0x3c8] sm:$0xff] }
 0x205   : > { %v809_v29 = vmul.f32 0.01, %v769_v18  ;;  %1352 = vmatmul.mubr.bf16.gmra.mrb[36].mxu0 %v857_v12  ;;  %1465 = vmatmul.mubr.bf16.gmra.mrb[52].mxu1 %v857_v12  ;;  %v839_v34 = vmax.f32 %v765_v10, %v807_v17  ;;  %v1767_v10 = vld [vmem:[%s15869_s6 + $0x380] sm:$0xff]  ;;  %v1768_v12 = vld [vmem:[%s15869_s6 + $0x388] sm:$0xff] }
 0x206   : > { %v810_v30 = vmul.f32 0.01, %v771_v25  ;;  %3254 = vmatpush1.bf16.msra.mxu0 %v9204_v13  ;;  %3480 = vmatpush1.bf16.msra.mxu1 %v9206_v16  ;;  %v840_v37 = vmax.f32 %v767_v56, %v808_v24  ;;  %v9237_v13 = vcombine.high %v1767_v10, %v1771_v11  ;;  %v1772_v56 = vld [vmem:[%s15869_s6 + $0x3a8] sm:$0xff]  ;;  %v9236_v14 = vcombine.low %v1767_v10, %v1771_v11  ;;  %v1775_v17 = vld [vmem:[%s15869_s6 + $0x3c0] sm:$0xff] }
 0x207   : > { %v841_v35 = vmax.f32 %v769_v18, %v809_v29  ;;  %3255 = vmatprep.subr.bf16.mxu0 %v9213_v20  ;;  %3481 = vmatprep.subr.bf16.mxu1 %v9215_v21  ;;  %v9238_v15 = vcombine.low %v1768_v12, %v1772_v56  ;;  %v9239_v16 = vcombine.high %v1768_v12, %v1772_v56  ;;  %v1779_v18 = vld [vmem:[%s15869_s6 + $0x3e0] sm:$0xff]  ;;  %v1780_v21 = vld [vmem:[%s15869_s6 + $0x3e8] sm:$0xff] }
 0x208   : > { %v842_v38 = vmax.f32 %v771_v25, %v810_v30  ;;  %v774_v39 = vpop.f32.mrb[28].mxu1  ;;  %v9245_v20 = vcombine.high %v1775_v17, %v1779_v18  ;;  %v9244_v22 = vcombine.low %v1775_v17, %v1779_v18  ;;  %v9246_v23 = vcombine.low %v1776_v19, %v1780_v21  ;;  %v11727_v25 = vld [vmem:[%s15869_s6 + $0x400] sm:$0xff]  ;;  %v11744_v30 = vld [vmem:[%s15869_s6 + $0x428] sm:$0xff] }
 0x209   : > { %v775_v40 = vadd.f32 %v774_v39, %v11507_v53  ;;  %v776_v41 = vpop.f32.mrb[29].mxu1  ;;  %v859_v42 = vpack.c.bf16 %v841_v35, %v839_v34  ;;  %v9247_v24 = vcombine.high %v1776_v19, %v1780_v21  ;;  %v9253_v29 = vcombine.high %v11727_v25, %v11732_v26  ;;  %v927_v34 = vld [vmem:[%s15865_s2 + $0x3] sm:$0xf]  ;;  %v11774_v39 = vld [vmem:[%s15869_s6 + $0x448] sm:$0xff] }
 0x20a   : > { %v777_v44 = vadd.f32 %v776_v41, %v11510_v54  ;;  %v778_v45 = vpop.f32.mrb[30].mxu1  ;;  %v860_v46 = vpack.c.bf16 %v842_v38, %v840_v37  ;;  %3256 = vmatpush1.bf16.msra.mxu0 %v9212_v31  ;;  %3482 = vmatpush1.bf16.msra.mxu1 %v9214_v32  ;;  %v11756_v35 = vsub.s32 2, %v11495_v49  ;;  %v11764_v37 = vld [vmem:[%s15869_s6 + $0x440] sm:$0xff]  ;;  %v11986_v12 = vld [vmem:[%s15869_s6 + $0x608] sm:$0xff] }
 0x20b   : > { %v811_v51 = vmul.f32 0.01, %v775_v40  ;;  %v779_v55 = vadd.f32 %v778_v45, %v11507_v53  ;;  %v780_v57 = vpop.f32.mrb[31].mxu1  ;;  %3257 = vmatprep.subr.bf16.mxu0 %v9221_v33  ;;  %3483 = vmatprep.subr.bf16.mxu1 %v9223_v36  ;;  %v9255_v33 = vcombine.high %v11737_v27, %v11744_v30  ;;  %v11759_v36 = vsub.s32 3, %v11495_v49  ;;  %v11769_v38 = vld [vmem:[%s15869_s6 + $0x460] sm:$0xff] }
 0x20c   : > { %v812_v58 = vmul.f32 0.01, %v777_v44  ;;  %v781_v59 = vadd.f32 %v780_v57, %v11510_v54  ;;  %1361 = vmatprep.mubr.bf16.mxu0 %v860_v46  ;;  %1474 = vmatprep.mubr.bf16.mxu1 %v860_v46  ;;  %v1759_v54 = vld [vmem:[%s15869_s6 + $0x340] sm:$0xff]  ;;  %15961 = vst [vmem:[#allocation5_spill] sm:$0xff] %v11756_v35  ;;  %v11825_v57 = vrot.slane %v927_v34, %v11756_v35 }
 0x20d   : > { %v813_v60 = vmul.f32 0.01, %v779_v55  ;;  %1362 = vmatmul.mubr.bf16.gmra.mrb[40].mxu0 %v859_v42  ;;  %1475 = vmatmul.mubr.bf16.gmra.mrb[56].mxu1 %v859_v42  ;;  %v843_v62 = vmax.f32 %v775_v40, %v811_v51  ;;  %v9229_v5 = vcombine.high %v1759_v54, %v1763_v3  ;;  %v9228_v7 = vcombine.low %v1759_v54, %v1763_v3  ;;  %v11779_v40 = vld [vmem:[%s15869_s6 + $0x468] sm:$0xff]  ;;  %v11784_v41 = vld [vmem:[%s15869_s6 + $0x480] sm:$0xff] }
 0x20e   : > { %v814_v61 = vmul.f32 0.01, %v781_v59  ;;  %3258 = vmatpush1.bf16.msra.mxu0 %v9220_v43  ;;  %3484 = vmatpush1.bf16.msra.mxu1 %v9222_v47  ;;  %v844_v0 = vmax.f32 %v777_v44, %v812_v58  ;;  %15962 = vst [vmem:[#allocation6_spill] sm:$0xff] %v11759_v36  ;;  %v11789_v42 = vld [vmem:[%s15869_s6 + $0x4a0] sm:$0xff]  ;;  %v11794_v43 = vld [vmem:[%s15869_s6 + $0x488] sm:$0xff]  ;;  %v11828_v58 = vrot.slane %v927_v34, %v11504_v52 }
 0x20f   : > { %v845_v63 = vmax.f32 %v779_v55, %v813_v60  ;;  %3259 = vmatprep.subr.bf16.mxu0 %v9229_v5  ;;  %3485 = vmatprep.subr.bf16.mxu1 %v9231_v9  ;;  %v11799_v44 = vld [vmem:[%s15869_s6 + $0x4a8] sm:$0xff]  ;;  %v11804_v45 = vld [vmem:[%s15869_s6 + $0x4c0] sm:$0xff]  ;;  %v11822_v55 = vrot.slane %v927_v34, %v11498_v50 }
 0x210   : > { %v846_v1 = vmax.f32 %v781_v59, %v814_v61  ;;  %v11809_v46 = vld [vmem:[%s15869_s6 + $0x4e0] sm:$0xff]  ;;  %v11814_v47 = vld [vmem:[%s15869_s6 + $0x4c8] sm:$0xff]  ;;  %v11831_v59 = vrot.slane %v927_v34, %v11759_v36 }
 0x211   : > { %v861_v2 = vpack.c.bf16 %v845_v63, %v843_v62  ;;  %v11819_v51 = vld [vmem:[%s15869_s6 + $0x4e8] sm:$0xff]  ;;  %v11836_v60 = vld [vmem:[%s15869_s6 + $0x500] sm:$0xff] }
 0x212   : > { %v862_v53 = vpack.c.bf16 %v846_v1, %v844_v0  ;;  %3260 = vmatpush1.bf16.msra.mxu0 %v9228_v7  ;;  %3486 = vmatpush1.bf16.msra.mxu1 %v9230_v8  ;;  %v11841_v61 = vld [vmem:[%s15869_s6 + $0x520] sm:$0xff]  ;;  %v11846_v62 = vld [vmem:[%s15869_s6 + $0x508] sm:$0xff] }
 0x213   : > { %3261 = vmatprep.subr.bf16.mxu0 %v9237_v13  ;;  %3487 = vmatprep.subr.bf16.mxu1 %v9239_v16  ;;  %v11864_v54 = vld [vmem:[%s15869_s6 + $0x540] sm:$0xff]  ;;  %v11882_v8 = vld [vmem:[%s15869_s6 + $0x548] sm:$0xff] }
 0x214   : > { %1371 = vmatprep.mubr.bf16.mxu0 %v862_v53  ;;  %1484 = vmatprep.mubr.bf16.mxu1 %v862_v53  ;;  %v11859_v53 = vld [vmem:[%s15869_s6 + $0x528] sm:$0xff]  ;;  %v11869_v3 = vld [vmem:[%s15869_s6 + $0x560] sm:$0xff] }
 0x215   : > { %1372 = vmatmul.mubr.bf16.gmra.mrb[44].mxu0 %v861_v2  ;;  %1485 = vmatmul.mubr.bf16.gmra.mrb[60].mxu1 %v861_v2  ;;  %v11887_v9 = vld [vmem:[%s15869_s6 + $0x568] sm:$0xff]  ;;  %v11892_v10 = vld [vmem:[%s15869_s6 + $0x580] sm:$0xff] }
 0x216   : > { %3262 = vmatpush1.bf16.msra.mxu0 %v9236_v14  ;;  %3488 = vmatpush1.bf16.msra.mxu1 %v9238_v15  ;;  %v11905_v14 = vld [vmem:[%s15869_s6 + $0x5a0] sm:$0xff]  ;;  %v11910_v15 = vld [vmem:[%s15869_s6 + $0x588] sm:$0xff] }
 0x217   : > { %3263 = vmatprep.subr.bf16.mxu0 %v9245_v20  ;;  %3489 = vmatprep.subr.bf16.mxu1 %v9247_v24  ;;  %15963 = vst [vmem:[#allocation7_spill] sm:$0xff] %v11910_v15  ;;  %v11915_v16 = vld [vmem:[%s15869_s6 + $0x5a8] sm:$0xff]  ;;  %v11928_v21 = vld [vmem:[%s15869_s6 + $0x5c0] sm:$0xff] }
 0x218   : > { %15964 = vst [vmem:[#allocation8_spill] sm:$0xff] %v11915_v16  ;;  %15965 = vst [vmem:[#allocation9_spill] sm:$0xff] %v11928_v21  ;;  %v11946_v34 = vld [vmem:[%s15869_s6 + $0x5c8] sm:$0xff]  ;;  %v11981_v24 = vld [vmem:[%s15869_s6 + $0x620] sm:$0xff] }
 0x219   : > { %15967 = vst [vmem:[#allocation11_spill] sm:$0xff] %v11946_v34  ;;  %15970 = vst [vmem:[#allocation14_spill] sm:$0xff] %v11981_v24 }
 0x21a   : > { %3264 = vmatpush1.bf16.msra.mxu0 %v9244_v22  ;;  %3490 = vmatpush1.bf16.msra.mxu1 %v9246_v23  ;;  %v11933_v22 = vld [vmem:[%s15869_s6 + $0x5e0] sm:$0xff] }
 0x21b   : > { %3346 = vmatprep.subr.bf16.mxu0 %v9253_v29  ;;  %3572 = vmatprep.subr.bf16.mxu1 %v9255_v33  ;;  %15966 = vst [vmem:[#allocation10_spill] sm:$0xff] %v11933_v22  ;;  %v11970_v29 = vld [vmem:[%s15869_s6 + $0x600] sm:$0xff] }
 0x21c   : > { %15969 = vst [vmem:[#allocation13_spill] sm:$0xff] %v11970_v29 }
 0x2b0   : > { %v1303_v28 = vpop.f32.mrb[16].mxu0  ;;  %v1416_v23 = vpop.f32.mrb[32].mxu1 }
 0x2b1   : > { %v1304_v20 = vadd.f32 %v1303_v28, %v11822_v55  ;;  %v1417_v17 = vadd.f32 %v1416_v23, %v11825_v57  ;;  %v1305_v18 = vpop.f32.mrb[17].mxu0  ;;  %v1418_v13 = vpop.f32.mrb[33].mxu1 }
 0x2b2   : > { %v1306_v33 = vadd.f32 %v1305_v18, %v11828_v58  ;;  %v1419_v19 = vadd.f32 %v1418_v13, %v11831_v59  ;;  %v1307_v28 = vpop.f32.mrb[18].mxu0  ;;  %v1420_v56 = vpop.f32.mrb[34].mxu1  ;;  %v11991_v13 = vld [vmem:[%s15869_s6 + $0x628] sm:$0xff] }
 0x2b3   : > { %v1495_v18 = vmul.f32 0.01, %v1304_v20  ;;  %v1497_v23 = vmul.f32 0.01, %v1417_v17  ;;  %v1308_v6 = vadd.f32 %v1307_v28, %v11822_v55  ;;  %v1421_v11 = vadd.f32 %v1420_v56, %v11825_v57  ;;  %v1309_v7 = vpop.f32.mrb[19].mxu0  ;;  %v1422_v4 = vpop.f32.mrb[35].mxu1 }
 0x2b4   : > { %v1496_v5 = vmul.f32 0.01, %v1306_v33  ;;  %v1498_v1 = vmul.f32 0.01, %v1419_v19  ;;  %v1310_v63 = vadd.f32 %v1309_v7, %v11828_v58  ;;  %v1423_v2 = vadd.f32 %v1422_v4, %v11831_v59 }
 0x2b5   : > { %v1499_v0 = vmul.f32 0.01, %v1308_v6  ;;  %v1501_v32 = vmul.f32 0.01, %v1421_v11  ;;  %v1559_v35 = vmax.f32 %v1304_v20, %v1495_v18  ;;  %v1561_v7 = vmax.f32 %v1417_v17, %v1497_v23 }
 0x2b6   : > { %v1500_v36 = vmul.f32 0.01, %v1310_v63  ;;  %v1502_v28 = vmul.f32 0.01, %v1423_v2  ;;  %v1560_v48 = vmax.f32 %v1306_v33, %v1496_v5  ;;  %v1562_v34 = vmax.f32 %v1419_v19, %v1498_v1 }
 0x2b7   : > { %v1563_v50 = vmax.f32 %v1308_v6, %v1499_v0  ;;  %v1565_v4 = vmax.f32 %v1421_v11, %v1501_v32  ;;  %v12014_v32 = vld [vmem:[%s15869_s6 + $0x640] sm:$0xff]  ;;  %v15973_v23 = vcombine.high %v11764_v37, %v11769_v38 }
 0x2b8   : > { %v1564_v22 = vmax.f32 %v1310_v63, %v1500_v36  ;;  %v1566_v21 = vmax.f32 %v1423_v2, %v1502_v28  ;;  %v1313_v31 = vpop.f32.mrb[20].mxu0  ;;  %v1426_v16 = vpop.f32.mrb[36].mxu1  ;;  %v12030_v2 = vld [vmem:[%s15869_s6 + $0x648] sm:$0xff] }
 0x2b9   : > { %v12005_v15 = vpack.c.bf16 %v1563_v50, %v1559_v35  ;;  %v12007_v49 = vpack.c.bf16 %v1565_v4, %v1561_v7  ;;  %v1314_v24 = vadd.f32 %v1313_v31, %v11822_v55  ;;  %v1427_v56 = vadd.f32 %v1426_v16, %v11825_v57  ;;  %v1315_v29 = vpop.f32.mrb[21].mxu0  ;;  %v1428_v52 = vpop.f32.mrb[37].mxu1  ;;  %v12025_v31 = vld [vmem:[%s15869_s6 + $0x660] sm:$0xff] }
 0x2ba   : > { %v12016_v0 = vpack.c.bf16 %v1564_v22, %v1560_v48  ;;  %v12018_v36 = vpack.c.bf16 %v1566_v21, %v1562_v34  ;;  %v1316_v50 = vadd.f32 %v1315_v29, %v11828_v58  ;;  %v1429_v35 = vadd.f32 %v1428_v52, %v11831_v59  ;;  %v1317_v63 = vpop.f32.mrb[22].mxu0  ;;  %v1430_v1 = vpop.f32.mrb[38].mxu1  ;;  %v12035_v48 = vld [vmem:[%s15869_s6 + $0x668] sm:$0xff] }
 0x2bb   : > { %v1503_v5 = vmul.f32 0.01, %v1314_v24  ;;  %v1505_v6 = vmul.f32 0.01, %v1427_v56  ;;  %v1318_v52 = vadd.f32 %v1317_v63, %v11822_v55  ;;  %v1431_v11 = vadd.f32 %v1430_v1, %v11825_v57  ;;  %v1319_v16 = vpop.f32.mrb[23].mxu0  ;;  %v1432_v17 = vpop.f32.mrb[39].mxu1 }
 0x2bc   : > { %v1504_v19 = vmul.f32 0.01, %v1316_v50  ;;  %v1506_v20 = vmul.f32 0.01, %v1429_v35  ;;  %v1320_v21 = vadd.f32 %v1319_v16, %v11828_v58  ;;  %v1433_v22 = vadd.f32 %v1432_v17, %v11831_v59  ;;  %3265 = vmatprep.mubr.bf16.mxu0 %v12016_v0  ;;  %3491 = vmatprep.mubr.bf16.mxu1 %v12016_v0 }
 0x2bd   : > { %v1507_v29 = vmul.f32 0.01, %v1318_v52  ;;  %v1509_v33 = vmul.f32 0.01, %v1431_v11  ;;  %3266 = vmatmul.mubr.bf16.vlgmr.msra.gmra.mrb[48].mxu0 %v12005_v15  ;;  %3492 = vmatmul.mubr.bf16.vlgmr.msra.gmra.mrb[64].mxu1 %v12005_v15  ;;  %v1567_v18 = vmax.f32 %v1314_v24, %v1503_v5  ;;  %v15971_v4 = vcombine.low %v11727_v25, %v11732_v26 }
 0x2be   : > { %v1508_v28 = vmul.f32 0.01, %v1320_v21  ;;  %v1510_v7 = vmul.f32 0.01, %v1433_v22  ;;  %v15972_v63 = vcombine.low %v11737_v27, %v11744_v30  ;;  %v1569_v16 = vmax.f32 %v1427_v56, %v1505_v6 }
 0x2bf   : > { %3347 = vmatpush1.bf16.msra.mxu0 %v15971_v4  ;;  %v1571_v17 = vmax.f32 %v1318_v52, %v1507_v29  ;;  %v1573_v34 = vmax.f32 %v1431_v11, %v1509_v33  ;;  %v15974_v24 = vcombine.high %v11774_v39, %v11779_v40  ;;  %v1568_v25 = vmax.f32 %v1316_v50, %v1504_v19 }
 0x2c0   : > { %3573 = vmatpush1.bf16.msra.mxu1 %v15972_v63  ;;  %3348 = vmatprep.subr.bf16.mxu0 %v15973_v23  ;;  %v1570_v26 = vmax.f32 %v1429_v35, %v1506_v20  ;;  %v1572_v5 = vmax.f32 %v1320_v21, %v1508_v28  ;;  %v1574_v4 = vmax.f32 %v1433_v22, %v1510_v7  ;;  %v1323_v27 = vpop.f32.mrb[24].mxu0  ;;  %v1436_v30 = vpop.f32.mrb[40].mxu1  ;;  %v12081_v22 = vld [vmem:[%s15869_s6 + $0x680] sm:$0xff] }
 0x2c1   : > { %3574 = vmatprep.subr.bf16.mxu1 %v15974_v24  ;;  %v12063_v63 = vpack.c.bf16 %v1571_v17, %v1567_v18  ;;  %v12065_v1 = vpack.c.bf16 %v1573_v34, %v1569_v16  ;;  %v1324_v56 = vadd.f32 %v1323_v27, %v11822_v55  ;;  %v1437_v6 = vadd.f32 %v1436_v30, %v11825_v57  ;;  %v1325_v52 = vpop.f32.mrb[25].mxu0  ;;  %v1438_v11 = vpop.f32.mrb[41].mxu1  ;;  %v12086_v34 = vld [vmem:[%s15869_s6 + $0x6a0] sm:$0xff] }
 0x2c2   : > { %v12069_v29 = vpack.c.bf16 %v1572_v5, %v1568_v25  ;;  %v12071_v33 = vpack.c.bf16 %v1574_v4, %v1570_v26  ;;  %v1326_v50 = vadd.f32 %v1325_v52, %v11828_v58  ;;  %v1439_v35 = vadd.f32 %v1438_v11, %v11831_v59  ;;  %v1327_v20 = vpop.f32.mrb[26].mxu0  ;;  %v1440_v21 = vpop.f32.mrb[42].mxu1 }
 0x2c3   : > { %v15975_v19 = vcombine.low %v11764_v37, %v11769_v38  ;;  %v1511_v23 = vmul.f32 0.01, %v1324_v56  ;;  %v1513_v18 = vmul.f32 0.01, %v1437_v6  ;;  %v1328_v28 = vadd.f32 %v1327_v20, %v11822_v55  ;;  %v1329_v38 = vpop.f32.mrb[27].mxu0  ;;  %v1442_v16 = vpop.f32.mrb[43].mxu1 }
 0x2c4   : > { %v1441_v7 = vadd.f32 %v1440_v21, %v11825_v57  ;;  %v15976_v37 = vcombine.low %v11774_v39, %v11779_v40  ;;  %v15977_v17 = vcombine.high %v11784_v41, %v11789_v42  ;;  %v1512_v24 = vmul.f32 0.01, %v1326_v50  ;;  %3275 = vmatprep.mubr.bf16.mxu0 %v12069_v29  ;;  %3501 = vmatprep.mubr.bf16.mxu1 %v12069_v29 }
 0x2c5   : > { %3349 = vmatpush1.bf16.msra.mxu0 %v15975_v19  ;;  %v1514_v25 = vmul.f32 0.01, %v1439_v35  ;;  %v1330_v26 = vadd.f32 %v1329_v38, %v11828_v58  ;;  %v1443_v5 = vadd.f32 %v1442_v16, %v11831_v59  ;;  %v1515_v4 = vmul.f32 0.01, %v1328_v28  ;;  %3502 = vmatmul.mubr.bf16.gmra.mrb[68].mxu1 %v12063_v63 }
 0x2c6   : > { %3575 = vmatpush1.bf16.msra.mxu1 %v15976_v37  ;;  %3350 = vmatprep.subr.bf16.mxu0 %v15977_v17  ;;  %v1517_v27 = vmul.f32 0.01, %v1441_v7  ;;  %v1575_v30 = vmax.f32 %v1324_v56, %v1511_v23  ;;  %v15978_v19 = vcombine.low %v11784_v41, %v11789_v42  ;;  %v15979_v20 = vcombine.high %v11794_v43, %v11799_v44 }
 0x2c7   : > { %3276 = vmatmul.mubr.bf16.gmra.mrb[52].mxu0 %v12063_v63  ;;  %v1516_v52 = vmul.f32 0.01, %v1330_v26  ;;  %v1518_v11 = vmul.f32 0.01, %v1443_v5  ;;  %v1577_v37 = vmax.f32 %v1437_v6, %v1513_v18  ;;  %v1579_v38 = vmax.f32 %v1328_v28, %v1515_v4 }
 0x2c8   : > { %3576 = vmatprep.subr.bf16.mxu1 %v15979_v20  ;;  %v1581_v16 = vmax.f32 %v1441_v7, %v1517_v27  ;;  %v15980_v17 = vcombine.low %v11794_v43, %v11799_v44  ;;  %v15981_v56 = vcombine.high %v11804_v45, %v11809_v46  ;;  %v1576_v41 = vmax.f32 %v1326_v50, %v1512_v24  ;;  %v1333_v40 = vpop.f32.mrb[28].mxu0  ;;  %v1446_v20 = vpop.f32.mrb[44].mxu1  ;;  %v12132_v50 = vld [vmem:[%s15869_s6 + $0x688] sm:$0xff] }
 0x2c9   : > { %3351 = vmatpush1.bf16.msra.mxu0 %v15978_v19  ;;  %v1578_v42 = vmax.f32 %v1439_v35, %v1514_v25  ;;  %v1580_v23 = vmax.f32 %v1330_v26, %v1516_v52  ;;  %v1582_v19 = vmax.f32 %v1443_v5, %v1518_v11  ;;  %v15982_v21 = vcombine.high %v11814_v47, %v11819_v51  ;;  %v1335_v28 = vpop.f32.mrb[29].mxu0  ;;  %v1448_v7 = vpop.f32.mrb[45].mxu1  ;;  %v12156_v52 = vld [vmem:[%s15869_s6 + $0x6e0] sm:$0xff] }
 0x2ca   : > { %3577 = vmatpush1.bf16.msra.mxu1 %v15980_v17  ;;  %3352 = vmatprep.subr.bf16.mxu0 %v15981_v56  ;;  %v12123_v6 = vpack.c.bf16 %v1579_v38, %v1575_v30  ;;  %v12125_v18 = vpack.c.bf16 %v1581_v16, %v1577_v37  ;;  %v1334_v43 = vadd.f32 %v1333_v40, %v11822_v55  ;;  %v1337_v4 = vpop.f32.mrb[30].mxu0  ;;  %v1450_v27 = vpop.f32.mrb[46].mxu1  ;;  %v12146_v40 = vld [vmem:[%s15869_s6 + $0x6a8] sm:$0xff]  ;;  %v12151_v30 = vld [vmem:[%s15869_s6 + $0x6c0] sm:$0xff] }
 0x2cb   : > { %3578 = vmatprep.subr.bf16.mxu1 %v15982_v21  ;;  %v1447_v44 = vadd.f32 %v1446_v20, %v11825_v57  ;;  %v12134_v35 = vpack.c.bf16 %v1580_v23, %v1576_v41  ;;  %v12136_v24 = vpack.c.bf16 %v1582_v19, %v1578_v42  ;;  %v1336_v25 = vadd.f32 %v1335_v28, %v11828_v58  ;;  %v1339_v38 = vpop.f32.mrb[31].mxu0  ;;  %v1452_v16 = vpop.f32.mrb[47].mxu1 }
 0x2cc   : > { %15983 = vst [vmem:[#allocation15_spill] sm:$0xff] %v12123_v6  ;;  %v1449_v26 = vadd.f32 %v1448_v7, %v11831_v59  ;;  %v15984_v5 = vcombine.low %v11804_v45, %v11809_v46  ;;  %v1519_v11 = vmul.f32 0.01, %v1334_v43  ;;  %v1338_v46 = vadd.f32 %v1337_v4, %v11822_v55 }
 0x2cd   : > { %v1521_v45 = vmul.f32 0.01, %v1447_v44  ;;  %v1451_v21 = vadd.f32 %v1450_v27, %v11825_v57  ;;  %v15985_v37 = vcombine.low %v11814_v47, %v11819_v51  ;;  %v15986_v17 = vcombine.high %v11836_v60, %v11841_v61  ;;  %3285 = vmatprep.mubr.bf16.mxu0 %v12134_v35  ;;  %3511 = vmatprep.mubr.bf16.mxu1 %v12134_v35 }
 0x2ce   : > { %3353 = vmatpush1.bf16.msra.mxu0 %v15984_v5  ;;  %v1520_v56 = vmul.f32 0.01, %v1336_v25  ;;  %v1522_v41 = vmul.f32 0.01, %v1449_v26  ;;  %v1340_v42 = vadd.f32 %v1339_v38, %v11828_v58  ;;  %v1453_v23 = vadd.f32 %v1452_v16, %v11831_v59  ;;  %3512 = vmatmul.mubr.bf16.gmra.mrb[72].mxu1 %v12123_v6 }
 0x2cf   : > { %3579 = vmatpush1.bf16.msra.mxu1 %v15985_v37  ;;  %3354 = vmatprep.subr.bf16.mxu0 %v15986_v17  ;;  %v1523_v19 = vmul.f32 0.01, %v1338_v46  ;;  %v1525_v20 = vmul.f32 0.01, %v1451_v21  ;;  %v1583_v28 = vmax.f32 %v1334_v43, %v1519_v11  ;;  %v15987_v4 = vcombine.low %v11836_v60, %v11841_v61 }
 0x2d0   : > { %3286 = vmatmul.mubr.bf16.gmra.mrb[56].mxu0 %v12123_v6  ;;  %v1524_v7 = vmul.f32 0.01, %v1340_v42  ;;  %v1526_v5 = vmul.f32 0.01, %v1453_v23  ;;  %v15988_v27 = vcombine.high %v11846_v62, %v11859_v53  ;;  %v1585_v38 = vmax.f32 %v1447_v44, %v1521_v45  ;;  %v1343_v51 = vpop.f32.mrb[32].mxu0  ;;  %v16006_v6 = vld [vmem:[#allocation12_spill] sm:$0xff] }
 0x2d1   : > { %v1587_v16 = vmax.f32 %v1338_v46, %v1523_v19  ;;  %v1589_v17 = vmax.f32 %v1451_v21, %v1525_v20  ;;  %v15989_v47 = vcombine.low %v11846_v62, %v11859_v53  ;;  %v15990_v43 = vcombine.high %v11864_v54, %v11869_v3  ;;  %v1345_v46 = vpop.f32.mrb[33].mxu0  ;;  %v12211_v20 = vld [vmem:[%s15869_s6 + $0x6c8] sm:$0xff] }
 0x2d2   : > { %3355 = vmatpush1.bf16.msra.mxu0 %v15987_v4  ;;  %3580 = vmatprep.subr.bf16.mxu1 %v15988_v27  ;;  %v1584_v60 = vmax.f32 %v1336_v25, %v1520_v56  ;;  %v1586_v61 = vmax.f32 %v1449_v26, %v1522_v41  ;;  %v1588_v11 = vmax.f32 %v1340_v42, %v1524_v7  ;;  %v1456_v27 = vpop.f32.mrb[48].mxu1 }
 0x2d3   : > { %3581 = vmatpush1.bf16.msra.mxu1 %v15989_v47  ;;  %3356 = vmatprep.subr.bf16.mxu0 %v15990_v43  ;;  %v1590_v4 = vmax.f32 %v1453_v23, %v1526_v5  ;;  %v15991_v37 = vcombine.high %v11882_v8, %v11887_v9  ;;  %v12193_v44 = vpack.c.bf16 %v1587_v16, %v1583_v28  ;;  %v1458_v21 = vpop.f32.mrb[49].mxu1  ;;  %v1347_v23 = vpop.f32.mrb[34].mxu0  ;;  %v12216_v47 = vld [vmem:[%s15869_s6 + $0x6e8] sm:$0xff] }
 0x2d4   : > { %v12195_v45 = vpack.c.bf16 %v1589_v17, %v1585_v38  ;;  %v1344_v62 = vadd.f32 %v1343_v51, %v11822_v55  ;;  %v1457_v53 = vadd.f32 %v1456_v27, %v11825_v57  ;;  %v12199_v25 = vpack.c.bf16 %v1588_v11, %v1584_v60  ;;  %v1460_v19 = vpop.f32.mrb[50].mxu1 }
 0x2d5   : > { %3582 = vmatprep.subr.bf16.mxu1 %v15991_v37  ;;  %15992 = vst [vmem:[#allocation16_spill] sm:$0xff] %v12193_v44  ;;  %v12201_v26 = vpack.c.bf16 %v1590_v4, %v1586_v61  ;;  %v1346_v56 = vadd.f32 %v1345_v46, %v11828_v58  ;;  %v1459_v41 = vadd.f32 %v1458_v21, %v11831_v59  ;;  %v1462_v37 = vpop.f32.mrb[51].mxu1 }
 0x2d6   : > { %15993 = vst [vmem:[#allocation17_spill] sm:$0xff] %v12199_v25  ;;  %v15994_v42 = vcombine.low %v11864_v54, %v11869_v3  ;;  %v1527_v51 = vmul.f32 0.01, %v1344_v62  ;;  %v1529_v28 = vmul.f32 0.01, %v1457_v53  ;;  %v1348_v7 = vadd.f32 %v1347_v23, %v11822_v55  ;;  %v1349_v3 = vpop.f32.mrb[35].mxu0  ;;  %3295 = vmatprep.mubr.bf16.mxu0 %v12199_v25  ;;  %3521 = vmatprep.mubr.bf16.mxu1 %v12199_v25 }
 0x2d7   : > { %v1461_v5 = vadd.f32 %v1460_v19, %v11825_v57  ;;  %v15995_v54 = vcombine.low %v11882_v8, %v11887_v9  ;;  %v15996_v38 = vcombine.high %v11892_v10, %v11905_v14  ;;  %v1528_v16 = vmul.f32 0.01, %v1346_v56  ;;  %3522 = vmatmul.mubr.bf16.gmra.mrb[76].mxu1 %v12193_v44  ;;  %v15999_v23 = vld [vmem:[#allocation8_spill] sm:$0xff]  ;;  %v16005_v25 = vld [vmem:[#allocation11_spill] sm:$0xff] }
 0x2d8   : > { %3357 = vmatpush1.bf16.msra.mxu0 %v15994_v42  ;;  %v1530_v17 = vmul.f32 0.01, %v1459_v41  ;;  %v1350_v43 = vadd.f32 %v1349_v3, %v11828_v58  ;;  %v1463_v60 = vadd.f32 %v1462_v37, %v11831_v59  ;;  %v1531_v61 = vmul.f32 0.01, %v1348_v7  ;;  %v15998_v42 = vld [vmem:[#allocation7_spill] sm:$0xff] }
 0x2d9   : > { %3583 = vmatpush1.bf16.msra.mxu1 %v15995_v54  ;;  %3358 = vmatprep.subr.bf16.mxu0 %v15996_v38  ;;  %v1533_v11 = vmul.f32 0.01, %v1461_v5  ;;  %v1591_v4 = vmax.f32 %v1344_v62, %v1527_v51  ;;  %v15997_v21 = vcombine.low %v11892_v10, %v11905_v14  ;;  %v16000_v19 = vcombine.high %v15998_v42, %v15999_v23  ;;  %v16002_v62 = vld [vmem:[#allocation9_spill] sm:$0xff]  ;;  %v16003_v51 = vld [vmem:[#allocation10_spill] sm:$0xff] }
 0x2da   : > { %3296 = vmatmul.mubr.bf16.gmra.mrb[60].mxu0 %v12193_v44  ;;  %v1532_v27 = vmul.f32 0.01, %v1350_v43  ;;  %v1534_v46 = vmul.f32 0.01, %v1463_v60  ;;  %v1593_v3 = vmax.f32 %v1457_v53, %v1529_v28  ;;  %v1595_v37 = vmax.f32 %v1348_v7, %v1531_v61  ;;  %v1353_v44 = vpop.f32.mrb[36].mxu0 }
 0x2db   : > { %3584 = vmatprep.subr.bf16.mxu1 %v16000_v19  ;;  %v1597_v38 = vmax.f32 %v1461_v5, %v1533_v11  ;;  %v16001_v9 = vcombine.low %v15998_v42, %v15999_v23  ;;  %v16004_v8 = vcombine.high %v16002_v62, %v16003_v51  ;;  %v1592_v10 = vmax.f32 %v1346_v56, %v1528_v16  ;;  %v1466_v19 = vpop.f32.mrb[52].mxu1  ;;  %v1355_v61 = vpop.f32.mrb[37].mxu0  ;;  %v12262_v56 = vld [vmem:[%s15869_s6 + $0x700] sm:$0xff] }
 0x2dc   : > { %3359 = vmatpush1.bf16.msra.mxu0 %v15997_v21  ;;  %v1594_v14 = vmax.f32 %v1459_v41, %v1530_v17  ;;  %v1596_v21 = vmax.f32 %v1350_v43, %v1532_v27  ;;  %v1598_v39 = vmax.f32 %v1463_v60, %v1534_v46  ;;  %v16007_v54 = vcombine.high %v16005_v25, %v16006_v6  ;;  %v1468_v11 = vpop.f32.mrb[53].mxu1  ;;  %v1357_v60 = vpop.f32.mrb[38].mxu0 }
 0x2dd   : > { %3585 = vmatpush1.bf16.msra.mxu1 %v16001_v9  ;;  %3360 = vmatprep.subr.bf16.mxu0 %v16004_v8  ;;  %v12253_v53 = vpack.c.bf16 %v1595_v37, %v1591_v4  ;;  %v12255_v28 = vpack.c.bf16 %v1597_v38, %v1593_v3  ;;  %v1354_v7 = vadd.f32 %v1353_v44, %v11822_v55  ;;  %v1470_v8 = vpop.f32.mrb[54].mxu1  ;;  %v12276_v9 = vld [vmem:[%s15869_s6 + $0x720] sm:$0xff]  ;;  %v12286_v4 = vld [vmem:[%s15869_s6 + $0x728] sm:$0xff]  ;;  %v1359_v3 = vpop.f32.mrb[39].mxu0  ;;  %v16012_v38 = vld [vmem:[#allocation13_spill] sm:$0xff] }
 0x2de   : > { %3586 = vmatprep.subr.bf16.mxu1 %v16007_v54  ;;  %v1467_v5 = vadd.f32 %v1466_v19, %v11825_v57  ;;  %v12264_v41 = vpack.c.bf16 %v1596_v21, %v1592_v10  ;;  %v12266_v16 = vpack.c.bf16 %v1598_v39, %v1594_v14  ;;  %v1356_v17 = vadd.f32 %v1355_v61, %v11828_v58  ;;  %v12281_v39 = vld [vmem:[%s15869_s6 + $0x708] sm:$0xff]  ;;  %v1472_v37 = vpop.f32.mrb[55].mxu1 }
 0x2df   : > { %16008 = vst [vmem:[#allocation7_spill] sm:$0xff] %v12253_v53  ;;  %v1469_v43 = vadd.f32 %v1468_v11, %v11831_v59  ;;  %v16010_v44 = vcombine.low %v16002_v62, %v16003_v51  ;;  %v1535_v27 = vmul.f32 0.01, %v1354_v7  ;;  %v1358_v42 = vadd.f32 %v1357_v60, %v11822_v55  ;;  %v16013_v62 = vld [vmem:[#allocation14_spill] sm:$0xff] }
 0x2e0   : > { %16009 = vst [vmem:[#allocation8_spill] sm:$0xff] %v12264_v41  ;;  %v1537_v46 = vmul.f32 0.01, %v1467_v5  ;;  %v1471_v23 = vadd.f32 %v1470_v8, %v11825_v57  ;;  %v16011_v54 = vcombine.low %v16005_v25, %v16006_v6  ;;  %v16014_v51 = vcombine.high %v16012_v38, %v16013_v62  ;;  %3305 = vmatprep.mubr.bf16.mxu0 %v12264_v41 }
 0x2e1   : > { %3361 = vmatpush1.bf16.msra.mxu0 %v16010_v44  ;;  %v1536_v10 = vmul.f32 0.01, %v1356_v17  ;;  %v1538_v14 = vmul.f32 0.01, %v1469_v43  ;;  %v1360_v21 = vadd.f32 %v1359_v3, %v11828_v58  ;;  %v1473_v19 = vadd.f32 %v1472_v37, %v11831_v59  ;;  %3531 = vmatprep.mubr.bf16.mxu1 %v12264_v41  ;;  %v1363_v41 = vpop.f32.mrb[40].mxu0 }
 0x2e2   : > { %3587 = vmatpush1.bf16.msra.mxu1 %v16011_v54  ;;  %3362 = vmatprep.subr.bf16.mxu0 %v16014_v51  ;;  %v1539_v61 = vmul.f32 0.01, %v1358_v42  ;;  %v1541_v11 = vmul.f32 0.01, %v1471_v23  ;;  %v1599_v44 = vmax.f32 %v1354_v7, %v1535_v27  ;;  %v16015_v54 = vcombine.low %v16012_v38, %v16013_v62 }
 0x2e3   : > { %3306 = vmatmul.mubr.bf16.gmra.mrb[64].mxu0 %v12253_v53  ;;  %3532 = vmatmul.mubr.bf16.gmra.mrb[80].mxu1 %v12253_v53  ;;  %v1540_v60 = vmul.f32 0.01, %v1360_v21  ;;  %v1542_v8 = vmul.f32 0.01, %v1473_v19  ;;  %v16016_v3 = vcombine.high %v11986_v12, %v11991_v13  ;;  %v1601_v51 = vmax.f32 %v1467_v5, %v1537_v46 }
 0x2e4   : > { %v1603_v53 = vmax.f32 %v1358_v42, %v1539_v61  ;;  %v1605_v6 = vmax.f32 %v1471_v23, %v1541_v11  ;;  %v16017_v25 = vcombine.low %v11986_v12, %v11991_v13  ;;  %v16018_v7 = vcombine.high %v12014_v32, %v12025_v31  ;;  %v1365_v42 = vpop.f32.mrb[41].mxu0  ;;  %v12346_v61 = vld [vmem:[%s15869_s6 + $0x760] sm:$0xff]  ;;  %v12351_v11 = vld [vmem:[%s15869_s6 + $0x748] sm:$0xff] }
 0x2e5   : > { %3363 = vmatpush1.bf16.msra.mxu0 %v16015_v54  ;;  %3588 = vmatprep.subr.bf16.mxu1 %v16016_v3  ;;  %v1600_v27 = vmax.f32 %v1356_v17, %v1536_v10  ;;  %v1602_v38 = vmax.f32 %v1469_v43, %v1538_v14  ;;  %v1604_v62 = vmax.f32 %v1360_v21, %v1540_v60  ;;  %v1476_v3 = vpop.f32.mrb[56].mxu1  ;;  %v12332_v17 = vld [vmem:[%s15869_s6 + $0x740] sm:$0xff]  ;;  %v1367_v21 = vpop.f32.mrb[42].mxu0 }
 0x2e6   : > { %3589 = vmatpush1.bf16.msra.mxu1 %v16017_v25  ;;  %3364 = vmatprep.subr.bf16.mxu0 %v16018_v7  ;;  %v1606_v54 = vmax.f32 %v1473_v19, %v1542_v8  ;;  %v16019_v37 = vcombine.high %v12030_v2, %v12035_v48  ;;  %v12323_v5 = vpack.c.bf16 %v1603_v53, %v1599_v44  ;;  %v1478_v23 = vpop.f32.mrb[57].mxu1  ;;  %v1369_v8 = vpop.f32.mrb[43].mxu0 }
 0x2e7   : > { %v12325_v46 = vpack.c.bf16 %v1605_v6, %v1601_v51  ;;  %v1364_v12 = vadd.f32 %v1363_v41, %v11822_v55  ;;  %v1477_v13 = vadd.f32 %v1476_v3, %v11825_v57  ;;  %v12334_v43 = vpack.c.bf16 %v1604_v62, %v1600_v27  ;;  %v1480_v19 = vpop.f32.mrb[58].mxu1  ;;  %v12356_v6 = vld [vmem:[%s15869_s6 + $0x768] sm:$0xff] }
 0x2e8   : > { %3590 = vmatprep.subr.bf16.mxu1 %v16019_v37  ;;  %16020 = vst [vmem:[#allocation9_spill] sm:$0xff] %v12323_v5  ;;  %v12336_v10 = vpack.c.bf16 %v1606_v54, %v1602_v38  ;;  %v1366_v53 = vadd.f32 %v1365_v42, %v11828_v58  ;;  %v1479_v14 = vadd.f32 %v1478_v23, %v11831_v59  ;;  %v1482_v37 = vpop.f32.mrb[59].mxu1 }
 0x2e9   : > { %v16021_v41 = vcombine.low %v12014_v32, %v12025_v31  ;;  %v1543_v25 = vmul.f32 0.01, %v1364_v12  ;;  %v1545_v32 = vmul.f32 0.01, %v1477_v13  ;;  %v1368_v31 = vadd.f32 %v1367_v21, %v11822_v55  ;;  %3315 = vmatprep.mubr.bf16.mxu0 %v12334_v43  ;;  %3541 = vmatprep.mubr.bf16.mxu1 %v12334_v43 }
 0x2ea   : > { %v1481_v44 = vadd.f32 %v1480_v19, %v11825_v57  ;;  %v16022_v60 = vcombine.low %v12030_v2, %v12035_v48  ;;  %v16023_v51 = vcombine.high %v12081_v22, %v12086_v34  ;;  %v1544_v7 = vmul.f32 0.01, %v1366_v53 }
 0x2eb   : > { %3365 = vmatpush1.bf16.msra.mxu0 %v16021_v41  ;;  %v1546_v27 = vmul.f32 0.01, %v1479_v14  ;;  %v1370_v38 = vadd.f32 %v1369_v8, %v11828_v58  ;;  %v1483_v62 = vadd.f32 %v1482_v37, %v11831_v59  ;;  %v1547_v54 = vmul.f32 0.01, %v1368_v31  ;;  %3542 = vmatmul.mubr.bf16.gmra.mrb[84].mxu1 %v12323_v5 }
 0x2ec   : > { %3591 = vmatpush1.bf16.msra.mxu1 %v16022_v60  ;;  %3366 = vmatprep.subr.bf16.mxu0 %v16023_v51  ;;  %v1549_v3 = vmul.f32 0.01, %v1481_v44  ;;  %v9351_v2 = vcombine.high %v12281_v39, %v12286_v4  ;;  %v1607_v42 = vmax.f32 %v1364_v12, %v1543_v25  ;;  %v16024_v21 = vcombine.low %v12081_v22, %v12086_v34 }
 0x2ed   : > { %3316 = vmatmul.mubr.bf16.gmra.mrb[68].mxu0 %v12323_v5  ;;  %v1548_v23 = vmul.f32 0.01, %v1370_v38  ;;  %v1550_v41 = vmul.f32 0.01, %v1483_v62  ;;  %v16025_v19 = vcombine.high %v12132_v50, %v12146_v40  ;;  %v1609_v8 = vmax.f32 %v1477_v13, %v1545_v32  ;;  %v1373_v5 = vpop.f32.mrb[44].mxu0 }
 0x2ee   : > { %v1611_v37 = vmax.f32 %v1368_v31, %v1547_v54  ;;  %v1613_v51 = vmax.f32 %v1481_v44, %v1549_v3  ;;  %v16026_v48 = vcombine.low %v12132_v50, %v12146_v40  ;;  %v16027_v12 = vcombine.high %v12151_v30, %v12156_v52  ;;  %v1375_v31 = vpop.f32.mrb[45].mxu0  ;;  %v12416_v3 = vld [vmem:[%s15869_s6 + $0x7a0] sm:$0xff] }
 0x2ef   : > { %3367 = vmatpush1.bf16.msra.mxu0 %v16024_v21  ;;  %3592 = vmatprep.subr.bf16.mxu1 %v16025_v19  ;;  %v1608_v22 = vmax.f32 %v1366_v53, %v1544_v7  ;;  %v1610_v34 = vmax.f32 %v1479_v14, %v1546_v27  ;;  %v1612_v25 = vmax.f32 %v1370_v38, %v1548_v23  ;;  %v1486_v19 = vpop.f32.mrb[60].mxu1 }
 0x2f0   : > { %3593 = vmatpush1.bf16.msra.mxu1 %v16026_v48  ;;  %3368 = vmatprep.subr.bf16.mxu0 %v16027_v12  ;;  %v1614_v21 = vmax.f32 %v1483_v62, %v1550_v41  ;;  %v16028_v60 = vcombine.high %v12211_v20, %v12216_v47  ;;  %v12393_v13 = vpack.c.bf16 %v1611_v37, %v1607_v42  ;;  %v1488_v44 = vpop.f32.mrb[61].mxu1  ;;  %v1377_v62 = vpop.f32.mrb[46].mxu0 }
 0x2f1   : > { %v12395_v32 = vpack.c.bf16 %v1613_v51, %v1609_v8  ;;  %v1374_v50 = vadd.f32 %v1373_v5, %v11822_v55  ;;  %v1487_v40 = vadd.f32 %v1486_v19, %v11825_v57  ;;  %v12399_v53 = vpack.c.bf16 %v1612_v25, %v1608_v22  ;;  %v1490_v54 = vpop.f32.mrb[62].mxu1  ;;  %v12411_v5 = vld [vmem:[%s15869_s6 + $0x780] sm:$0xff] }
 0x2f2   : > { %3594 = vmatprep.subr.bf16.mxu1 %v16028_v60  ;;  %v12401_v14 = vpack.c.bf16 %v1614_v21, %v1610_v34  ;;  %v1376_v7 = vadd.f32 %v1375_v31, %v11828_v58  ;;  %v1489_v27 = vadd.f32 %v1488_v44, %v11831_v59  ;;  %v16029_v38 = vcombine.low %v12151_v30, %v12156_v52  ;;  %v1379_v52 = vpop.f32.mrb[47].mxu0  ;;  %v1492_v60 = vpop.f32.mrb[63].mxu1 }
 0x2f3   : > { %v1551_v48 = vmul.f32 0.01, %v1374_v50  ;;  %v1553_v42 = vmul.f32 0.01, %v1487_v40  ;;  %v1378_v23 = vadd.f32 %v1377_v62, %v11822_v55  ;;  %v1491_v41 = vadd.f32 %v1490_v54, %v11825_v57  ;;  %3325 = vmatprep.mubr.bf16.mxu0 %v12399_v53  ;;  %3551 = vmatprep.mubr.bf16.mxu1 %v12399_v53 }
 0x2f4   : > { %3369 = vmatpush1.bf16.msra.mxu0 %v16029_v38  ;;  %v16030_v30 = vcombine.low %v12211_v20, %v12216_v47  ;;  %v16031_v8 = vcombine.high %v12262_v56, %v12276_v9  ;;  %v1552_v37 = vmul.f32 0.01, %v1376_v7  ;;  %v1554_v51 = vmul.f32 0.01, %v1489_v27  ;;  %3552 = vmatmul.mubr.bf16.gmra.mrb[88].mxu1 %v12393_v13 }
 0x2f5   : > { %v1380_v12 = vadd.f32 %v1379_v52, %v11828_v58  ;;  %v1493_v22 = vadd.f32 %v1492_v60, %v11831_v59  ;;  %v1555_v55 = vmul.f32 0.01, %v1378_v23  ;;  %v1557_v57 = vmul.f32 0.01, %v1491_v41  ;;  %3326 = vmatmul.mubr.bf16.gmra.mrb[72].mxu0 %v12393_v13  ;;  %v1658_v60 = vld [vmem:[%s15869_s6 + $0x18] sm:$0xff] }
 0x2f6   : > { %3595 = vmatpush1.bf16.msra.mxu1 %v16030_v30  ;;  %3370 = vmatprep.subr.bf16.mxu0 %v16031_v8  ;;  %v9356_v20 = vcombine.low %v12332_v17, %v12346_v61  ;;  %v9358_v47 = vcombine.low %v12351_v11, %v12356_v6  ;;  %v1615_v34 = vmax.f32 %v1374_v50, %v1551_v48  ;;  %v1907_v48 = vld [vmem:[%s15869_s6 + $0x7e0] sm:$0xff]  ;;  %v1662_v8 = vld [vmem:[%s15869_s6 + $0x38] sm:$0xff] }
 0x2f7   : > { %v1556_v58 = vmul.f32 0.01, %v1380_v12  ;;  %v1558_v25 = vmul.f32 0.01, %v1493_v22  ;;  %v16032_v59 = vcombine.low %v12262_v56, %v12276_v9  ;;  %3596 = vmatprep.subr.bf16.mxu1 %v9351_v2  ;;  %v9365_v21 = vcombine.high %v12411_v5, %v12416_v3  ;;  %v1896_v56 = vld [vmem:[%s15869_s6 + $0x788] sm:$0xff] }
 0x2f8   : > { %v1617_v19 = vmax.f32 %v1487_v40, %v1553_v42  ;;  %v1619_v31 = vmax.f32 %v1378_v23, %v1555_v55  ;;  %v1621_v44 = vmax.f32 %v1491_v41, %v1557_v57  ;;  %v16033_v38 = vcombine.low %v12281_v39, %v12286_v4  ;;  %v1900_v9 = vld [vmem:[%s15869_s6 + $0x7a8] sm:$0xff]  ;;  %v1665_v55 = vld [vmem:[%s15869_s6 + $0x50] sm:$0xff] }
 0x2f9   : > { %3371 = vmatpush1.bf16.msra.mxu0 %v16032_v59  ;;  %v16034_v50 = vcombine.high %v12332_v17, %v12346_v61  ;;  %v1616_v2 = vmax.f32 %v1376_v7, %v1552_v37  ;;  %v1618_v40 = vmax.f32 %v1489_v27, %v1554_v51  ;;  %v1620_v62 = vmax.f32 %v1380_v12, %v1556_v58  ;;  %v1903_v61 = vld [vmem:[%s15869_s6 + $0x7c0] sm:$0xff]  ;;  %v1904_v42 = vld [vmem:[%s15869_s6 + $0x7c8] sm:$0xff]  ;;  %v1669_v57 = vld [vmem:[%s15869_s6 + $0x70] sm:$0xff] }
 0x2fa   : > { %3597 = vmatpush1.bf16.msra.mxu1 %v16033_v38  ;;  %v1622_v54 = vmax.f32 %v1493_v22, %v1558_v25  ;;  %v16035_v39 = vcombine.high %v12351_v11, %v12356_v6  ;;  %v12456_v4 = vpack.c.bf16 %v1619_v31, %v1615_v34  ;;  %v12458_v17 = vpack.c.bf16 %v1621_v44, %v1617_v19  ;;  %v1908_v23 = vld [vmem:[%s15869_s6 + $0x7e8] sm:$0xff]  ;;  %v1670_v34 = vld [vmem:[%s15869_s6 + $0x78] sm:$0xff]  ;;  %v1673_v59 = vld [vmem:[%s15869_s6 + $0x90] sm:$0xff] }
 0x2fb   : > { %3372 = vmatprep.subr.bf16.mxu0 %v16034_v50  ;;  %v12466_v7 = vpack.c.bf16 %v1620_v62, %v1616_v2  ;;  %v9364_v11 = vcombine.low %v12411_v5, %v12416_v3  ;;  %v9367_v6 = vcombine.high %v1896_v56, %v1900_v9  ;;  %v9366_v41 = vcombine.low %v1896_v56, %v1900_v9  ;;  %v1657_v5 = vld [vmem:[%s15869_s6 + $0x10] sm:$0xff]  ;;  %v1674_v44 = vld [vmem:[%s15869_s6 + $0x98] sm:$0xff] }
 0x2fc   : > { %3598 = vmatprep.subr.bf16.mxu1 %v16035_v39  ;;  %v12468_v27 = vpack.c.bf16 %v1622_v54, %v1618_v40  ;;  %v9373_v30 = vcombine.high %v1903_v61, %v1907_v48  ;;  %v1661_v3 = vld [vmem:[%s15869_s6 + $0x30] sm:$0xff]  ;;  %v9375_v52 = vcombine.high %v1904_v42, %v1908_v23  ;;  %v9372_v37 = vcombine.low %v1903_v61, %v1907_v48  ;;  %v1678_v38 = vld [vmem:[%s15869_s6 + $0xb8] sm:$0xff] }
 0x2fd   : > { %3373 = vmatpush1.bf16.msra.mxu0 %v9356_v20  ;;  %3335 = vmatprep.mubr.bf16.mxu0 %v12466_v7  ;;  %v9374_v51 = vcombine.low %v1904_v42, %v1908_v23  ;;  %v9129_v12 = vcombine.high %v1657_v5, %v1661_v3  ;;  %v9131_v22 = vcombine.high %v1658_v60, %v1662_v8  ;;  %v1681_v2 = vld [vmem:[%s15869_s6 + $0xd0] sm:$0xff]  ;;  %v1682_v54 = vld [vmem:[%s15869_s6 + $0xd8] sm:$0xff] }
 0x2fe   : > { %3599 = vmatpush1.bf16.msra.mxu1 %v9358_v47  ;;  %3374 = vmatprep.subr.bf16.mxu0 %v9365_v21  ;;  %v9128_v20 = vcombine.low %v1657_v5, %v1661_v3  ;;  %v1666_v47 = vld [vmem:[%s15869_s6 + $0x58] sm:$0xff]  ;;  %v9130_v58 = vcombine.low %v1658_v60, %v1662_v8  ;;  %v9137_v25 = vcombine.high %v1665_v55, %v1669_v57  ;;  %v1677_v21 = vld [vmem:[%s15869_s6 + $0xb0] sm:$0xff] }
 0x2ff   : > { %3561 = vmatprep.mubr.bf16.mxu1 %v12466_v7  ;;  %3336 = vmatmul.mubr.bf16.gmra.mrb[76].mxu0 %v12456_v4  ;;  %v9139_v19 = vcombine.high %v1666_v47, %v1670_v34  ;;  %v9136_v31 = vcombine.low %v1665_v55, %v1669_v57  ;;  %v9145_v50 = vcombine.high %v1673_v59, %v1677_v21  ;;  %v1685_v40 = vld [vmem:[%s15869_s6 + $0xf0] sm:$0xff]  ;;  %v1686_v39 = vld [vmem:[%s15869_s6 + $0xf8] sm:$0xff] }
 0x300   : > { %3562 = vmatmul.mubr.bf16.gmra.mrb[92].mxu1 %v12456_v4  ;;  %3600 = vmatprep.subr.bf16.mxu1 %v9367_v6  ;;  %v9138_v56 = vcombine.low %v1666_v47, %v1670_v34  ;;  %v9147_v9 = vcombine.high %v1674_v44, %v1678_v38  ;;  %v9144_v62 = vcombine.low %v1673_v59, %v1677_v21  ;;  %v1693_v6 = vld [vmem:[%s15869_s6 + $0x130] sm:$0xff] }
 0x301   : > { %3375 = vmatpush1.bf16.msra.mxu0 %v9364_v11  ;;  %3378 = vmatprep.mubr.bf16.mxu0 %v12018_v36  ;;  %v9146_v61 = vcombine.low %v1674_v44, %v1678_v38  ;;  %v9153_v48 = vcombine.high %v1681_v2, %v1685_v40  ;;  %v1689_v11 = vld [vmem:[%s15869_s6 + $0x110] sm:$0xff]  ;;  %v9155_v42 = vcombine.high %v1682_v54, %v1686_v39 }
 0x302   : > { %3601 = vmatpush1.bf16.msra.mxu1 %v9366_v41  ;;  %3604 = vmatprep.mubr.bf16.mxu1 %v12018_v36  ;;  %v9152_v23 = vcombine.low %v1681_v2, %v1685_v40  ;;  %v1690_v41 = vld [vmem:[%s15869_s6 + $0x118] sm:$0xff]  ;;  %v9161_v5 = vcombine.high %v1689_v11, %v1693_v6  ;;  %v9154_v3 = vcombine.low %v1682_v54, %v1686_v39  ;;  %v1697_v60 = vld [vmem:[%s15869_s6 + $0x150] sm:$0xff] }
 0x303   : > { %3376 = vmatprep.subr.bf16.mxu0 %v9373_v30  ;;  %3602 = vmatprep.subr.bf16.mxu1 %v9375_v52  ;;  %v1694_v30 = vld [vmem:[%s15869_s6 + $0x138] sm:$0xff]  ;;  %v1701_v8 = vld [vmem:[%s15869_s6 + $0x170] sm:$0xff] }
 0x304   : > { %v9163_v52 = vcombine.high %v1690_v41, %v1694_v30  ;;  %v9169_v55 = vcombine.high %v1697_v60, %v1701_v8  ;;  %v1705_v57 = vld [vmem:[%s15869_s6 + $0x190] sm:$0xff]  ;;  %v9168_v34 = vcombine.low %v1697_v60, %v1701_v8 }
 0x305   : > { %3377 = vmatpush1.bf16.msra.mxu0 %v9372_v37  ;;  %v9160_v37 = vcombine.low %v1689_v11, %v1693_v6  ;;  %v1717_v44 = vld [vmem:[%s15869_s6 + $0x1f0] sm:$0xff] }
 0x306   : > { %3603 = vmatpush1.bf16.msra.mxu1 %v9374_v51  ;;  %3685 = vmatprep.subr.bf16.mxu0 %v9129_v12  ;;  %v1698_v51 = vld [vmem:[%s15869_s6 + $0x158] sm:$0xff]  ;;  %v1721_v40 = vld [vmem:[%s15869_s6 + $0x210] sm:$0xff] }
 0x307   : > { %3911 = vmatprep.subr.bf16.mxu1 %v9131_v22  ;;  %v1702_v12 = vld [vmem:[%s15869_s6 + $0x178] sm:$0xff]  ;;  %v9162_v22 = vcombine.low %v1690_v41, %v1694_v30  ;;  %v1733_v41 = vld [vmem:[%s15869_s6 + $0x270] sm:$0xff] }
 0x308   : > { %3379 = vmatmul.mubr.bf16.vlgmr.msra.gmra.mrb[48].mxu0 %v12007_v49  ;;  %v9171_v47 = vcombine.high %v1698_v51, %v1702_v12  ;;  %v9170_v21 = vcombine.low %v1698_v51, %v1702_v12  ;;  %v1737_v8 = vld [vmem:[%s15869_s6 + $0x290] sm:$0xff] }
 0x309   : > { %3605 = vmatmul.mubr.bf16.vlgmr.msra.gmra.mrb[64].mxu1 %v12007_v49  ;;  %3686 = vmatpush1.bf16.msra.mxu0 %v9128_v20  ;;  %v1709_v20 = vld [vmem:[%s15869_s6 + $0x1b0] sm:$0xff] }
 0x30a   : > { %3388 = vmatprep.mubr.bf16.mxu0 %v12071_v33  ;;  %3614 = vmatprep.mubr.bf16.mxu1 %v12071_v33  ;;  %v9177_v59 = vcombine.high %v1705_v57, %v1709_v20  ;;  %v9176_v38 = vcombine.low %v1705_v57, %v1709_v20 }
 0x30b   : > { %3912 = vmatpush1.bf16.msra.mxu1 %v9130_v58  ;;  %3687 = vmatprep.subr.bf16.mxu0 %v9137_v25  ;;  %v1706_v58 = vld [vmem:[%s15869_s6 + $0x198] sm:$0xff] }
 0x30c   : > { %3913 = vmatprep.subr.bf16.mxu1 %v9139_v19  ;;  %v1710_v25 = vld [vmem:[%s15869_s6 + $0x1b8] sm:$0xff] }
 0x30d   : > { %3688 = vmatpush1.bf16.msra.mxu0 %v9136_v31  ;;  %v9179_v19 = vcombine.high %v1706_v58, %v1710_v25  ;;  %v1713_v31 = vld [vmem:[%s15869_s6 + $0x1d0] sm:$0xff] }
 0x30e   : > { %3689 = vmatprep.subr.bf16.mxu0 %v9145_v50  ;;  %v1714_v50 = vld [vmem:[%s15869_s6 + $0x1d8] sm:$0xff]  ;;  %v9185_v2 = vcombine.high %v1713_v31, %v1717_v44  ;;  %v9184_v39 = vcombine.low %v1713_v31, %v1717_v44  ;;  %v1753_v44 = vld [vmem:[%s15869_s6 + $0x310] sm:$0xff] }
 0x30f   : > { %3914 = vmatpush1.bf16.msra.mxu1 %v9138_v56  ;;  %v1718_v56 = vld [vmem:[%s15869_s6 + $0x1f8] sm:$0xff] }
 0x310   : > { %3389 = vmatmul.mubr.bf16.gmra.mrb[52].mxu0 %v12065_v1  ;;  %3915 = vmatprep.subr.bf16.mxu1 %v9147_v9  ;;  %v9178_v9 = vcombine.low %v1706_v58, %v1710_v25  ;;  %v9187_v54 = vcombine.high %v1714_v50, %v1718_v56  ;;  %v9186_v6 = vcombine.low %v1714_v50, %v1718_v56  ;;  %v1749_v58 = vld [vmem:[%s15869_s6 + $0x2f0] sm:$0xff] }
 0x311   : > { %3615 = vmatmul.mubr.bf16.gmra.mrb[68].mxu1 %v12065_v1  ;;  %3690 = vmatpush1.bf16.msra.mxu0 %v9144_v62  ;;  %v1725_v62 = vld [vmem:[%s15869_s6 + $0x230] sm:$0xff] }
 0x312   : > { %3398 = vmatprep.mubr.bf16.mxu0 %v12136_v24  ;;  %3624 = vmatprep.mubr.bf16.mxu1 %v12136_v24  ;;  %v9193_v11 = vcombine.high %v1721_v40, %v1725_v62  ;;  %v9192_v30 = vcombine.low %v1721_v40, %v1725_v62 }
 0x313   : > { %3916 = vmatpush1.bf16.msra.mxu1 %v9146_v61  ;;  %3691 = vmatprep.subr.bf16.mxu0 %v9153_v48  ;;  %v1722_v61 = vld [vmem:[%s15869_s6 + $0x218] sm:$0xff] }
 0x314   : > { %3917 = vmatprep.subr.bf16.mxu1 %v9155_v42  ;;  %v1726_v48 = vld [vmem:[%s15869_s6 + $0x238] sm:$0xff] }
 0x315   : > { %3692 = vmatpush1.bf16.msra.mxu0 %v9152_v23  ;;  %v9195_v42 = vcombine.high %v1722_v61, %v1726_v48  ;;  %v1729_v23 = vld [vmem:[%s15869_s6 + $0x250] sm:$0xff] }
 0x316   : > { %3693 = vmatprep.subr.bf16.mxu0 %v9161_v5  ;;  %v1730_v5 = vld [vmem:[%s15869_s6 + $0x258] sm:$0xff]  ;;  %v9201_v60 = vcombine.high %v1729_v23, %v1733_v41  ;;  %v9200_v12 = vcombine.low %v1729_v23, %v1733_v41  ;;  %v1769_v41 = vld [vmem:[%s15869_s6 + $0x390] sm:$0xff] }
 0x317   : > { %3918 = vmatpush1.bf16.msra.mxu1 %v9154_v3  ;;  %v1734_v3 = vld [vmem:[%s15869_s6 + $0x278] sm:$0xff] }
 0x318   : > { %3399 = vmatmul.mubr.bf16.gmra.mrb[56].mxu0 %v12125_v18  ;;  %3919 = vmatprep.subr.bf16.mxu1 %v9163_v52  ;;  %v9194_v52 = vcombine.low %v1722_v61, %v1726_v48  ;;  %v9203_v51 = vcombine.high %v1730_v5, %v1734_v3  ;;  %v9202_v20 = vcombine.low %v1730_v5, %v1734_v3  ;;  %v1765_v61 = vld [vmem:[%s15869_s6 + $0x370] sm:$0xff] }
 0x319   : > { %3625 = vmatmul.mubr.bf16.gmra.mrb[72].mxu1 %v12125_v18  ;;  %3694 = vmatpush1.bf16.msra.mxu0 %v9160_v37  ;;  %v1741_v37 = vld [vmem:[%s15869_s6 + $0x2b0] sm:$0xff] }
 0x31a   : > { %3408 = vmatprep.mubr.bf16.mxu0 %v12201_v26  ;;  %3634 = vmatprep.mubr.bf16.mxu1 %v12201_v26  ;;  %v9209_v57 = vcombine.high %v1737_v8, %v1741_v37  ;;  %v9208_v25 = vcombine.low %v1737_v8, %v1741_v37 }
 0x31b   : > { %3920 = vmatpush1.bf16.msra.mxu1 %v9162_v22  ;;  %3695 = vmatprep.subr.bf16.mxu0 %v9169_v55  ;;  %v1738_v22 = vld [vmem:[%s15869_s6 + $0x298] sm:$0xff] }
 0x31c   : > { %3921 = vmatprep.subr.bf16.mxu1 %v9171_v47  ;;  %v1742_v55 = vld [vmem:[%s15869_s6 + $0x2b8] sm:$0xff] }
 0x31d   : > { %3696 = vmatpush1.bf16.msra.mxu0 %v9168_v34  ;;  %v9211_v47 = vcombine.high %v1738_v22, %v1742_v55  ;;  %v1745_v34 = vld [vmem:[%s15869_s6 + $0x2d0] sm:$0xff] }
 0x31e   : > { %3697 = vmatprep.subr.bf16.mxu0 %v9177_v59  ;;  %v1746_v59 = vld [vmem:[%s15869_s6 + $0x2d8] sm:$0xff]  ;;  %v9217_v31 = vcombine.high %v1745_v34, %v1749_v58  ;;  %v9216_v56 = vcombine.low %v1745_v34, %v1749_v58  ;;  %v1785_v58 = vld [vmem:[%s15869_s6 + $0x410] sm:$0xff] }
 0x31f   : > { %3922 = vmatpush1.bf16.msra.mxu1 %v9170_v21  ;;  %v1750_v21 = vld [vmem:[%s15869_s6 + $0x2f8] sm:$0xff] }
 0x320   : > { %3409 = vmatmul.mubr.bf16.gmra.mrb[60].mxu0 %v12195_v45  ;;  %3923 = vmatprep.subr.bf16.mxu1 %v9179_v19  ;;  %v9210_v19 = vcombine.low %v1738_v22, %v1742_v55  ;;  %v9219_v50 = vcombine.high %v1746_v59, %v1750_v21  ;;  %v9218_v62 = vcombine.low %v1746_v59, %v1750_v21  ;;  %v1781_v22 = vld [vmem:[%s15869_s6 + $0x3f0] sm:$0xff] }
 0x321   : > { %3635 = vmatmul.mubr.bf16.gmra.mrb[76].mxu1 %v12195_v45  ;;  %3698 = vmatpush1.bf16.msra.mxu0 %v9176_v38  ;;  %v1757_v38 = vld [vmem:[%s15869_s6 + $0x330] sm:$0xff] }
 0x322   : > { %3418 = vmatprep.mubr.bf16.mxu0 %v12266_v16  ;;  %3644 = vmatprep.mubr.bf16.mxu1 %v12266_v16  ;;  %v9225_v40 = vcombine.high %v1753_v44, %v1757_v38  ;;  %v9224_v48 = vcombine.low %v1753_v44, %v1757_v38 }
 0x323   : > { %3924 = vmatpush1.bf16.msra.mxu1 %v9178_v9  ;;  %3699 = vmatprep.subr.bf16.mxu0 %v9185_v2  ;;  %v1754_v9 = vld [vmem:[%s15869_s6 + $0x318] sm:$0xff] }
 0x324   : > { %3925 = vmatprep.subr.bf16.mxu1 %v9187_v54  ;;  %v1758_v2 = vld [vmem:[%s15869_s6 + $0x338] sm:$0xff] }
 0x325   : > { %3700 = vmatpush1.bf16.msra.mxu0 %v9184_v39  ;;  %v9227_v54 = vcombine.high %v1754_v9, %v1758_v2  ;;  %v1761_v39 = vld [vmem:[%s15869_s6 + $0x350] sm:$0xff] }
 0x326   : > { %3701 = vmatprep.subr.bf16.mxu0 %v9193_v11  ;;  %v1762_v11 = vld [vmem:[%s15869_s6 + $0x358] sm:$0xff]  ;;  %v9233_v23 = vcombine.high %v1761_v39, %v1765_v61  ;;  %v9232_v3 = vcombine.low %v1761_v39, %v1765_v61  ;;  %v1801_v39 = vld [vmem:[%s15869_s6 + $0x490] sm:$0xff] }
 0x327   : > { %3926 = vmatpush1.bf16.msra.mxu1 %v9186_v6  ;;  %v1766_v6 = vld [vmem:[%s15869_s6 + $0x378] sm:$0xff]  ;;  %v1805_v61 = vld [vmem:[%s15869_s6 + $0x4b0] sm:$0xff] }
 0x328   : > { %3419 = vmatmul.mubr.bf16.gmra.mrb[64].mxu0 %v12255_v28  ;;  %3927 = vmatprep.subr.bf16.mxu1 %v9195_v42  ;;  %v9226_v42 = vcombine.low %v1754_v9, %v1758_v2  ;;  %v9235_v5 = vcombine.high %v1762_v11, %v1766_v6  ;;  %v9234_v37 = vcombine.low %v1762_v11, %v1766_v6  ;;  %v1802_v6 = vld [vmem:[%s15869_s6 + $0x498] sm:$0xff] }
 0x329   : > { %3645 = vmatmul.mubr.bf16.gmra.mrb[80].mxu1 %v12255_v28  ;;  %3702 = vmatpush1.bf16.msra.mxu0 %v9192_v30  ;;  %v1773_v30 = vld [vmem:[%s15869_s6 + $0x3b0] sm:$0xff] }
 0x32a   : > { %3428 = vmatprep.mubr.bf16.mxu0 %v12336_v10  ;;  %3654 = vmatprep.mubr.bf16.mxu1 %v12336_v10  ;;  %v9241_v8 = vcombine.high %v1769_v41, %v1773_v30  ;;  %v9240_v55 = vcombine.low %v1769_v41, %v1773_v30  ;;  %v1809_v30 = vld [vmem:[%s15869_s6 + $0x4d0] sm:$0xff] }
 0x32b   : > { %3928 = vmatpush1.bf16.msra.mxu1 %v9194_v52  ;;  %3703 = vmatprep.subr.bf16.mxu0 %v9201_v60  ;;  %v1770_v52 = vld [vmem:[%s15869_s6 + $0x398] sm:$0xff] }
 0x32c   : > { %3929 = vmatprep.subr.bf16.mxu1 %v9203_v51  ;;  %v1774_v60 = vld [vmem:[%s15869_s6 + $0x3b8] sm:$0xff] }
 0x32d   : > { %3704 = vmatpush1.bf16.msra.mxu0 %v9200_v12  ;;  %v9243_v51 = vcombine.high %v1770_v52, %v1774_v60  ;;  %v1777_v12 = vld [vmem:[%s15869_s6 + $0x3d0] sm:$0xff] }
 0x32e   : > { %3705 = vmatprep.subr.bf16.mxu0 %v9209_v57  ;;  %v1778_v57 = vld [vmem:[%s15869_s6 + $0x3d8] sm:$0xff]  ;;  %v9249_v34 = vcombine.high %v1777_v12, %v1781_v22  ;;  %v9248_v21 = vcombine.low %v1777_v12, %v1781_v22 }
 0x32f   : > { %3930 = vmatpush1.bf16.msra.mxu1 %v9202_v20  ;;  %v1782_v20 = vld [vmem:[%s15869_s6 + $0x3f8] sm:$0xff] }
 0x330   : > { %3429 = vmatmul.mubr.bf16.gmra.mrb[68].mxu0 %v12325_v46  ;;  %3931 = vmatprep.subr.bf16.mxu1 %v9211_v47  ;;  %v9242_v47 = vcombine.low %v1770_v52, %v1774_v60  ;;  %v9251_v59 = vcombine.high %v1778_v57, %v1782_v20  ;;  %v9250_v38 = vcombine.low %v1778_v57, %v1782_v20  ;;  %v1822_v57 = vld [vmem:[%s15869_s6 + $0x538] sm:$0xff] }
 0x331   : > { %3655 = vmatmul.mubr.bf16.gmra.mrb[84].mxu1 %v12325_v46  ;;  %3706 = vmatpush1.bf16.msra.mxu0 %v9208_v25  ;;  %v1789_v25 = vld [vmem:[%s15869_s6 + $0x430] sm:$0xff]  ;;  %v9272_v52 = vcombine.low %v1801_v39, %v1805_v61 }
 0x332   : > { %3438 = vmatprep.mubr.bf16.mxu0 %v12401_v14  ;;  %3664 = vmatprep.mubr.bf16.mxu1 %v12401_v14  ;;  %v9257_v44 = vcombine.high %v1785_v58, %v1789_v25  ;;  %v9256_v2 = vcombine.low %v1785_v58, %v1789_v25  ;;  %v1829_v58 = vld [vmem:[%s15869_s6 + $0x570] sm:$0xff] }
 0x333   : > { %3932 = vmatpush1.bf16.msra.mxu1 %v9210_v19  ;;  %3707 = vmatprep.subr.bf16.mxu0 %v9217_v31  ;;  %v1786_v19 = vld [vmem:[%s15869_s6 + $0x418] sm:$0xff] }
 0x334   : > { %3933 = vmatprep.subr.bf16.mxu1 %v9219_v50  ;;  %v1790_v31 = vld [vmem:[%s15869_s6 + $0x438] sm:$0xff]  ;;  %v1793_v50 = vld [vmem:[%s15869_s6 + $0x450] sm:$0xff] }
 0x335   : > { %3708 = vmatpush1.bf16.msra.mxu0 %v9216_v56  ;;  %v1797_v56 = vld [vmem:[%s15869_s6 + $0x470] sm:$0xff]  ;;  %v9259_v9 = vcombine.high %v1786_v19, %v1790_v31 }
 0x336   : > { %3709 = vmatprep.subr.bf16.mxu0 %v9225_v40  ;;  %v1798_v40 = vld [vmem:[%s15869_s6 + $0x478] sm:$0xff]  ;;  %v9264_v11 = vcombine.low %v1793_v50, %v1797_v56 }
 0x337   : > { %3934 = vmatpush1.bf16.msra.mxu1 %v9218_v62  ;;  %v9265_v62 = vcombine.high %v1793_v50, %v1797_v56  ;;  %v16037_v56 = vld [vmem:[#allocation17_spill] sm:$0xff] }
 0x338   : > { %3439 = vmatmul.mubr.bf16.gmra.mrb[72].mxu0 %v12395_v32  ;;  %3935 = vmatprep.subr.bf16.mxu1 %v9227_v54  ;;  %v9258_v54 = vcombine.low %v1786_v19, %v1790_v31  ;;  %v1833_v31 = vld [vmem:[%s15869_s6 + $0x590] sm:$0xff] }
 0x339   : > { %3665 = vmatmul.mubr.bf16.gmra.mrb[88].mxu1 %v12395_v32  ;;  %3710 = vmatpush1.bf16.msra.mxu0 %v9224_v48 }
 0x33a   : > { %3448 = vmatprep.mubr.bf16.mxu0 %v12468_v27  ;;  %3674 = vmatprep.mubr.bf16.mxu1 %v12468_v27 }
 0x33b   : > { %3936 = vmatpush1.bf16.msra.mxu1 %v9226_v42  ;;  %3711 = vmatprep.subr.bf16.mxu0 %v9233_v23  ;;  %v1806_v42 = vld [vmem:[%s15869_s6 + $0x4b8] sm:$0xff]  ;;  %v9273_v23 = vcombine.high %v1801_v39, %v1805_v61  ;;  %v1845_v39 = vld [vmem:[%s15869_s6 + $0x5f0] sm:$0xff] }
 0x33c   : > { %3937 = vmatprep.subr.bf16.mxu1 %v9235_v5  ;;  %v1813_v5 = vld [vmem:[%s15869_s6 + $0x4f0] sm:$0xff] }
 0x33d   : > { %3712 = vmatpush1.bf16.msra.mxu0 %v9232_v3  ;;  %v9275_v3 = vcombine.high %v1802_v6, %v1806_v42  ;;  %v9281_v60 = vcombine.high %v1809_v30, %v1813_v5  ;;  %v9280_v22 = vcombine.low %v1809_v30, %v1813_v5  ;;  %v1853_v30 = vld [vmem:[%s15869_s6 + $0x630] sm:$0xff] }
 0x33e   : > { %3713 = vmatprep.subr.bf16.mxu0 %v9241_v8  ;;  %v9274_v8 = vcombine.low %v1802_v6, %v1806_v42  ;;  %v1846_v6 = vld [vmem:[%s15869_s6 + $0x5f8] sm:$0xff]  ;;  %v16038_v5 = vld [vmem:[#allocation16_spill] sm:$0xff] }
 0x33f   : > { %3938 = vmatpush1.bf16.msra.mxu1 %v9234_v37  ;;  %v1817_v37 = vld [vmem:[%s15869_s6 + $0x510] sm:$0xff] }
 0x340   : > { %3449 = vmatmul.mubr.bf16.gmra.mrb[76].mxu0 %v12458_v17  ;;  %3939 = vmatprep.subr.bf16.mxu1 %v9243_v51  ;;  %v1821_v51 = vld [vmem:[%s15869_s6 + $0x530] sm:$0xff] }
 0x341   : > { %3675 = vmatmul.mubr.bf16.gmra.mrb[92].mxu1 %v12458_v17  ;;  %3714 = vmatpush1.bf16.msra.mxu0 %v9240_v55  ;;  %v1818_v55 = vld [vmem:[%s15869_s6 + $0x518] sm:$0xff]  ;;  %v9289_v20 = vcombine.high %v1817_v37, %v1821_v51 }
 0x342   : > { %3717 = vmatprep.mubr.bf16.mxu0 %v12016_v0  ;;  %3943 = vmatprep.mubr.bf16.mxu1 %v12016_v0  ;;  %v1794_v0 = vld [vmem:[%s15869_s6 + $0x458] sm:$0xff]  ;;  %v9291_v25 = vcombine.high %v1818_v55, %v1822_v57  ;;  %v9290_v19 = vcombine.low %v1818_v55, %v1822_v57 }
 0x343   : > { %3940 = vmatpush1.bf16.msra.mxu1 %v9242_v47  ;;  %3715 = vmatprep.subr.bf16.mxu0 %v9249_v34  ;;  %v9267_v48 = vcombine.high %v1794_v0, %v1798_v40  ;;  %v9266_v41 = vcombine.low %v1794_v0, %v1798_v40  ;;  %v1825_v34 = vld [vmem:[%s15869_s6 + $0x550] sm:$0xff]  ;;  %v1838_v0 = vld [vmem:[%s15869_s6 + $0x5b8] sm:$0xff] }
 0x344   : > { %3941 = vmatprep.subr.bf16.mxu1 %v9251_v59  ;;  %v9288_v59 = vcombine.low %v1817_v37, %v1821_v51  ;;  %v1857_v51 = vld [vmem:[%s15869_s6 + $0x650] sm:$0xff]  ;;  %v1858_v57 = vld [vmem:[%s15869_s6 + $0x658] sm:$0xff] }
 0x345   : > { %3716 = vmatpush1.bf16.msra.mxu0 %v9248_v21  ;;  %v9297_v21 = vcombine.high %v1825_v34, %v1829_v58 }
 0x346   : > { %3798 = vmatprep.subr.bf16.mxu0 %v9257_v44  ;;  %v1837_v44 = vld [vmem:[%s15869_s6 + $0x5b0] sm:$0xff] }
 0x347   : > { %3942 = vmatpush1.bf16.msra.mxu1 %v9250_v38  ;;  %v16036_v38 = vld [vmem:[#allocation15_spill] sm:$0xff]  ;;  %v9305_v40 = vcombine.high %v1833_v31, %v1837_v44 }
 0x348   : > { %3718 = vmatmul.mubr.bf16.vlgmr.msra.gmra.mrb[80].mxu0 %v12005_v15  ;;  %4024 = vmatprep.subr.bf16.mxu1 %v9259_v9  ;;  %v9296_v9 = vcombine.low %v1825_v34, %v1829_v58  ;;  %v1865_v58 = vld [vmem:[%s15869_s6 + $0x690] sm:$0xff] }
 0x349   : > { %3799 = vmatpush1.bf16.msra.mxu0 %v9256_v2  ;;  %3727 = vmatprep.mubr.bf16.mxu0 %v12069_v29  ;;  %v1834_v2 = vld [vmem:[%s15869_s6 + $0x598] sm:$0xff] }
 0x34a   : > { %3944 = vmatmul.mubr.bf16.vlgmr.msra.gmra.mrb[96].mxu1 %v12005_v15  ;;  %3800 = vmatprep.subr.bf16.mxu0 %v9265_v62  ;;  %v1810_v15 = vld [vmem:[%s15869_s6 + $0x4d8] sm:$0xff]  ;;  %v9307_v61 = vcombine.high %v1834_v2, %v1838_v0 }
 0x34b   : > { %3953 = vmatprep.mubr.bf16.mxu1 %v12069_v29  ;;  %4025 = vmatpush1.bf16.msra.mxu1 %v9258_v54  ;;  %v1814_v29 = vld [vmem:[%s15869_s6 + $0x4f8] sm:$0xff]  ;;  %v1841_v54 = vld [vmem:[%s15869_s6 + $0x5d0] sm:$0xff] }
 0x34c   : > { %4026 = vmatprep.subr.bf16.mxu1 %v9267_v48  ;;  %v9283_v12 = vcombine.high %v1810_v15, %v1814_v29  ;;  %v9282_v47 = vcombine.low %v1810_v15, %v1814_v29  ;;  %v9304_v48 = vcombine.low %v1833_v31, %v1837_v44  ;;  %v9313_v42 = vcombine.high %v1841_v54, %v1845_v39  ;;  %v1850_v29 = vld [vmem:[%s15869_s6 + $0x618] sm:$0xff] }
 0x34d   : > { %3801 = vmatpush1.bf16.msra.mxu0 %v9264_v11  ;;  %v1842_v11 = vld [vmem:[%s15869_s6 + $0x5d8] sm:$0xff]  ;;  %v9312_v15 = vcombine.low %v1841_v54, %v1845_v39  ;;  %v1885_v54 = vld [vmem:[%s15869_s6 + $0x730] sm:$0xff] }
 0x34e   : > { %3802 = vmatprep.subr.bf16.mxu0 %v9273_v23  ;;  %v9306_v23 = vcombine.low %v1834_v2, %v1838_v0  ;;  %v9314_v37 = vcombine.low %v1842_v11, %v1846_v6  ;;  %v1874_v2 = vld [vmem:[%s15869_s6 + $0x6d8] sm:$0xff] }
 0x34f   : > { %4027 = vmatpush1.bf16.msra.mxu1 %v9266_v41  ;;  %v1849_v41 = vld [vmem:[%s15869_s6 + $0x610] sm:$0xff]  ;;  %v16041_v39 = vld [vmem:[#allocation9_spill] sm:$0xff] }
 0x350   : > { %3728 = vmatmul.mubr.bf16.gmra.mrb[84].mxu0 %v12063_v63  ;;  %4028 = vmatprep.subr.bf16.mxu1 %v9275_v3  ;;  %v9315_v3 = vcombine.high %v1842_v11, %v1846_v6  ;;  %v9320_v55 = vcombine.low %v1849_v41, %v1853_v30  ;;  %v1882_v11 = vld [vmem:[%s15869_s6 + $0x718] sm:$0xff] }
 0x351   : > { %3803 = vmatpush1.bf16.msra.mxu0 %v9272_v52  ;;  %3737 = vmatprep.mubr.bf16.mxu0 %v12134_v35  ;;  %v16039_v52 = vld [vmem:[#allocation8_spill] sm:$0xff]  ;;  %v1886_v6 = vld [vmem:[%s15869_s6 + $0x738] sm:$0xff] }
 0x352   : > { %3954 = vmatmul.mubr.bf16.gmra.mrb[100].mxu1 %v12063_v63  ;;  %3804 = vmatprep.subr.bf16.mxu0 %v9281_v60  ;;  %v1826_v63 = vld [vmem:[%s15869_s6 + $0x558] sm:$0xff] }
 0x353   : > { %3963 = vmatprep.mubr.bf16.mxu1 %v12134_v35  ;;  %4029 = vmatpush1.bf16.msra.mxu1 %v9274_v8  ;;  %v1830_v35 = vld [vmem:[%s15869_s6 + $0x578] sm:$0xff]  ;;  %v9321_v8 = vcombine.high %v1849_v41, %v1853_v30  ;;  %v1889_v41 = vld [vmem:[%s15869_s6 + $0x750] sm:$0xff] }
 0x354   : > { %4030 = vmatprep.subr.bf16.mxu1 %v9283_v12  ;;  %v9299_v50 = vcombine.high %v1826_v63, %v1830_v35  ;;  %v9298_v62 = vcombine.low %v1826_v63, %v1830_v35  ;;  %v1854_v60 = vld [vmem:[%s15869_s6 + $0x638] sm:$0xff]  ;;  %v1861_v12 = vld [vmem:[%s15869_s6 + $0x670] sm:$0xff] }
 0x355   : > { %3805 = vmatpush1.bf16.msra.mxu0 %v9280_v22  ;;  %v9323_v22 = vcombine.high %v1850_v29, %v1854_v60  ;;  %v9322_v34 = vcombine.low %v1850_v29, %v1854_v60  ;;  %v9328_v35 = vcombine.low %v1857_v51, %v1861_v12  ;;  %v1893_v30 = vld [vmem:[%s15869_s6 + $0x770] sm:$0xff]  ;;  %v9354_v29 = vcombine.low %v1882_v11, %v1886_v6 }
 0x356   : > { %3806 = vmatprep.subr.bf16.mxu0 %v9289_v20  ;;  %v1862_v20 = vld [vmem:[%s15869_s6 + $0x678] sm:$0xff]  ;;  %v1897_v60 = vld [vmem:[%s15869_s6 + $0x790] sm:$0xff] }
 0x357   : > { %4031 = vmatpush1.bf16.msra.mxu1 %v9282_v47  ;;  %v9329_v47 = vcombine.high %v1857_v51, %v1861_v12  ;;  %v9331_v63 = vcombine.high %v1858_v57, %v1862_v20  ;;  %v9330_v44 = vcombine.low %v1858_v57, %v1862_v20  ;;  %v9360_v51 = vcombine.low %v1889_v41, %v1893_v30  ;;  %v1898_v12 = vld [vmem:[%s15869_s6 + $0x798] sm:$0xff]  ;;  %v1905_v20 = vld [vmem:[%s15869_s6 + $0x7d0] sm:$0xff] }
 0x358   : > { %3738 = vmatmul.mubr.bf16.gmra.mrb[88].mxu0 %v16036_v38  ;;  %4032 = vmatprep.subr.bf16.mxu1 %v9291_v25  ;;  %v1869_v25 = vld [vmem:[%s15869_s6 + $0x6b0] sm:$0xff] }
 0x359   : > { %3807 = vmatpush1.bf16.msra.mxu0 %v9288_v59  ;;  %3747 = vmatprep.mubr.bf16.mxu0 %v16037_v56  ;;  %v16040_v59 = vld [vmem:[#allocation7_spill] sm:$0xff]  ;;  %v9337_v31 = vcombine.high %v1865_v58, %v1869_v25 }
 0x35a   : > { %3964 = vmatmul.mubr.bf16.gmra.mrb[104].mxu1 %v16036_v38  ;;  %3808 = vmatprep.subr.bf16.mxu0 %v9297_v21  ;;  %v1866_v21 = vld [vmem:[%s15869_s6 + $0x698] sm:$0xff]  ;;  %v1873_v38 = vld [vmem:[%s15869_s6 + $0x6d0] sm:$0xff] }
 0x35b   : > { %3973 = vmatprep.mubr.bf16.mxu1 %v16037_v56  ;;  %4033 = vmatpush1.bf16.msra.mxu1 %v9290_v19  ;;  %v1870_v19 = vld [vmem:[%s15869_s6 + $0x6b8] sm:$0xff] }
 0x35c   : > { %4034 = vmatprep.subr.bf16.mxu1 %v9299_v50  ;;  %v1877_v50 = vld [vmem:[%s15869_s6 + $0x6f0] sm:$0xff]  ;;  %v9339_v56 = vcombine.high %v1866_v21, %v1870_v19 }
 0x35d   : > { %3809 = vmatpush1.bf16.msra.mxu0 %v9296_v9  ;;  %v9336_v9 = vcombine.low %v1865_v58, %v1869_v25  ;;  %v9345_v0 = vcombine.high %v1873_v38, %v1877_v50 }
 0x35e   : > { %3810 = vmatprep.subr.bf16.mxu0 %v9305_v40  ;;  %v9338_v40 = vcombine.low %v1866_v21, %v1870_v19  ;;  %v10606_v21 = vld [vmem:[%s15868_s5 + $0x204] ss:$16 sps:$4 sm:$0xff]  }
 0x35f   : > { %4035 = vmatpush1.bf16.msra.mxu1 %v9298_v62  ;;  %v1881_v62 = vld [vmem:[%s15869_s6 + $0x710] sm:$0xff] }
 0x360   : > { %3748 = vmatmul.mubr.bf16.gmra.mrb[92].mxu0 %v16038_v5  ;;  %4036 = vmatprep.subr.bf16.mxu1 %v9307_v61 }
 0x361   : > { %3811 = vmatpush1.bf16.msra.mxu0 %v9304_v48  ;;  %3757 = vmatprep.mubr.bf16.mxu0 %v16039_v52  ;;  %v9344_v48 = vcombine.low %v1873_v38, %v1877_v50  ;;  %v10615_v38 = vld [vmem:[%s15868_s5 + $0x22c] ss:$16 sps:$4 sm:$0xff]   ;;  %v10610_v50 = vld [vmem:[%s15868_s5 + $0x220] ss:$16 sps:$4 sm:$0xff]  }
 0x362   : > { %3974 = vmatmul.mubr.bf16.gmra.mrb[108].mxu1 %v16038_v5  ;;  %3812 = vmatprep.subr.bf16.mxu0 %v9313_v42  ;;  %v9353_v42 = vcombine.high %v1881_v62, %v1885_v54  ;;  %v9355_v5 = vcombine.high %v1882_v11, %v1886_v6  ;;  %v10634_v11 = vld [vmem:[%s15868_s5 + $0x2a0] ss:$16 sps:$4 sm:$0xff]   ;;  %v10642_v6 = vld [vmem:[%s15868_s5 + $0x2c4] ss:$16 sps:$4 sm:$0xff]  }
 0x363   : > { %3983 = vmatprep.mubr.bf16.mxu1 %v16039_v52  ;;  %4037 = vmatpush1.bf16.msra.mxu1 %v9306_v23  ;;  %v1890_v52 = vld [vmem:[%s15869_s6 + $0x758] sm:$0xff] }
 0x364   : > { %4038 = vmatprep.subr.bf16.mxu1 %v9315_v3  ;;  %v9352_v3 = vcombine.low %v1881_v62, %v1885_v54  ;;  %v10630_v62 = vld [vmem:[%s15868_s5 + $0x284] ss:$16 sps:$4 sm:$0xff]   ;;  %v10625_v54 = vld [vmem:[%s15868_s5 + $0x268] ss:$16 sps:$4 sm:$0xff]  }
 0x365   : > { %3813 = vmatpush1.bf16.msra.mxu0 %v9312_v15  ;;  %v9361_v15 = vcombine.high %v1889_v41, %v1893_v30  ;;  %v10643_v41 = vld [vmem:[%s15868_s5 + $0x2c8] ss:$16 sps:$4 sm:$0xff]   ;;  %v10651_v30 = vld [vmem:[%s15868_s5 + $0x2ec] ss:$16 sps:$4 sm:$0xff]  }
 0x366   : > { %3814 = vmatprep.subr.bf16.mxu0 %v9321_v8  ;;  %v1901_v8 = vld [vmem:[%s15869_s6 + $0x7b0] sm:$0xff] }
 0x367   : > { %4039 = vmatpush1.bf16.msra.mxu1 %v9314_v37  ;;  %v9368_v58 = vcombine.low %v1897_v60, %v1901_v8 }
 0x368   : > { %3758 = vmatmul.mubr.bf16.gmra.mrb[96].mxu0 %v16040_v59  ;;  %4040 = vmatprep.subr.bf16.mxu1 %v9323_v22  ;;  %v1902_v22 = vld [vmem:[%s15869_s6 + $0x7b8] sm:$0xff] }
 0x369   : > { %3815 = vmatpush1.bf16.msra.mxu0 %v9320_v55  ;;  %3767 = vmatprep.mubr.bf16.mxu0 %v12334_v43  ;;  %v9369_v55 = vcombine.high %v1897_v60, %v1901_v8  ;;  %v10658_v60 = vld [vmem:[%s15868_s5 + $0x320] ss:$16 sps:$4 sm:$0xff]   ;;  %v10666_v8 = vld [vmem:[%s15868_s5 + $0x344] ss:$16 sps:$4 sm:$0xff]  }
 0x36a   : > { %3984 = vmatmul.mubr.bf16.gmra.mrb[112].mxu1 %v16040_v59  ;;  %3816 = vmatprep.subr.bf16.mxu0 %v9329_v47  ;;  %v1909_v47 = vld [vmem:[%s15869_s6 + $0x7f0] sm:$0xff]  ;;  %v9370_v59 = vcombine.low %v1898_v12, %v1902_v22 }
 0x36b   : > { %3993 = vmatprep.mubr.bf16.mxu1 %v12334_v43  ;;  %4041 = vmatpush1.bf16.msra.mxu1 %v9322_v34  ;;  %v1878_v43 = vld [vmem:[%s15869_s6 + $0x6f8] sm:$0xff]  ;;  %v9371_v34 = vcombine.high %v1898_v12, %v1902_v22  ;;  %v9377_v25 = vcombine.high %v1905_v20, %v1909_v47 }
 0x36c   : > { %4042 = vmatprep.subr.bf16.mxu1 %v9331_v63  ;;  %v9347_v61 = vcombine.high %v1874_v2, %v1878_v43  ;;  %v9346_v23 = vcombine.low %v1874_v2, %v1878_v43  ;;  %v10621_v2 = vld [vmem:[%s15868_s5 + $0x24c] ss:$16 sps:$4 sm:$0xff]   ;;  %v10619_v43 = vld [vmem:[%s15868_s5 + $0x248] ss:$16 sps:$4 sm:$0xff]  }
 0x36d   : > { %3817 = vmatpush1.bf16.msra.mxu0 %v9328_v35  ;;  %v9376_v35 = vcombine.low %v1905_v20, %v1909_v47  ;;  %v10667_v12 = vld [vmem:[%s15868_s5 + $0x348] ss:$16 sps:$4 sm:$0xff]   ;;  %v10675_v22 = vld [vmem:[%s15868_s5 + $0x36c] ss:$16 sps:$4 sm:$0xff]  }
 0x36e   : > { %3818 = vmatprep.subr.bf16.mxu0 %v9337_v31  ;;  %v10609_v31 = vld [vmem:[%s15868_s5 + $0x20c] ss:$16 sps:$4 sm:$0xff]   ;;  %v10673_v20 = vld [vmem:[%s15868_s5 + $0x368] ss:$16 sps:$4 sm:$0xff]  }
 0x36f   : > { %4043 = vmatpush1.bf16.msra.mxu1 %v9330_v44  ;;  %v10604_v44 = vld [vmem:[%s15868_s5 + $0x200] ss:$16 sps:$4 sm:$0xff]   ;;  %v10681_v47 = vld [vmem:[%s15868_s5 + $0x38c] ss:$16 sps:$4 sm:$0xff]  }
 0x370   : > { %3768 = vmatmul.mubr.bf16.gmra.mrb[100].mxu0 %v16041_v39  ;;  %4044 = vmatprep.subr.bf16.mxu1 %v9339_v56  ;;  %v10618_v56 = vld [vmem:[%s15868_s5 + $0x244] ss:$16 sps:$4 sm:$0xff]  }
 0x371   : > { %3819 = vmatpush1.bf16.msra.mxu0 %v9336_v9  ;;  %3777 = vmatprep.mubr.bf16.mxu0 %v12399_v53  ;;  %v10613_v9 = vld [vmem:[%s15868_s5 + $0x228] ss:$16 sps:$4 sm:$0xff]  }
 0x372   : > { %3994 = vmatmul.mubr.bf16.gmra.mrb[116].mxu1 %v16041_v39  ;;  %3820 = vmatprep.subr.bf16.mxu0 %v9345_v0  ;;  %v10627_v0 = vld [vmem:[%s15868_s5 + $0x26c] ss:$16 sps:$4 sm:$0xff]  }
 0x373   : > { %4003 = vmatprep.mubr.bf16.mxu1 %v12399_v53  ;;  %4045 = vmatpush1.bf16.msra.mxu1 %v9338_v40  ;;  %v1894_v53 = vld [vmem:[%s15869_s6 + $0x778] sm:$0xff]  ;;  %v10622_v40 = vld [vmem:[%s15868_s5 + $0x260] ss:$16 sps:$4 sm:$0xff]  }
 0x374   : > { %4046 = vmatprep.subr.bf16.mxu1 %v9347_v61  ;;  %v9363_v37 = vcombine.high %v1890_v52, %v1894_v53  ;;  %v9362_v57 = vcombine.low %v1890_v52, %v1894_v53  ;;  %v10633_v39 = vld [vmem:[%s15868_s5 + $0x28c] ss:$16 sps:$4 sm:$0xff]   ;;  %v10631_v61 = vld [vmem:[%s15868_s5 + $0x288] ss:$16 sps:$4 sm:$0xff]  }
 0x375   : > { %3821 = vmatpush1.bf16.msra.mxu0 %v9344_v48  ;;  %v10639_v48 = vld [vmem:[%s15868_s5 + $0x2ac] ss:$16 sps:$4 sm:$0xff]   ;;  %v10649_v52 = vld [vmem:[%s15868_s5 + $0x2e8] ss:$16 sps:$4 sm:$0xff]  }
 0x376   : > { %3822 = vmatprep.subr.bf16.mxu0 %v9353_v42  ;;  %v10637_v42 = vld [vmem:[%s15868_s5 + $0x2a8] ss:$16 sps:$4 sm:$0xff]   ;;  %v10657_v53 = vld [vmem:[%s15868_s5 + $0x30c] ss:$16 sps:$4 sm:$0xff]  }
 0x377   : > { %4047 = vmatpush1.bf16.msra.mxu1 %v9346_v23  ;;  %v10645_v23 = vld [vmem:[%s15868_s5 + $0x2cc] ss:$16 sps:$4 sm:$0xff]  }
 0x378   : > { %3778 = vmatmul.mubr.bf16.gmra.mrb[104].mxu0 %v12393_v13  ;;  %4048 = vmatprep.subr.bf16.mxu1 %v9355_v5  ;;  %v10646_v5 = vld [vmem:[%s15868_s5 + $0x2e0] ss:$16 sps:$4 sm:$0xff]  }
 0x379   : > { %3823 = vmatpush1.bf16.msra.mxu0 %v9352_v3  ;;  %3787 = vmatprep.mubr.bf16.mxu0 %v12466_v7  ;;  %v10654_v3 = vld [vmem:[%s15868_s5 + $0x304] ss:$16 sps:$4 sm:$0xff]  }
 0x37a   : > { %4004 = vmatmul.mubr.bf16.gmra.mrb[120].mxu1 %v12393_v13  ;;  %3824 = vmatprep.subr.bf16.mxu0 %v9361_v15  ;;  %v1906_v13 = vld [vmem:[%s15869_s6 + $0x7d8] sm:$0xff] }
 0x37b   : > { %4013 = vmatprep.mubr.bf16.mxu1 %v12466_v7  ;;  %4049 = vmatpush1.bf16.msra.mxu1 %v9354_v29  ;;  %v1910_v7 = vld [vmem:[%s15869_s6 + $0x7f8] sm:$0xff] }
 0x37c   : > { %4050 = vmatprep.subr.bf16.mxu1 %v9363_v37  ;;  %v9379_v63 = vcombine.high %v1906_v13, %v1910_v7  ;;  %v9378_v19 = vcombine.low %v1906_v13, %v1910_v7  ;;  %v10655_v15 = vld [vmem:[%s15868_s5 + $0x308] ss:$16 sps:$4 sm:$0xff]   ;;  %v10663_v29 = vld [vmem:[%s15868_s5 + $0x32c] ss:$16 sps:$4 sm:$0xff]   ;;  %v10682_v13 = vld [vmem:[%s15868_s5 + $0x3a0] ss:$16 sps:$4 sm:$0xff]  }
 0x37d   : > { %3825 = vmatpush1.bf16.msra.mxu0 %v9360_v51  ;;  %v10661_v37 = vld [vmem:[%s15868_s5 + $0x328] ss:$16 sps:$4 sm:$0xff]   ;;  %v10669_v51 = vld [vmem:[%s15868_s5 + $0x34c] ss:$16 sps:$4 sm:$0xff]   ;;  %v10690_v7 = vld [vmem:[%s15868_s5 + $0x3c4] ss:$16 sps:$4 sm:$0xff]  }
 0x37e   : > { %3826 = vmatprep.subr.bf16.mxu0 %v9369_v55  ;;  %v10670_v55 = vld [vmem:[%s15868_s5 + $0x360] ss:$16 sps:$4 sm:$0xff]  }
 0x37f   : > { %4051 = vmatpush1.bf16.msra.mxu1 %v9362_v57  ;;  %v10678_v57 = vld [vmem:[%s15868_s5 + $0x384] ss:$16 sps:$4 sm:$0xff]  }
 0x380   : > { %3788 = vmatmul.mubr.bf16.gmra.mrb[108].mxu0 %v12456_v4  ;;  %4052 = vmatprep.subr.bf16.mxu1 %v9371_v34  ;;  %v10679_v34 = vld [vmem:[%s15868_s5 + $0x388] ss:$16 sps:$4 sm:$0xff]  }
 0x381   : > { %3827 = vmatpush1.bf16.msra.mxu0 %v9368_v58  ;;  %3830 = vmatprep.mubr.bf16.mxu0 %v12018_v36  ;;  %v10687_v58 = vld [vmem:[%s15868_s5 + $0x3ac] ss:$16 sps:$4 sm:$0xff]  }
 0x382   : > { %4014 = vmatmul.mubr.bf16.gmra.mrb[124].mxu1 %v12456_v4  ;;  %3828 = vmatprep.subr.bf16.mxu0 %v9377_v25  ;;  %v10612_v4 = vld [vmem:[%s15868_s5 + $0x224] ss:$16 sps:$4 sm:$0xff]   ;;  %v10685_v25 = vld [vmem:[%s15868_s5 + $0x3a8] ss:$16 sps:$4 sm:$0xff]  }
 0x383   : > { %4053 = vmatpush1.bf16.msra.mxu1 %v9370_v59  ;;  %4056 = vmatprep.mubr.bf16.mxu1 %v12018_v36  ;;  %v10607_v36 = vld [vmem:[%s15868_s5 + $0x208] ss:$16 sps:$4 sm:$0xff]   ;;  %v10693_v59 = vld [vmem:[%s15868_s5 + $0x3cc] ss:$16 sps:$4 sm:$0xff]  }
 0x384   : > { %4054 = vmatprep.subr.bf16.mxu1 %v9379_v63  ;;  %v10691_v63 = vld [vmem:[%s15868_s5 + $0x3c8] ss:$16 sps:$4 sm:$0xff]  }
 0x385   : > { %3829 = vmatpush1.bf16.msra.mxu0 %v9376_v35  ;;  %v10699_v35 = vld [vmem:[%s15868_s5 + $0x3ec] ss:$16 sps:$4 sm:$0xff]  }
 0x386   : > { %6015 = vmatprep.subr.bf16.mxu0 %v10606_v21  ;;  %v10694_v21 = vld [vmem:[%s15868_s5 + $0x3e0] ss:$16 sps:$4 sm:$0xff]  }
 0x387   : > { %4055 = vmatpush1.bf16.msra.mxu1 %v9378_v19  ;;  %v10702_v19 = vld [vmem:[%s15868_s5 + $0x404] ss:$16 sps:$4 sm:$0xff]  }
 0x388   : > { %3831 = vmatmul.mubr.bf16.vlgmr.msra.gmra.mrb[80].mxu0 %v12007_v49  ;;  %6467 = vmatprep.subr.bf16.mxu1 %v10609_v31  ;;  %v10697_v31 = vld [vmem:[%s15868_s5 + $0x3e8] ss:$16 sps:$4 sm:$0xff]  }
 0x389   : > { %3840 = vmatprep.mubr.bf16.mxu0 %v12071_v33  ;;  %6016 = vmatpush1.bf16.msra.mxu0 %v10604_v44  ;;  %v10705_v44 = vld [vmem:[%s15868_s5 + $0x40c] ss:$16 sps:$4 sm:$0xff]  }
 0x38a   : > { %4057 = vmatmul.mubr.bf16.vlgmr.msra.gmra.mrb[96].mxu1 %v12007_v49  ;;  %6017 = vmatprep.subr.bf16.mxu0 %v10612_v4  ;;  %v10616_v49 = vld [vmem:[%s15868_s5 + $0x240] ss:$16 sps:$4 sm:$0xff]   ;;  %v16042_v4 = vld [vmem:[#allocation3_spill] sm:$0xff] }
 0x38b   : > { %4066 = vmatprep.mubr.bf16.mxu1 %v12071_v33  ;;  %6468 = vmatpush1.bf16.msra.mxu1 %v10607_v36  ;;  %v10624_v33 = vld [vmem:[%s15868_s5 + $0x264] ss:$16 sps:$4 sm:$0xff]  }
 0x38c   : > { %6469 = vmatprep.subr.bf16.mxu1 %v10615_v38  ;;  %v16043_v38 = vld [vmem:[#allocation5_spill] sm:$0xff] }
 0x38d   : > { %6018 = vmatpush1.bf16.msra.mxu0 %v10610_v50 }
 0x38e   : > { %6019 = vmatprep.subr.bf16.mxu0 %v10618_v56  ;;  %v16044_v56 = vld [vmem:[#allocation4_spill] sm:$0xff] }
 0x38f   : > { %6470 = vmatpush1.bf16.msra.mxu1 %v10613_v9 }
 0x390   : > { %3841 = vmatmul.mubr.bf16.gmra.mrb[84].mxu0 %v12065_v1  ;;  %6471 = vmatprep.subr.bf16.mxu1 %v10621_v2  ;;  %v16045_v2 = vld [vmem:[#allocation6_spill] sm:$0xff] }
 0x391   : > { %3850 = vmatprep.mubr.bf16.mxu0 %v12136_v24  ;;  %6020 = vmatpush1.bf16.msra.mxu0 %v10616_v49 }
 0x392   : > { %4067 = vmatmul.mubr.bf16.gmra.mrb[100].mxu1 %v12065_v1  ;;  %6021 = vmatprep.subr.bf16.mxu0 %v10624_v33  ;;  %v10628_v1 = vld [vmem:[%s15868_s5 + $0x280] ss:$16 sps:$4 sm:$0xff]  }
 0x393   : > { %4076 = vmatprep.mubr.bf16.mxu1 %v12136_v24  ;;  %6472 = vmatpush1.bf16.msra.mxu1 %v10619_v43  ;;  %v10636_v24 = vld [vmem:[%s15868_s5 + $0x2a4] ss:$16 sps:$4 sm:$0xff]  }
 0x394   : > { %6473 = vmatprep.subr.bf16.mxu1 %v10627_v0 }
 0x395   : > { %6022 = vmatpush1.bf16.msra.mxu0 %v10622_v40 }
 0x396   : > { %6023 = vmatprep.subr.bf16.mxu0 %v10630_v62 }
 0x397   : > { %6474 = vmatpush1.bf16.msra.mxu1 %v10625_v54 }
 0x398   : > { %3851 = vmatmul.mubr.bf16.gmra.mrb[88].mxu0 %v12125_v18  ;;  %6475 = vmatprep.subr.bf16.mxu1 %v10633_v39 }
 0x399   : > { %3860 = vmatprep.mubr.bf16.mxu0 %v12201_v26  ;;  %6024 = vmatpush1.bf16.msra.mxu0 %v10628_v1 }
 0x39a   : > { %4077 = vmatmul.mubr.bf16.gmra.mrb[104].mxu1 %v12125_v18  ;;  %6025 = vmatprep.subr.bf16.mxu0 %v10636_v24  ;;  %v10640_v18 = vld [vmem:[%s15868_s5 + $0x2c0] ss:$16 sps:$4 sm:$0xff]  }
 0x39b   : > { %4086 = vmatprep.mubr.bf16.mxu1 %v12201_v26  ;;  %6476 = vmatpush1.bf16.msra.mxu1 %v10631_v61  ;;  %v10648_v26 = vld [vmem:[%s15868_s5 + $0x2e4] ss:$16 sps:$4 sm:$0xff]  }
 0x39c   : > { %6477 = vmatprep.subr.bf16.mxu1 %v10639_v48 }
 0x39d   : > { %6026 = vmatpush1.bf16.msra.mxu0 %v10634_v11 }
 0x39e   : > { %6027 = vmatprep.subr.bf16.mxu0 %v10642_v6 }
 0x39f   : > { %6478 = vmatpush1.bf16.msra.mxu1 %v10637_v42 }
 0x3a0   : > { %3861 = vmatmul.mubr.bf16.gmra.mrb[92].mxu0 %v12195_v45  ;;  %6479 = vmatprep.subr.bf16.mxu1 %v10645_v23 }
 0x3a1   : > { %3870 = vmatprep.mubr.bf16.mxu0 %v12266_v16  ;;  %6028 = vmatpush1.bf16.msra.mxu0 %v10640_v18 }
 0x3a2   : > { %4087 = vmatmul.mubr.bf16.gmra.mrb[108].mxu1 %v12195_v45  ;;  %6029 = vmatprep.subr.bf16.mxu0 %v10648_v26  ;;  %v10652_v45 = vld [vmem:[%s15868_s5 + $0x300] ss:$16 sps:$4 sm:$0xff]  }
 0x3a3   : > { %4096 = vmatprep.mubr.bf16.mxu1 %v12266_v16  ;;  %6480 = vmatpush1.bf16.msra.mxu1 %v10643_v41  ;;  %v10660_v16 = vld [vmem:[%s15868_s5 + $0x324] ss:$16 sps:$4 sm:$0xff]  }
 0x3a4   : > { %6481 = vmatprep.subr.bf16.mxu1 %v10651_v30 }
 0x3a5   : > { %6030 = vmatpush1.bf16.msra.mxu0 %v10646_v5 }
 0x3a6   : > { %6031 = vmatprep.subr.bf16.mxu0 %v10654_v3 }
 0x3a7   : > { %6482 = vmatpush1.bf16.msra.mxu1 %v10649_v52 }
 0x3a8   : > { %3871 = vmatmul.mubr.bf16.gmra.mrb[96].mxu0 %v12255_v28  ;;  %6483 = vmatprep.subr.bf16.mxu1 %v10657_v53 }
 0x3a9   : > { %3880 = vmatprep.mubr.bf16.mxu0 %v12336_v10  ;;  %6032 = vmatpush1.bf16.msra.mxu0 %v10652_v45 }
 0x3aa   : > { %4097 = vmatmul.mubr.bf16.gmra.mrb[112].mxu1 %v12255_v28  ;;  %6033 = vmatprep.subr.bf16.mxu0 %v10660_v16  ;;  %v10664_v28 = vld [vmem:[%s15868_s5 + $0x340] ss:$16 sps:$4 sm:$0xff]  }
 0x3ab   : > { %4106 = vmatprep.mubr.bf16.mxu1 %v12336_v10  ;;  %6484 = vmatpush1.bf16.msra.mxu1 %v10655_v15  ;;  %v10672_v10 = vld [vmem:[%s15868_s5 + $0x364] ss:$16 sps:$4 sm:$0xff]  }
 0x3ac   : > { %6485 = vmatprep.subr.bf16.mxu1 %v10663_v29 }
 0x3ad   : > { %6034 = vmatpush1.bf16.msra.mxu0 %v10658_v60 }
 0x3ae   : > { %6035 = vmatprep.subr.bf16.mxu0 %v10666_v8 }
 0x3af   : > { %6486 = vmatpush1.bf16.msra.mxu1 %v10661_v37 }
 0x3b0   : > { %3881 = vmatmul.mubr.bf16.gmra.mrb[100].mxu0 %v12325_v46  ;;  %6487 = vmatprep.subr.bf16.mxu1 %v10669_v51 }
 0x3b1   : > { %3890 = vmatprep.mubr.bf16.mxu0 %v12401_v14  ;;  %6036 = vmatpush1.bf16.msra.mxu0 %v10664_v28 }
 0x3b2   : > { %4107 = vmatmul.mubr.bf16.gmra.mrb[116].mxu1 %v12325_v46  ;;  %6037 = vmatprep.subr.bf16.mxu0 %v10672_v10  ;;  %v10676_v46 = vld [vmem:[%s15868_s5 + $0x380] ss:$16 sps:$4 sm:$0xff]  }
 0x3b3   : > { %4116 = vmatprep.mubr.bf16.mxu1 %v12401_v14  ;;  %6488 = vmatpush1.bf16.msra.mxu1 %v10667_v12  ;;  %v10684_v14 = vld [vmem:[%s15868_s5 + $0x3a4] ss:$16 sps:$4 sm:$0xff]  }
 0x3b4   : > { %6489 = vmatprep.subr.bf16.mxu1 %v10675_v22 }
 0x3b5   : > { %6038 = vmatpush1.bf16.msra.mxu0 %v10670_v55 }
 0x3b6   : > { %6039 = vmatprep.subr.bf16.mxu0 %v10678_v57 }
 0x3b7   : > { %6490 = vmatpush1.bf16.msra.mxu1 %v10673_v20  ;;  %v10700_v20 = vld [vmem:[%s15868_s5 + $0x400] ss:$16 sps:$4 sm:$0xff]  }
 0x3b8   : > { %3891 = vmatmul.mubr.bf16.gmra.mrb[104].mxu0 %v12395_v32  ;;  %6491 = vmatprep.subr.bf16.mxu1 %v10681_v47 }
 0x3b9   : > { %3900 = vmatprep.mubr.bf16.mxu0 %v12468_v27  ;;  %6040 = vmatpush1.bf16.msra.mxu0 %v10676_v46 }
 0x3ba   : > { %4117 = vmatmul.mubr.bf16.gmra.mrb[120].mxu1 %v12395_v32  ;;  %6041 = vmatprep.subr.bf16.mxu0 %v10684_v14  ;;  %v10688_v32 = vld [vmem:[%s15868_s5 + $0x3c0] ss:$16 sps:$4 sm:$0xff]  }
 0x3bb   : > { %4126 = vmatprep.mubr.bf16.mxu1 %v12468_v27  ;;  %6492 = vmatpush1.bf16.msra.mxu1 %v10679_v34  ;;  %v10696_v27 = vld [vmem:[%s15868_s5 + $0x3e4] ss:$16 sps:$4 sm:$0xff]  }
 0x3bc   : > { %6493 = vmatprep.subr.bf16.mxu1 %v10687_v58 }
 0x3bd   : > { %6042 = vmatpush1.bf16.msra.mxu0 %v10682_v13  ;;  %v10703_v13 = vld [vmem:[%s15868_s5 + $0x408] ss:$16 sps:$4 sm:$0xff]  }
 0x3be   : > { %6043 = vmatprep.subr.bf16.mxu0 %v10690_v7  ;;  %v10708_v7 = vld [vmem:[%s15868_s5 + $0x424] ss:$16 sps:$4 sm:$0xff]  }
 0x3bf   : > { %6494 = vmatpush1.bf16.msra.mxu1 %v10685_v25 }
 0x3c0   : > { %3901 = vmatmul.mubr.bf16.gmra.mrb[108].mxu0 %v12458_v17  ;;  %6495 = vmatprep.subr.bf16.mxu1 %v10693_v59 }
 0x3c1   : > { %6044 = vmatpush1.bf16.msra.mxu0 %v10688_v32 }
 0x3c2   : > { %4127 = vmatmul.mubr.bf16.gmra.mrb[124].mxu1 %v12458_v17  ;;  %6045 = vmatprep.subr.bf16.mxu0 %v10696_v27  ;;  %v1911_v17 = vld [vmem:[%s15865_s2 + $0x7] sm:$0xff] }
 0x3c3   : > { %6496 = vmatpush1.bf16.msra.mxu1 %v10691_v63  ;;  %v13164_v36 = vrot.slane %v1911_v17, %v16042_v4  ;;  %v13167_v50 = vrot.slane %v1911_v17, %v16043_v38  ;;  %v13170_v9 = vrot.slane %v1911_v17, %v16044_v56  ;;  %v13173_v49 = vrot.slane %v1911_v17, %v16045_v2 }
 0x3c4   : > { %6497 = vmatprep.subr.bf16.mxu1 %v10699_v35  ;;  %v10711_v35 = vld [vmem:[%s15868_s5 + $0x42c] ss:$16 sps:$4 sm:$0xff]  }
 0x3c5   : > { %6046 = vmatpush1.bf16.msra.mxu0 %v10694_v21 }
 0x3c6   : > { %6128 = vmatprep.subr.bf16.mxu0 %v10702_v19 }
 0x3c7   : > { %6498 = vmatpush1.bf16.msra.mxu1 %v10697_v31 }
 0x3c8   : > { %6580 = vmatprep.subr.bf16.mxu1 %v10705_v44 }
 0x3db   : > { %v3380_v33 = vpop.f32.mrb[48].mxu0 }
 0x3dc   : > { %v9876_v43 = vadd.f32 %v3380_v33, %v13164_v36  ;;  %v3606_v0 = vpop.f32.mrb[64].mxu1  ;;  %v3382_v40 = vpop.f32.mrb[49].mxu0 }
 0x3dd   : > { %v9908_v62 = vadd.f32 %v3606_v0, %v13167_v50  ;;  %v9877_v54 = vadd.f32 %v3382_v40, %v13170_v9  ;;  %v3608_v39 = vpop.f32.mrb[65].mxu1  ;;  %v3384_v1 = vpop.f32.mrb[50].mxu0 }
 0x3de   : > { %v4137_v24 = vmul.f32 0.01, %v9876_v43  ;;  %v9909_v61 = vadd.f32 %v3608_v39, %v13173_v49  ;;  %v9878_v48 = vadd.f32 %v3384_v1, %v13164_v36  ;;  %v3610_v11 = vpop.f32.mrb[66].mxu1  ;;  %v3386_v6 = vpop.f32.mrb[51].mxu0  ;;  %v10709_v1 = vld [vmem:[%s15868_s5 + $0x428] ss:$16 sps:$4 sm:$0xff]  }
 0x3df   : > { %v4139_v42 = vmul.f32 0.01, %v9908_v62  ;;  %v4138_v23 = vmul.f32 0.01, %v9877_v54  ;;  %v9910_v18 = vadd.f32 %v3610_v11, %v13167_v50  ;;  %v9879_v26 = vadd.f32 %v3386_v6, %v13170_v9  ;;  %v3612_v41 = vpop.f32.mrb[67].mxu1 }
 0x3e0   : > { %v4140_v30 = vmul.f32 0.01, %v9909_v61  ;;  %v4145_v5 = vmul.f32 0.01, %v9878_v48  ;;  %v9911_v3 = vadd.f32 %v3612_v41, %v13173_v49  ;;  %v4265_v45 = vmax.f32 %v9876_v43, %v4137_v24  ;;  %v10714_v11 = vld [vmem:[%s15868_s5 + $0x444] ss:$16 sps:$4 sm:$0xff]  }
 0x3e1   : > { %v4147_v52 = vmul.f32 0.01, %v9910_v18  ;;  %v4146_v53 = vmul.f32 0.01, %v9879_v26  ;;  %v4267_v29 = vmax.f32 %v9908_v62, %v4139_v42  ;;  %v4266_v60 = vmax.f32 %v9877_v54, %v4138_v23  ;;  %v10706_v62 = vld [vmem:[%s15868_s5 + $0x420] ss:$16 sps:$4 sm:$0xff]  }
 0x3e2   : > { %v4273_v16 = vmax.f32 %v9878_v48, %v4145_v5  ;;  %v4148_v15 = vmul.f32 0.01, %v9911_v3  ;;  %v4268_v28 = vmax.f32 %v9909_v61, %v4140_v30  ;;  %v10717_v6 = vld [vmem:[%s15868_s5 + $0x44c] ss:$16 sps:$4 sm:$0xff]  }
 0x3e3   : > { %v4275_v8 = vmax.f32 %v9910_v18, %v4147_v52  ;;  %v4274_v37 = vmax.f32 %v9879_v26, %v4146_v53  ;;  %v3390_v51 = vpop.f32.mrb[52].mxu0  ;;  %v10712_v53 = vld [vmem:[%s15868_s5 + $0x440] ss:$16 sps:$4 sm:$0xff]  }
 0x3e4   : > { %v4393_v10 = vpack.c.bf16 %v4273_v16, %v4265_v45  ;;  %v4276_v12 = vmax.f32 %v9911_v3, %v4148_v15  ;;  %v9880_v22 = vadd.f32 %v3390_v51, %v13164_v36  ;;  %v3616_v55 = vpop.f32.mrb[68].mxu1  ;;  %v3392_v57 = vpop.f32.mrb[53].mxu0  ;;  %v10720_v51 = vld [vmem:[%s15868_s5 + $0x464] ss:$16 sps:$4 sm:$0xff]  }
 0x3e5   : > { %v13187_v47 = vpack.c.bf16 %v4275_v8, %v4267_v29  ;;  %v9881_v46 = vadd.f32 %v3392_v57, %v13170_v9  ;;  %v3618_v14 = vpop.f32.mrb[69].mxu1  ;;  %v3394_v34 = vpop.f32.mrb[54].mxu0  ;;  %v4394_v58 = vpack.c.bf16 %v4274_v37, %v4266_v60  ;;  %v13204_v19 = vadd.f32 %v3616_v55, %v13167_v50  ;;  %v10715_v37 = vld [vmem:[%s15868_s5 + $0x448] ss:$16 sps:$4 sm:$0xff]   ;;  %v10723_v57 = vld [vmem:[%s15868_s5 + $0x46c] ss:$16 sps:$4 sm:$0xff]  }
 0x3e6   : > { %v4153_v25 = vmul.f32 0.01, %v9880_v22  ;;  %v9913_v59 = vadd.f32 %v3618_v14, %v13173_v49  ;;  %v9882_v32 = vadd.f32 %v3394_v34, %v13164_v36  ;;  %v3620_v27 = vpop.f32.mrb[70].mxu1  ;;  %v3396_v63 = vpop.f32.mrb[55].mxu0  ;;  %v13201_v21 = vpack.c.bf16 %v4276_v12, %v4268_v28 }
 0x3e7   : > { %v4154_v31 = vmul.f32 0.01, %v9881_v46  ;;  %v13207_v44 = vadd.f32 %v3620_v27, %v13167_v50  ;;  %v9883_v17 = vadd.f32 %v3396_v63, %v13170_v9  ;;  %v3622_v33 = vpop.f32.mrb[71].mxu1  ;;  %6047 = vmatprep.mubr.bf16.mxu0 %v4394_v58  ;;  %6499 = vmatprep.mubr.bf16.mxu1 %v4394_v58  ;;  %v4155_v42 = vmul.f32 0.01, %v13204_v19 }
 0x3e8   : > { %v4156_v43 = vmul.f32 0.01, %v9913_v59  ;;  %v4161_v0 = vmul.f32 0.01, %v9882_v32  ;;  %v9915_v40 = vadd.f32 %v3622_v33, %v13173_v49  ;;  %6048 = vmatmul.mubr.bf16.vlgmr.msra.gmra.mrb[112].mxu0 %v4393_v10  ;;  %6500 = vmatmul.mubr.bf16.vlgmr.msra.gmra.mrb[128].mxu1 %v4393_v10  ;;  %v4281_v24 = vmax.f32 %v9880_v22, %v4153_v25  ;;  %v10718_v27 = vld [vmem:[%s15868_s5 + $0x460] ss:$16 sps:$4 sm:$0xff]  }
 0x3e9   : > { %v13215_v54 = vmul.f32 0.01, %v13207_v44  ;;  %v4162_v39 = vmul.f32 0.01, %v9883_v17  ;;  %6129 = vmatpush1.bf16.msra.mxu0 %v10700_v20  ;;  %6581 = vmatpush1.bf16.msra.mxu1 %v10703_v13  ;;  %v4282_v23 = vmax.f32 %v9881_v46, %v4154_v31  ;;  %v10726_v33 = vld [vmem:[%s15868_s5 + $0x484] ss:$16 sps:$4 sm:$0xff]  }
 0x3ea   : > { %v4289_v61 = vmax.f32 %v9882_v32, %v4161_v0  ;;  %v4164_v48 = vmul.f32 0.01, %v9915_v40  ;;  %6130 = vmatprep.subr.bf16.mxu0 %v10708_v7  ;;  %6582 = vmatprep.subr.bf16.mxu1 %v10711_v35  ;;  %v4284_v41 = vmax.f32 %v9913_v59, %v4156_v43  ;;  %v4283_v7 = vmax.f32 %v13204_v19, %v4155_v42  ;;  %v10721_v19 = vld [vmem:[%s15868_s5 + $0x468] ss:$16 sps:$4 sm:$0xff]   ;;  %v10729_v43 = vld [vmem:[%s15868_s5 + $0x48c] ss:$16 sps:$4 sm:$0xff]  }
 0x3eb   : > { %v4290_v18 = vmax.f32 %v9883_v17, %v4162_v39  ;;  %v3400_v26 = vpop.f32.mrb[56].mxu0  ;;  %v4291_v16 = vmax.f32 %v13207_v44, %v13215_v54 }
 0x3ec   : > { %v4292_v30 = vmax.f32 %v9915_v40, %v4164_v48  ;;  %v9884_v5 = vadd.f32 %v3400_v26, %v13164_v36  ;;  %v3626_v3 = vpop.f32.mrb[72].mxu1  ;;  %v3402_v52 = vpop.f32.mrb[57].mxu0  ;;  %v4401_v45 = vpack.c.bf16 %v4289_v61, %v4281_v24 }
 0x3ed   : > { %v9885_v15 = vadd.f32 %v3402_v52, %v13170_v9  ;;  %v3628_v29 = vpop.f32.mrb[73].mxu1  ;;  %6131 = vmatpush1.bf16.msra.mxu0 %v10706_v62  ;;  %v3404_v60 = vpop.f32.mrb[58].mxu0  ;;  %6583 = vmatpush1.bf16.msra.mxu1 %v10709_v1  ;;  %v4402_v8 = vpack.c.bf16 %v4290_v18, %v4282_v23  ;;  %v13250_v46 = vadd.f32 %v3626_v3, %v13167_v50  ;;  %v10732_v3 = vld [vmem:[%s15868_s5 + $0x4a4] ss:$16 sps:$4 sm:$0xff]  }
 0x3ee   : > { %v4169_v28 = vmul.f32 0.01, %v9884_v5  ;;  %v13241_v10 = vadd.f32 %v3628_v29, %v13173_v49  ;;  %v9886_v12 = vadd.f32 %v3404_v60, %v13164_v36  ;;  %v3630_v22 = vpop.f32.mrb[74].mxu1  ;;  %v3406_v55 = vpop.f32.mrb[59].mxu0  ;;  %6132 = vmatprep.subr.bf16.mxu0 %v10714_v11  ;;  %6584 = vmatprep.subr.bf16.mxu1 %v10717_v6  ;;  %v13247_v20 = vpack.c.bf16 %v4292_v30, %v4284_v41  ;;  %v10724_v6 = vld [vmem:[%s15868_s5 + $0x480] ss:$16 sps:$4 sm:$0xff]  }
 0x3ef   : > { %v4170_v14 = vmul.f32 0.01, %v9885_v15  ;;  %v13253_v34 = vadd.f32 %v3630_v22, %v13167_v50  ;;  %v9887_v58 = vadd.f32 %v3406_v55, %v13170_v9  ;;  %v3632_v13 = vpop.f32.mrb[75].mxu1  ;;  %6057 = vmatprep.mubr.bf16.mxu0 %v4402_v8  ;;  %6509 = vmatprep.mubr.bf16.mxu1 %v4402_v8  ;;  %v13274_v0 = vpack.c.bf16 %v4291_v16, %v4283_v7  ;;  %v10735_v29 = vld [vmem:[%s15868_s5 + $0x4ac] ss:$16 sps:$4 sm:$0xff]  }
 0x3f0   : > { %v4172_v25 = vmul.f32 0.01, %v13241_v10  ;;  %v4177_v59 = vmul.f32 0.01, %v9886_v12  ;;  %v9919_v32 = vadd.f32 %v3632_v13, %v13173_v49  ;;  %6058 = vmatmul.mubr.bf16.gmra.mrb[116].mxu0 %v4401_v45  ;;  %6510 = vmatmul.mubr.bf16.gmra.mrb[132].mxu1 %v4401_v45  ;;  %v4297_v31 = vmax.f32 %v9884_v5, %v4169_v28  ;;  %v10727_v5 = vld [vmem:[%s15868_s5 + $0x488] ss:$16 sps:$4 sm:$0xff]  }
 0x3f1   : > { %v13263_v63 = vmul.f32 0.01, %v13253_v34  ;;  %v4178_v35 = vmul.f32 0.01, %v9887_v58  ;;  %6133 = vmatpush1.bf16.msra.mxu0 %v10712_v53  ;;  %6585 = vmatpush1.bf16.msra.mxu1 %v10715_v37  ;;  %v4171_v40 = vmul.f32 0.01, %v13250_v46  ;;  %v4298_v62 = vmax.f32 %v9885_v15, %v4170_v14 }
 0x3f2   : > { %v4305_v44 = vmax.f32 %v9886_v12, %v4177_v59  ;;  %v4180_v17 = vmul.f32 0.01, %v9919_v32  ;;  %6134 = vmatprep.subr.bf16.mxu0 %v10720_v51  ;;  %6586 = vmatprep.subr.bf16.mxu1 %v10723_v57  ;;  %v4300_v1 = vmax.f32 %v13241_v10, %v4172_v25  ;;  %v10730_v14 = vld [vmem:[%s15868_s5 + $0x4a0] ss:$16 sps:$4 sm:$0xff]   ;;  %v10738_v59 = vld [vmem:[%s15868_s5 + $0x4c4] ss:$16 sps:$4 sm:$0xff]  }
 0x3f3   : > { %v4306_v54 = vmax.f32 %v9887_v58, %v4178_v35  ;;  %v3410_v39 = vpop.f32.mrb[60].mxu0  ;;  %v4307_v23 = vmax.f32 %v13253_v34, %v13263_v63  ;;  %v4299_v12 = vmax.f32 %v13250_v46, %v4171_v40  ;;  %v10733_v46 = vld [vmem:[%s15868_s5 + $0x4a8] ss:$16 sps:$4 sm:$0xff]  }
 0x3f4   : > { %v4308_v24 = vmax.f32 %v9919_v32, %v4180_v17  ;;  %v9888_v61 = vadd.f32 %v3410_v39, %v13164_v36  ;;  %v3636_v48 = vpop.f32.mrb[76].mxu1  ;;  %v3412_v11 = vpop.f32.mrb[61].mxu0  ;;  %v4409_v42 = vpack.c.bf16 %v4305_v44, %v4297_v31  ;;  %v10741_v32 = vld [vmem:[%s15868_s5 + $0x4cc] ss:$16 sps:$4 sm:$0xff]  }
 0x3f5   : > { %v9889_v18 = vadd.f32 %v3412_v11, %v13170_v9  ;;  %v3638_v26 = vpop.f32.mrb[77].mxu1  ;;  %6135 = vmatpush1.bf16.msra.mxu0 %v10718_v27  ;;  %v3414_v41 = vpop.f32.mrb[62].mxu0  ;;  %6587 = vmatpush1.bf16.msra.mxu1 %v10721_v19  ;;  %v4410_v30 = vpack.c.bf16 %v4306_v54, %v4298_v62  ;;  %v13301_v8 = vadd.f32 %v3636_v48, %v13167_v50  ;;  %v10736_v62 = vld [vmem:[%s15868_s5 + $0x4c0] ss:$16 sps:$4 sm:$0xff]   ;;  %v10739_v11 = vld [vmem:[%s15868_s5 + $0x4c8] ss:$16 sps:$4 sm:$0xff]  }
 0x3f6   : > { %v4185_v52 = vmul.f32 0.01, %v9888_v61  ;;  %v13292_v53 = vadd.f32 %v3638_v26, %v13173_v49  ;;  %v9890_v45 = vadd.f32 %v3414_v41, %v13164_v36  ;;  %v3640_v16 = vpop.f32.mrb[78].mxu1  ;;  %v3416_v15 = vpop.f32.mrb[63].mxu0  ;;  %6136 = vmatprep.subr.bf16.mxu0 %v10726_v33  ;;  %6588 = vmatprep.subr.bf16.mxu1 %v10729_v43  ;;  %v13298_v60 = vpack.c.bf16 %v4308_v24, %v4300_v1 }
 0x3f7   : > { %v4186_v37 = vmul.f32 0.01, %v9889_v18  ;;  %v13304_v51 = vadd.f32 %v3640_v16, %v13167_v50  ;;  %v9891_v28 = vadd.f32 %v3416_v15, %v13170_v9  ;;  %v3642_v10 = vpop.f32.mrb[79].mxu1  ;;  %6067 = vmatprep.mubr.bf16.mxu0 %v4410_v30  ;;  %6519 = vmatprep.mubr.bf16.mxu1 %v4410_v30  ;;  %v13325_v27 = vpack.c.bf16 %v4307_v23, %v4299_v12  ;;  %v10747_v30 = vld [vmem:[%s15868_s5 + $0x4ec] ss:$16 sps:$4 sm:$0xff]  }
 0x3f8   : > { %v4188_v22 = vmul.f32 0.01, %v13292_v53  ;;  %v4193_v55 = vmul.f32 0.01, %v9890_v45  ;;  %v9923_v57 = vadd.f32 %v3642_v10, %v13173_v49  ;;  %6068 = vmatmul.mubr.bf16.gmra.mrb[120].mxu0 %v4409_v42  ;;  %6520 = vmatmul.mubr.bf16.gmra.mrb[136].mxu1 %v4409_v42  ;;  %v4313_v13 = vmax.f32 %v9888_v61, %v4185_v52 }
 0x3f9   : > { %v13314_v34 = vmul.f32 0.01, %v13304_v51  ;;  %v4194_v58 = vmul.f32 0.01, %v9891_v28  ;;  %6137 = vmatpush1.bf16.msra.mxu0 %v10724_v6  ;;  %6589 = vmatpush1.bf16.msra.mxu1 %v10727_v5  ;;  %v4187_v63 = vmul.f32 0.01, %v13301_v8  ;;  %v4314_v35 = vmax.f32 %v9889_v18, %v4186_v37 }
 0x3fa   : > { %v4321_v7 = vmax.f32 %v9890_v45, %v4193_v55  ;;  %v4196_v25 = vmul.f32 0.01, %v9923_v57  ;;  %6138 = vmatprep.subr.bf16.mxu0 %v10732_v3  ;;  %6590 = vmatprep.subr.bf16.mxu1 %v10735_v29  ;;  %v4316_v44 = vmax.f32 %v13292_v53, %v4188_v22  ;;  %v10744_v6 = vld [vmem:[%s15868_s5 + $0x4e4] ss:$16 sps:$4 sm:$0xff]  }
 0x3fb   : > { %v4322_v19 = vmax.f32 %v9891_v28, %v4194_v58  ;;  %v3420_v31 = vpop.f32.mrb[64].mxu0  ;;  %v4323_v39 = vmax.f32 %v13304_v51, %v13314_v34  ;;  %v4315_v15 = vmax.f32 %v13301_v8, %v4187_v63  ;;  %v10742_v28 = vld [vmem:[%s15868_s5 + $0x4e0] ss:$16 sps:$4 sm:$0xff]   ;;  %v10745_v8 = vld [vmem:[%s15868_s5 + $0x4e8] ss:$16 sps:$4 sm:$0xff]  }
 0x3fc   : > { %v4324_v17 = vmax.f32 %v9923_v57, %v4196_v25  ;;  %v9892_v33 = vadd.f32 %v3420_v31, %v13164_v36  ;;  %v3646_v43 = vpop.f32.mrb[80].mxu1  ;;  %v3422_v40 = vpop.f32.mrb[65].mxu0  ;;  %v4417_v54 = vpack.c.bf16 %v4321_v7, %v4313_v13  ;;  %v10753_v34 = vld [vmem:[%s15868_s5 + $0x50c] ss:$16 sps:$4 sm:$0xff]   ;;  %v10748_v31 = vld [vmem:[%s15868_s5 + $0x500] ss:$16 sps:$4 sm:$0xff]  }
 0x3fd   : > { %v9893_v1 = vadd.f32 %v3422_v40, %v13170_v9  ;;  %v3648_v24 = vpop.f32.mrb[81].mxu1  ;;  %6139 = vmatpush1.bf16.msra.mxu0 %v10730_v14  ;;  %v3424_v61 = vpop.f32.mrb[66].mxu0  ;;  %6591 = vmatpush1.bf16.msra.mxu1 %v10733_v46  ;;  %v4418_v48 = vpack.c.bf16 %v4322_v19, %v4314_v35  ;;  %v13352_v3 = vadd.f32 %v3646_v43, %v13167_v50  ;;  %v10750_v14 = vld [vmem:[%s15868_s5 + $0x504] ss:$16 sps:$4 sm:$0xff]  }
 0x3fe   : > { %v4201_v42 = vmul.f32 0.01, %v9892_v33  ;;  %v13343_v23 = vadd.f32 %v3648_v24, %v13173_v49  ;;  %v9894_v18 = vadd.f32 %v3424_v61, %v13164_v36  ;;  %v3650_v26 = vpop.f32.mrb[82].mxu1  ;;  %v3426_v41 = vpop.f32.mrb[67].mxu0  ;;  %6140 = vmatprep.subr.bf16.mxu0 %v10738_v59  ;;  %6592 = vmatprep.subr.bf16.mxu1 %v10741_v32  ;;  %v13349_v5 = vpack.c.bf16 %v4324_v17, %v4316_v44 }
 0x3ff   : > { %v4202_v52 = vmul.f32 0.01, %v9893_v1  ;;  %v13355_v53 = vadd.f32 %v3650_v26, %v13167_v50  ;;  %v9895_v45 = vadd.f32 %v3426_v41, %v13170_v9  ;;  %v3652_v16 = vpop.f32.mrb[83].mxu1  ;;  %6077 = vmatprep.mubr.bf16.mxu0 %v4418_v48  ;;  %6529 = vmatprep.mubr.bf16.mxu1 %v4418_v48  ;;  %v13376_v58 = vpack.c.bf16 %v4323_v39, %v4315_v15  ;;  %v10756_v39 = vld [vmem:[%s15868_s5 + $0x524] ss:$16 sps:$4 sm:$0xff]  }
 0x400   : > { %v4204_v29 = vmul.f32 0.01, %v13343_v23  ;;  %v4209_v37 = vmul.f32 0.01, %v9894_v18  ;;  %v9927_v51 = vadd.f32 %v3652_v16, %v13173_v49  ;;  %6078 = vmatmul.mubr.bf16.gmra.mrb[124].mxu0 %v4417_v54  ;;  %6530 = vmatmul.mubr.bf16.gmra.mrb[140].mxu1 %v4417_v54  ;;  %v4329_v22 = vmax.f32 %v9892_v33, %v4201_v42  ;;  %v10751_v54 = vld [vmem:[%s15868_s5 + $0x508] ss:$16 sps:$4 sm:$0xff]  }
 0x401   : > { %v13365_v10 = vmul.f32 0.01, %v13355_v53  ;;  %v4210_v12 = vmul.f32 0.01, %v9895_v45  ;;  %6141 = vmatpush1.bf16.msra.mxu0 %v10736_v62  ;;  %6593 = vmatpush1.bf16.msra.mxu1 %v10739_v11  ;;  %v4203_v46 = vmul.f32 0.01, %v13352_v3  ;;  %v4330_v13 = vmax.f32 %v9893_v1, %v4202_v52 }
 0x402   : > { %v4337_v55 = vmax.f32 %v9894_v18, %v4209_v37  ;;  %v4212_v57 = vmul.f32 0.01, %v9927_v51  ;;  %6142 = vmatprep.subr.bf16.mxu0 %v10744_v6  ;;  %6594 = vmatprep.subr.bf16.mxu1 %v10747_v30  ;;  %v4332_v59 = vmax.f32 %v13343_v23, %v4204_v29  ;;  %v10759_v6 = vld [vmem:[%s15868_s5 + $0x52c] ss:$16 sps:$4 sm:$0xff]   ;;  %v10754_v15 = vld [vmem:[%s15868_s5 + $0x520] ss:$16 sps:$4 sm:$0xff]  }
 0x403   : > { %v4338_v7 = vmax.f32 %v9895_v45, %v4210_v12  ;;  %v3430_v25 = vpop.f32.mrb[68].mxu0  ;;  %v4339_v17 = vmax.f32 %v13355_v53, %v13365_v10  ;;  %v4331_v52 = vmax.f32 %v13352_v3, %v4203_v46  ;;  %v10757_v3 = vld [vmem:[%s15868_s5 + $0x528] ss:$16 sps:$4 sm:$0xff]   ;;  %v10762_v12 = vld [vmem:[%s15868_s5 + $0x544] ss:$16 sps:$4 sm:$0xff]  }
 0x404   : > { %v4340_v32 = vmax.f32 %v9927_v51, %v4212_v57  ;;  %v9896_v63 = vadd.f32 %v3430_v25, %v13164_v36  ;;  %v3656_v35 = vpop.f32.mrb[84].mxu1  ;;  %v3432_v19 = vpop.f32.mrb[69].mxu0  ;;  %v4425_v44 = vpack.c.bf16 %v4337_v55, %v4329_v22 }
 0x405   : > { %v9897_v33 = vadd.f32 %v3432_v19, %v13170_v9  ;;  %v3658_v43 = vpop.f32.mrb[85].mxu1  ;;  %6143 = vmatpush1.bf16.msra.mxu0 %v10742_v28  ;;  %v3434_v40 = vpop.f32.mrb[70].mxu0  ;;  %6595 = vmatpush1.bf16.msra.mxu1 %v10745_v8  ;;  %v4426_v62 = vpack.c.bf16 %v4338_v7, %v4330_v13  ;;  %v13403_v23 = vadd.f32 %v3656_v35, %v13167_v50  ;;  %v10765_v8 = vld [vmem:[%s15868_s5 + $0x54c] ss:$16 sps:$4 sm:$0xff]  }
 0x406   : > { %v4217_v1 = vmul.f32 0.01, %v9896_v63  ;;  %v13394_v24 = vadd.f32 %v3658_v43, %v13173_v49  ;;  %v9898_v61 = vadd.f32 %v3434_v40, %v13164_v36  ;;  %v3660_v48 = vpop.f32.mrb[86].mxu1  ;;  %v3436_v11 = vpop.f32.mrb[71].mxu0  ;;  %6144 = vmatprep.subr.bf16.mxu0 %v10750_v14  ;;  %6596 = vmatprep.subr.bf16.mxu1 %v10753_v34  ;;  %v13400_v42 = vpack.c.bf16 %v4340_v32, %v4332_v59  ;;  %v10760_v32 = vld [vmem:[%s15868_s5 + $0x540] ss:$16 sps:$4 sm:$0xff]  }
 0x407   : > { %v4218_v18 = vmul.f32 0.01, %v9897_v33  ;;  %v13406_v26 = vadd.f32 %v3660_v48, %v13167_v50  ;;  %v9899_v41 = vadd.f32 %v3436_v11, %v13170_v9  ;;  %v3662_v30 = vpop.f32.mrb[87].mxu1  ;;  %6087 = vmatprep.mubr.bf16.mxu0 %v4426_v62  ;;  %6539 = vmatprep.mubr.bf16.mxu1 %v4426_v62  ;;  %v13427_v22 = vpack.c.bf16 %v4339_v17, %v4331_v52  ;;  %v10768_v43 = vld [vmem:[%s15868_s5 + $0x564] ss:$16 sps:$4 sm:$0xff]  }
 0x408   : > { %v4220_v53 = vmul.f32 0.01, %v13394_v24  ;;  %v4225_v45 = vmul.f32 0.01, %v9898_v61  ;;  %v9931_v16 = vadd.f32 %v3662_v30, %v13173_v49  ;;  %6088 = vmatmul.mubr.bf16.gmra.mrb[128].mxu0 %v4425_v44  ;;  %6540 = vmatmul.mubr.bf16.gmra.mrb[144].mxu1 %v4425_v44  ;;  %v4345_v51 = vmax.f32 %v9896_v63, %v4217_v1 }
 0x409   : > { %v13416_v29 = vmul.f32 0.01, %v13406_v26  ;;  %v4226_v37 = vmul.f32 0.01, %v9899_v41  ;;  %6145 = vmatpush1.bf16.msra.mxu0 %v10748_v31  ;;  %6597 = vmatpush1.bf16.msra.mxu1 %v10751_v54  ;;  %v4219_v55 = vmul.f32 0.01, %v13403_v23  ;;  %v4346_v57 = vmax.f32 %v9897_v33, %v4218_v18 }
 0x40a   : > { %v4353_v28 = vmax.f32 %v9898_v61, %v4225_v45  ;;  %v4228_v10 = vmul.f32 0.01, %v9931_v16  ;;  %6146 = vmatprep.subr.bf16.mxu0 %v10756_v39  ;;  %6598 = vmatprep.subr.bf16.mxu1 %v10759_v6  ;;  %v4348_v46 = vmax.f32 %v13394_v24, %v4220_v53  ;;  %v10763_v33 = vld [vmem:[%s15868_s5 + $0x548] ss:$16 sps:$4 sm:$0xff]   ;;  %v10771_v24 = vld [vmem:[%s15868_s5 + $0x56c] ss:$16 sps:$4 sm:$0xff]  }
 0x40b   : > { %v4354_v14 = vmax.f32 %v9899_v41, %v4226_v37  ;;  %v3440_v34 = vpop.f32.mrb[72].mxu0  ;;  %v4355_v35 = vmax.f32 %v13406_v26, %v13416_v29  ;;  %v4347_v41 = vmax.f32 %v13403_v23, %v4219_v55  ;;  %v10766_v45 = vld [vmem:[%s15868_s5 + $0x560] ss:$16 sps:$4 sm:$0xff]   ;;  %v10769_v23 = vld [vmem:[%s15868_s5 + $0x568] ss:$16 sps:$4 sm:$0xff]  }
 0x40c   : > { %v4356_v13 = vmax.f32 %v9931_v16, %v4228_v10  ;;  %v9900_v7 = vadd.f32 %v3440_v34, %v13164_v36  ;;  %v3666_v25 = vpop.f32.mrb[88].mxu1  ;;  %v3442_v59 = vpop.f32.mrb[73].mxu0  ;;  %v4433_v63 = vpack.c.bf16 %v4353_v28, %v4345_v51  ;;  %v10774_v51 = vld [vmem:[%s15868_s5 + $0x584] ss:$16 sps:$4 sm:$0xff]   ;;  %v10777_v28 = vld [vmem:[%s15868_s5 + $0x58c] ss:$16 sps:$4 sm:$0xff]  }
 0x40d   : > { %v13438_v19 = vadd.f32 %v3442_v59, %v13170_v9  ;;  %v3668_v31 = vpop.f32.mrb[89].mxu1  ;;  %6147 = vmatpush1.bf16.msra.mxu0 %v10754_v15  ;;  %v3444_v44 = vpop.f32.mrb[74].mxu0  ;;  %6599 = vmatpush1.bf16.msra.mxu1 %v10757_v3  ;;  %v4434_v17 = vpack.c.bf16 %v4354_v14, %v4346_v57  ;;  %v13456_v48 = vadd.f32 %v3666_v25, %v13167_v50  ;;  %v10772_v59 = vld [vmem:[%s15868_s5 + $0x580] ss:$16 sps:$4 sm:$0xff]  }
 0x40e   : > { %v4233_v40 = vmul.f32 0.01, %v9900_v7  ;;  %v13447_v62 = vadd.f32 %v3668_v31, %v13173_v49  ;;  %v9902_v54 = vadd.f32 %v3444_v44, %v13164_v36  ;;  %v3670_v39 = vpop.f32.mrb[90].mxu1  ;;  %v3446_v1 = vpop.f32.mrb[75].mxu0  ;;  %6148 = vmatprep.subr.bf16.mxu0 %v10762_v12  ;;  %6600 = vmatprep.subr.bf16.mxu1 %v10765_v8  ;;  %v13453_v61 = vpack.c.bf16 %v4356_v13, %v4348_v46 }
 0x40f   : > { %v4234_v11 = vmul.f32 0.01, %v13438_v19  ;;  %v13460_v6 = vadd.f32 %v3670_v39, %v13167_v50  ;;  %v9903_v18 = vadd.f32 %v3446_v1, %v13170_v9  ;;  %v3672_v26 = vpop.f32.mrb[91].mxu1  ;;  %6097 = vmatprep.mubr.bf16.mxu0 %v4434_v17  ;;  %6549 = vmatprep.mubr.bf16.mxu1 %v4434_v17  ;;  %v13481_v10 = vpack.c.bf16 %v4355_v35, %v4347_v41  ;;  %v10775_v17 = vld [vmem:[%s15868_s5 + $0x588] ss:$16 sps:$4 sm:$0xff]  }
 0x410   : > { %v4236_v30 = vmul.f32 0.01, %v13447_v62  ;;  %v4241_v52 = vmul.f32 0.01, %v9902_v54  ;;  %v9935_v53 = vadd.f32 %v3672_v26, %v13173_v49  ;;  %6098 = vmatmul.mubr.bf16.gmra.mrb[132].mxu0 %v4433_v63  ;;  %6550 = vmatmul.mubr.bf16.gmra.mrb[148].mxu1 %v4433_v63  ;;  %v4361_v29 = vmax.f32 %v9900_v7, %v4233_v40  ;;  %v10783_v1 = vld [vmem:[%s15868_s5 + $0x5ac] ss:$16 sps:$4 sm:$0xff]  }
 0x411   : > { %v13470_v16 = vmul.f32 0.01, %v13460_v6  ;;  %v4242_v15 = vmul.f32 0.01, %v9903_v18  ;;  %6149 = vmatpush1.bf16.msra.mxu0 %v10760_v32  ;;  %6601 = vmatpush1.bf16.msra.mxu1 %v10763_v33  ;;  %v4235_v12 = vmul.f32 0.01, %v13456_v48  ;;  %v4362_v8 = vmax.f32 %v13438_v19, %v4234_v11 }
 0x412   : > { %v4369_v37 = vmax.f32 %v9902_v54, %v4241_v52  ;;  %v4244_v3 = vmul.f32 0.01, %v9935_v53  ;;  %6150 = vmatprep.subr.bf16.mxu0 %v10768_v43  ;;  %6602 = vmatprep.subr.bf16.mxu1 %v10771_v24  ;;  %v4364_v55 = vmax.f32 %v13447_v62, %v4236_v30  ;;  %v10780_v33 = vld [vmem:[%s15868_s5 + $0x5a4] ss:$16 sps:$4 sm:$0xff]  }
 0x413   : > { %v4370_v57 = vmax.f32 %v9903_v18, %v4242_v15  ;;  %v3450_v14 = vpop.f32.mrb[76].mxu0  ;;  %v4371_v34 = vmax.f32 %v13460_v6, %v13470_v16 }
 0x414   : > { %v4372_v46 = vmax.f32 %v9935_v53, %v4244_v3  ;;  %v9904_v13 = vadd.f32 %v3450_v14, %v13164_v36  ;;  %v3676_v7 = vpop.f32.mrb[92].mxu1  ;;  %v3452_v25 = vpop.f32.mrb[77].mxu0  ;;  %v4441_v32 = vpack.c.bf16 %v4369_v37, %v4361_v29  ;;  %v10789_v29 = vld [vmem:[%s15868_s5 + $0x5cc] ss:$16 sps:$4 sm:$0xff]  }
 0x415   : > { %v9936_v63 = vadd.f32 %v3676_v7, %v13167_v50  ;;  %v9905_v35 = vadd.f32 %v3452_v25, %v13170_v9  ;;  %v3678_v19 = vpop.f32.mrb[93].mxu1  ;;  %6151 = vmatpush1.bf16.msra.mxu0 %v10766_v45  ;;  %v3454_v31 = vpop.f32.mrb[78].mxu0  ;;  %6603 = vmatpush1.bf16.msra.mxu1 %v10769_v23  ;;  %v4442_v44 = vpack.c.bf16 %v4370_v57, %v4362_v8  ;;  %v10778_v45 = vld [vmem:[%s15868_s5 + $0x5a0] ss:$16 sps:$4 sm:$0xff]   ;;  %v10792_v25 = vld [vmem:[%s15868_s5 + $0x5e4] ss:$16 sps:$4 sm:$0xff]  }
 0x416   : > { %v4249_v43 = vmul.f32 0.01, %v9904_v13  ;;  %v9937_v40 = vadd.f32 %v3678_v19, %v13173_v49  ;;  %v9906_v62 = vadd.f32 %v3454_v31, %v13164_v36  ;;  %v3680_v54 = vpop.f32.mrb[94].mxu1  ;;  %v3456_v39 = vpop.f32.mrb[79].mxu0  ;;  %6152 = vmatprep.subr.bf16.mxu0 %v10774_v51  ;;  %6604 = vmatprep.subr.bf16.mxu1 %v10777_v28  ;;  %v13505_v24 = vpack.c.bf16 %v4372_v46, %v4364_v55  ;;  %v10784_v46 = vld [vmem:[%s15868_s5 + $0x5c0] ss:$16 sps:$4 sm:$0xff]  }
 0x417   : > { %v4251_v11 = vmul.f32 0.01, %v9936_v63  ;;  %v4250_v6 = vmul.f32 0.01, %v9905_v35  ;;  %v9938_v18 = vadd.f32 %v3680_v54, %v13167_v50  ;;  %v9907_v26 = vadd.f32 %v3456_v39, %v13170_v9  ;;  %v3682_v41 = vpop.f32.mrb[95].mxu1  ;;  %6107 = vmatprep.mubr.bf16.mxu0 %v4442_v44  ;;  %6559 = vmatprep.mubr.bf16.mxu1 %v4442_v44 }
 0x418   : > { %v4363_v36 = vmax.f32 %v13456_v48, %v4235_v12  ;;  %v4252_v30 = vmul.f32 0.01, %v9937_v40  ;;  %v4257_v52 = vmul.f32 0.01, %v9906_v62  ;;  %v9939_v53 = vadd.f32 %v3682_v41, %v13173_v49  ;;  %6108 = vmatmul.mubr.bf16.gmra.mrb[136].mxu0 %v4441_v32  ;;  %6560 = vmatmul.mubr.bf16.gmra.mrb[152].mxu1 %v4441_v32  ;;  %v10781_v50 = vld [vmem:[%s15868_s5 + $0x5a8] ss:$16 sps:$4 sm:$0xff]  }
 0x419   : > { %v4259_v16 = vmul.f32 0.01, %v9938_v18  ;;  %v4258_v15 = vmul.f32 0.01, %v9907_v26  ;;  %6153 = vmatpush1.bf16.msra.mxu0 %v10772_v59  ;;  %6605 = vmatpush1.bf16.msra.mxu1 %v10775_v17  ;;  %v4377_v9 = vmax.f32 %v9904_v13, %v4249_v43  ;;  %v10786_v49 = vld [vmem:[%s15868_s5 + $0x5c4] ss:$16 sps:$4 sm:$0xff]   ;;  %v4379_v3 = vmax.f32 %v9936_v63, %v4251_v11 }
 0x41a   : > { %v4385_v48 = vmax.f32 %v9906_v62, %v4257_v52  ;;  %v4260_v23 = vmul.f32 0.01, %v9939_v53  ;;  %6154 = vmatprep.subr.bf16.mxu0 %v10780_v33  ;;  %6606 = vmatprep.subr.bf16.mxu1 %v10783_v1  ;;  %v13523_v37 = vpack.c.bf16 %v4371_v34, %v4363_v36  ;;  %v4378_v51 = vmax.f32 %v9905_v35, %v4250_v6  ;;  %v10787_v34 = vld [vmem:[%s15868_s5 + $0x5c8] ss:$16 sps:$4 sm:$0xff]   ;;  %v10795_v59 = vld [vmem:[%s15868_s5 + $0x5ec] ss:$16 sps:$4 sm:$0xff]  }
 0x41b   : > { %v4387_v28 = vmax.f32 %v9938_v18, %v4259_v16  ;;  %v4386_v12 = vmax.f32 %v9907_v26, %v4258_v15  ;;  %v4380_v8 = vmax.f32 %v9937_v40, %v4252_v30  ;;  %v10790_v32 = vld [vmem:[%s15868_s5 + $0x5e0] ss:$16 sps:$4 sm:$0xff]   ;;  %v10793_v63 = vld [vmem:[%s15868_s5 + $0x5e8] ss:$16 sps:$4 sm:$0xff]   ;;  %v10798_v35 = vld [vmem:[%s15868_s5 + $0x604] ss:$16 sps:$4 sm:$0xff]  }
 0x41c   : > { %v4388_v55 = vmax.f32 %v9939_v53, %v4260_v23  ;;  %v4449_v57 = vpack.c.bf16 %v4385_v48, %v4377_v9  ;;  %v10801_v19 = vld [vmem:[%s15868_s5 + $0x60c] ss:$16 sps:$4 sm:$0xff]   ;;  %v10796_v31 = vld [vmem:[%s15868_s5 + $0x600] ss:$16 sps:$4 sm:$0xff]   ;;  %v10804_v44 = vld [vmem:[%s15868_s5 + $0x624] ss:$16 sps:$4 sm:$0xff]  }
 0x41d   : > { %6155 = vmatpush1.bf16.msra.mxu0 %v10778_v45  ;;  %6607 = vmatpush1.bf16.msra.mxu1 %v10781_v50  ;;  %v4450_v14 = vpack.c.bf16 %v4386_v12, %v4378_v51  ;;  %v13528_v13 = vpack.c.bf16 %v4387_v28, %v4379_v3  ;;  %v10807_v17 = vld [vmem:[%s15868_s5 + $0x62c] ss:$16 sps:$4 sm:$0xff]   ;;  %v10802_v33 = vld [vmem:[%s15868_s5 + $0x620] ss:$16 sps:$4 sm:$0xff]   ;;  %v10810_v43 = vld [vmem:[%s15868_s5 + $0x644] ss:$16 sps:$4 sm:$0xff]  }
 0x41e   : > { %6156 = vmatprep.subr.bf16.mxu0 %v10786_v49  ;;  %6608 = vmatprep.subr.bf16.mxu1 %v10789_v29  ;;  %v13533_v7 = vpack.c.bf16 %v4388_v55, %v4380_v8  ;;  %v10805_v40 = vld [vmem:[%s15868_s5 + $0x628] ss:$16 sps:$4 sm:$0xff]   ;;  %v10816_v54 = vld [vmem:[%s15868_s5 + $0x664] ss:$16 sps:$4 sm:$0xff]   ;;  %v10819_v39 = vld [vmem:[%s15868_s5 + $0x66c] ss:$16 sps:$4 sm:$0xff]  }
 0x41f   : > { %6117 = vmatprep.mubr.bf16.mxu0 %v4450_v14  ;;  %6569 = vmatprep.mubr.bf16.mxu1 %v4450_v14  ;;  %v10811_v62 = vld [vmem:[%s15868_s5 + $0x648] ss:$16 sps:$4 sm:$0xff]   ;;  %v10814_v1 = vld [vmem:[%s15868_s5 + $0x660] ss:$16 sps:$4 sm:$0xff]   ;;  %v10822_v11 = vld [vmem:[%s15868_s5 + $0x684] ss:$16 sps:$4 sm:$0xff]  }
 0x420   : > { %6118 = vmatmul.mubr.bf16.gmra.mrb[140].mxu0 %v4449_v57  ;;  %6570 = vmatmul.mubr.bf16.gmra.mrb[156].mxu1 %v4449_v57  ;;  %v10817_v6 = vld [vmem:[%s15868_s5 + $0x668] ss:$16 sps:$4 sm:$0xff]   ;;  %v10828_v26 = vld [vmem:[%s15868_s5 + $0x6a4] ss:$16 sps:$4 sm:$0xff]   ;;  %v10831_v41 = vld [vmem:[%s15868_s5 + $0x6ac] ss:$16 sps:$4 sm:$0xff]  }
 0x421   : > { %6157 = vmatpush1.bf16.msra.mxu0 %v10784_v46  ;;  %6160 = vmatprep.mubr.bf16.mxu0 %v13201_v21  ;;  %v10823_v18 = vld [vmem:[%s15868_s5 + $0x688] ss:$16 sps:$4 sm:$0xff]   ;;  %v10826_v36 = vld [vmem:[%s15868_s5 + $0x6a0] ss:$16 sps:$4 sm:$0xff]   ;;  %v10834_v30 = vld [vmem:[%s15868_s5 + $0x6c4] ss:$16 sps:$4 sm:$0xff]  }
 0x422   : > { %6609 = vmatpush1.bf16.msra.mxu1 %v10787_v34  ;;  %6612 = vmatprep.mubr.bf16.mxu1 %v13201_v21  ;;  %v10799_v21 = vld [vmem:[%s15868_s5 + $0x608] ss:$16 sps:$4 sm:$0xff]   ;;  %v10840_v45 = vld [vmem:[%s15868_s5 + $0x6e4] ss:$16 sps:$4 sm:$0xff]   ;;  %v10843_v16 = vld [vmem:[%s15868_s5 + $0x6ec] ss:$16 sps:$4 sm:$0xff]  }
 0x423   : > { %6158 = vmatprep.subr.bf16.mxu0 %v10792_v25  ;;  %6610 = vmatprep.subr.bf16.mxu1 %v10795_v59  ;;  %v10829_v52 = vld [vmem:[%s15868_s5 + $0x6a8] ss:$16 sps:$4 sm:$0xff]   ;;  %v10838_v15 = vld [vmem:[%s15868_s5 + $0x6e0] ss:$16 sps:$4 sm:$0xff]   ;;  %v10846_v50 = vld [vmem:[%s15868_s5 + $0x704] ss:$16 sps:$4 sm:$0xff]  }
 0x424   : > { %v10835_v53 = vld [vmem:[%s15868_s5 + $0x6c8] ss:$16 sps:$4 sm:$0xff]   ;;  %v10852_v23 = vld [vmem:[%s15868_s5 + $0x724] ss:$16 sps:$4 sm:$0xff]   ;;  %v10855_v49 = vld [vmem:[%s15868_s5 + $0x72c] ss:$16 sps:$4 sm:$0xff]  }
 0x425   : > { %6159 = vmatpush1.bf16.msra.mxu0 %v10790_v32  ;;  %v10841_v9 = vld [vmem:[%s15868_s5 + $0x6e8] ss:$16 sps:$4 sm:$0xff]   ;;  %v10850_v29 = vld [vmem:[%s15868_s5 + $0x720] ss:$16 sps:$4 sm:$0xff]   ;;  %v10858_v3 = vld [vmem:[%s15868_s5 + $0x744] ss:$16 sps:$4 sm:$0xff]  }
 0x426   : > { %6611 = vmatpush1.bf16.msra.mxu1 %v10793_v63  ;;  %6241 = vmatprep.subr.bf16.mxu0 %v10798_v35  ;;  %v10847_v48 = vld [vmem:[%s15868_s5 + $0x708] ss:$16 sps:$4 sm:$0xff]   ;;  %v10864_v12 = vld [vmem:[%s15868_s5 + $0x764] ss:$16 sps:$4 sm:$0xff]   ;;  %v10867_v8 = vld [vmem:[%s15868_s5 + $0x76c] ss:$16 sps:$4 sm:$0xff]  }
 0x427   : > { %6693 = vmatprep.subr.bf16.mxu1 %v10801_v19  ;;  %v10853_v51 = vld [vmem:[%s15868_s5 + $0x728] ss:$16 sps:$4 sm:$0xff]   ;;  %v10862_v55 = vld [vmem:[%s15868_s5 + $0x760] ss:$16 sps:$4 sm:$0xff]   ;;  %v10870_v57 = vld [vmem:[%s15868_s5 + $0x784] ss:$16 sps:$4 sm:$0xff]  }
 0x428   : > { %6161 = vmatmul.mubr.bf16.vlgmr.msra.gmra.mrb[112].mxu0 %v13187_v47  ;;  %v10859_v28 = vld [vmem:[%s15868_s5 + $0x748] ss:$16 sps:$4 sm:$0xff]   ;;  %v16046_v46 = vld [vmem:[#allocation2_spill] sm:$0xff] }
 0x429   : > { %6242 = vmatpush1.bf16.msra.mxu0 %v10796_v31  ;;  %6613 = vmatmul.mubr.bf16.vlgmr.msra.gmra.mrb[128].mxu1 %v13187_v47  ;;  %v10813_v47 = vld [vmem:[%s15868_s5 + $0x64c] ss:$16 sps:$4 sm:$0xff]   ;;  %v10865_v14 = vld [vmem:[%s15868_s5 + $0x768] ss:$16 sps:$4 sm:$0xff]   ;;  %v1931_v34 = vsub.s32 4, %v16046_v46  ;;  %v1935_v25 = vsub.s32 5, %v16046_v46 }
 0x42a   : > { %6170 = vmatprep.mubr.bf16.mxu0 %v13247_v20  ;;  %6622 = vmatprep.mubr.bf16.mxu1 %v13247_v20  ;;  %v10808_v20 = vld [vmem:[%s15868_s5 + $0x640] ss:$16 sps:$4 sm:$0xff]   ;;  %v1939_v59 = vsub.s32 6, %v16046_v46  ;;  %v10871_v32 = vld [vmem:[%s15868_s5 + $0x788] ss:$16 sps:$4 sm:$0xff]   ;;  %v1943_v35 = vsub.s32 7, %v16046_v46 }
 0x42b   : > { %6694 = vmatpush1.bf16.msra.mxu1 %v10799_v21  ;;  %6243 = vmatprep.subr.bf16.mxu0 %v10804_v44  ;;  %v10876_v63 = vld [vmem:[%s15868_s5 + $0x7a4] ss:$16 sps:$4 sm:$0xff]   ;;  %v10879_v21 = vld [vmem:[%s15868_s5 + $0x7ac] ss:$16 sps:$4 sm:$0xff]   ;;  %v10874_v44 = vld [vmem:[%s15868_s5 + $0x7a0] ss:$16 sps:$4 sm:$0xff]  }
 0x42c   : > { %6695 = vmatprep.subr.bf16.mxu1 %v10807_v17  ;;  %v11108_v19 = vld [vmem:[%s15865_s2 + $0x7] sm:$0xff] }
 0x42d   : > { %6244 = vmatpush1.bf16.msra.mxu0 %v10802_v33  ;;  %v13740_v31 = vrot.slane %v11108_v19, %v1931_v34  ;;  %v13749_v17 = vrot.slane %v11108_v19, %v1935_v25  ;;  %v13753_v33 = vrot.slane %v11108_v19, %v1939_v59 }
 0x42e   : > { %6245 = vmatprep.subr.bf16.mxu0 %v10810_v43  ;;  %v10882_v43 = vld [vmem:[%s15868_s5 + $0x7c4] ss:$16 sps:$4 sm:$0xff]  }
 0x42f   : > { %6696 = vmatpush1.bf16.msra.mxu1 %v10805_v40 }
 0x430   : > { %6171 = vmatmul.mubr.bf16.gmra.mrb[116].mxu0 %v13274_v0  ;;  %6697 = vmatprep.subr.bf16.mxu1 %v10813_v47  ;;  %v10877_v47 = vld [vmem:[%s15868_s5 + $0x7a8] ss:$16 sps:$4 sm:$0xff]  }
 0x431   : > { %6246 = vmatpush1.bf16.msra.mxu0 %v10808_v20  ;;  %6623 = vmatmul.mubr.bf16.gmra.mrb[132].mxu1 %v13274_v0  ;;  %v10825_v0 = vld [vmem:[%s15868_s5 + $0x68c] ss:$16 sps:$4 sm:$0xff]  }
 0x432   : > { %6180 = vmatprep.mubr.bf16.mxu0 %v13298_v60  ;;  %6632 = vmatprep.mubr.bf16.mxu1 %v13298_v60  ;;  %v10820_v60 = vld [vmem:[%s15868_s5 + $0x680] ss:$16 sps:$4 sm:$0xff]  }
 0x433   : > { %6698 = vmatpush1.bf16.msra.mxu1 %v10811_v62  ;;  %6247 = vmatprep.subr.bf16.mxu0 %v10816_v54 }
 0x434   : > { %6699 = vmatprep.subr.bf16.mxu1 %v10819_v39 }
 0x435   : > { %6248 = vmatpush1.bf16.msra.mxu0 %v10814_v1 }
 0x436   : > { %6249 = vmatprep.subr.bf16.mxu0 %v10822_v11  ;;  %v10880_v11 = vld [vmem:[%s15868_s5 + $0x7c0] ss:$16 sps:$4 sm:$0xff]  }
 0x437   : > { %6700 = vmatpush1.bf16.msra.mxu1 %v10817_v6  ;;  %v10883_v6 = vld [vmem:[%s15868_s5 + $0x7c8] ss:$16 sps:$4 sm:$0xff]  }
 0x438   : > { %6181 = vmatmul.mubr.bf16.gmra.mrb[120].mxu0 %v13325_v27  ;;  %6701 = vmatprep.subr.bf16.mxu1 %v10825_v0 }
 0x439   : > { %6250 = vmatpush1.bf16.msra.mxu0 %v10820_v60  ;;  %6633 = vmatmul.mubr.bf16.gmra.mrb[136].mxu1 %v13325_v27  ;;  %v10837_v27 = vld [vmem:[%s15868_s5 + $0x6cc] ss:$16 sps:$4 sm:$0xff]  }
 0x43a   : > { %6190 = vmatprep.mubr.bf16.mxu0 %v13349_v5  ;;  %6642 = vmatprep.mubr.bf16.mxu1 %v13349_v5  ;;  %v10832_v5 = vld [vmem:[%s15868_s5 + $0x6c0] ss:$16 sps:$4 sm:$0xff]  }
 0x43b   : > { %6702 = vmatpush1.bf16.msra.mxu1 %v10823_v18  ;;  %6251 = vmatprep.subr.bf16.mxu0 %v10828_v26 }
 0x43c   : > { %6703 = vmatprep.subr.bf16.mxu1 %v10831_v41 }
 0x43d   : > { %6252 = vmatpush1.bf16.msra.mxu0 %v10826_v36  ;;  %v10888_v36 = vld [vmem:[%s15868_s5 + $0x7e4] ss:$16 sps:$4 sm:$0xff]  }
 0x43e   : > { %6253 = vmatprep.subr.bf16.mxu0 %v10834_v30 }
 0x43f   : > { %6704 = vmatpush1.bf16.msra.mxu1 %v10829_v52 }
 0x440   : > { %6191 = vmatmul.mubr.bf16.gmra.mrb[124].mxu0 %v13376_v58  ;;  %6705 = vmatprep.subr.bf16.mxu1 %v10837_v27 }
 0x441   : > { %6254 = vmatpush1.bf16.msra.mxu0 %v10832_v5  ;;  %6643 = vmatmul.mubr.bf16.gmra.mrb[140].mxu1 %v13376_v58  ;;  %v10849_v58 = vld [vmem:[%s15868_s5 + $0x70c] ss:$16 sps:$4 sm:$0xff]  }
 0x442   : > { %6200 = vmatprep.mubr.bf16.mxu0 %v13400_v42  ;;  %6652 = vmatprep.mubr.bf16.mxu1 %v13400_v42  ;;  %v10844_v42 = vld [vmem:[%s15868_s5 + $0x700] ss:$16 sps:$4 sm:$0xff]  }
 0x443   : > { %6706 = vmatpush1.bf16.msra.mxu1 %v10835_v53  ;;  %6255 = vmatprep.subr.bf16.mxu0 %v10840_v45  ;;  %v10891_v53 = vld [vmem:[%s15868_s5 + $0x7ec] ss:$16 sps:$4 sm:$0xff]  }
 0x444   : > { %6707 = vmatprep.subr.bf16.mxu1 %v10843_v16 }
 0x445   : > { %6256 = vmatpush1.bf16.msra.mxu0 %v10838_v15 }
 0x446   : > { %6257 = vmatprep.subr.bf16.mxu0 %v10846_v50 }
 0x447   : > { %6708 = vmatpush1.bf16.msra.mxu1 %v10841_v9 }
 0x448   : > { %6201 = vmatmul.mubr.bf16.gmra.mrb[128].mxu0 %v13427_v22  ;;  %6709 = vmatprep.subr.bf16.mxu1 %v10849_v58 }
 0x449   : > { %6258 = vmatpush1.bf16.msra.mxu0 %v10844_v42  ;;  %6653 = vmatmul.mubr.bf16.gmra.mrb[144].mxu1 %v13427_v22  ;;  %v10861_v22 = vld [vmem:[%s15868_s5 + $0x74c] ss:$16 sps:$4 sm:$0xff]  }
 0x44a   : > { %6210 = vmatprep.mubr.bf16.mxu0 %v13453_v61  ;;  %6662 = vmatprep.mubr.bf16.mxu1 %v13453_v61  ;;  %v10856_v61 = vld [vmem:[%s15868_s5 + $0x740] ss:$16 sps:$4 sm:$0xff]  }
 0x44b   : > { %6710 = vmatpush1.bf16.msra.mxu1 %v10847_v48  ;;  %6259 = vmatprep.subr.bf16.mxu0 %v10852_v23  ;;  %v10886_v48 = vld [vmem:[%s15868_s5 + $0x7e0] ss:$16 sps:$4 sm:$0xff]  }
 0x44c   : > { %6711 = vmatprep.subr.bf16.mxu1 %v10855_v49 }
 0x44d   : > { %6260 = vmatpush1.bf16.msra.mxu0 %v10850_v29 }
 0x44e   : > { %6261 = vmatprep.subr.bf16.mxu0 %v10858_v3  ;;  %v10894_v3 = vld [vmem:[%s15868_s5 + $0x804] ss:$16 sps:$4 sm:$0xff]  }
 0x44f   : > { %6712 = vmatpush1.bf16.msra.mxu1 %v10853_v51 }
 0x450   : > { %6211 = vmatmul.mubr.bf16.gmra.mrb[132].mxu0 %v13481_v10  ;;  %6713 = vmatprep.subr.bf16.mxu1 %v10861_v22 }
 0x451   : > { %6262 = vmatpush1.bf16.msra.mxu0 %v10856_v61  ;;  %6663 = vmatmul.mubr.bf16.gmra.mrb[148].mxu1 %v13481_v10  ;;  %v10873_v10 = vld [vmem:[%s15868_s5 + $0x78c] ss:$16 sps:$4 sm:$0xff]  }
 0x452   : > { %6220 = vmatprep.mubr.bf16.mxu0 %v13505_v24  ;;  %6672 = vmatprep.mubr.bf16.mxu1 %v13505_v24  ;;  %v10868_v24 = vld [vmem:[%s15868_s5 + $0x780] ss:$16 sps:$4 sm:$0xff]  }
 0x453   : > { %6714 = vmatpush1.bf16.msra.mxu1 %v10859_v28  ;;  %6263 = vmatprep.subr.bf16.mxu0 %v10864_v12 }
 0x454   : > { %6715 = vmatprep.subr.bf16.mxu1 %v10867_v8 }
 0x455   : > { %6264 = vmatpush1.bf16.msra.mxu0 %v10862_v55 }
 0x456   : > { %6265 = vmatprep.subr.bf16.mxu0 %v10870_v57 }
 0x457   : > { %6716 = vmatpush1.bf16.msra.mxu1 %v10865_v14 }
 0x458   : > { %6221 = vmatmul.mubr.bf16.gmra.mrb[136].mxu0 %v13523_v37  ;;  %6717 = vmatprep.subr.bf16.mxu1 %v10873_v10  ;;  %v10897_v10 = vld [vmem:[%s15868_s5 + $0x80c] ss:$16 sps:$4 sm:$0xff]  }
 0x459   : > { %6266 = vmatpush1.bf16.msra.mxu0 %v10868_v24  ;;  %6673 = vmatmul.mubr.bf16.gmra.mrb[152].mxu1 %v13523_v37  ;;  %v13758_v37 = vrot.slane %v11108_v19, %v1943_v35  ;;  %v10895_v35 = vld [vmem:[%s15868_s5 + $0x808] ss:$16 sps:$4 sm:$0xff]  }
 0x45a   : > { %6230 = vmatprep.mubr.bf16.mxu0 %v13533_v7  ;;  %6682 = vmatprep.mubr.bf16.mxu1 %v13533_v7  ;;  %v10885_v7 = vld [vmem:[%s15868_s5 + $0x7cc] ss:$16 sps:$4 sm:$0xff]  }
 0x45b   : > { %6718 = vmatpush1.bf16.msra.mxu1 %v10871_v32  ;;  %v3832_v40 = vpop.f32.mrb[80].mxu0  ;;  %6267 = vmatprep.subr.bf16.mxu0 %v10876_v63  ;;  %v10892_v63 = vld [vmem:[%s15868_s5 + $0x800] ss:$16 sps:$4 sm:$0xff]  }
 0x45c   : > { %v9940_v20 = vadd.f32 %v3832_v40, %v13740_v31  ;;  %v3834_v62 = vpop.f32.mrb[81].mxu0  ;;  %6719 = vmatprep.subr.bf16.mxu1 %v10879_v21 }
 0x45d   : > { %v4058_v54 = vpop.f32.mrb[96].mxu1  ;;  %v9941_v39 = vadd.f32 %v3834_v62, %v13749_v17  ;;  %6268 = vmatpush1.bf16.msra.mxu0 %v10874_v44  ;;  %v3836_v1 = vpop.f32.mrb[82].mxu0 }
 0x45e   : > { %v4141_v0 = vmul.f32 0.01, %v9940_v20  ;;  %v9972_v60 = vadd.f32 %v4058_v54, %v13753_v33  ;;  %v4060_v18 = vpop.f32.mrb[97].mxu1  ;;  %v9942_v26 = vadd.f32 %v3836_v1, %v13740_v31  ;;  %v3838_v41 = vpop.f32.mrb[83].mxu0  ;;  %6269 = vmatprep.subr.bf16.mxu0 %v10882_v43  ;;  %v10903_v1 = vld [vmem:[%s15868_s5 + $0x82c] ss:$16 sps:$4 sm:$0xff]  }
 0x45f   : > { %v4142_v30 = vmul.f32 0.01, %v9941_v39  ;;  %v9973_v52 = vadd.f32 %v4060_v18, %v13758_v37  ;;  %v4062_v27 = vpop.f32.mrb[98].mxu1  ;;  %6720 = vmatpush1.bf16.msra.mxu1 %v10877_v47  ;;  %v9943_v5 = vadd.f32 %v3838_v41, %v13749_v17 }
 0x460   : > { %v4143_v45 = vmul.f32 0.01, %v9972_v60  ;;  %v4149_v16 = vmul.f32 0.01, %v9942_v26  ;;  %v9974_v15 = vadd.f32 %v4062_v27, %v13753_v33  ;;  %v4064_v50 = vpop.f32.mrb[99].mxu1  ;;  %6231 = vmatmul.mubr.bf16.gmra.mrb[140].mxu0 %v13528_v13  ;;  %6721 = vmatprep.subr.bf16.mxu1 %v10885_v7  ;;  %v4269_v23 = vmax.f32 %v9940_v20, %v4141_v0 }
 0x461   : > { %v4144_v9 = vmul.f32 0.01, %v9973_v52  ;;  %v4150_v58 = vmul.f32 0.01, %v9943_v5  ;;  %v9975_v42 = vadd.f32 %v4064_v50, %v13758_v37  ;;  %6270 = vmatpush1.bf16.msra.mxu0 %v10880_v11  ;;  %6683 = vmatmul.mubr.bf16.gmra.mrb[156].mxu1 %v13528_v13  ;;  %v4270_v51 = vmax.f32 %v9941_v39, %v4142_v30  ;;  %v10889_v13 = vld [vmem:[%s15868_s5 + $0x7e8] ss:$16 sps:$4 sm:$0xff]  }
 0x462   : > { %v4277_v49 = vmax.f32 %v9942_v26, %v4149_v16  ;;  %v4151_v29 = vmul.f32 0.01, %v9974_v15  ;;  %6271 = vmatprep.subr.bf16.mxu0 %v10888_v36  ;;  %v4271_v12 = vmax.f32 %v9972_v60, %v4143_v45  ;;  %v10900_v20 = vld [vmem:[%s15868_s5 + $0x824] ss:$16 sps:$4 sm:$0xff]   ;;  %v10898_v30 = vld [vmem:[%s15868_s5 + $0x820] ss:$16 sps:$4 sm:$0xff]  }
 0x463   : > { %v4278_v22 = vmax.f32 %v9943_v5, %v4150_v58  ;;  %v4152_v61 = vmul.f32 0.01, %v9975_v42  ;;  %6722 = vmatpush1.bf16.msra.mxu1 %v10883_v6  ;;  %v3842_v28 = vpop.f32.mrb[84].mxu0  ;;  %v4272_v46 = vmax.f32 %v9973_v52, %v4144_v9  ;;  %v10901_v9 = vld [vmem:[%s15868_s5 + $0x828] ss:$16 sps:$4 sm:$0xff]  }
 0x464   : > { %v4397_v8 = vpack.c.bf16 %v4277_v49, %v4269_v23  ;;  %v4279_v55 = vmax.f32 %v9974_v15, %v4151_v29  ;;  %v9944_v57 = vadd.f32 %v3842_v28, %v13740_v31  ;;  %v3844_v14 = vpop.f32.mrb[85].mxu0  ;;  %6723 = vmatprep.subr.bf16.mxu1 %v10891_v53  ;;  %v10906_v53 = vld [vmem:[%s15868_s5 + $0x844] ss:$16 sps:$4 sm:$0xff]   ;;  %v10909_v29 = vld [vmem:[%s15868_s5 + $0x84c] ss:$16 sps:$4 sm:$0xff]  }
 0x465   : > { %v4280_v34 = vmax.f32 %v9975_v42, %v4152_v61  ;;  %v4068_v24 = vpop.f32.mrb[100].mxu1  ;;  %v9945_v25 = vadd.f32 %v3844_v14, %v13749_v17  ;;  %6272 = vmatpush1.bf16.msra.mxu0 %v10886_v48  ;;  %v3846_v59 = vpop.f32.mrb[86].mxu0  ;;  %v4398_v32 = vpack.c.bf16 %v4278_v22, %v4270_v51 }
 0x466   : > { %v13808_v19 = vpack.c.bf16 %v4279_v55, %v4271_v12  ;;  %v4157_v21 = vmul.f32 0.01, %v9944_v57  ;;  %v9976_v44 = vadd.f32 %v4068_v24, %v13753_v33  ;;  %v4070_v43 = vpop.f32.mrb[101].mxu1  ;;  %v9946_v40 = vadd.f32 %v3846_v59, %v13740_v31  ;;  %v3848_v47 = vpop.f32.mrb[87].mxu0  ;;  %6354 = vmatprep.subr.bf16.mxu0 %v10894_v3  ;;  %v10904_v12 = vld [vmem:[%s15868_s5 + $0x840] ss:$16 sps:$4 sm:$0xff]  }
 0x467   : > { %v4158_v62 = vmul.f32 0.01, %v9945_v25  ;;  %v13816_v7 = vadd.f32 %v4070_v43, %v13758_v37  ;;  %v4072_v54 = vpop.f32.mrb[102].mxu1  ;;  %6724 = vmatpush1.bf16.msra.mxu1 %v10889_v13  ;;  %v9947_v39 = vadd.f32 %v3848_v47, %v13749_v17  ;;  %6273 = vmatprep.mubr.bf16.mxu0 %v4398_v32  ;;  %v13822_v11 = vpack.c.bf16 %v4280_v34, %v4272_v46  ;;  %v10912_v34 = vld [vmem:[%s15868_s5 + $0x864] ss:$16 sps:$4 sm:$0xff]  }
 0x468   : > { %v4159_v6 = vmul.f32 0.01, %v9976_v44  ;;  %v4165_v0 = vmul.f32 0.01, %v9946_v40  ;;  %v9978_v60 = vadd.f32 %v4072_v54, %v13753_v33  ;;  %v4074_v18 = vpop.f32.mrb[103].mxu1  ;;  %6725 = vmatprep.mubr.bf16.mxu1 %v4398_v32  ;;  %6274 = vmatmul.mubr.bf16.vlgmr.msra.gmra.mrb[112].mxu0 %v4397_v8  ;;  %v4285_v52 = vmax.f32 %v9944_v57, %v4157_v21 }
 0x469   : > { %v4160_v26 = vmul.f32 0.01, %v13816_v7  ;;  %v4166_v41 = vmul.f32 0.01, %v9947_v39  ;;  %v9979_v36 = vadd.f32 %v4074_v18, %v13758_v37  ;;  %6355 = vmatpush1.bf16.msra.mxu0 %v10892_v63  ;;  %6806 = vmatprep.subr.bf16.mxu1 %v10897_v10  ;;  %v4286_v45 = vmax.f32 %v9945_v25, %v4158_v62  ;;  %v10910_v54 = vld [vmem:[%s15868_s5 + $0x860] ss:$16 sps:$4 sm:$0xff]  }
 0x46a   : > { %v4293_v27 = vmax.f32 %v9946_v40, %v4165_v0  ;;  %v4167_v5 = vmul.f32 0.01, %v9978_v60  ;;  %6726 = vmatmul.mubr.bf16.vlgmr.msra.gmra.mrb[128].mxu1 %v4397_v8  ;;  %6356 = vmatprep.subr.bf16.mxu0 %v10900_v20  ;;  %v4287_v58 = vmax.f32 %v9976_v44, %v4159_v6  ;;  %v10907_v8 = vld [vmem:[%s15868_s5 + $0x848] ss:$16 sps:$4 sm:$0xff]   ;;  %v10918_v0 = vld [vmem:[%s15868_s5 + $0x884] ss:$16 sps:$4 sm:$0xff]  }
 0x46b   : > { %v4294_v16 = vmax.f32 %v9947_v39, %v4166_v41  ;;  %v4168_v15 = vmul.f32 0.01, %v9979_v36  ;;  %6807 = vmatpush1.bf16.msra.mxu1 %v10895_v35  ;;  %v3852_v50 = vpop.f32.mrb[88].mxu0  ;;  %v4288_v3 = vmax.f32 %v13816_v7, %v4160_v26  ;;  %v10915_v35 = vld [vmem:[%s15868_s5 + $0x86c] ss:$16 sps:$4 sm:$0xff]  }
 0x46c   : > { %v4295_v42 = vmax.f32 %v9978_v60, %v4167_v5  ;;  %v9948_v48 = vadd.f32 %v3852_v50, %v13740_v31  ;;  %v3854_v23 = vpop.f32.mrb[89].mxu0  ;;  %6808 = vmatprep.subr.bf16.mxu1 %v10903_v1  ;;  %v4405_v49 = vpack.c.bf16 %v4293_v27, %v4285_v52 }
 0x46d   : > { %v4296_v51 = vmax.f32 %v9979_v36, %v4168_v15  ;;  %v4078_v22 = vpop.f32.mrb[104].mxu1  ;;  %v9949_v61 = vadd.f32 %v3854_v23, %v13749_v17  ;;  %6357 = vmatpush1.bf16.msra.mxu0 %v10898_v30  ;;  %v3856_v28 = vpop.f32.mrb[90].mxu0  ;;  %v4406_v13 = vpack.c.bf16 %v4294_v16, %v4286_v45  ;;  %v10913_v36 = vld [vmem:[%s15868_s5 + $0x868] ss:$16 sps:$4 sm:$0xff]   ;;  %v10921_v45 = vld [vmem:[%s15868_s5 + $0x88c] ss:$16 sps:$4 sm:$0xff]  }
 0x46e   : > { %v4173_v55 = vmul.f32 0.01, %v9948_v48  ;;  %v13849_v57 = vadd.f32 %v4078_v22, %v13753_v33  ;;  %v4080_v14 = vpop.f32.mrb[105].mxu1  ;;  %v9950_v10 = vadd.f32 %v3856_v28, %v13740_v31  ;;  %v3858_v46 = vpop.f32.mrb[91].mxu0  ;;  %6358 = vmatprep.subr.bf16.mxu0 %v10906_v53  ;;  %v13855_v24 = vpack.c.bf16 %v4295_v42, %v4287_v58  ;;  %v10919_v23 = vld [vmem:[%s15868_s5 + $0x888] ss:$16 sps:$4 sm:$0xff]  }
 0x46f   : > { %v4174_v25 = vmul.f32 0.01, %v9949_v61  ;;  %v13858_v59 = vadd.f32 %v4080_v14, %v13758_v37  ;;  %v4082_v32 = vpop.f32.mrb[106].mxu1  ;;  %6809 = vmatpush1.bf16.msra.mxu1 %v10901_v9  ;;  %v9951_v63 = vadd.f32 %v3858_v46, %v13749_v17  ;;  %6283 = vmatprep.mubr.bf16.mxu0 %v4406_v13  ;;  %v13864_v21 = vpack.c.bf16 %v4296_v51, %v4288_v3 }
 0x470   : > { %v4175_v44 = vmul.f32 0.01, %v13849_v57  ;;  %v4181_v43 = vmul.f32 0.01, %v9950_v10  ;;  %v9982_v40 = vadd.f32 %v4082_v32, %v13753_v33  ;;  %v4084_v47 = vpop.f32.mrb[107].mxu1  ;;  %6735 = vmatprep.mubr.bf16.mxu1 %v4406_v13  ;;  %6284 = vmatmul.mubr.bf16.gmra.mrb[116].mxu0 %v4405_v49  ;;  %v4301_v39 = vmax.f32 %v9948_v48, %v4173_v55 }
 0x471   : > { %v4176_v20 = vmul.f32 0.01, %v13858_v59  ;;  %v4182_v62 = vmul.f32 0.01, %v9951_v63  ;;  %v9983_v7 = vadd.f32 %v4084_v47, %v13758_v37  ;;  %6359 = vmatpush1.bf16.msra.mxu0 %v10904_v12  ;;  %6810 = vmatprep.subr.bf16.mxu1 %v10909_v29  ;;  %v4302_v60 = vmax.f32 %v9949_v61, %v4174_v25  ;;  %v10916_v48 = vld [vmem:[%s15868_s5 + $0x880] ss:$16 sps:$4 sm:$0xff]  }
 0x472   : > { %v4309_v1 = vmax.f32 %v9950_v10, %v4181_v43  ;;  %v4183_v6 = vmul.f32 0.01, %v9982_v40  ;;  %6736 = vmatmul.mubr.bf16.gmra.mrb[132].mxu1 %v4405_v49  ;;  %6360 = vmatprep.subr.bf16.mxu0 %v10912_v34  ;;  %v4303_v30 = vmax.f32 %v13849_v57, %v4175_v44  ;;  %v10924_v61 = vld [vmem:[%s15868_s5 + $0x8a4] ss:$16 sps:$4 sm:$0xff]   ;;  %v10927_v57 = vld [vmem:[%s15868_s5 + $0x8ac] ss:$16 sps:$4 sm:$0xff]  }
 0x473   : > { %v4310_v18 = vmax.f32 %v9951_v63, %v4182_v62  ;;  %v4184_v26 = vmul.f32 0.01, %v9983_v7  ;;  %6811 = vmatpush1.bf16.msra.mxu1 %v10907_v8  ;;  %v3862_v41 = vpop.f32.mrb[92].mxu0  ;;  %v4304_v16 = vmax.f32 %v13858_v59, %v4176_v20  ;;  %v10930_v47 = vld [vmem:[%s15868_s5 + $0x8c4] ss:$16 sps:$4 sm:$0xff]  }
 0x474   : > { %v4311_v52 = vmax.f32 %v9982_v40, %v4183_v6  ;;  %v9952_v27 = vadd.f32 %v3862_v41, %v13740_v31  ;;  %v3864_v5 = vpop.f32.mrb[93].mxu0  ;;  %6812 = vmatprep.subr.bf16.mxu1 %v10915_v35  ;;  %v4413_v53 = vpack.c.bf16 %v4309_v1, %v4301_v39  ;;  %v10922_v35 = vld [vmem:[%s15868_s5 + $0x8a0] ss:$16 sps:$4 sm:$0xff]   ;;  %v10925_v39 = vld [vmem:[%s15868_s5 + $0x8a8] ss:$16 sps:$4 sm:$0xff]  }
 0x475   : > { %v4312_v15 = vmax.f32 %v9983_v7, %v4184_v26  ;;  %v4088_v50 = vpop.f32.mrb[108].mxu1  ;;  %v9953_v9 = vadd.f32 %v3864_v5, %v13749_v17  ;;  %6361 = vmatpush1.bf16.msra.mxu0 %v10910_v54  ;;  %v3866_v58 = vpop.f32.mrb[94].mxu0  ;;  %v4414_v42 = vpack.c.bf16 %v4310_v18, %v4302_v60  ;;  %v10933_v26 = vld [vmem:[%s15868_s5 + $0x8cc] ss:$16 sps:$4 sm:$0xff]  }
 0x476   : > { %v4189_v49 = vmul.f32 0.01, %v9952_v27  ;;  %v13893_v29 = vadd.f32 %v4088_v50, %v13753_v33  ;;  %v4090_v3 = vpop.f32.mrb[109].mxu1  ;;  %v9954_v51 = vadd.f32 %v3866_v58, %v13740_v31  ;;  %v3868_v22 = vpop.f32.mrb[95].mxu0  ;;  %6362 = vmatprep.subr.bf16.mxu0 %v10918_v0  ;;  %v13899_v28 = vpack.c.bf16 %v4311_v52, %v4303_v30 }
 0x477   : > { %v4190_v13 = vmul.f32 0.01, %v9953_v9  ;;  %v13902_v12 = vadd.f32 %v4090_v3, %v13758_v37  ;;  %v4092_v8 = vpop.f32.mrb[110].mxu1  ;;  %6813 = vmatpush1.bf16.msra.mxu1 %v10913_v36  ;;  %v9955_v55 = vadd.f32 %v3868_v22, %v13749_v17  ;;  %6293 = vmatprep.mubr.bf16.mxu0 %v4414_v42  ;;  %v13908_v14 = vpack.c.bf16 %v4312_v15, %v4304_v16 }
 0x478   : > { %v4191_v10 = vmul.f32 0.01, %v13893_v29  ;;  %v4197_v46 = vmul.f32 0.01, %v9954_v51  ;;  %v9986_v34 = vadd.f32 %v4092_v8, %v13753_v33  ;;  %v4094_v25 = vpop.f32.mrb[111].mxu1  ;;  %6745 = vmatprep.mubr.bf16.mxu1 %v4414_v42  ;;  %6294 = vmatmul.mubr.bf16.gmra.mrb[120].mxu0 %v4413_v53  ;;  %v4317_v44 = vmax.f32 %v9952_v27, %v4189_v49 }
 0x479   : > { %v4192_v59 = vmul.f32 0.01, %v13902_v12  ;;  %v4198_v32 = vmul.f32 0.01, %v9955_v55  ;;  %v9987_v63 = vadd.f32 %v4094_v25, %v13758_v37  ;;  %6363 = vmatpush1.bf16.msra.mxu0 %v10916_v48  ;;  %6814 = vmatprep.subr.bf16.mxu1 %v10921_v45  ;;  %v4318_v20 = vmax.f32 %v9953_v9, %v4190_v13  ;;  %v10931_v45 = vld [vmem:[%s15868_s5 + $0x8c8] ss:$16 sps:$4 sm:$0xff]  }
 0x47a   : > { %v4325_v43 = vmax.f32 %v9954_v51, %v4197_v46  ;;  %v4199_v40 = vmul.f32 0.01, %v9986_v34  ;;  %6746 = vmatmul.mubr.bf16.gmra.mrb[136].mxu1 %v4413_v53  ;;  %6364 = vmatprep.subr.bf16.mxu0 %v10924_v61  ;;  %v4319_v1 = vmax.f32 %v13893_v29, %v4191_v10  ;;  %v10928_v53 = vld [vmem:[%s15868_s5 + $0x8c0] ss:$16 sps:$4 sm:$0xff]   ;;  %v10936_v42 = vld [vmem:[%s15868_s5 + $0x8e4] ss:$16 sps:$4 sm:$0xff]  }
 0x47b   : > { %v4326_v62 = vmax.f32 %v9955_v55, %v4198_v32  ;;  %v4200_v7 = vmul.f32 0.01, %v9987_v63  ;;  %6815 = vmatpush1.bf16.msra.mxu1 %v10919_v23  ;;  %v3872_v54 = vpop.f32.mrb[96].mxu0  ;;  %v4320_v41 = vmax.f32 %v13902_v12, %v4192_v59  ;;  %v10939_v51 = vld [vmem:[%s15868_s5 + $0x8ec] ss:$16 sps:$4 sm:$0xff]  }
 0x47c   : > { %v4327_v6 = vmax.f32 %v9986_v34, %v4199_v40  ;;  %v9956_v0 = vadd.f32 %v3872_v54, %v13740_v31  ;;  %v3874_v60 = vpop.f32.mrb[97].mxu0  ;;  %6816 = vmatprep.subr.bf16.mxu1 %v10927_v57  ;;  %v4421_v18 = vpack.c.bf16 %v4325_v43, %v4317_v44  ;;  %v10934_v46 = vld [vmem:[%s15868_s5 + $0x8e0] ss:$16 sps:$4 sm:$0xff]   ;;  %v10942_v32 = vld [vmem:[%s15868_s5 + $0x904] ss:$16 sps:$4 sm:$0xff]  }
 0x47d   : > { %v4328_v36 = vmax.f32 %v9987_v63, %v4200_v7  ;;  %v4098_v30 = vpop.f32.mrb[112].mxu1  ;;  %v9957_v52 = vadd.f32 %v3874_v60, %v13749_v17  ;;  %6365 = vmatpush1.bf16.msra.mxu0 %v10922_v35  ;;  %v3876_v27 = vpop.f32.mrb[98].mxu0  ;;  %v4422_v5 = vpack.c.bf16 %v4326_v62, %v4318_v20  ;;  %v10937_v40 = vld [vmem:[%s15868_s5 + $0x8e8] ss:$16 sps:$4 sm:$0xff]  }
 0x47e   : > { %v4205_v16 = vmul.f32 0.01, %v9956_v0  ;;  %v13937_v15 = vadd.f32 %v4098_v30, %v13753_v33  ;;  %v4100_v50 = vpop.f32.mrb[113].mxu1  ;;  %v9958_v9 = vadd.f32 %v3876_v27, %v13740_v31  ;;  %v3878_v58 = vpop.f32.mrb[99].mxu0  ;;  %6366 = vmatprep.subr.bf16.mxu0 %v10930_v47  ;;  %v13943_v48 = vpack.c.bf16 %v4327_v6, %v4319_v1 }
 0x47f   : > { %v4206_v23 = vmul.f32 0.01, %v9957_v52  ;;  %v13946_v49 = vadd.f32 %v4100_v50, %v13758_v37  ;;  %v4102_v29 = vpop.f32.mrb[114].mxu1  ;;  %6817 = vmatpush1.bf16.msra.mxu1 %v10925_v39  ;;  %v9959_v3 = vadd.f32 %v3878_v58, %v13749_v17  ;;  %6303 = vmatprep.mubr.bf16.mxu0 %v4422_v5  ;;  %v13952_v22 = vpack.c.bf16 %v4328_v36, %v4320_v41  ;;  %v10945_v39 = vld [vmem:[%s15868_s5 + $0x90c] ss:$16 sps:$4 sm:$0xff]  }
 0x480   : > { %v4207_v61 = vmul.f32 0.01, %v13937_v15  ;;  %v4213_v13 = vmul.f32 0.01, %v9958_v9  ;;  %v9990_v12 = vadd.f32 %v4102_v29, %v13753_v33  ;;  %v4104_v8 = vpop.f32.mrb[115].mxu1  ;;  %6755 = vmatprep.mubr.bf16.mxu1 %v4422_v5  ;;  %6304 = vmatmul.mubr.bf16.gmra.mrb[124].mxu0 %v4421_v18  ;;  %v4333_v34 = vmax.f32 %v9956_v0, %v4205_v16 }
 0x481   : > { %v4208_v55 = vmul.f32 0.01, %v13946_v49  ;;  %v4214_v57 = vmul.f32 0.01, %v9959_v3  ;;  %v9991_v10 = vadd.f32 %v4104_v8, %v13758_v37  ;;  %6367 = vmatpush1.bf16.msra.mxu0 %v10928_v53  ;;  %6818 = vmatprep.subr.bf16.mxu1 %v10933_v26  ;;  %v4334_v63 = vmax.f32 %v9957_v52, %v4206_v23  ;;  %v10940_v41 = vld [vmem:[%s15868_s5 + $0x900] ss:$16 sps:$4 sm:$0xff]  }
 0x482   : > { %v4341_v25 = vmax.f32 %v9958_v9, %v4213_v13  ;;  %v4215_v59 = vmul.f32 0.01, %v9990_v12  ;;  %6756 = vmatmul.mubr.bf16.gmra.mrb[140].mxu1 %v4421_v18  ;;  %6368 = vmatprep.subr.bf16.mxu0 %v10936_v42  ;;  %v4335_v47 = vmax.f32 %v13937_v15, %v4207_v61  ;;  %v10943_v36 = vld [vmem:[%s15868_s5 + $0x908] ss:$16 sps:$4 sm:$0xff]   ;;  %v10951_v42 = vld [vmem:[%s15868_s5 + $0x92c] ss:$16 sps:$4 sm:$0xff]  }
 0x483   : > { %v4342_v35 = vmax.f32 %v9959_v3, %v4214_v57  ;;  %v4216_v44 = vmul.f32 0.01, %v9991_v10  ;;  %6819 = vmatpush1.bf16.msra.mxu1 %v10931_v45  ;;  %v3882_v43 = vpop.f32.mrb[100].mxu0  ;;  %v4336_v1 = vmax.f32 %v13946_v49, %v4208_v55  ;;  %v10948_v45 = vld [vmem:[%s15868_s5 + $0x924] ss:$16 sps:$4 sm:$0xff]  }
 0x484   : > { %v4343_v20 = vmax.f32 %v9990_v12, %v4215_v59  ;;  %v9960_v62 = vadd.f32 %v3882_v43, %v13740_v31  ;;  %v3884_v7 = vpop.f32.mrb[101].mxu0  ;;  %6820 = vmatprep.subr.bf16.mxu1 %v10939_v51  ;;  %v4429_v54 = vpack.c.bf16 %v4341_v25, %v4333_v34  ;;  %v10946_v8 = vld [vmem:[%s15868_s5 + $0x920] ss:$16 sps:$4 sm:$0xff]  }
 0x485   : > { %v4344_v6 = vmax.f32 %v9991_v10, %v4216_v44  ;;  %v4108_v0 = vpop.f32.mrb[116].mxu1  ;;  %v9961_v60 = vadd.f32 %v3884_v7, %v13749_v17  ;;  %6369 = vmatpush1.bf16.msra.mxu0 %v10934_v46  ;;  %v3886_v18 = vpop.f32.mrb[102].mxu0  ;;  %v4430_v26 = vpack.c.bf16 %v4342_v35, %v4334_v63  ;;  %v10954_v46 = vld [vmem:[%s15868_s5 + $0x944] ss:$16 sps:$4 sm:$0xff]   ;;  %v10949_v63 = vld [vmem:[%s15868_s5 + $0x928] ss:$16 sps:$4 sm:$0xff]  }
 0x486   : > { %v4221_v30 = vmul.f32 0.01, %v9960_v62  ;;  %v13981_v52 = vadd.f32 %v4108_v0, %v13753_v33  ;;  %v4110_v27 = vpop.f32.mrb[117].mxu1  ;;  %v9962_v5 = vadd.f32 %v3886_v18, %v13740_v31  ;;  %v3888_v53 = vpop.f32.mrb[103].mxu0  ;;  %6370 = vmatprep.subr.bf16.mxu0 %v10942_v32  ;;  %v13987_v16 = vpack.c.bf16 %v4343_v20, %v4335_v47  ;;  %v10957_v20 = vld [vmem:[%s15868_s5 + $0x94c] ss:$16 sps:$4 sm:$0xff]  }
 0x487   : > { %v4222_v15 = vmul.f32 0.01, %v9961_v60  ;;  %v13990_v50 = vadd.f32 %v4110_v27, %v13758_v37  ;;  %v4112_v9 = vpop.f32.mrb[118].mxu1  ;;  %6821 = vmatpush1.bf16.msra.mxu1 %v10937_v40  ;;  %v9963_v58 = vadd.f32 %v3888_v53, %v13749_v17  ;;  %6313 = vmatprep.mubr.bf16.mxu0 %v4430_v26  ;;  %v13996_v23 = vpack.c.bf16 %v4344_v6, %v4336_v1  ;;  %v10952_v0 = vld [vmem:[%s15868_s5 + $0x940] ss:$16 sps:$4 sm:$0xff]  }
 0x488   : > { %v4223_v49 = vmul.f32 0.01, %v13981_v52  ;;  %v4229_v29 = vmul.f32 0.01, %v9962_v5  ;;  %v9994_v3 = vadd.f32 %v4112_v9, %v13753_v33  ;;  %v4114_v51 = vpop.f32.mrb[119].mxu1  ;;  %6765 = vmatprep.mubr.bf16.mxu1 %v4430_v26  ;;  %6314 = vmatmul.mubr.bf16.gmra.mrb[128].mxu0 %v4429_v54  ;;  %v4349_v55 = vmax.f32 %v9960_v62, %v4221_v30 }
 0x489   : > { %v4224_v61 = vmul.f32 0.01, %v13990_v50  ;;  %v4230_v13 = vmul.f32 0.01, %v9963_v58  ;;  %v9995_v12 = vadd.f32 %v4114_v51, %v13758_v37  ;;  %6371 = vmatpush1.bf16.msra.mxu0 %v10940_v41  ;;  %6822 = vmatprep.subr.bf16.mxu1 %v10945_v39  ;;  %v4350_v34 = vmax.f32 %v9961_v60, %v4222_v15  ;;  %v10955_v60 = vld [vmem:[%s15868_s5 + $0x948] ss:$16 sps:$4 sm:$0xff]  }
 0x48a   : > { %v4357_v57 = vmax.f32 %v9962_v5, %v4229_v29  ;;  %v4231_v10 = vmul.f32 0.01, %v9994_v3  ;;  %6766 = vmatmul.mubr.bf16.gmra.mrb[144].mxu1 %v4429_v54  ;;  %6372 = vmatprep.subr.bf16.mxu0 %v10948_v45  ;;  %v4351_v35 = vmax.f32 %v13981_v52, %v4223_v49  ;;  %v10960_v52 = vld [vmem:[%s15868_s5 + $0x964] ss:$16 sps:$4 sm:$0xff]  }
 0x48b   : > { %v4358_v25 = vmax.f32 %v9963_v58, %v4230_v13  ;;  %v4232_v59 = vmul.f32 0.01, %v9995_v12  ;;  %6823 = vmatpush1.bf16.msra.mxu1 %v10943_v36  ;;  %v3892_v32 = vpop.f32.mrb[104].mxu0  ;;  %v4352_v62 = vmax.f32 %v13990_v50, %v4224_v61  ;;  %v10963_v50 = vld [vmem:[%s15868_s5 + $0x96c] ss:$16 sps:$4 sm:$0xff]  }
 0x48c   : > { %v4359_v44 = vmax.f32 %v9994_v3, %v4231_v10  ;;  %v9964_v43 = vadd.f32 %v3892_v32, %v13740_v31  ;;  %v3894_v40 = vpop.f32.mrb[105].mxu0  ;;  %6824 = vmatprep.subr.bf16.mxu1 %v10951_v42  ;;  %v4437_v47 = vpack.c.bf16 %v4357_v57, %v4349_v55  ;;  %v10958_v13 = vld [vmem:[%s15868_s5 + $0x960] ss:$16 sps:$4 sm:$0xff]   ;;  %v10966_v57 = vld [vmem:[%s15868_s5 + $0x984] ss:$16 sps:$4 sm:$0xff]  }
 0x48d   : > { %v4360_v7 = vmax.f32 %v9995_v12, %v4232_v59  ;;  %v4118_v54 = vpop.f32.mrb[120].mxu1  ;;  %v9965_v39 = vadd.f32 %v3894_v40, %v13749_v17  ;;  %6373 = vmatpush1.bf16.msra.mxu0 %v10946_v8  ;;  %v3896_v1 = vpop.f32.mrb[106].mxu0  ;;  %v4438_v6 = vpack.c.bf16 %v4358_v25, %v4350_v34  ;;  %v10961_v59 = vld [vmem:[%s15868_s5 + $0x968] ss:$16 sps:$4 sm:$0xff]   ;;  %v10969_v40 = vld [vmem:[%s15868_s5 + $0x98c] ss:$16 sps:$4 sm:$0xff]  }
 0x48e   : > { %v4237_v18 = vmul.f32 0.01, %v9964_v43  ;;  %v14025_v26 = vadd.f32 %v4118_v54, %v13753_v33  ;;  %v4120_v41 = vpop.f32.mrb[121].mxu1  ;;  %v9966_v36 = vadd.f32 %v3896_v1, %v13740_v31  ;;  %v3898_v30 = vpop.f32.mrb[107].mxu0  ;;  %6374 = vmatprep.subr.bf16.mxu0 %v10954_v46  ;;  %v14031_v27 = vpack.c.bf16 %v4359_v44, %v4351_v35  ;;  %v10964_v1 = vld [vmem:[%s15868_s5 + $0x980] ss:$16 sps:$4 sm:$0xff]  }
 0x48f   : > { %v4238_v5 = vmul.f32 0.01, %v9965_v39  ;;  %v14034_v53 = vadd.f32 %v4120_v41, %v13758_v37  ;;  %v4122_v45 = vpop.f32.mrb[122].mxu1  ;;  %6825 = vmatpush1.bf16.msra.mxu1 %v10949_v63  ;;  %v9967_v15 = vadd.f32 %v3898_v30, %v13749_v17  ;;  %6323 = vmatprep.mubr.bf16.mxu0 %v4438_v6  ;;  %v14040_v9 = vpack.c.bf16 %v4360_v7, %v4352_v62 }
 0x490   : > { %v4239_v58 = vmul.f32 0.01, %v14025_v26  ;;  %v4245_v42 = vmul.f32 0.01, %v9966_v36  ;;  %v9998_v49 = vadd.f32 %v4122_v45, %v13753_v33  ;;  %v4124_v29 = vpop.f32.mrb[123].mxu1  ;;  %6775 = vmatprep.mubr.bf16.mxu1 %v4438_v6  ;;  %6324 = vmatmul.mubr.bf16.gmra.mrb[132].mxu0 %v4437_v47  ;;  %v4365_v12 = vmax.f32 %v9964_v43, %v4237_v18 }
 0x491   : > { %v4240_v3 = vmul.f32 0.01, %v14034_v53  ;;  %v4246_v51 = vmul.f32 0.01, %v9967_v15  ;;  %v9999_v61 = vadd.f32 %v4124_v29, %v13758_v37  ;;  %6375 = vmatpush1.bf16.msra.mxu0 %v10952_v0  ;;  %6826 = vmatprep.subr.bf16.mxu1 %v10957_v20  ;;  %v4366_v10 = vmax.f32 %v9965_v39, %v4238_v5  ;;  %v10967_v6 = vld [vmem:[%s15868_s5 + $0x988] ss:$16 sps:$4 sm:$0xff]  }
 0x492   : > { %v4373_v8 = vmax.f32 %v9966_v36, %v4245_v42  ;;  %v4247_v55 = vmul.f32 0.01, %v9998_v49  ;;  %6776 = vmatmul.mubr.bf16.gmra.mrb[148].mxu1 %v4437_v47  ;;  %6376 = vmatprep.subr.bf16.mxu0 %v10960_v52  ;;  %v4367_v32 = vmax.f32 %v14025_v26, %v4239_v58  ;;  %v10972_v36 = vld [vmem:[%s15868_s5 + $0x9a4] ss:$16 sps:$4 sm:$0xff]  }
 0x493   : > { %v4374_v46 = vmax.f32 %v9967_v15, %v4246_v51  ;;  %v4248_v34 = vmul.f32 0.01, %v9999_v61  ;;  %6827 = vmatpush1.bf16.msra.mxu1 %v10955_v60  ;;  %v3902_v25 = vpop.f32.mrb[108].mxu0  ;;  %v4368_v47 = vmax.f32 %v14034_v53, %v4240_v3 }
 0x494   : > { %v4375_v63 = vmax.f32 %v9998_v49, %v4247_v55  ;;  %v9968_v35 = vadd.f32 %v3902_v25, %v13740_v31  ;;  %v3904_v44 = vpop.f32.mrb[109].mxu0  ;;  %6828 = vmatprep.subr.bf16.mxu1 %v10963_v50  ;;  %v4445_v43 = vpack.c.bf16 %v4373_v8, %v4365_v12 }
 0x495   : > { %v4376_v20 = vmax.f32 %v9999_v61, %v4248_v34  ;;  %v4128_v62 = vpop.f32.mrb[124].mxu1  ;;  %v9969_v7 = vadd.f32 %v3904_v44, %v13749_v17  ;;  %6377 = vmatpush1.bf16.msra.mxu0 %v10958_v13  ;;  %v3906_v54 = vpop.f32.mrb[110].mxu0  ;;  %v4446_v39 = vpack.c.bf16 %v4374_v46, %v4366_v10 }
 0x496   : > { %v4253_v0 = vmul.f32 0.01, %v9968_v35  ;;  %v10000_v60 = vadd.f32 %v4128_v62, %v13753_v33  ;;  %v4130_v18 = vpop.f32.mrb[125].mxu1  ;;  %v9970_v26 = vadd.f32 %v3906_v54, %v13740_v31  ;;  %v3908_v41 = vpop.f32.mrb[111].mxu0  ;;  %6378 = vmatprep.subr.bf16.mxu0 %v10966_v57  ;;  %v14073_v30 = vpack.c.bf16 %v4375_v63, %v4367_v32  ;;  %v10975_v31 = vld [vmem:[%s15868_s5 + $0x9ac] ss:$16 sps:$4 sm:$0xff]  }
 0x497   : > { %v4254_v52 = vmul.f32 0.01, %v9969_v7  ;;  %v10001_v5 = vadd.f32 %v4130_v18, %v13758_v37  ;;  %v4132_v53 = vpop.f32.mrb[126].mxu1  ;;  %6829 = vmatpush1.bf16.msra.mxu1 %v10961_v59  ;;  %v9971_v45 = vadd.f32 %v3908_v41, %v13749_v17  ;;  %6333 = vmatprep.mubr.bf16.mxu0 %v4446_v39  ;;  %v14080_v15 = vpack.c.bf16 %v4376_v20, %v4368_v47  ;;  %v10970_v17 = vld [vmem:[%s15868_s5 + $0x9a0] ss:$16 sps:$4 sm:$0xff]  }
 0x498   : > { %v4255_v50 = vmul.f32 0.01, %v10000_v60  ;;  %v4261_v58 = vmul.f32 0.01, %v9970_v26  ;;  %v10002_v42 = vadd.f32 %v4132_v53, %v13753_v33  ;;  %v4134_v49 = vpop.f32.mrb[127].mxu1  ;;  %6785 = vmatprep.mubr.bf16.mxu1 %v4446_v39  ;;  %6334 = vmatmul.mubr.bf16.gmra.mrb[136].mxu0 %v4445_v43  ;;  %v4381_v61 = vmax.f32 %v9968_v35, %v4253_v0 }
 0x499   : > { %v4256_v29 = vmul.f32 0.01, %v10001_v5  ;;  %v4262_v3 = vmul.f32 0.01, %v9971_v45  ;;  %v10003_v51 = vadd.f32 %v4134_v49, %v13758_v37  ;;  %6379 = vmatpush1.bf16.msra.mxu0 %v10964_v1  ;;  %6830 = vmatprep.subr.bf16.mxu1 %v10969_v40  ;;  %v10978_v33 = vld [vmem:[%s15868_s5 + $0x9c4] ss:$16 sps:$4 sm:$0xff]   ;;  %v4382_v8 = vmax.f32 %v9969_v7, %v4254_v52 }
 0x49a   : > { %v4389_v13 = vmax.f32 %v9970_v26, %v4261_v58  ;;  %v4263_v12 = vmul.f32 0.01, %v10002_v42  ;;  %6786 = vmatmul.mubr.bf16.gmra.mrb[152].mxu1 %v4445_v43  ;;  %6380 = vmatprep.subr.bf16.mxu0 %v10972_v36  ;;  %v10973_v37 = vld [vmem:[%s15868_s5 + $0x9a8] ss:$16 sps:$4 sm:$0xff]   ;;  %v4383_v10 = vmax.f32 %v10000_v60, %v4255_v50  ;;  %v10976_v63 = vld [vmem:[%s15868_s5 + $0x9c0] ss:$16 sps:$4 sm:$0xff]  }
 0x49b   : > { %v4390_v55 = vmax.f32 %v9971_v45, %v4262_v3  ;;  %v4264_v57 = vmul.f32 0.01, %v10003_v51  ;;  %6831 = vmatpush1.bf16.msra.mxu1 %v10967_v6  ;;  %v4384_v25 = vmax.f32 %v10001_v5, %v4256_v29  ;;  %v10981_v35 = vld [vmem:[%s15868_s5 + $0x9cc] ss:$16 sps:$4 sm:$0xff]   ;;  %v10979_v43 = vld [vmem:[%s15868_s5 + $0x9c8] ss:$16 sps:$4 sm:$0xff]  }
 0x49c   : > { %v4391_v46 = vmax.f32 %v10002_v42, %v4263_v12  ;;  %6832 = vmatprep.subr.bf16.mxu1 %v10975_v31  ;;  %v4453_v34 = vpack.c.bf16 %v4389_v13, %v4381_v61  ;;  %v10984_v47 = vld [vmem:[%s15868_s5 + $0x9e4] ss:$16 sps:$4 sm:$0xff]   ;;  %v10987_v20 = vld [vmem:[%s15868_s5 + $0x9ec] ss:$16 sps:$4 sm:$0xff]   ;;  %v10982_v62 = vld [vmem:[%s15868_s5 + $0x9e0] ss:$16 sps:$4 sm:$0xff]  }
 0x49d   : > { %v4392_v59 = vmax.f32 %v10003_v51, %v4264_v57  ;;  %6381 = vmatpush1.bf16.msra.mxu0 %v10970_v17  ;;  %v4454_v32 = vpack.c.bf16 %v4390_v55, %v4382_v8  ;;  %v10990_v7 = vld [vmem:[%s15867_s4 + $0x84] ss:$8 sps:$4 sm:$0xff]   ;;  %v10985_v54 = vld [vmem:[%s15868_s5 + $0x9e8] ss:$16 sps:$4 sm:$0xff]   ;;  %v10993_v1 = vld [vmem:[%s15867_s4 + $0x94] ss:$8 sps:$4 sm:$0xff]  }
 0x49e   : > { %6382 = vmatprep.subr.bf16.mxu0 %v10978_v33  ;;  %v14099_v44 = vpack.c.bf16 %v4391_v46, %v4383_v10  ;;  %v10988_v39 = vld [vmem:[%s15867_s4 + $0x80] ss:$8 sps:$4 sm:$0xff]   ;;  %v10996_v6 = vld [vmem:[%s15867_s4 + $0xa4] ss:$8 sps:$4 sm:$0xff]   ;;  %v10999_v60 = vld [vmem:[%s15867_s4 + $0xb4] ss:$8 sps:$4 sm:$0xff]  }
 0x49f   : > { %6833 = vmatpush1.bf16.msra.mxu1 %v10973_v37  ;;  %6343 = vmatprep.mubr.bf16.mxu0 %v4454_v32  ;;  %v14104_v40 = vpack.c.bf16 %v4392_v59, %v4384_v25  ;;  %v10994_v0 = vld [vmem:[%s15867_s4 + $0xa0] ss:$8 sps:$4 sm:$0xff]   ;;  %v11005_v26 = vld [vmem:[%s15867_s4 + $0xd4] ss:$8 sps:$4 sm:$0xff]   ;;  %v11033_v42 = vld [vmem:[%s15867_s4 + $0x170] ss:$8 sps:$4 sm:$0xff]  }
 0x4a0   : > { %6795 = vmatprep.mubr.bf16.mxu1 %v4454_v32  ;;  %6344 = vmatmul.mubr.bf16.gmra.mrb[140].mxu0 %v4453_v34  ;;  %v11000_v18 = vld [vmem:[%s15867_s4 + $0xc0] ss:$8 sps:$4 sm:$0xff]   ;;  %v11011_v36 = vld [vmem:[%s15867_s4 + $0xf4] ss:$8 sps:$4 sm:$0xff]   ;;  %v11038_v49 = vld [vmem:[%s15867_s4 + $0x184] ss:$8 sps:$4 sm:$0xff]  }
 0x4a1   : > { %6383 = vmatpush1.bf16.msra.mxu0 %v10976_v63  ;;  %6834 = vmatprep.subr.bf16.mxu1 %v10981_v35  ;;  %v11006_v41 = vld [vmem:[%s15867_s4 + $0xe0] ss:$8 sps:$4 sm:$0xff]   ;;  %v11017_v5 = vld [vmem:[%s15867_s4 + $0x114] ss:$8 sps:$4 sm:$0xff]   ;;  %v4713_v29 = vld [vmem:[%s15865_s2 + $0xf] sm:$0xf] }
 0x4a2   : > { %6796 = vmatmul.mubr.bf16.gmra.mrb[156].mxu1 %v4453_v34  ;;  %6386 = vmatprep.mubr.bf16.mxu0 %v13822_v11  ;;  %v11012_v52 = vld [vmem:[%s15867_s4 + $0x100] ss:$8 sps:$4 sm:$0xff]   ;;  %v11023_v45 = vld [vmem:[%s15867_s4 + $0x134] ss:$8 sps:$4 sm:$0xff]   ;;  %v14253_v3 = vrot.slane %v4713_v29, %v16042_v4  ;;  %v14256_v51 = vrot.slane %v4713_v29, %v16044_v56  ;;  %v14259_v17 = vrot.slane %v4713_v29, %v16043_v38 }
 0x4a3   : > { %6835 = vmatpush1.bf16.msra.mxu1 %v10979_v43  ;;  %6838 = vmatprep.mubr.bf16.mxu1 %v13822_v11  ;;  %v10991_v11 = vld [vmem:[%s15867_s4 + $0x90] ss:$8 sps:$4 sm:$0xff]   ;;  %v11018_v53 = vld [vmem:[%s15867_s4 + $0x120] ss:$8 sps:$4 sm:$0xff]   ;;  %v11035_v58 = vld [vmem:[%s15867_s4 + $0x174] ss:$8 sps:$4 sm:$0xff]   ;;  %v14262_v13 = vrot.slane %v4713_v29, %v16045_v2 }
 0x4a4   : > { %6384 = vmatprep.subr.bf16.mxu0 %v10984_v47  ;;  %6836 = vmatprep.subr.bf16.mxu1 %v10987_v20  ;;  %v11024_v31 = vld [vmem:[%s15867_s4 + $0x140] ss:$8 sps:$4 sm:$0xff]  }
 0x4a5   : > { %6385 = vmatpush1.bf16.msra.mxu0 %v10982_v62  ;;  %v11030_v50 = vld [vmem:[%s15867_s4 + $0x160] ss:$8 sps:$4 sm:$0xff]  }
 0x4a6   : > { %7475 = vmatprep.subr.bf16.mxu0 %v10990_v7  ;;  %v11084_v62 = vld [vmem:[%s15866_s3 + $0x60] sm:$0xff]  }
 0x4a7   : > { %6837 = vmatpush1.bf16.msra.mxu1 %v10985_v54  ;;  %v11085_v7 = vld [vmem:[%s15866_s3 + $0x20] sm:$0xff]  }
 0x4a8   : > { %6387 = vmatmul.mubr.bf16.vlgmr.msra.gmra.mrb[112].mxu0 %v13808_v19  ;;  %9740 = vmatprep.subr.bf16.mxu1 %v11084_v62  ;;  %v11089_v62 = vld [vmem:[%s15866_s3 + $0x30] sm:$0xff]  }
 0x4a9   : > { %6396 = vmatprep.mubr.bf16.mxu0 %v13864_v21  ;;  %7476 = vmatpush1.bf16.msra.mxu0 %v10988_v39 }
 0x4aa   : > { %6839 = vmatmul.mubr.bf16.vlgmr.msra.gmra.mrb[128].mxu1 %v13808_v19  ;;  %7477 = vmatprep.subr.bf16.mxu0 %v10993_v1  ;;  %v10997_v19 = vld [vmem:[%s15867_s4 + $0xb0] ss:$8 sps:$4 sm:$0xff]  }
 0x4ab   : > { %6848 = vmatprep.mubr.bf16.mxu1 %v13864_v21  ;;  %v11002_v21 = vld [vmem:[%s15867_s4 + $0xc4] ss:$8 sps:$4 sm:$0xff]   ;;  %9741 = vmatpush3.bf16.msra.mxu1 %v11085_v7 }
 0x4ad   : > { %7478 = vmatpush1.bf16.msra.mxu0 %v10991_v11 }
 0x4ae   : > { %7479 = vmatprep.subr.bf16.mxu0 %v10996_v6  ;;  %v14287_v6 = vld [vmem:[%s14278_s22 + $0x10] sm:$0xff] }
 0x4af   : > { %8247 = vperm.xlu1 %10465, %v14287_v6   ;;  %vm8306_vm4 = vcmp.gt.s32.totalorder %v14287_v6, 0 }
 0x4b0   : > { %6397 = vmatmul.mubr.bf16.gmra.mrb[116].mxu0 %v13855_v24 }
 0x4b1   : > { %6406 = vmatprep.mubr.bf16.mxu0 %v13908_v14  ;;  %7480 = vmatpush1.bf16.msra.mxu0 %v10994_v0  ;;  %v14290_v0 = vld [vmem:[%s14278_s22] sm:$0xff] }
 0x4b2   : > { %6849 = vmatmul.mubr.bf16.gmra.mrb[132].mxu1 %v13855_v24  ;;  %7481 = vmatprep.subr.bf16.mxu0 %v10999_v60  ;;  %v11003_v24 = vld [vmem:[%s15867_s4 + $0xd0] ss:$8 sps:$4 sm:$0xff]   ;;  %vm8304_vm2 = vcmp.gt.s32.totalorder %v14290_v0, 0 }
 0x4b3   : > { %6858 = vmatprep.mubr.bf16.mxu1 %v13908_v14  ;;  %v11008_v14 = vld [vmem:[%s15867_s4 + $0xe4] ss:$8 sps:$4 sm:$0xff]   ;;  %8241 = vperm.xlu0 %10464, %v14290_v0  }
 0x4b5   : > { %7482 = vmatpush1.bf16.msra.mxu0 %v10997_v19 }
 0x4b6   : > { %7483 = vmatprep.subr.bf16.mxu0 %v11002_v21 }
 0x4b8   : > { %6407 = vmatmul.mubr.bf16.gmra.mrb[120].mxu0 %v13899_v28 }
 0x4b9   : > { %6416 = vmatprep.mubr.bf16.mxu0 %v13952_v22  ;;  %7484 = vmatpush1.bf16.msra.mxu0 %v11000_v18 }
 0x4ba   : > { %6859 = vmatmul.mubr.bf16.gmra.mrb[136].mxu1 %v13899_v28  ;;  %7485 = vmatprep.subr.bf16.mxu0 %v11005_v26  ;;  %v11009_v28 = vld [vmem:[%s15867_s4 + $0xf0] ss:$8 sps:$4 sm:$0xff]  }
 0x4bb   : > { %6868 = vmatprep.mubr.bf16.mxu1 %v13952_v22  ;;  %v11014_v22 = vld [vmem:[%s15867_s4 + $0x104] ss:$8 sps:$4 sm:$0xff]  }
 0x4bd   : > { %7486 = vmatpush1.bf16.msra.mxu0 %v11003_v24  ;;  %v14295_v24 = vld [vmem:[%s14278_s22 + $0x8] sm:$0xff] }
 0x4be   : > { %7487 = vmatprep.subr.bf16.mxu0 %v11008_v14  ;;  %vm8305_vm1 = vcmp.gt.s32.totalorder %v14295_v24, 0  ;;  %8244 = vperm.xlu0 %10464, %v14295_v24  }
 0x4c0   : > { %6417 = vmatmul.mubr.bf16.gmra.mrb[124].mxu0 %v13943_v48 }
 0x4c1   : > { %6426 = vmatprep.mubr.bf16.mxu0 %v13996_v23  ;;  %7488 = vmatpush1.bf16.msra.mxu0 %v11006_v41 }
 0x4c2   : > { %6869 = vmatmul.mubr.bf16.gmra.mrb[140].mxu1 %v13943_v48  ;;  %7489 = vmatprep.subr.bf16.mxu0 %v11011_v36  ;;  %v11015_v48 = vld [vmem:[%s15867_s4 + $0x110] ss:$8 sps:$4 sm:$0xff]  }
 0x4c3   : > { %6878 = vmatprep.mubr.bf16.mxu1 %v13996_v23  ;;  %v11020_v23 = vld [vmem:[%s15867_s4 + $0x124] ss:$8 sps:$4 sm:$0xff]  }
 0x4c5   : > { %7490 = vmatpush1.bf16.msra.mxu0 %v11009_v28 }
 0x4c6   : > { %7491 = vmatprep.subr.bf16.mxu0 %v11014_v22  ;;  %v14301_v22 = vld [vmem:[%s14278_s22 + $0x18] sm:$0xff] }
 0x4c7   : > { %8250 = vperm.xlu1 %10465, %v14301_v22   ;;  %vm8307_vm3 = vcmp.gt.s32.totalorder %v14301_v22, 0 }
 0x4c8   : > { %6427 = vmatmul.mubr.bf16.gmra.mrb[128].mxu0 %v13987_v16 }
 0x4c9   : > { %6436 = vmatprep.mubr.bf16.mxu0 %v14040_v9  ;;  %7492 = vmatpush1.bf16.msra.mxu0 %v11012_v52 }
 0x4ca   : > { %6879 = vmatmul.mubr.bf16.gmra.mrb[144].mxu1 %v13987_v16  ;;  %7493 = vmatprep.subr.bf16.mxu0 %v11017_v5  ;;  %v11021_v16 = vld [vmem:[%s15867_s4 + $0x130] ss:$8 sps:$4 sm:$0xff]  }
 0x4cb   : > { %6888 = vmatprep.mubr.bf16.mxu1 %v14040_v9  ;;  %v11026_v9 = vld [vmem:[%s15867_s4 + $0x144] ss:$8 sps:$4 sm:$0xff]  }
 0x4cd   : > { %7494 = vmatpush1.bf16.msra.mxu0 %v11015_v48 }
 0x4ce   : > { %7495 = vmatprep.subr.bf16.mxu0 %v11020_v23 }
 0x4d0   : > { %6437 = vmatmul.mubr.bf16.gmra.mrb[132].mxu0 %v14031_v27 }
 0x4d1   : > { %6446 = vmatprep.mubr.bf16.mxu0 %v14080_v15  ;;  %7496 = vmatpush1.bf16.msra.mxu0 %v11018_v53 }
 0x4d2   : > { %6889 = vmatmul.mubr.bf16.gmra.mrb[148].mxu1 %v14031_v27  ;;  %7497 = vmatprep.subr.bf16.mxu0 %v11023_v45  ;;  %v11029_v27 = vld [vmem:[%s15867_s4 + $0x154] ss:$8 sps:$4 sm:$0xff]   ;;  %v11036_v45 = vld [vmem:[%s15867_s4 + $0x180] ss:$8 sps:$4 sm:$0xff]  }
 0x4d3   : > { %6898 = vmatprep.mubr.bf16.mxu1 %v14080_v15  ;;  %v11027_v15 = vld [vmem:[%s15867_s4 + $0x150] ss:$8 sps:$4 sm:$0xff]  }
 0x4d5   : > { %7498 = vmatpush1.bf16.msra.mxu0 %v11021_v16  ;;  %v16047_v16 = vmov 0  }
 0x4d6   : > { %7499 = vmatprep.subr.bf16.mxu0 %v11026_v9  ;;  %v14311_v9 = vsel %vm8305_vm1, 1, %v16047_v16 }
 0x4d8   : > { %6447 = vmatmul.mubr.bf16.gmra.mrb[136].mxu0 %v14073_v30 }
 0x4d9   : > { %6456 = vmatprep.mubr.bf16.mxu0 %v14104_v40  ;;  %7500 = vmatpush1.bf16.msra.mxu0 %v11024_v31 }
 0x4da   : > { %6899 = vmatmul.mubr.bf16.gmra.mrb[152].mxu1 %v14073_v30  ;;  %7501 = vmatprep.subr.bf16.mxu0 %v11029_v27  ;;  %v11032_v30 = vld [vmem:[%s15867_s4 + $0x164] ss:$8 sps:$4 sm:$0xff]  }
 0x4db   : > { %6908 = vmatprep.mubr.bf16.mxu1 %v14104_v40 }
 0x4dd   : > { %7502 = vmatpush1.bf16.msra.mxu0 %v11027_v15 }
 0x4de   : > { %7503 = vmatprep.subr.bf16.mxu0 %v11032_v30 }
 0x4e0   : > { %6457 = vmatmul.mubr.bf16.gmra.mrb[140].mxu0 %v14099_v44 }
 0x4e1   : > { %7504 = vmatpush1.bf16.msra.mxu0 %v11030_v50 }
 0x4e2   : > { %6909 = vmatmul.mubr.bf16.gmra.mrb[156].mxu1 %v14099_v44  ;;  %7505 = vmatprep.subr.bf16.mxu0 %v11035_v58 }
 0x4e5   : > { %7506 = vmatpush1.bf16.msra.mxu0 %v11033_v42  ;;  %v11041_v42 = vld [vmem:[%s15867_s4 + $0x194] ss:$8 sps:$4 sm:$0xff]  }
 0x4e6   : > { %7588 = vmatprep.subr.bf16.mxu0 %v11038_v49 }
 0x57b   : > { %v6388_v61 = vpop.f32.mrb[112].mxu0 }
 0x57c   : > { %v10004_v12 = vadd.f32 %v6388_v61, %v14253_v3  ;;  %v6390_v33 = vpop.f32.mrb[113].mxu0 }
 0x57d   : > { %v6840_v8 = vpop.f32.mrb[128].mxu1  ;;  %v10005_v55 = vadd.f32 %v6390_v33, %v14256_v51  ;;  %v6392_v57 = vpop.f32.mrb[114].mxu0  ;;  %v11039_v33 = vld [vmem:[%s15867_s4 + $0x190] ss:$8 sps:$4 sm:$0xff]  }
 0x57e   : > { %v6919_v37 = vmul.f32 0.01, %v10004_v12  ;;  %v10036_v10 = vadd.f32 %v6840_v8, %v14259_v17  ;;  %v6842_v46 = vpop.f32.mrb[129].mxu1  ;;  %v10006_v38 = vadd.f32 %v6392_v57, %v14253_v3  ;;  %v6394_v34 = vpop.f32.mrb[115].mxu0  ;;  %v11086_v57 = vld [vmem:[%s15866_s3 + $0x68] sm:$0xff]  }
 0x57f   : > { %v6920_v25 = vmul.f32 0.01, %v10005_v55  ;;  %v10037_v2 = vadd.f32 %v6842_v46, %v14262_v13  ;;  %v6844_v59 = vpop.f32.mrb[130].mxu1  ;;  %v10007_v32 = vadd.f32 %v6394_v34, %v14256_v51  ;;  %9742 = vmatprep.subr.bf16.mxu1 %v11086_v57  ;;  %v11045_v57 = vld [vmem:[%s15867_s4 + $0x1b0] ss:$8 sps:$4 sm:$0xff]  }
 0x580   : > { %v6921_v63 = vmul.f32 0.01, %v10036_v10  ;;  %v6923_v35 = vmul.f32 0.01, %v10006_v38  ;;  %v10038_v44 = vadd.f32 %v6844_v59, %v14259_v17  ;;  %v6846_v43 = vpop.f32.mrb[131].mxu1  ;;  %v6983_v54 = vmax.f32 %v10004_v12, %v6919_v37 }
 0x581   : > { %v6922_v40 = vmul.f32 0.01, %v10037_v2  ;;  %v6924_v47 = vmul.f32 0.01, %v10007_v32  ;;  %v10039_v20 = vadd.f32 %v6846_v43, %v14262_v13  ;;  %v6984_v39 = vmax.f32 %v10005_v55, %v6920_v25  ;;  %v14335_v55 = vld [vmem:[%s14278_s22 + $0x28] sm:$0xff] }
 0x582   : > { %v6987_v1 = vmax.f32 %v10006_v38, %v6923_v35  ;;  %v6925_v11 = vmul.f32 0.01, %v10038_v44  ;;  %v6985_v60 = vmax.f32 %v10036_v10, %v6921_v63  ;;  %v11087_v25 = vld [vmem:[%s15866_s3 + $0x28] sm:$0xff]   ;;  %v14351_v35 = vld [vmem:[%s14278_s22 + $0x20] sm:$0xff]  ;;  %8256 = vperm.xlu1 %10465, %v14335_v55   ;;  %vm8309_vm5 = vcmp.gt.s32.totalorder %v14335_v55, 0 }
 0x583   : > { %v6986_v19 = vmax.f32 %v10037_v2, %v6922_v40  ;;  %v6988_v21 = vmax.f32 %v10007_v32, %v6924_v47  ;;  %v6926_v18 = vmul.f32 0.01, %v10039_v20  ;;  %v6398_v26 = vpop.f32.mrb[116].mxu0  ;;  %9743 = vmatpush3.bf16.msra.mxu1 %v11087_v25  ;;  %8253 = vperm.xlu0 %10464, %v14351_v35   ;;  %vm8308_vm6 = vcmp.gt.s32.totalorder %v14351_v35, 0 }
 0x584   : > { %v7047_v14 = vpack.c.bf16 %v6987_v1, %v6983_v54  ;;  %v6989_v41 = vmax.f32 %v10038_v44, %v6925_v11  ;;  %v14298_v36 = vadd.f32 %v6398_v26, %v14253_v3  ;;  %v6400_v28 = vpop.f32.mrb[117].mxu0  ;;  %v11088_v44 = vld [vmem:[%s15866_s3 + $0x70] sm:$0xff]   ;;  %v11042_v11 = vld [vmem:[%s15867_s4 + $0x1a0] ss:$8 sps:$4 sm:$0xff]  }
 0x585   : > { %v6990_v52 = vmax.f32 %v10039_v20, %v6926_v18  ;;  %v6850_v5 = vpop.f32.mrb[132].mxu1  ;;  %v14305_v48 = vadd.f32 %v6400_v28, %v14256_v51  ;;  %v6402_v23 = vpop.f32.mrb[118].mxu0  ;;  %v7048_v53 = vpack.c.bf16 %v6988_v21, %v6984_v39  ;;  %v11044_v20 = vld [vmem:[%s15867_s4 + $0x1a4] ss:$8 sps:$4 sm:$0xff]   ;;  %9744 = vmatprep.subr.bf16.mxu1 %v11088_v44 }
 0x586   : > { %v14313_v31 = vpack.c.bf16 %v6989_v41, %v6985_v60  ;;  %v6927_v27 = vmul.f32 0.01, %v14298_v36  ;;  %v14317_v15 = vadd.f32 %v6850_v5, %v14259_v17  ;;  %v6852_v30 = vpop.f32.mrb[133].mxu1  ;;  %v10010_v50 = vadd.f32 %v6402_v23, %v14253_v3  ;;  %v6404_v58 = vpop.f32.mrb[119].mxu0  ;;  %v14380_v41 = vld [vmem:[%s14278_s22 + $0x38] sm:$0xff]  ;;  %v14387_v23 = vld [vmem:[%s14278_s22 + $0x30] sm:$0xff] }
 0x587   : > { %v6928_v49 = vmul.f32 0.01, %v14305_v48  ;;  %v14325_v29 = vadd.f32 %v6852_v30, %v14262_v13  ;;  %v6854_v61 = vpop.f32.mrb[134].mxu1  ;;  %v10011_v12 = vadd.f32 %v6404_v58, %v14256_v51  ;;  %7507 = vmatprep.mubr.bf16.mxu0 %v7048_v53  ;;  %v14331_v8 = vpack.c.bf16 %v6990_v52, %v6986_v19  ;;  %9745 = vmatpush3.bf16.msra.mxu1 %v11089_v62 }
 0x588   : > { %v6991_v37 = vmax.f32 %v14298_v36, %v6927_v27  ;;  %v6929_v10 = vmul.f32 0.01, %v14317_v15  ;;  %v6931_v46 = vmul.f32 0.01, %v10010_v50  ;;  %v10042_v38 = vadd.f32 %v6854_v61, %v14259_v17  ;;  %v6856_v34 = vpop.f32.mrb[135].mxu1  ;;  %7508 = vmatmul.mubr.bf16.vlgmr.msra.gmra.mrb[144].mxu0 %v7047_v14  ;;  %8262 = vperm.xlu1 %10465, %v14380_v41  }
 0x589   : > { %v6992_v2 = vmax.f32 %v14305_v48, %v6928_v49  ;;  %v6930_v59 = vmul.f32 0.01, %v14325_v29  ;;  %v6932_v32 = vmul.f32 0.01, %v10011_v12  ;;  %v10043_v63 = vadd.f32 %v6856_v34, %v14262_v13  ;;  %7589 = vmatpush1.bf16.msra.mxu0 %v11036_v45  ;;  %v11047_v14 = vld [vmem:[%s15867_s4 + $0x1b4] ss:$8 sps:$4 sm:$0xff]   ;;  %8259 = vperm.xlu0 %10464, %v14387_v23  }
 0x58a   : > { %v6993_v43 = vmax.f32 %v14317_v15, %v6929_v10  ;;  %v6995_v40 = vmax.f32 %v10010_v50, %v6931_v46  ;;  %v6933_v47 = vmul.f32 0.01, %v10042_v38  ;;  %7590 = vmatprep.subr.bf16.mxu0 %v11041_v42  ;;  %v14370_v60 = vsel %vm8304_vm2, 1, %v16047_v16  ;;  %v11090_v45 = vld [vmem:[%s15866_s3 + $0x78] sm:$0xff]   ;;  %v11092_v10 = vld [vmem:[%s15866_s3 + $0x80] sm:$0xff]  }
 0x58b   : > { %v6994_v7 = vmax.f32 %v14325_v29, %v6930_v59  ;;  %v6996_v54 = vmax.f32 %v10011_v12, %v6932_v32  ;;  %v6934_v39 = vmul.f32 0.01, %v10043_v63  ;;  %v6408_v1 = vpop.f32.mrb[120].mxu0  ;;  %v14390_v53 = vsel %vm8307_vm3, 1, %v16047_v16  ;;  %v11091_v49 = vld [vmem:[%s15866_s3 + $0x38] sm:$0xff]   ;;  %v14424_v59 = vld [vmem:[%s14278_s22 + $0x48] sm:$0xff]  ;;  %9746 = vmatprep.subr.bf16.mxu1 %v11090_v45 }
 0x58c   : > { %v6997_v19 = vmax.f32 %v10042_v38, %v6933_v47  ;;  %v14373_v21 = vadd.f32 %v6408_v1, %v14253_v3  ;;  %v6410_v18 = vpop.f32.mrb[121].mxu0  ;;  %v7051_v26 = vpack.c.bf16 %v6995_v40, %v6991_v37  ;;  %16048 = vst [vmem:[#allocation10_spill] sm:$0xff] %v14390_v53  ;;  %v14430_v40 = vld [vmem:[%s14278_s22 + $0x40] sm:$0xff]  ;;  %9747 = vmatpush3.bf16.msra.mxu1 %v11091_v49  ;;  %v11094_v49 = vld [vmem:[%s15866_s3 + $0x88] sm:$0xff]   ;;  %vm8311_vm7 = vcmp.gt.s32.totalorder %v14380_v41, 0 }
 0x58d   : > { %v6998_v36 = vmax.f32 %v10043_v63, %v6934_v39  ;;  %v6860_v28 = vpop.f32.mrb[136].mxu1  ;;  %v14384_v52 = vadd.f32 %v6410_v18, %v14256_v51  ;;  %7591 = vmatpush1.bf16.msra.mxu0 %v11039_v33  ;;  %v6412_v5 = vpop.f32.mrb[122].mxu0  ;;  %v7052_v48 = vpack.c.bf16 %v6996_v54, %v6992_v2  ;;  %v11093_v54 = vld [vmem:[%s15866_s3 + $0x40] sm:$0xff]   ;;  %8268 = vperm.xlu1 %10465, %v14424_v59   ;;  %v14446_v18 = vsel %vm8306_vm4, 1, %v16047_v16 }
 0x58e   : > { %v6935_v27 = vmul.f32 0.01, %v14373_v21  ;;  %v14397_v15 = vadd.f32 %v6860_v28, %v14259_v17  ;;  %v6862_v30 = vpop.f32.mrb[137].mxu1  ;;  %v10014_v50 = vadd.f32 %v6412_v5, %v14253_v3  ;;  %v6414_v58 = vpop.f32.mrb[123].mxu0  ;;  %7592 = vmatprep.subr.bf16.mxu0 %v11044_v20  ;;  %v14400_v42 = vpack.c.bf16 %v6997_v19, %v6993_v43  ;;  %9748 = vmatprep.subr.bf16.mxu1 %v11092_v10  ;;  %v14456_v5 = vld [vmem:[%s14278_s22 + $0x58] sm:$0xff] }
 0x58f   : > { %v6936_v29 = vmul.f32 0.01, %v14384_v52  ;;  %v14407_v61 = vadd.f32 %v6862_v30, %v14262_v13  ;;  %v6864_v12 = vpop.f32.mrb[138].mxu1  ;;  %v10015_v33 = vadd.f32 %v6414_v58, %v14256_v51  ;;  %7517 = vmatprep.mubr.bf16.mxu0 %v7052_v48  ;;  %v14413_v37 = vpack.c.bf16 %v6998_v36, %v6994_v7  ;;  %v11050_v7 = vld [vmem:[%s15867_s4 + $0x1c4] ss:$8 sps:$4 sm:$0xff]   ;;  %8265 = vperm.xlu0 %10464, %v14430_v40  }
 0x590   : > { %v6999_v46 = vmax.f32 %v14373_v21, %v6935_v27  ;;  %v6937_v38 = vmul.f32 0.01, %v14397_v15  ;;  %v6939_v34 = vmul.f32 0.01, %v10014_v50  ;;  %v10046_v25 = vadd.f32 %v6864_v12, %v14259_v17  ;;  %v6866_v2 = vpop.f32.mrb[139].mxu1  ;;  %7518 = vmatmul.mubr.bf16.gmra.mrb[148].mxu0 %v7051_v26  ;;  %9749 = vmatpush3.bf16.msra.mxu1 %v11093_v54  ;;  %v14500_v54 = vld [vmem:[%s14278_s22 + $0x68] sm:$0xff] }
 0x591   : > { %v7000_v32 = vmax.f32 %v14384_v52, %v6936_v29  ;;  %v6938_v63 = vmul.f32 0.01, %v14407_v61  ;;  %v6940_v44 = vmul.f32 0.01, %v10015_v33  ;;  %v10047_v43 = vadd.f32 %v6866_v2, %v14262_v13  ;;  %7593 = vmatpush1.bf16.msra.mxu0 %v11042_v11  ;;  %v11048_v21 = vld [vmem:[%s15867_s4 + $0x1c0] ss:$8 sps:$4 sm:$0xff]   ;;  %8274 = vperm.xlu1 %10465, %v14456_v5  }
 0x592   : > { %v7001_v47 = vmax.f32 %v14397_v15, %v6937_v38  ;;  %v7003_v20 = vmax.f32 %v10014_v50, %v6939_v34  ;;  %v6941_v62 = vmul.f32 0.01, %v10046_v25  ;;  %7594 = vmatprep.subr.bf16.mxu0 %v11047_v14  ;;  %v11053_v52 = vld [vmem:[%s15867_s4 + $0x1d4] ss:$8 sps:$4 sm:$0xff]   ;;  %v14466_v58 = vsel %vm8309_vm5, 1, %v16047_v16  ;;  %9750 = vmatprep.subr.bf16.mxu1 %v11094_v49 }
 0x593   : > { %v7002_v39 = vmax.f32 %v14407_v61, %v6938_v63  ;;  %v7004_v1 = vmax.f32 %v10015_v33, %v6940_v44  ;;  %v6942_v11 = vmul.f32 0.01, %v10047_v43  ;;  %v6418_v19 = vpop.f32.mrb[124].mxu0  ;;  %v14463_v50 = vld [vmem:[%s14278_s22 + $0x50] sm:$0xff]  ;;  %16049 = vst [vmem:[#allocation11_spill] sm:$0xff] %v14466_v58  ;;  %vm8310_vm8 = vcmp.gt.s32.totalorder %v14387_v23, 0 }
 0x594   : > { %v7005_v26 = vmax.f32 %v10046_v25, %v6941_v62  ;;  %v14449_v14 = vadd.f32 %v6418_v19, %v14253_v3  ;;  %v6420_v36 = vpop.f32.mrb[125].mxu0  ;;  %v7055_v28 = vpack.c.bf16 %v7003_v20, %v6999_v46  ;;  %v11095_v46 = vld [vmem:[%s15866_s3 + $0x48] sm:$0xff]   ;;  %v11096_v44 = vld [vmem:[%s15866_s3 + $0x90] sm:$0xff]   ;;  %8271 = vperm.xlu0 %10464, %v14463_v50   ;;  %vm8313_vm9 = vcmp.gt.s32.totalorder %v14424_v59, 0 }
 0x595   : > { %v7006_v48 = vmax.f32 %v10047_v43, %v6942_v11  ;;  %v6870_v45 = vpop.f32.mrb[140].mxu1  ;;  %v14460_v27 = vadd.f32 %v6420_v36, %v14256_v51  ;;  %7595 = vmatpush1.bf16.msra.mxu0 %v11045_v57  ;;  %v6422_v15 = vpop.f32.mrb[126].mxu0  ;;  %v7056_v30 = vpack.c.bf16 %v7004_v1, %v7000_v32  ;;  %v11051_v32 = vld [vmem:[%s15867_s4 + $0x1d0] ss:$8 sps:$4 sm:$0xff]   ;;  %9751 = vmatpush3.bf16.msra.mxu1 %v11095_v46  ;;  %vm8312_vm10 = vcmp.gt.s32.totalorder %v14430_v40, 0 }
 0x596   : > { %v6943_v29 = vmul.f32 0.01, %v14449_v14  ;;  %v14473_v61 = vadd.f32 %v6870_v45, %v14259_v17  ;;  %v6872_v12 = vpop.f32.mrb[141].mxu1  ;;  %v10018_v33 = vadd.f32 %v6422_v15, %v14253_v3  ;;  %v6424_v57 = vpop.f32.mrb[127].mxu0  ;;  %7596 = vmatprep.subr.bf16.mxu0 %v11050_v7  ;;  %v14476_v10 = vpack.c.bf16 %v7005_v26, %v7001_v47  ;;  %v14506_v26 = vld [vmem:[%s14278_s22 + $0x60] sm:$0xff]  ;;  %8280 = vperm.xlu1 %10465, %v14500_v54  }
 0x597   : > { %v6944_v38 = vmul.f32 0.01, %v14460_v27  ;;  %v14483_v34 = vadd.f32 %v6872_v12, %v14262_v13  ;;  %v6874_v25 = vpop.f32.mrb[142].mxu1  ;;  %v10019_v2 = vadd.f32 %v6424_v57, %v14256_v51  ;;  %7527 = vmatprep.mubr.bf16.mxu0 %v7056_v30  ;;  %v14489_v63 = vpack.c.bf16 %v7006_v48, %v7002_v39  ;;  %9752 = vmatprep.subr.bf16.mxu1 %v11096_v44  ;;  %v14532_v44 = vld [vmem:[%s14278_s22 + $0x70] sm:$0xff] }
 0x598   : > { %v7007_v43 = vmax.f32 %v14449_v14, %v6943_v29  ;;  %v6945_v47 = vmul.f32 0.01, %v14473_v61  ;;  %v6947_v20 = vmul.f32 0.01, %v10018_v33  ;;  %v10050_v62 = vadd.f32 %v6874_v25, %v14259_v17  ;;  %v6876_v7 = vpop.f32.mrb[143].mxu1  ;;  %7528 = vmatmul.mubr.bf16.gmra.mrb[152].mxu0 %v7055_v28  ;;  %8277 = vperm.xlu0 %10464, %v14506_v26  }
 0x599   : > { %v7008_v39 = vmax.f32 %v14460_v27, %v6944_v38  ;;  %v6946_v1 = vmul.f32 0.01, %v14483_v34  ;;  %v6948_v11 = vmul.f32 0.01, %v10019_v2  ;;  %v10051_v19 = vadd.f32 %v6876_v7, %v14262_v13  ;;  %7597 = vmatpush1.bf16.msra.mxu0 %v11048_v21  ;;  %v11056_v28 = vld [vmem:[%s15867_s4 + $0x1e4] ss:$8 sps:$4 sm:$0xff]  }
 0x59a   : > { %v7009_v14 = vmax.f32 %v14473_v61, %v6945_v47  ;;  %v7011_v36 = vmax.f32 %v10018_v33, %v6947_v20  ;;  %v6949_v48 = vmul.f32 0.01, %v10050_v62  ;;  %7598 = vmatprep.subr.bf16.mxu0 %v11053_v52  ;;  %v11097_v21 = vld [vmem:[%s15866_s3 + $0x50] sm:$0xff]   ;;  %v14519_v52 = vsel %vm8308_vm6, 1, %v16047_v16  ;;  %v14524_v33 = vld [vmem:[%s14278_s22 + $0x78] sm:$0xff] }
 0x59b   : > { %v7010_v45 = vmax.f32 %v14483_v34, %v6946_v1  ;;  %v7012_v27 = vmax.f32 %v10019_v2, %v6948_v11  ;;  %v6950_v15 = vmul.f32 0.01, %v10051_v19  ;;  %v6428_v30 = vpop.f32.mrb[128].mxu0  ;;  %16050 = vst [vmem:[#allocation12_spill] sm:$0xff] %v14519_v52  ;;  %v11054_v2 = vld [vmem:[%s15867_s4 + $0x1e0] ss:$8 sps:$4 sm:$0xff]   ;;  %9753 = vmatpush3.bf16.msra.mxu1 %v11097_v21  ;;  %8286 = vperm.xlu1 %10465, %v14524_v33  }
 0x59c   : > { %v7013_v49 = vmax.f32 %v10050_v62, %v6949_v48  ;;  %v10020_v29 = vadd.f32 %v6428_v30, %v14253_v3  ;;  %v6430_v61 = vpop.f32.mrb[129].mxu0  ;;  %v7059_v12 = vpack.c.bf16 %v7011_v36, %v7007_v43  ;;  %v14535_v43 = vsel %vm8311_vm7, 1, %v16047_v16  ;;  %8283 = vperm.xlu0 %10464, %v14532_v44  }
 0x59d   : > { %v7014_v57 = vmax.f32 %v10051_v19, %v6950_v15  ;;  %v6880_v46 = vpop.f32.mrb[144].mxu1  ;;  %v10021_v38 = vadd.f32 %v6430_v61, %v14256_v51  ;;  %7599 = vmatpush1.bf16.msra.mxu0 %v11051_v32  ;;  %v6432_v34 = vpop.f32.mrb[130].mxu0  ;;  %v7060_v25 = vpack.c.bf16 %v7012_v27, %v7008_v39  ;;  %v11059_v32 = vld [vmem:[%s15867_s4 + $0x1f4] ss:$8 sps:$4 sm:$0xff]   ;;  %vm8315_vm11 = vcmp.gt.s32.totalorder %v14456_v5, 0 }
 0x59e   : > { %v6951_v47 = vmul.f32 0.01, %v10020_v29  ;;  %v10052_v20 = vadd.f32 %v6880_v46, %v14259_v17  ;;  %v6882_v62 = vpop.f32.mrb[145].mxu1  ;;  %v10022_v7 = vadd.f32 %v6432_v34, %v14253_v3  ;;  %v6434_v1 = vpop.f32.mrb[131].mxu0  ;;  %7600 = vmatprep.subr.bf16.mxu0 %v11056_v28  ;;  %v14542_v39 = vpack.c.bf16 %v7013_v49, %v7009_v14 }
 0x59f   : > { %v6952_v11 = vmul.f32 0.01, %v10021_v38  ;;  %v10053_v19 = vadd.f32 %v6882_v62, %v14262_v13  ;;  %v6884_v36 = vpop.f32.mrb[146].mxu1  ;;  %v10023_v48 = vadd.f32 %v6434_v1, %v14256_v51  ;;  %7537 = vmatprep.mubr.bf16.mxu0 %v7060_v25  ;;  %v14546_v27 = vpack.c.bf16 %v7014_v57, %v7010_v45  ;;  %v11057_v45 = vld [vmem:[%s15867_s4 + $0x1f0] ss:$8 sps:$4 sm:$0xff]   ;;  %8340 = vperm.xlu1 %10465, %v14311_v9  }
 0x5a0   : > { %v7015_v15 = vmax.f32 %v10020_v29, %v6951_v47  ;;  %v6953_v28 = vmul.f32 0.01, %v10052_v20  ;;  %v6955_v30 = vmul.f32 0.01, %v10022_v7  ;;  %v10054_v61 = vadd.f32 %v6884_v36, %v14259_v17  ;;  %v6886_v46 = vpop.f32.mrb[147].mxu1  ;;  %7538 = vmatmul.mubr.bf16.gmra.mrb[156].mxu0 %v7059_v12  ;;  %8337 = vperm.xlu0 %10464, %v14370_v60  }
 0x5a1   : > { %v7016_v14 = vmax.f32 %v10021_v38, %v6952_v11  ;;  %v6954_v21 = vmul.f32 0.01, %v10053_v19  ;;  %v6956_v49 = vmul.f32 0.01, %v10023_v48  ;;  %v10055_v34 = vadd.f32 %v6886_v46, %v14262_v13  ;;  %7601 = vmatpush1.bf16.msra.mxu0 %v11054_v2  ;;  %v11062_v12 = vld [vmem:[%s15867_s4 + $0x204] ss:$8 sps:$4 sm:$0xff]  }
 0x5a2   : > { %v7017_v57 = vmax.f32 %v10052_v20, %v6953_v28  ;;  %v7019_v29 = vmax.f32 %v10022_v7, %v6955_v30  ;;  %v6957_v25 = vmul.f32 0.01, %v10054_v61  ;;  %7602 = vmatprep.subr.bf16.mxu0 %v11059_v32  ;;  %v14561_v2 = vsel %vm8310_vm8, 1, %v16047_v16  ;;  %v11060_v46 = vld [vmem:[%s15867_s4 + $0x200] ss:$8 sps:$4 sm:$0xff]  }
 0x5a3   : > { %v7018_v38 = vmax.f32 %v10053_v19, %v6954_v21  ;;  %v7020_v47 = vmax.f32 %v10023_v48, %v6956_v49  ;;  %v6958_v62 = vmul.f32 0.01, %v10055_v34  ;;  %v6438_v1 = vpop.f32.mrb[132].mxu0  ;;  %8346 = vperm.xlu1 %10465, %v14390_v53   ;;  %vm8314_vm12 = vcmp.gt.s32.totalorder %v14463_v50, 0 }
 0x5a4   : > { %v7021_v11 = vmax.f32 %v10054_v61, %v6957_v25  ;;  %v10024_v20 = vadd.f32 %v6438_v1, %v14253_v3  ;;  %v6440_v7 = vpop.f32.mrb[133].mxu0  ;;  %v7063_v32 = vpack.c.bf16 %v7019_v29, %v7015_v15  ;;  %v14571_v61 = vsel %vm8313_vm9, 1, %v16047_v16  ;;  %8343 = vperm.xlu0 %10464, %v14446_v18  }
 0x5a5   : > { %v7022_v36 = vmax.f32 %v10055_v34, %v6958_v62  ;;  %v6890_v28 = vpop.f32.mrb[148].mxu1  ;;  %v10025_v19 = vadd.f32 %v6440_v7, %v14256_v51  ;;  %7603 = vmatpush1.bf16.msra.mxu0 %v11057_v45  ;;  %v6442_v48 = vpop.f32.mrb[134].mxu0  ;;  %v7064_v30 = vpack.c.bf16 %v7020_v47, %v7016_v14  ;;  %16051 = vst [vmem:[#allocation13_spill] sm:$0xff] %v14571_v61  ;;  %v11065_v45 = vld [vmem:[%s15867_s4 + $0x214] ss:$8 sps:$4 sm:$0xff]   ;;  %vm8317_vm13 = vcmp.gt.s32.totalorder %v14500_v54, 0 }
 0x5a6   : > { %v6959_v21 = vmul.f32 0.01, %v10024_v20  ;;  %v10056_v15 = vadd.f32 %v6890_v28, %v14259_v17  ;;  %v6892_v49 = vpop.f32.mrb[149].mxu1  ;;  %v10026_v29 = vadd.f32 %v6442_v48, %v14253_v3  ;;  %v6444_v34 = vpop.f32.mrb[135].mxu0  ;;  %7604 = vmatprep.subr.bf16.mxu0 %v11062_v12  ;;  %v14578_v14 = vpack.c.bf16 %v7021_v11, %v7017_v57 }
 0x5a7   : > { %v6960_v25 = vmul.f32 0.01, %v10025_v19  ;;  %v10057_v47 = vadd.f32 %v6892_v49, %v14262_v13  ;;  %v6894_v62 = vpop.f32.mrb[150].mxu1  ;;  %v10027_v1 = vadd.f32 %v6444_v34, %v14256_v51  ;;  %7547 = vmatprep.mubr.bf16.mxu0 %v7064_v30  ;;  %v14582_v7 = vpack.c.bf16 %v7022_v36, %v7018_v38  ;;  %v11063_v38 = vld [vmem:[%s15867_s4 + $0x210] ss:$8 sps:$4 sm:$0xff]   ;;  %8352 = vperm.xlu1 %10465, %v14466_v58  }
 0x5a8   : > { %16052 = vst [vmem:[#allocation14_spill] sm:$0xff] %v14578_v14  ;;  %v7023_v28 = vmax.f32 %v10024_v20, %v6959_v21  ;;  %v6961_v48 = vmul.f32 0.01, %v10056_v15  ;;  %v6963_v12 = vmul.f32 0.01, %v10026_v29  ;;  %v10058_v56 = vadd.f32 %v6894_v62, %v14259_v17  ;;  %v6896_v4 = vpop.f32.mrb[151].mxu1  ;;  %7548 = vmatmul.mubr.bf16.gmra.mrb[160].mxu0 %v7063_v32  ;;  %8349 = vperm.xlu0 %10464, %v14519_v52  }
 0x5a9   : > { %v7024_v57 = vmax.f32 %v10025_v19, %v6960_v25  ;;  %v6962_v11 = vmul.f32 0.01, %v10057_v47  ;;  %v6964_v49 = vmul.f32 0.01, %v10027_v1  ;;  %v10059_v14 = vadd.f32 %v6896_v4, %v14262_v13  ;;  %7605 = vmatpush1.bf16.msra.mxu0 %v11060_v46  ;;  %v11068_v32 = vld [vmem:[%s15867_s4 + $0x224] ss:$8 sps:$4 sm:$0xff]  }
 0x5aa   : > { %v7025_v36 = vmax.f32 %v10056_v15, %v6961_v48  ;;  %v7027_v20 = vmax.f32 %v10026_v29, %v6963_v12  ;;  %v6965_v30 = vmul.f32 0.01, %v10058_v56  ;;  %7606 = vmatprep.subr.bf16.mxu0 %v11065_v45  ;;  %v14597_v4 = vsel %vm8312_vm10, 1, %v16047_v16 }
 0x5ab   : > { %v7026_v19 = vmax.f32 %v10057_v47, %v6962_v11  ;;  %v7028_v21 = vmax.f32 %v10027_v1, %v6964_v49  ;;  %v6966_v34 = vmul.f32 0.01, %v10059_v14  ;;  %v6448_v25 = vpop.f32.mrb[136].mxu0  ;;  %16053 = vst [vmem:[#allocation15_spill] sm:$0xff] %v14597_v4  ;;  %v11066_v11 = vld [vmem:[%s15867_s4 + $0x220] ss:$8 sps:$4 sm:$0xff]   ;;  %8358 = vperm.xlu1 %10465, %v14535_v43  }
 0x5ac   : > { %v7029_v46 = vmax.f32 %v10058_v56, %v6965_v30  ;;  %v10028_v15 = vadd.f32 %v6448_v25, %v14253_v3  ;;  %v6450_v29 = vpop.f32.mrb[137].mxu0  ;;  %v7067_v45 = vpack.c.bf16 %v7027_v20, %v7023_v28  ;;  %v14607_v56 = vsel %vm8315_vm11, 1, %v16047_v16  ;;  %8355 = vperm.xlu0 %10464, %v14561_v2  }
 0x5ad   : > { %v7030_v62 = vmax.f32 %v10059_v14, %v6966_v34  ;;  %v6900_v48 = vpop.f32.mrb[152].mxu1  ;;  %v10029_v47 = vadd.f32 %v6450_v29, %v14256_v51  ;;  %7607 = vmatpush1.bf16.msra.mxu0 %v11063_v38  ;;  %v6452_v1 = vpop.f32.mrb[138].mxu0  ;;  %v7068_v12 = vpack.c.bf16 %v7028_v21, %v7024_v57  ;;  %v11071_v38 = vld [vmem:[%s15867_s4 + $0x234] ss:$8 sps:$4 sm:$0xff]   ;;  %vm8316_vm14 = vcmp.gt.s32.totalorder %v14506_v26, 0 }
 0x5ae   : > { %v6967_v49 = vmul.f32 0.01, %v10028_v15  ;;  %v10060_v28 = vadd.f32 %v6900_v48, %v14259_v17  ;;  %v6902_v20 = vpop.f32.mrb[153].mxu1  ;;  %v10030_v30 = vadd.f32 %v6452_v1, %v14253_v3  ;;  %v6454_v14 = vpop.f32.mrb[139].mxu0  ;;  %7608 = vmatprep.subr.bf16.mxu0 %v11068_v32  ;;  %v14614_v57 = vpack.c.bf16 %v7029_v46, %v7025_v36 }
 0x5af   : > { %v6968_v21 = vmul.f32 0.01, %v10029_v47  ;;  %v10061_v34 = vadd.f32 %v6902_v20, %v14262_v13  ;;  %v6904_v25 = vpop.f32.mrb[154].mxu1  ;;  %v10031_v29 = vadd.f32 %v6454_v14, %v14256_v51  ;;  %7557 = vmatprep.mubr.bf16.mxu0 %v7068_v12  ;;  %v14618_v58 = vpack.c.bf16 %v7030_v62, %v7026_v19  ;;  %v11069_v19 = vld [vmem:[%s15867_s4 + $0x230] ss:$8 sps:$4 sm:$0xff]   ;;  %8364 = vperm.xlu1 %10465, %v14571_v61  }
 0x5b0   : > { %16054 = vst [vmem:[#allocation17_spill] sm:$0xff] %v14614_v57  ;;  %v7031_v48 = vmax.f32 %v10028_v15, %v6967_v49  ;;  %v6969_v1 = vmul.f32 0.01, %v10060_v28  ;;  %v6971_v32 = vmul.f32 0.01, %v10030_v30  ;;  %v10062_v52 = vadd.f32 %v6904_v25, %v14259_v17  ;;  %v6906_v53 = vpop.f32.mrb[155].mxu1  ;;  %7558 = vmatmul.mubr.bf16.gmra.mrb[164].mxu0 %v7067_v45  ;;  %8361 = vperm.xlu0 %10464, %v14597_v4  }
 0x5b1   : > { %v7032_v36 = vmax.f32 %v10029_v47, %v6968_v21  ;;  %v6970_v46 = vmul.f32 0.01, %v10061_v34  ;;  %v6972_v20 = vmul.f32 0.01, %v10031_v29  ;;  %v10063_v57 = vadd.f32 %v6906_v53, %v14262_v13  ;;  %7609 = vmatpush1.bf16.msra.mxu0 %v11066_v11  ;;  %v11074_v45 = vld [vmem:[%s15867_s4 + $0x244] ss:$8 sps:$4 sm:$0xff]  }
 0x5b2   : > { %v7033_v62 = vmax.f32 %v10060_v28, %v6969_v1  ;;  %v7035_v15 = vmax.f32 %v10030_v30, %v6971_v32  ;;  %v6973_v12 = vmul.f32 0.01, %v10062_v52  ;;  %7610 = vmatprep.subr.bf16.mxu0 %v11071_v38  ;;  %v14633_v53 = vsel %vm8314_vm12, 1, %v16047_v16 }
 0x5b3   : > { %v7034_v47 = vmax.f32 %v10061_v34, %v6970_v46  ;;  %v7036_v49 = vmax.f32 %v10031_v29, %v6972_v20  ;;  %v6974_v14 = vmul.f32 0.01, %v10063_v57  ;;  %v6458_v21 = vpop.f32.mrb[140].mxu0  ;;  %v11072_v46 = vld [vmem:[%s15867_s4 + $0x240] ss:$8 sps:$4 sm:$0xff]   ;;  %8370 = vperm.xlu1 %10465, %v14607_v56   ;;  %vm8319_vm15 = vcmp.gt.s32.totalorder %v14524_v33, 0 }
 0x5b4   : > { %v7037_v11 = vmax.f32 %v10062_v52, %v6973_v12  ;;  %v10032_v28 = vadd.f32 %v6458_v21, %v14253_v3  ;;  %v6460_v30 = vpop.f32.mrb[141].mxu0  ;;  %v7071_v38 = vpack.c.bf16 %v7035_v15, %v7031_v48  ;;  %v14643_v52 = vsel %vm8317_vm13, 1, %v16047_v16  ;;  %8367 = vperm.xlu0 %10464, %v14633_v53  }
 0x5b5   : > { %v7038_v25 = vmax.f32 %v10063_v57, %v6974_v14  ;;  %v6910_v1 = vpop.f32.mrb[156].mxu1  ;;  %v10033_v34 = vadd.f32 %v6460_v30, %v14256_v51  ;;  %7611 = vmatpush1.bf16.msra.mxu0 %v11069_v19  ;;  %v6462_v29 = vpop.f32.mrb[142].mxu0  ;;  %v7072_v32 = vpack.c.bf16 %v7036_v49, %v7032_v36  ;;  %v11077_v19 = vld [vmem:[%s15867_s4 + $0x254] ss:$8 sps:$4 sm:$0xff]   ;;  %vm8318_vm0 = vcmp.gt.s32.totalorder %v14532_v44, 0 }
 0x5b6   : > { %v6975_v20 = vmul.f32 0.01, %v10032_v28  ;;  %v10064_v48 = vadd.f32 %v6910_v1, %v14259_v17  ;;  %v6912_v15 = vpop.f32.mrb[157].mxu1  ;;  %v10034_v12 = vadd.f32 %v6462_v29, %v14253_v3  ;;  %v6464_v57 = vpop.f32.mrb[143].mxu0  ;;  %7612 = vmatprep.subr.bf16.mxu0 %v11074_v45  ;;  %v14650_v36 = vpack.c.bf16 %v7037_v11, %v7033_v62 }
 0x5b7   : > { %v6976_v49 = vmul.f32 0.01, %v10033_v34  ;;  %v10065_v14 = vadd.f32 %v6912_v15, %v14262_v13  ;;  %v6914_v21 = vpop.f32.mrb[158].mxu1  ;;  %v10035_v30 = vadd.f32 %v6464_v57, %v14256_v51  ;;  %7567 = vmatprep.mubr.bf16.mxu0 %v7072_v32  ;;  %v14654_v61 = vpack.c.bf16 %v7038_v25, %v7034_v47  ;;  %v11075_v51 = vld [vmem:[%s15867_s4 + $0x250] ss:$8 sps:$4 sm:$0xff]   ;;  %8376 = vperm.xlu1 %10465, %v14643_v52  }
 0x5b8   : > { %16055 = vst [vmem:[#allocation16_spill] sm:$0xff] %v14650_v36  ;;  %v7039_v3 = vmax.f32 %v10032_v28, %v6975_v20  ;;  %v6977_v1 = vmul.f32 0.01, %v10064_v48  ;;  %v6979_v45 = vmul.f32 0.01, %v10034_v12  ;;  %v10066_v29 = vadd.f32 %v6914_v21, %v14259_v17  ;;  %v6916_v4 = vpop.f32.mrb[159].mxu1  ;;  %7568 = vmatmul.mubr.bf16.gmra.mrb[168].mxu0 %v7071_v38 }
 0x5b9   : > { %v7040_v62 = vmax.f32 %v10033_v34, %v6976_v49  ;;  %v6978_v11 = vmul.f32 0.01, %v10065_v14  ;;  %v6980_v15 = vmul.f32 0.01, %v10035_v30  ;;  %v10067_v36 = vadd.f32 %v6916_v4, %v14262_v13  ;;  %7613 = vmatpush1.bf16.msra.mxu0 %v11072_v46  ;;  %v11080_v17 = vld [vmem:[%s15867_s4 + $0x264] ss:$8 sps:$4 sm:$0xff]  }
 0x5ba   : > { %v7041_v47 = vmax.f32 %v10064_v48, %v6977_v1  ;;  %v7043_v28 = vmax.f32 %v10034_v12, %v6979_v45  ;;  %v6981_v25 = vmul.f32 0.01, %v10066_v29  ;;  %7614 = vmatprep.subr.bf16.mxu0 %v11077_v19  ;;  %v14669_v13 = vsel %vm8316_vm14, 1, %v16047_v16  ;;  %v11078_v12 = vld [vmem:[%s15867_s4 + $0x260] ss:$8 sps:$4 sm:$0xff]  }
 0x5bb   : > { %v7042_v38 = vmax.f32 %v10065_v14, %v6978_v11  ;;  %v7044_v34 = vmax.f32 %v10035_v30, %v6980_v15  ;;  %v6982_v32 = vmul.f32 0.01, %v10067_v36  ;;  %8373 = vperm.xlu0 %10464, %v14669_v13   ;;  %v14678_v57 = vsel %vm8319_vm15, 1, %v16047_v16  ;;  %v11083_v49 = vld [vmem:[%s15867_s4 + $0x274] ss:$8 sps:$4 sm:$0xff]  }
 0x5bc   : > { %v7045_v4 = vmax.f32 %v10066_v29, %v6981_v25  ;;  %v7075_v46 = vpack.c.bf16 %v7043_v28, %v7039_v3  ;;  %v14681_v19 = vsel %vm8318_vm0, 1, %v16047_v16  ;;  %8382 = vperm.xlu1 %10465, %v14678_v57   ;;  %v11081_v16 = vld [vmem:[%s15867_s4 + $0x270] ss:$8 sps:$4 sm:$0xff]   ;;  %v11124_v21 = vmov 1  }
 0x5bd   : > { %v7046_v20 = vmax.f32 %v10067_v36, %v6982_v32  ;;  %7615 = vmatpush1.bf16.msra.mxu0 %v11075_v51  ;;  %v7076_v48 = vpack.c.bf16 %v7044_v34, %v7040_v62  ;;  %v11098_v30 = vld [vmem:[%s15866_s3 + $0x98] sm:$0xff]  }
 0x5be   : > { %7616 = vmatprep.subr.bf16.mxu0 %v11080_v17  ;;  %v7077_v14 = vpack.c.bf16 %v7045_v4, %v7041_v47  ;;  %v11099_v3 = vld [vmem:[%s15866_s3 + $0x58] sm:$0xff]   ;;  %9754 = vmatprep.subr.bf16.mxu1 %v11098_v30 }
 0x5bf   : > { %7577 = vmatprep.mubr.bf16.mxu0 %v7076_v48  ;;  %v7078_v36 = vpack.c.bf16 %v7046_v20, %v7042_v38  ;;  %8379 = vperm.xlu0 %10464, %v14681_v19   ;;  %v11110_v30 = vld [vmem:[%s14278_s22 + $0x18] sm:$0xff] }
 0x5c0   : > { %7578 = vmatmul.mubr.bf16.gmra.mrb[172].mxu0 %v7075_v46  ;;  %10467 = vset.pattern.permute.xlu1 %v11124_v21 }
 0x5c1   : > { %7617 = vmatpush1.bf16.msra.mxu0 %v11078_v12  ;;  %7620 = vmatprep.mubr.bf16.mxu0 %v14331_v8  ;;  %v16057_v8 = vld [vmem:[#allocation10_spill] sm:$0xff] }
 0x5c2   : > { %7618 = vmatprep.subr.bf16.mxu0 %v11083_v49  ;;  %8436 = vperm.xlu1 %10467, %v14295_v24  }
 0x5c3   : > { %10466 = vset.pattern.permute.xlu0 %v11124_v21  ;;  %9755 = vmatpush3.bf16.msra.mxu1 %v11099_v3  ;;  %v11126_v21 = vmov 3  }
 0x5c4   : > { %8433 = vperm.xlu0 %10466, %v14290_v0  }
 0x5c5   : > { %7619 = vmatpush1.bf16.msra.mxu0 %v11081_v16 }
 0x5c6   : > { %8439 = vperm.xlu1 %10467, %v14287_v6  }
 0x5c8   : > { %7621 = vmatmul.mubr.bf16.vlgmr.msra.gmra.mrb[144].mxu0 %v14313_v31  ;;  %8442 = vperm.xlu0 %10466, %v14301_v22   ;;  %v16056_v31 = vld [vmem:[#allocation14_spill] sm:$0xff] }
 0x5c9   : > { %7630 = vmatprep.mubr.bf16.mxu0 %v14413_v37  ;;  %v16059_v37 = vld [vmem:[#allocation11_spill] sm:$0xff] }
 0x5ca   : > { %8445 = vperm.xlu1 %10467, %v14351_v35  }
 0x5cc   : > { %8448 = vperm.xlu0 %10466, %v14335_v55  }
 0x5ce   : > { %8451 = vperm.xlu1 %10467, %v14387_v23  }
 0x5d0   : > { %7631 = vmatmul.mubr.bf16.gmra.mrb[148].mxu0 %v14400_v42  ;;  %8454 = vperm.xlu0 %10466, %v14380_v41   ;;  %v16058_v42 = vld [vmem:[#allocation12_spill] sm:$0xff] }
 0x5d1   : > { %7640 = vmatprep.mubr.bf16.mxu0 %v14489_v63  ;;  %v16061_v63 = vld [vmem:[#allocation15_spill] sm:$0xff] }
 0x5d2   : > { %8457 = vperm.xlu1 %10467, %v14430_v40  }
 0x5d4   : > { %8460 = vperm.xlu0 %10466, %v14424_v59  }
 0x5d6   : > { %8463 = vperm.xlu1 %10467, %v14463_v50  }
 0x5d8   : > { %7641 = vmatmul.mubr.bf16.gmra.mrb[152].mxu0 %v14476_v10  ;;  %8466 = vperm.xlu0 %10466, %v14456_v5   ;;  %v16060_v10 = vld [vmem:[#allocation17_spill] sm:$0xff] }
 0x5d9   : > { %7650 = vmatprep.mubr.bf16.mxu0 %v14546_v27  ;;  %v16063_v27 = vld [vmem:[#allocation16_spill] sm:$0xff] }
 0x5da   : > { %8469 = vperm.xlu1 %10467, %v14506_v26  }
 0x5dc   : > { %8472 = vperm.xlu0 %10466, %v14500_v54  }
 0x5de   : > { %8475 = vperm.xlu1 %10467, %v14532_v44  }
 0x5e0   : > { %7651 = vmatmul.mubr.bf16.gmra.mrb[156].mxu0 %v14542_v39  ;;  %8478 = vperm.xlu0 %10466, %v14524_v33   ;;  %v16062_v39 = vld [vmem:[#allocation13_spill] sm:$0xff] }
 0x5e1   : > { %7660 = vmatprep.mubr.bf16.mxu0 %v14582_v7  ;;  %v14741_v7 = vpop.permute.xlu0 %8241 }
 0x5e2   : > { %8497 = vperm.xlu1 %10467, %v14370_v60  }
 0x5e4   : > { %8500 = vperm.xlu0 %10466, %v14311_v9  }
 0x5e6   : > { %8503 = vperm.xlu1 %10467, %v14446_v18  }
 0x5e8   : > { %7661 = vmatmul.mubr.bf16.gmra.mrb[160].mxu0 %v16056_v31  ;;  %8506 = vperm.xlu0 %10466, %v16057_v8  }
 0x5e9   : > { %7670 = vmatprep.mubr.bf16.mxu0 %v14618_v58  ;;  %v11125_v58 = vmov 2  }
 0x5ea   : > { %8509 = vperm.xlu1 %10467, %v16058_v42  }
 0x5ec   : > { %8512 = vperm.xlu0 %10466, %v16059_v37  }
 0x5ee   : > { %8515 = vperm.xlu1 %10467, %v14561_v2  }
 0x5f0   : > { %7671 = vmatmul.mubr.bf16.gmra.mrb[164].mxu0 %v16060_v10  ;;  %8518 = vperm.xlu0 %10466, %v14535_v43   ;;  %v11109_v10 = vld [vmem:[%s14278_s22] sm:$0xff] }
 0x5f1   : > { %7680 = vmatprep.mubr.bf16.mxu0 %v14654_v61  ;;  %v14739_v61 = vpop.permute.xlu1 %8247 }
 0x5f2   : > { %8521 = vperm.xlu1 %10467, %v16061_v63  }
 0x5f4   : > { %8524 = vperm.xlu0 %10466, %v16062_v39  }
 0x5f5   : > { %v14750_v1 = vpop.permute.xlu1 %8250 }
 0x5f6   : > { %8527 = vperm.xlu1 %10467, %v14633_v53  }
 0x5f8   : > { %7681 = vmatmul.mubr.bf16.gmra.mrb[168].mxu0 %v16063_v27  ;;  %8530 = vperm.xlu0 %10466, %v14607_v56  }
 0x5f9   : > { %7690 = vmatprep.mubr.bf16.mxu0 %v7078_v36 }
 0x5fa   : > { %8533 = vperm.xlu1 %10467, %v14669_v13  }
 0x5fc   : > { %8536 = vperm.xlu0 %10466, %v14643_v52  }
 0x5fe   : > { %8539 = vperm.xlu1 %10467, %v14681_v19  }
 0x600   : > { %7691 = vmatmul.mubr.bf16.gmra.mrb[172].mxu0 %v7077_v14  ;;  %8542 = vperm.xlu0 %10466, %v14678_v57  }
 0x602   : > { %10468 = vset.pattern.permute.xlu1 %v11125_v58 }
 0x603   : > { %8593 = vperm.xlu1 %10468, %v14290_v0   ;;  %v14752_v0 = vpop.permute.xlu0 %8244 }
 0x604   : > { %10469 = vset.pattern.permute.xlu0 %v11125_v58 }
 0x605   : > { %8596 = vperm.xlu0 %10469, %v14295_v24   ;;  %v14756_v24 = vpop.permute.xlu1 %8256 }
 0x607   : > { %8599 = vperm.xlu1 %10468, %v14287_v6   ;;  %v14758_v45 = vpop.permute.xlu0 %8253 }
 0x609   : > { %8605 = vperm.xlu0 %10469, %v14351_v35   ;;  %v14762_v29 = vpop.permute.xlu1 %8262 }
 0x60b   : > { %8602 = vperm.xlu1 %10468, %v14301_v22   ;;  %v14764_v62 = vpop.permute.xlu0 %8259 }
 0x60d   : > { %8611 = vperm.xlu0 %10469, %v14387_v23   ;;  %v14768_v6 = vpop.permute.xlu1 %8268 }
 0x60e   : > { %16064 = vst [vmem:[#allocation8_spill] sm:$0xff] %v14768_v6 }
 0x60f   : > { %8608 = vperm.xlu1 %10468, %v14335_v55   ;;  %v14770_v35 = vpop.permute.xlu0 %8265 }
 0x611   : > { %8617 = vperm.xlu0 %10469, %v14430_v40   ;;  %v14774_v22 = vpop.permute.xlu1 %8274 }
 0x612   : > { %16065 = vst [vmem:[#allocation7_spill] sm:$0xff] %v14774_v22  ;;  %v11113_v22 = vld [vmem:[%s14278_s22 + $0x10] sm:$0xff] }
 0x613   : > { %8614 = vperm.xlu1 %10468, %v14380_v41   ;;  %v14776_v11 = vpop.permute.xlu0 %8271 }
 0x615   : > { %8623 = vperm.xlu0 %10469, %v14463_v50   ;;  %v14780_v55 = vpop.permute.xlu1 %8280 }
 0x616   : > { %16066 = vst [vmem:[#allocation9_spill] sm:$0xff] %v14780_v55 }
 0x617   : > { %8620 = vperm.xlu1 %10468, %v14424_v59   ;;  %v14782_v15 = vpop.permute.xlu0 %8277 }
 0x619   : > { %8629 = vperm.xlu0 %10469, %v14506_v26  }
 0x61a   : > { %v14786_v51 = vpop.permute.xlu1 %8286 }
 0x61b   : > { %8626 = vperm.xlu1 %10468, %v14456_v5   ;;  %16067 = vst [vmem:[#allocation5_spill] sm:$0xff] %v14786_v51  ;;  %v14788_v47 = vpop.permute.xlu0 %8283 }
 0x61d   : > { %8635 = vperm.xlu0 %10469, %v14532_v44  }
 0x61e   : > { %v14792_v28 = vpop.permute.xlu1 %8340 }
 0x61f   : > { %8632 = vperm.xlu1 %10468, %v14500_v54   ;;  %v14795_v25 = vpop.permute.xlu0 %8337 }
 0x621   : > { %8657 = vperm.xlu0 %10469, %v14370_v60  }
 0x622   : > { %v14798_v17 = vpop.permute.xlu1 %8346 }
 0x623   : > { %8638 = vperm.xlu1 %10468, %v14524_v33   ;;  %v14801_v38 = vpop.permute.xlu0 %8343 }
 0x625   : > { %8663 = vperm.xlu0 %10469, %v14446_v18  }
 0x626   : > { %v14804_v34 = vpop.permute.xlu1 %8352 }
 0x627   : > { %8660 = vperm.xlu1 %10468, %v14311_v9   ;;  %v14807_v32 = vpop.permute.xlu0 %8349 }
 0x629   : > { %8669 = vperm.xlu0 %10469, %v16058_v42  }
 0x62a   : > { %v14810_v4 = vpop.permute.xlu1 %8358 }
 0x62b   : > { %8666 = vperm.xlu1 %10468, %v16057_v8   ;;  %v14813_v46 = vpop.permute.xlu0 %8355 }
 0x62d   : > { %8675 = vperm.xlu0 %10469, %v14561_v2  }
 0x62e   : > { %v14816_v20 = vpop.permute.xlu1 %8364 }
 0x62f   : > { %8672 = vperm.xlu1 %10468, %v16059_v37   ;;  %16068 = vst [vmem:[#allocation6_spill] sm:$0xff] %v14816_v20  ;;  %v14819_v48 = vpop.permute.xlu0 %8361 }
 0x631   : > { %8681 = vperm.xlu0 %10469, %v16061_v63  }
 0x632   : > { %v14822_v12 = vpop.permute.xlu1 %8370 }
 0x633   : > { %8678 = vperm.xlu1 %10468, %v14535_v43   ;;  %16069 = vst [vmem:[#allocation2_spill] sm:$0xff] %v14822_v12  ;;  %v14825_v49 = vpop.permute.xlu0 %8367 }
 0x634   : > { %16070 = vst [vmem:[#allocation14_spill] sm:$0xff] %v14825_v49 }
 0x635   : > { %8687 = vperm.xlu0 %10469, %v14633_v53  }
 0x636   : > { %v14828_v14 = vpop.permute.xlu1 %8376 }
 0x637   : > { %8684 = vperm.xlu1 %10468, %v16062_v39   ;;  %16071 = vst [vmem:[#allocation10_spill] sm:$0xff] %v14828_v14  ;;  %v11111_v14 = vld [vmem:[%s14278_s22 + $0x8] sm:$0xff] }
 0x639   : > { %8693 = vperm.xlu0 %10469, %v14669_v13  }
 0x63a   : > { %v14831_v36 = vpop.permute.xlu0 %8373 }
 0x63b   : > { %8690 = vperm.xlu1 %10468, %v14607_v56   ;;  %v14834_v16 = vpop.permute.xlu1 %8382 }
 0x63c   : > { %16072 = vst [vmem:[#allocation12_spill] sm:$0xff] %v14834_v16  ;;  %v11112_v16 = vld [vmem:[%s14278_s22 + $0x28] sm:$0xff] }
 0x63d   : > { %8699 = vperm.xlu0 %10469, %v14681_v19  }
 0x63e   : > { %v14836_v31 = vpop.permute.xlu0 %8379 }
 0x63f   : > { %8696 = vperm.xlu1 %10468, %v14643_v52  }
 0x641   : > { %10470 = vset.pattern.permute.xlu0 %v11126_v21  ;;  %v8437_v27 = vpop.permute.xlu1 %8436 }
 0x642   : > { %8753 = vperm.xlu0 %10470, %v11109_v10   ;;  %v14848_v10 = vld [vmem:[%s15866_s3 + $0xa0] sm:$0xff]  }
 0x643   : > { %8702 = vperm.xlu1 %10468, %v14678_v57   ;;  %v8434_v58 = vpop.permute.xlu0 %8433  ;;  %9844 = vmatprep.subr.bf16.mxu1 %v14848_v10 }
 0x645   : > { %v8440_v3 = vpop.permute.xlu1 %8439 }
 0x646   : > { %8762 = vperm.xlu0 %10470, %v11110_v30  }
 0x647   : > { %10471 = vset.pattern.permute.xlu1 %v11126_v21  ;;  %v8443_v51 = vpop.permute.xlu0 %8442  ;;  %v11114_v21 = vld [vmem:[%s14278_s22 + $0x20] sm:$0xff] }
 0x648   : > { %8756 = vperm.xlu1 %10471, %v11111_v14  }
 0x649   : > { %v8446_v55 = vpop.permute.xlu1 %8445 }
 0x64a   : > { %8768 = vperm.xlu0 %10470, %v11112_v16  }
 0x64b   : > { %v8449_v12 = vpop.permute.xlu0 %8448 }
 0x64c   : > { %8759 = vperm.xlu1 %10471, %v11113_v22  }
 0x64d   : > { %v8452_v30 = vpop.permute.xlu1 %8451 }
 0x64e   : > { %8774 = vperm.xlu0 %10470, %v14380_v41  }
 0x64f   : > { %v14850_v20 = vpop.permute.xlu0 %8454 }
 0x650   : > { %8765 = vperm.xlu1 %10471, %v11114_v21  }
 0x651   : > { %v14855_v14 = vpop.permute.xlu1 %8457 }
 0x652   : > { %8780 = vperm.xlu0 %10470, %v14424_v59  }
 0x653   : > { %v14857_v16 = vpop.permute.xlu0 %8460 }
 0x654   : > { %8771 = vperm.xlu1 %10471, %v14387_v23  }
 0x655   : > { %v14861_v41 = vpop.permute.xlu1 %8463 }
 0x656   : > { %8786 = vperm.xlu0 %10470, %v14456_v5   ;;  %v16073_v5 = vlaneseq }
 0x657   : > { %v14863_v22 = vpop.permute.xlu0 %8466 }
 0x658   : > { %8777 = vperm.xlu1 %10471, %v14430_v40   ;;  %v14879_v49 = vand.u32 127, %v16073_v5  ;;  %v16104_v5 = vmov 0 }
 0x659   : > { %v14867_v21 = vpop.permute.xlu1 %8469 }
 0x65a   : > { %8792 = vperm.xlu0 %10470, %v14500_v54   ;;  %vm8480_vm1 = vcmp.eq.s32.totalorder %v14879_v49, %v8434_v58  ;;  %vm8481_vm2 = vcmp.eq.s32.totalorder %v14879_v49, %v8437_v27  ;;  %vm8482_vm6 = vcmp.eq.s32.totalorder %v14879_v49, %v8440_v3  ;;  %vm8483_vm8 = vcmp.eq.s32.totalorder %v14879_v49, %v8443_v51  ;;  %v16097_v3 = vld [vmem:[#allocation4_spill] sm:$0xff] }
 0x65b   : > { %v14869_v6 = vpop.permute.xlu0 %8472  ;;  %vm8484_vm12 = vcmp.eq.s32.totalorder %v14879_v49, %v8446_v55  ;;  %vm8485_vm14 = vcmp.eq.s32.totalorder %v14879_v49, %v8449_v12  ;;  %v16094_v12 = vld [vmem:[#allocation3_spill] sm:$0xff] }
 0x65c   : > { %8783 = vperm.xlu1 %10471, %v14463_v50   ;;  %v16074_v50 = vmov 0 }
 0x65d   : > { %v14873_v59 = vpop.permute.xlu1 %8475 }
 0x65e   : > { %8798 = vperm.xlu0 %10470, %v14524_v33  }
 0x65f   : > { %v14875_v23 = vpop.permute.xlu0 %8478 }
 0x660   : > { %8789 = vperm.xlu1 %10471, %v14506_v26  }
 0x661   : > { %v8498_v40 = vpop.permute.xlu1 %8497 }
 0x662   : > { %8820 = vperm.xlu0 %10470, %v14311_v9   ;;  %vm8544_vm3 = vcmp.eq.s32.totalorder %v8498_v40, 1  ;;  %v16076_v9 = vmov 0 }
 0x663   : > { %v8501_v54 = vpop.permute.xlu0 %8500  ;;  %vm14886_vm5 = vmand %vm8480_vm1, %vm8544_vm3 }
 0x664   : > { %8795 = vperm.xlu1 %10471, %v14532_v44   ;;  %vm8545_vm4 = vcmp.eq.s32.totalorder %v8501_v54, 1  ;;  %v16075_v50 = vsel %vm14886_vm5, 4294967295, %v16074_v50  ;;  %v16078_v44 = vmov 0 }
 0x665   : > { %vm14891_vm7 = vmand %vm8481_vm2, %vm8545_vm4  ;;  %v8504_v26 = vpop.permute.xlu1 %8503  ;;  %vm8486_vm2 = vcmp.eq.s32.totalorder %v14879_v49, %v8452_v30  ;;  %vm8487_vm4 = vcmp.eq.s32.totalorder %v14879_v49, %v14850_v20 }
 0x666   : > { %8826 = vperm.xlu0 %10470, %v16057_v8   ;;  %v16077_v9 = vsel %vm14891_vm7, 4294967295, %v16076_v9  ;;  %vm8546_vm9 = vcmp.eq.s32.totalorder %v8504_v26, 1  ;;  %v16080_v8 = vmov 0  ;;  %vm16159_vm7 = vcmp.eq.s32.totalorder %v14879_v49, 0 }
 0x667   : > { %v8507_v33 = vpop.permute.xlu0 %8506  ;;  %vm14898_vm11 = vmand %vm8482_vm6, %vm8546_vm9 }
 0x668   : > { %8817 = vperm.xlu1 %10471, %v14370_v60   ;;  %vm8547_vm10 = vcmp.eq.s32.totalorder %v8507_v33, 1  ;;  %v16079_v44 = vsel %vm14898_vm11, 4294967295, %v16078_v44  ;;  %v16082_v60 = vmov 0  ;;  %v16106_v33 = vmov 0 }
 0x669   : > { %vm14903_vm13 = vmand %vm8483_vm8, %vm8547_vm10  ;;  %v8510_v27 = vpop.permute.xlu1 %8509  ;;  %vm8488_vm10 = vcmp.eq.s32.totalorder %v14879_v49, %v14855_v14  ;;  %vm16152_vm11 = vcmp.eq.s32.totalorder %v14879_v49, %v14770_v35 }
 0x66a   : > { %8832 = vperm.xlu0 %10470, %v16059_v37   ;;  %v16081_v8 = vsel %vm14903_vm13, 4294967295, %v16080_v8  ;;  %vm8548_vm15 = vcmp.eq.s32.totalorder %v8510_v27, 1  ;;  %v16084_v37 = vmov 0 }
 0x66b   : > { %v8513_v58 = vpop.permute.xlu0 %8512  ;;  %vm14910_vm1 = vmand %vm8484_vm12, %vm8548_vm15  ;;  %vm8300_vm12 = vcmp.eq.s32.totalorder %v14879_v49, %v14782_v15  ;;  %v16090_v15 = vmov 0 }
 0x66c   : > { %8823 = vperm.xlu1 %10471, %v14446_v18   ;;  %vm8549_vm0 = vcmp.eq.s32.totalorder %v8513_v58, 1  ;;  %v16083_v60 = vsel %vm14910_vm1, 4294967295, %v16082_v60  ;;  %v16086_v18 = vmov 0 }
 0x66d   : > { %vm14915_vm3 = vmand %vm8485_vm14, %vm8549_vm0  ;;  %v8516_v55 = vpop.permute.xlu1 %8515  ;;  %vm8396_vm14 = vcmp.eq.s32.totalorder %v14831_v36, 1  ;;  %vm8489_vm0 = vcmp.eq.s32.totalorder %v14879_v49, %v14857_v16  ;;  %v16100_v16 = vmov 0 }
 0x66e   : > { %8838 = vperm.xlu0 %10470, %v14535_v43   ;;  %v16085_v37 = vsel %vm14915_vm3, 4294967295, %v16084_v37  ;;  %vm8550_vm6 = vcmp.eq.s32.totalorder %v8516_v55, 1  ;;  %v16088_v43 = vmov 0  ;;  %vm8490_vm3 = vcmp.eq.s32.totalorder %v14879_v49, %v14861_v41 }
 0x66f   : > { %v8519_v51 = vpop.permute.xlu0 %8518  ;;  %vm14923_vm9 = vmand %vm8486_vm2, %vm8550_vm6  ;;  %v16102_v41 = vmov 0 }
 0x670   : > { %8829 = vperm.xlu1 %10471, %v16058_v42   ;;  %vm8551_vm8 = vcmp.eq.s32.totalorder %v8519_v51, 1  ;;  %v16087_v18 = vsel %vm14923_vm9, 4294967295, %v16086_v18  ;;  %vm14950_vm9 = vmand %vm8300_vm12, %vm8396_vm14  ;;  %vm8491_vm12 = vcmp.eq.s32.totalorder %v14879_v49, %v14863_v22  ;;  %v16108_v51 = vmov 0 }
 0x671   : > { %vm14932_vm15 = vmand %vm8487_vm4, %vm8551_vm8  ;;  %v8522_v42 = vpop.permute.xlu1 %8521  ;;  %vm8302_vm4 = vcmp.eq.s32.totalorder %v14879_v49, %v14788_v47  ;;  %vm8398_vm8 = vcmp.eq.s32.totalorder %v14836_v31, 1 }
 0x672   : > { %8844 = vperm.xlu0 %10470, %v16062_v39   ;;  %v16089_v43 = vsel %vm14932_vm15, 4294967295, %v16088_v43  ;;  %v7143_v39 = vld [vmem:[%s15865_s2 + $0x13] sm:$0x3]  ;;  %vm8552_vm2 = vcmp.eq.s32.totalorder %v8522_v42, 1 }
 0x673   : > { %v8525_v20 = vpop.permute.xlu0 %8524  ;;  %vm14946_vm15 = vmand %vm8488_vm10, %vm8552_vm2  ;;  %v14957_v36 = vrot.slane %v7143_v39, %v16094_v12  ;;  %v14965_v30 = vrot.slane %v7143_v39, %v16097_v3 }
 0x674   : > { %8835 = vperm.xlu1 %10471, %v14561_v2   ;;  %vm8553_vm6 = vcmp.eq.s32.totalorder %v8525_v20, 1  ;;  %v16091_v15 = vsel %vm14946_vm15, 4294967295, %v16090_v15  ;;  %vm14967_vm10 = vmand %vm8302_vm4, %vm8398_vm8  ;;  %vm8492_vm8 = vcmp.eq.s32.totalorder %v14879_v49, %v14867_v21 }
 0x675   : > { %vm14959_vm1 = vmand %vm8489_vm0, %vm8553_vm6  ;;  %v8528_v47 = vpop.permute.xlu1 %8527  ;;  %vm15936_vm0 = vcmp.eq.s32.totalorder %v14879_v49, 0 }
 0x676   : > { %8850 = vperm.xlu0 %10470, %v14607_v56   ;;  %v16095_v56 = vmov 0  ;;  %vm8554_vm14 = vcmp.eq.s32.totalorder %v8528_v47, 1  ;;  %vm14983_vm4 = vmor %vm15936_vm0, %vm14950_vm9  ;;  %vm8493_vm9 = vcmp.eq.s32.totalorder %v14879_v49, %v14869_v6  ;;  %v16110_v6 = vmov 0 }
 0x677   : > { %v16096_v56 = vsel %vm14959_vm1, 4294967295, %v16095_v56  ;;  %v8531_v31 = vpop.permute.xlu0 %8530  ;;  %vm14975_vm6 = vmand %vm8490_vm3, %vm8554_vm14  ;;  %v16103_v41 = vsel %vm14983_vm4, 4294967295, %v16102_v41  ;;  %v16112_v47 = vmov 0  ;;  %vm16137_vm4 = vcmp.eq.s32.totalorder %v14879_v49, %v14758_v45 }
 0x678   : > { %8841 = vperm.xlu1 %10471, %v16061_v63   ;;  %vm8555_vm2 = vcmp.eq.s32.totalorder %v8531_v31, 1  ;;  %v16101_v16 = vsel %vm14975_vm6, 4294967295, %v16100_v16  ;;  %vm15000_vm3 = vmor %vm15936_vm0, %vm14967_vm10  ;;  %v16190_v45 = vmov 0 }
 0x679   : > { %vm14990_vm1 = vmand %vm8491_vm12, %vm8555_vm2  ;;  %v8534_v40 = vpop.permute.xlu1 %8533  ;;  %v16107_v33 = vsel %vm15000_vm3, 4294967295, %v16106_v33  ;;  %vm8494_vm2 = vcmp.eq.s32.totalorder %v14879_v49, %v14873_v59  ;;  %vm16121_vm3 = vcmp.eq.s32.totalorder %v14879_v49, %v14741_v7 }
 0x67a   : > { %8856 = vperm.xlu0 %10470, %v14643_v52   ;;  %v16105_v5 = vsel %vm14990_vm1, 4294967295, %v16104_v5  ;;  %vm8556_vm12 = vcmp.eq.s32.totalorder %v8534_v40, 1 }
 0x67b   : > { %v8537_v27 = vpop.permute.xlu0 %8536  ;;  %vm15011_vm14 = vmand %vm8492_vm8, %vm8556_vm12  ;;  %vm8495_vm8 = vcmp.eq.s32.totalorder %v14879_v49, %v14875_v23 }
 0x67c   : > { %8847 = vperm.xlu1 %10471, %v14633_v53   ;;  %v16109_v51 = vsel %vm15011_vm14, 4294967295, %v16108_v51  ;;  %vm8557_vm10 = vcmp.eq.s32.totalorder %v8537_v27, 1 }
 0x67d   : > { %vm15022_vm1 = vmand %vm8493_vm9, %vm8557_vm10  ;;  %v8540_v21 = vpop.permute.xlu1 %8539 }
 0x67e   : > { %8862 = vperm.xlu0 %10470, %v14678_v57   ;;  %v16111_v6 = vsel %vm15022_vm1, 4294967295, %v16110_v6  ;;  %vm8558_vm12 = vcmp.eq.s32.totalorder %v8540_v21, 1  ;;  %vm16133_vm1 = vcmp.eq.s32.totalorder %v14879_v49, %v14756_v24 }
 0x67f   : > { %v8543_v2 = vpop.permute.xlu0 %8542  ;;  %vm15029_vm6 = vmand %vm8494_vm2, %vm8558_vm12  ;;  %vm16116_vm12 = vcmp.eq.s32.totalorder %v14792_v28, 1  ;;  %vm16129_vm2 = vcmp.eq.s32.totalorder %v14879_v49, %v14739_v61  ;;  %v16185_v61 = vmov 0 }
 0x680   : > { %8853 = vperm.xlu1 %10471, %v14669_v13   ;;  %v16113_v47 = vsel %vm15029_vm6, 4294967295, %v16112_v47  ;;  %vm8559_vm0 = vcmp.eq.s32.totalorder %v8543_v2, 1  ;;  %vm16125_vm6 = vcmp.eq.s32.totalorder %v14879_v49, %v14750_v1 }
 0x681   : > { %vm15038_vm10 = vmand %vm8495_vm8, %vm8559_vm0  ;;  %vm16120_vm0 = vcmp.eq.s32.totalorder %v14795_v25, 1  ;;  %vm16124_vm8 = vcmp.eq.s32.totalorder %v14798_v17, 1 }
 0x682   : > { %vm15117_vm14 = vmand %vm16125_vm6, %vm16124_vm8  ;;  %vm16136_vm6 = vcmp.eq.s32.totalorder %v14807_v32, 1  ;;  %vm16141_vm8 = vcmp.eq.s32.totalorder %v14810_v4, 1  ;;  %v16143_v32 = vmov 0 }
 0x684   : > { %8859 = vperm.xlu1 %10471, %v14681_v19   ;;  %v15046_v27 = vpop.permute.xlu0 %8596 }
 0x688   : > { %v15055_v2 = vpop.permute.xlu0 %8605 }
 0x69b   : > { %v7622_v63 = vpop.f32.mrb[144].mxu0 }
 0x69c   : > { %v10068_v52 = vadd.f32 %v7622_v63, %v14957_v36  ;;  %v7624_v22 = vpop.f32.mrb[145].mxu0 }
 0x69d   : > { %v10069_v54 = vadd.f32 %v7624_v22, %v14965_v30  ;;  %v7626_v26 = vpop.f32.mrb[146].mxu0  ;;  %v15042_v22 = vpop.permute.xlu1 %8593 }
 0x69e   : > { %v7701_v58 = vmul.f32 0.01, %v10068_v52  ;;  %v10070_v53 = vadd.f32 %v7626_v26, %v14957_v36  ;;  %v7628_v55 = vpop.f32.mrb[147].mxu0 }
 0x69f   : > { %v7702_v42 = vmul.f32 0.01, %v10069_v54  ;;  %v10071_v20 = vadd.f32 %v7628_v55, %v14965_v30 }
 0x6a0   : > { %v7703_v57 = vmul.f32 0.01, %v10070_v53  ;;  %v7733_v59 = vmax.f32 %v10068_v52, %v7701_v58  ;;  %v16114_v52 = vmov 0 }
 0x6a1   : > { %v7704_v39 = vmul.f32 0.01, %v10071_v20  ;;  %v7734_v31 = vmax.f32 %v10069_v54, %v7702_v42  ;;  %v16115_v52 = vsel %vm15038_vm10, 4294967295, %v16114_v52  ;;  %v11101_v42 = vld [vmem:[%s15866_s3 + $0xa8] sm:$0xff]   ;;  %v15053_v19 = vpop.permute.xlu1 %8599  ;;  %vm16117_vm10 = vcmp.eq.s32.totalorder %v14879_v49, %v14752_v0 }
 0x6a2   : > { %v7735_v12 = vmax.f32 %v10070_v53, %v7703_v57  ;;  %vm15087_vm9 = vmand %vm16117_vm10, %vm16116_vm12 }
 0x6a3   : > { %v7736_v3 = vmax.f32 %v10071_v20, %v7704_v39  ;;  %v7632_v14 = vpop.f32.mrb[148].mxu0  ;;  %vm15103_vm10 = vmand %vm16121_vm3, %vm16120_vm0  ;;  %vm16128_vm0 = vcmp.eq.s32.totalorder %v14801_v38, 1  ;;  %vm16132_vm3 = vcmp.eq.s32.totalorder %v14804_v34, 1  ;;  %v16140_v34 = vld [vmem:[#allocation14_spill] sm:$0xff] }
 0x6a4   : > { %v7765_v13 = vpack.c.bf16 %v7735_v12, %v7733_v59  ;;  %v10072_v23 = vadd.f32 %v7632_v14, %v14957_v36  ;;  %v7634_v63 = vpop.f32.mrb[149].mxu0  ;;  %vm15127_vm12 = vmand %vm16129_vm2, %vm16128_vm0  ;;  %vm16142_vm0 = vcmp.eq.s32.totalorder %v14879_v49, %v14762_v29  ;;  %v16150_v29 = vld [vmem:[#allocation6_spill] sm:$0xff] }
 0x6a5   : > { %v10073_v40 = vadd.f32 %v7634_v63, %v14965_v30  ;;  %v7636_v54 = vpop.f32.mrb[150].mxu0  ;;  %v7766_v26 = vpack.c.bf16 %v7736_v3, %v7734_v31  ;;  %v11102_v31 = vld [vmem:[%s15866_s3 + $0xb0] sm:$0xff]   ;;  %vm15141_vm2 = vmand %vm16133_vm1, %vm16132_vm3 }
 0x6a6   : > { %v7705_v58 = vmul.f32 0.01, %v10072_v23  ;;  %v10074_v53 = vadd.f32 %v7636_v54, %v14957_v36  ;;  %v7638_v55 = vpop.f32.mrb[151].mxu0  ;;  %vm15156_vm1 = vmand %vm16137_vm4, %vm16136_vm6  ;;  %vm16145_vm4 = vcmp.eq.s32.totalorder %v14813_v46, 1  ;;  %vm16146_vm6 = vcmp.eq.s32.totalorder %v14879_v49, %v14764_v62 }
 0x6a7   : > { %v7706_v20 = vmul.f32 0.01, %v10073_v40  ;;  %v10075_v57 = vadd.f32 %v7638_v55, %v14965_v30  ;;  %7948 = vmatprep.mubr.bf16.mxu1 %v7766_v26  ;;  %v15062_v55 = vpop.permute.xlu1 %8602  ;;  %vm15169_vm15 = vmand %vm16142_vm0, %vm16141_vm8  ;;  %vm8393_vm8 = vcmp.eq.s32.totalorder %v16150_v29, 1  ;;  %vm16151_vm0 = vcmp.eq.s32.totalorder %v14819_v48, 1 }
 0x6a8   : > { %v7707_v21 = vmul.f32 0.01, %v10074_v53  ;;  %7949 = vmatmul.mubr.bf16.vlgmr.msra.gmra.mrb[160].mxu1 %v7765_v13  ;;  %v7737_v59 = vmax.f32 %v10072_v23, %v7705_v58  ;;  %v16144_v32 = vsel %vm15169_vm15, 4294967295, %v16143_v32  ;;  %vm15178_vm3 = vmand %vm16146_vm6, %vm16145_vm4  ;;  %vm16155_vm4 = vcmp.eq.s32.totalorder %v16140_v34, 1 }
 0x6a9   : > { %v7708_v39 = vmul.f32 0.01, %v10075_v57  ;;  %9845 = vmatpush3.bf16.msra.mxu1 %v14848_v10  ;;  %v7738_v3 = vmax.f32 %v10073_v40, %v7706_v20  ;;  %vm15191_vm15 = vmand %vm16152_vm11, %vm16151_vm0  ;;  %vm16156_vm6 = vcmp.eq.s32.totalorder %v14879_v49, %v14776_v11  ;;  %v16163_v11 = vmov 0 }
 0x6aa   : > { %v7739_v12 = vmax.f32 %v10074_v53, %v7707_v21  ;;  %9846 = vmatprep.subr.bf16.mxu1 %v11101_v42  ;;  %v15068_v53 = vpop.permute.xlu0 %8611  ;;  %vm15200_vm13 = vmand %vm16156_vm6, %vm16155_vm4 }
 0x6ab   : > { %v7740_v14 = vmax.f32 %v10075_v57, %v7708_v39  ;;  %v7642_v63 = vpop.f32.mrb[152].mxu0  ;;  %vm15208_vm5 = vmor %vm16159_vm7, %vm15103_vm10 }
 0x6ac   : > { %v10076_v54 = vadd.f32 %v7642_v63, %v14957_v36  ;;  %v7644_v13 = vpop.f32.mrb[153].mxu0  ;;  %v7767_v26 = vpack.c.bf16 %v7739_v12, %v7737_v59  ;;  %v15092_v12 = vpop.permute.xlu1 %8608  ;;  %vm16162_vm11 = vmmov %vm16159_vm7  ;;  %v16224_v59 = vld [vmem:[#allocation5_spill] sm:$0xff] }
 0x6ad   : > { %v10077_v10 = vadd.f32 %v7644_v13, %v14965_v30  ;;  %v7646_v23 = vpop.f32.mrb[154].mxu0  ;;  %v7768_v58 = vpack.c.bf16 %v7740_v14, %v7738_v3  ;;  %9847 = vmatpush3.bf16.msra.mxu1 %v11101_v42  ;;  %vm15218_vm0 = vmor %vm16162_vm11, %vm15087_vm9 }
 0x6ae   : > { %v7709_v40 = vmul.f32 0.01, %v10076_v54  ;;  %v10078_v20 = vadd.f32 %v7646_v23, %v14957_v36  ;;  %v7648_v57 = vpop.f32.mrb[155].mxu0  ;;  %9848 = vmatprep.subr.bf16.mxu1 %v11102_v31  ;;  %v15108_v28 = vpop.permute.xlu0 %8617  ;;  %v16164_v11 = vsel %vm15218_vm0, 4294967295, %v16163_v11  ;;  %vm16168_vm4 = vmmov %vm16162_vm11 }
 0x6af   : > { %v7710_v21 = vmul.f32 0.01, %v10077_v10  ;;  %v10079_v39 = vadd.f32 %v7648_v57, %v14965_v30  ;;  %7956 = vmatprep.mubr.bf16.mxu1 %v7768_v58  ;;  %vm15235_vm6 = vmor %vm16168_vm4, %vm15127_vm12 }
 0x6b0   : > { %v7711_v42 = vmul.f32 0.01, %v10078_v20  ;;  %7957 = vmatmul.mubr.bf16.gmra.mrb[164].mxu1 %v7767_v26  ;;  %v7741_v14 = vmax.f32 %v10076_v54, %v7709_v40  ;;  %v15146_v38 = vpop.permute.xlu1 %8614  ;;  %vm16176_vm12 = vmmov %vm16168_vm4 }
 0x6b1   : > { %v7712_v3 = vmul.f32 0.01, %v10079_v39  ;;  %9849 = vmatpush3.bf16.msra.mxu1 %v11102_v31  ;;  %v7742_v25 = vmax.f32 %v10077_v10, %v7710_v21  ;;  %v16174_v31 = vmov 0 }
 0x6b2   : > { %v7743_v63 = vmax.f32 %v10078_v20, %v7711_v42  ;;  %v15161_v40 = vpop.permute.xlu0 %8623 }
 0x6b3   : > { %v7744_v13 = vmax.f32 %v10079_v39, %v7712_v3  ;;  %v7652_v26 = vpop.f32.mrb[156].mxu0  ;;  %v16149_v39 = vld [vmem:[#allocation8_spill] sm:$0xff]  ;;  %v16206_v3 = vmov 0 }
 0x6b4   : > { %v10080_v1 = vadd.f32 %v7652_v26, %v14957_v36  ;;  %v7654_v17 = vpop.f32.mrb[157].mxu0  ;;  %v7769_v54 = vpack.c.bf16 %v7743_v63, %v7741_v14  ;;  %v15212_v48 = vpop.permute.xlu1 %8620  ;;  %vm16165_vm7 = vcmp.eq.s32.totalorder %v14879_v49, %v16149_v39  ;;  %v16171_v26 = vld [vmem:[#allocation7_spill] sm:$0xff] }
 0x6b5   : > { %v10081_v10 = vadd.f32 %v7654_v17, %v14965_v30  ;;  %v7656_v23 = vpop.f32.mrb[158].mxu0  ;;  %v7770_v58 = vpack.c.bf16 %v7744_v13, %v7742_v25  ;;  %vm15227_vm10 = vmand %vm16165_vm7, %vm8393_vm8  ;;  %vm8299_vm9 = vcmp.eq.s32.totalorder %v14879_v49, %v16171_v26  ;;  %v16188_v26 = vld [vmem:[#allocation10_spill] sm:$0xff] }
 0x6b6   : > { %v7713_v20 = vmul.f32 0.01, %v10080_v1  ;;  %v10082_v57 = vadd.f32 %v7656_v23, %v14957_v36  ;;  %v7658_v21 = vpop.f32.mrb[159].mxu0  ;;  %v15222_v63 = vpop.permute.xlu0 %8629  ;;  %v16172_v23 = vld [vmem:[#allocation2_spill] sm:$0xff]  ;;  %vm16173_vm8 = vmmov %vm16168_vm4 }
 0x6b7   : > { %v7714_v4 = vmul.f32 0.01, %v10081_v10  ;;  %v10083_v42 = vadd.f32 %v7658_v21, %v14965_v30  ;;  %7964 = vmatprep.mubr.bf16.mxu1 %v7770_v58  ;;  %vm8395_vm11 = vcmp.eq.s32.totalorder %v16172_v23, 1  ;;  %vm15246_vm7 = vmor %vm16173_vm8, %vm15117_vm14 }
 0x6b8   : > { %v7715_v46 = vmul.f32 0.01, %v10082_v57  ;;  %7965 = vmatmul.mubr.bf16.gmra.mrb[168].mxu1 %v7769_v54  ;;  %v7745_v0 = vmax.f32 %v10080_v1, %v7713_v20  ;;  %v16175_v31 = vsel %vm15246_vm7, 4294967295, %v16174_v31  ;;  %vm15255_vm4 = vmor %vm16176_vm12, %vm15156_vm1 }
 0x6b9   : > { %v7716_v14 = vmul.f32 0.01, %v10083_v42  ;;  %v7746_v1 = vmax.f32 %v10081_v10, %v7714_v4  ;;  %vm16179_vm14 = vmmov %vm16173_vm8  ;;  %v16180_v4 = vmov 0  ;;  %v16244_v10 = vmov 0 }
 0x6ba   : > { %v7747_v25 = vmax.f32 %v10082_v57, %v7715_v46  ;;  %v15259_v57 = vpop.permute.xlu1 %8626  ;;  %vm15266_vm8 = vmor %vm16179_vm14, %vm15141_vm2  ;;  %v15270_v24 = vpop.permute.xlu0 %8635 }
 0x6bb   : > { %v7748_v17 = vmax.f32 %v10083_v42, %v7716_v14  ;;  %v7662_v54 = vpop.f32.mrb[160].mxu0  ;;  %v16181_v4 = vsel %vm15266_vm8, 4294967295, %v16180_v4  ;;  %vm15278_vm1 = vmand %vm8299_vm9, %vm8395_vm11  ;;  %v16182_v14 = vmov 0  ;;  %vm8397_vm9 = vcmp.eq.s32.totalorder %v16188_v26, 1 }
 0x6bc   : > { %v10084_v58 = vadd.f32 %v7662_v54, %v14957_v36  ;;  %v7664_v34 = vpop.f32.mrb[161].mxu0  ;;  %v7771_v20 = vpack.c.bf16 %v7747_v25, %v7745_v0  ;;  %v16183_v14 = vsel %vm15278_vm1, 4294967295, %v16182_v14  ;;  %vm16184_vm2 = vmmov %vm16176_vm12  ;;  %v16187_v0 = vld [vmem:[#allocation9_spill] sm:$0xff] }
 0x6bd   : > { %v10085_v7 = vadd.f32 %v7664_v34, %v14965_v30  ;;  %v7666_v21 = vpop.f32.mrb[162].mxu0  ;;  %v7772_v39 = vpack.c.bf16 %v7748_v17, %v7746_v1  ;;  %vm15286_vm12 = vmor %vm16184_vm2, %vm15178_vm3  ;;  %vm16192_vm3 = vnez %v16075_v50  ;;  %v16210_v50 = vmov 0 }
 0x6be   : > { %v7717_v42 = vmul.f32 0.01, %v10084_v58  ;;  %v10086_v29 = vadd.f32 %v7666_v21, %v14957_v36  ;;  %v7668_v46 = vpop.f32.mrb[163].mxu0  ;;  %v16186_v61 = vsel %vm15286_vm12, 4294967295, %v16185_v61  ;;  %vm16189_vm11 = vmmov %vm16184_vm2  ;;  %v15308_v54 = vpop.permute.xlu1 %8632  ;;  %vm8642_vm12 = vcmp.eq.s32.totalorder %v14879_v49, %v15053_v19 }
 0x6bf   : > { %v7718_v25 = vmul.f32 0.01, %v10085_v7  ;;  %v10087_v1 = vadd.f32 %v7668_v46, %v14965_v30  ;;  %7972 = vmatprep.mubr.bf16.mxu1 %v7772_v39  ;;  %vm15298_vm1 = vmor %vm16189_vm11, %vm15191_vm15  ;;  %vm16194_vm11 = vnez %v16144_v32  ;;  %v8658_v34 = vpop.permute.xlu0 %8657  ;;  %v16199_v39 = vmov 0 }
 0x6c0   : > { %v16191_v45 = vsel %vm15298_vm1, 4294967295, %v16190_v45  ;;  %v7719_v17 = vmul.f32 0.01, %v10086_v29  ;;  %7973 = vmatmul.mubr.bf16.gmra.mrb[172].mxu1 %v7771_v20  ;;  %vm16195_vm1 = vmmov %vm16184_vm2  ;;  %v7749_v20 = vmax.f32 %v10084_v58, %v7717_v42  ;;  %vm16198_vm2 = vcmp.eq.s32.totalorder %v14879_v49, %v16187_v0 }
 0x6c1   : > { %v7720_v23 = vmul.f32 0.01, %v10087_v1  ;;  %vm15318_vm8 = vmor %vm16195_vm1, %vm16194_vm11  ;;  %vm16201_vm15 = vnez %v16079_v44  ;;  %vm8704_vm0 = vcmp.eq.s32.totalorder %v8658_v34, 1  ;;  %v7750_v32 = vmax.f32 %v10085_v7, %v7718_v25 }
 0x6c2   : > { %v7751_v21 = vmax.f32 %v10086_v29, %v7719_v17  ;;  %vm15325_vm14 = vmand %vm16198_vm2, %vm8397_vm9  ;;  %v16202_v58 = vmov 0  ;;  %vm16204_vm9 = vcmp.eq.s32.totalorder %v14879_v49, %v15042_v22  ;;  %v15356_v7 = vpop.permute.xlu1 %8638  ;;  %vm16220_vm7 = vnez %v16183_v14 }
 0x6c3   : > { %v16200_v39 = vsel %vm15325_vm14, 4294967295, %v16199_v39  ;;  %v7752_v46 = vmax.f32 %v10087_v1, %v7720_v23  ;;  %v7672_v26 = vpop.f32.mrb[164].mxu0  ;;  %vm15337_vm11 = vmor %vm16195_vm1, %vm15200_vm13  ;;  %v8664_v35 = vpop.permute.xlu0 %8663  ;;  %v16222_v19 = vmov 0 }
 0x6c4   : > { %v16203_v58 = vsel %vm15337_vm11, 4294967295, %v16202_v58  ;;  %vm8720_vm2 = vmand %vm16204_vm9, %vm8704_vm0  ;;  %v10088_v42 = vadd.f32 %v7672_v26, %v14957_v36  ;;  %v7674_v29 = vpop.f32.mrb[165].mxu0  ;;  %v7773_v0 = vpack.c.bf16 %v7751_v21, %v7749_v20 }
 0x6c5   : > { %vm16205_vm14 = vmor %vm15208_vm5, %vm16192_vm3  ;;  %v10089_v22 = vadd.f32 %v7674_v29, %v14965_v30  ;;  %v7676_v25 = vpop.f32.mrb[166].mxu0  ;;  %v7774_v1 = vpack.c.bf16 %v7752_v46, %v7750_v32  ;;  %v16216_v32 = vmov 0 }
 0x6c6   : > { %vm15352_vm13 = vmor %vm16205_vm14, %vm8720_vm2  ;;  %v7721_v17 = vmul.f32 0.01, %v10088_v42  ;;  %v10090_v23 = vadd.f32 %v7676_v25, %v14957_v36  ;;  %v7678_v34 = vpop.f32.mrb[167].mxu0  ;;  %vm16212_vm14 = vnez %v16083_v60  ;;  %vm8706_vm2 = vcmp.eq.s32.totalorder %v8664_v35, 1  ;;  %v8661_v46 = vpop.permute.xlu1 %8660  ;;  %v16228_v35 = vld [vmem:[#allocation12_spill] sm:$0xff] }
 0x6c7   : > { %v16207_v3 = vsel %vm15352_vm13, 4294967295, %v16206_v3  ;;  %vm16209_vm9 = vmmov %vm16195_vm1  ;;  %v7722_v20 = vmul.f32 0.01, %v10089_v22  ;;  %v10091_v13 = vadd.f32 %v7678_v34, %v14965_v30  ;;  %7980 = vmatprep.mubr.bf16.mxu1 %v7774_v1  ;;  %v8670_v44 = vpop.permute.xlu0 %8669  ;;  %vm16229_vm13 = vnez %v16164_v11 }
 0x6c8   : > { %vm15367_vm5 = vmor %vm16209_vm9, %vm15227_vm10  ;;  %v7723_v21 = vmul.f32 0.01, %v10090_v23  ;;  %7981 = vmatmul.mubr.bf16.gmra.mrb[176].mxu1 %v7773_v0  ;;  %v7753_v29 = vmax.f32 %v10088_v42, %v7721_v17  ;;  %vm16226_vm10 = vnez %v16191_v45  ;;  %v16232_v42 = vmov 0 }
 0x6c9   : > { %v16211_v50 = vsel %vm15367_vm5, 4294967295, %v16210_v50  ;;  %vm8722_vm9 = vmand %vm8642_vm12, %vm8706_vm2  ;;  %v7724_v26 = vmul.f32 0.01, %v10091_v13  ;;  %vm16221_vm5 = vcmp.eq.s32.totalorder %v14879_v49, 0  ;;  %v7754_v14 = vmax.f32 %v10089_v22, %v7722_v20 }
 0x6ca   : > { %vm16215_vm3 = vmor %vm15235_vm6, %vm16201_vm15  ;;  %vm8705_vm15 = vcmp.eq.s32.totalorder %v8661_v46, 1  ;;  %v7755_v0 = vmax.f32 %v10090_v23, %v7723_v21  ;;  %vm8399_vm6 = vcmp.eq.s32.totalorder %v16228_v35, 1  ;;  %vm16230_vm12 = vnez %v16077_v9  ;;  %v8667_v11 = vpop.permute.xlu1 %8666 }
 0x6cb   : > { %vm15391_vm0 = vmor %vm16215_vm3, %vm8722_vm9  ;;  %vm16225_vm9 = vnez %v16091_v15  ;;  %v7756_v25 = vmax.f32 %v10091_v13, %v7724_v26  ;;  %v7682_v1 = vpop.f32.mrb[168].mxu0  ;;  %v16238_v20 = vmov 0  ;;  %v16276_v15 = vmov 0 }
 0x6cc   : > { %v16217_v32 = vsel %vm15391_vm0, 4294967295, %v16216_v32  ;;  %vm15403_vm1 = vmor %vm16221_vm5, %vm16220_vm7  ;;  %vm16227_vm7 = vcmp.eq.s32.totalorder %v14879_v49, %v15046_v27  ;;  %v10092_v27 = vadd.f32 %v7682_v1, %v14957_v36  ;;  %v7684_v17 = vpop.f32.mrb[169].mxu0  ;;  %v7775_v22 = vpack.c.bf16 %v7755_v0, %v7753_v29 }
 0x6cd   : > { %v16223_v19 = vsel %vm15403_vm1, 4294967295, %v16222_v19  ;;  %vm8721_vm5 = vmand %vm16227_vm7, %vm8705_vm15  ;;  %vm8708_vm1 = vcmp.eq.s32.totalorder %v8670_v44, 1  ;;  %vm16235_vm0 = vcmp.eq.s32.totalorder %v14879_v49, %v15055_v2  ;;  %v10093_v9 = vadd.f32 %v7684_v17, %v14965_v30  ;;  %v7686_v23 = vpop.f32.mrb[170].mxu0 }
 0x6ce   : > { %vm16231_vm2 = vmor %vm16229_vm13, %vm16230_vm12  ;;  %v7776_v34 = vpack.c.bf16 %v7756_v25, %v7754_v14  ;;  %vm16236_vm13 = vnez %v16200_v39  ;;  %vm16237_vm12 = vcmp.eq.s32.totalorder %v14879_v49, 0  ;;  %v16241_v2 = vmov 0  ;;  %v8676_v39 = vpop.permute.xlu0 %8675  ;;  %v7688_v46 = vpop.f32.mrb[171].mxu0 }
 0x6cf   : > { %vm15426_vm11 = vmor %vm16231_vm2, %vm8721_vm5  ;;  %vm8707_vm7 = vcmp.eq.s32.totalorder %v8667_v11, 1  ;;  %v7725_v13 = vmul.f32 0.01, %v10092_v27  ;;  %v10094_v21 = vadd.f32 %v7686_v23, %v14957_v36  ;;  %v7726_v60 = vmul.f32 0.01, %v10093_v9 }
 0x6d0   : > { %v16233_v42 = vsel %vm15426_vm11, 4294967295, %v16232_v42  ;;  %vm8724_vm3 = vmand %vm16235_vm0, %vm8708_vm1  ;;  %v10095_v26 = vadd.f32 %v7688_v46, %v14965_v30  ;;  %7988 = vmatprep.mubr.bf16.mxu1 %v7776_v34  ;;  %vm16250_vm11 = vnez %v16081_v8  ;;  %v16252_v44 = vmov 0 }
 0x6d1   : > { %vm15443_vm2 = vmor %vm16237_vm12, %vm16236_vm13  ;;  %vm16243_vm13 = vcmp.eq.s32.totalorder %v14879_v49, %v16224_v59  ;;  %v7727_v59 = vmul.f32 0.01, %v10094_v21  ;;  %7989 = vmatmul.mubr.bf16.gmra.mrb[180].mxu1 %v7775_v22  ;;  %v16260_v8 = vmov 0  ;;  %v7757_v29 = vmax.f32 %v10092_v27, %v7725_v13 }
 0x6d2   : > { %v16239_v20 = vsel %vm15443_vm2, 4294967295, %v16238_v20  ;;  %vm16240_vm0 = vmor %vm15255_vm4, %vm16212_vm14  ;;  %vm16256_vm4 = vcmp.eq.s32.totalorder %v14879_v49, %v15068_v53  ;;  %v7758_v53 = vmax.f32 %v10093_v9, %v7726_v60  ;;  %v16271_v22 = vmov 0 }
 0x6d3   : > { %vm15454_vm1 = vmor %vm16240_vm0, %vm8724_vm3  ;;  %vm16248_vm0 = vcmp.eq.s32.totalorder %v14879_v49, %v15062_v55  ;;  %v8673_v55 = vpop.permute.xlu1 %8672  ;;  %v7759_v0 = vmax.f32 %v10094_v21, %v7727_v59  ;;  %v7692_v25 = vpop.f32.mrb[172].mxu0 }
 0x6d4   : > { %v16242_v2 = vsel %vm15454_vm1, 4294967295, %v16241_v2  ;;  %vm15464_vm12 = vmand %vm16243_vm13, %vm8399_vm6  ;;  %vm8710_vm1 = vcmp.eq.s32.totalorder %v8676_v39, 1  ;;  %vm8645_vm6 = vcmp.eq.s32.totalorder %v14879_v49, %v15092_v12  ;;  %vm16249_vm13 = vnez %v16175_v31  ;;  %v8682_v31 = vpop.permute.xlu0 %8681  ;;  %v7694_v1 = vpop.f32.mrb[173].mxu0 }
 0x6d5   : > { %v16245_v10 = vsel %vm15464_vm12, 4294967295, %v16244_v10  ;;  %vm8723_vm5 = vmand %vm16248_vm0, %vm8707_vm7  ;;  %vm16254_vm7 = vnez %v16096_v56  ;;  %vm16255_vm0 = vnez %v16211_v50  ;;  %v7728_v12 = vmul.f32 0.01, %v10095_v26  ;;  %v7696_v27 = vpop.f32.mrb[174].mxu0  ;;  %v11107_v50 = vld [vmem:[%s15866_s3 + $0xd8] sm:$0xff]  }
 0x6d6   : > { %vm16251_vm12 = vmor %vm16249_vm13, %vm16250_vm11  ;;  %vm8709_vm15 = vcmp.eq.s32.totalorder %v8673_v55, 1  ;;  %vm16262_vm11 = vnez %v16181_v4  ;;  %v7777_v35 = vpack.c.bf16 %v7759_v0, %v7757_v29  ;;  %v10098_v9 = vadd.f32 %v7696_v27, %v14957_v36  ;;  %v7698_v23 = vpop.f32.mrb[175].mxu0 }
 0x6d7   : > { %vm15483_vm2 = vmor %vm16251_vm12, %vm8723_vm5  ;;  %vm16257_vm5 = vnez %v16186_v61  ;;  %vm16258_vm12 = vnez %v16087_v18  ;;  %v7760_v14 = vmax.f32 %v10095_v26, %v7728_v12  ;;  %v16265_v18 = vmov 0  ;;  %v8679_v4 = vpop.permute.xlu1 %8678 }
 0x6d8   : > { %v16253_v44 = vsel %vm15483_vm2, 4294967295, %v16252_v44  ;;  %vm8726_vm14 = vmand %vm16256_vm4, %vm8710_vm1  ;;  %vm8712_vm1 = vcmp.eq.s32.totalorder %v8682_v31, 1  ;;  %v10096_v61 = vadd.f32 %v7692_v25, %v14957_v36  ;;  %vm16269_vm4 = vcmp.eq.s32.totalorder %v14879_v49, %v15108_v28  ;;  %v8688_v28 = vpop.permute.xlu0 %8687 }
 0x6d9   : > { %vm16259_vm13 = vmor %vm16257_vm5, %vm16258_vm12  ;;  %vm16263_vm5 = vnez %v16085_v37  ;;  %v10097_v37 = vadd.f32 %v7694_v1, %v14965_v30  ;;  %v7778_v17 = vpack.c.bf16 %v7760_v14, %v7758_v53  ;;  %v10099_v45 = vadd.f32 %v7698_v23, %v14965_v30 }
 0x6da   : > { %vm15501_vm2 = vmor %vm16259_vm13, %vm8726_vm14  ;;  %v7729_v11 = vmul.f32 0.01, %v10096_v61  ;;  %vm8714_vm13 = vcmp.eq.s32.totalorder %v8688_v28, 1  ;;  %v7731_v36 = vmul.f32 0.01, %v10098_v9 }
 0x6db   : > { %v16261_v8 = vsel %vm15501_vm2, 4294967295, %v16260_v8  ;;  %vm8725_vm3 = vmand %vm8645_vm6, %vm8709_vm15  ;;  %vm16267_vm15 = vnez %v16105_v5  ;;  %vm16268_vm6 = vnez %v16223_v19  ;;  %v7730_v34 = vmul.f32 0.01, %v10097_v37  ;;  %7996 = vmatprep.mubr.bf16.mxu1 %v7778_v17  ;;  %v8685_v30 = vpop.permute.xlu1 %8684 }
 0x6dc   : > { %vm16264_vm14 = vmor %vm16262_vm11, %vm16263_vm5  ;;  %7997 = vmatmul.mubr.bf16.gmra.mrb[184].mxu1 %v7777_v35  ;;  %v8694_v62 = vpop.permute.xlu0 %8693  ;;  %v7761_v39 = vmax.f32 %v10096_v61, %v7729_v11  ;;  %v7763_v13 = vmax.f32 %v10098_v9, %v7731_v36  ;;  %v16310_v5 = vmov 0 }
 0x6dd   : > { %vm15512_vm12 = vmor %vm16264_vm14, %vm8725_vm3  ;;  %vm8711_vm14 = vcmp.eq.s32.totalorder %v8679_v4, 1  ;;  %vm16286_vm3 = vnez %v16101_v16  ;;  %v7762_v21 = vmax.f32 %v10097_v37, %v7730_v34 }
 0x6de   : > { %v16266_v18 = vsel %vm15512_vm12, 4294967295, %v16265_v18  ;;  %vm8728_vm2 = vmand %vm16269_vm4, %vm8712_vm1  ;;  %vm16273_vm1 = vcmp.eq.s32.totalorder %v14879_v49, %v15146_v38  ;;  %v7732_v38 = vmul.f32 0.01, %v10099_v45  ;;  %vm16281_vm12 = vnez %v16245_v10 }
 0x6df   : > { %vm16270_vm11 = vmor %vm16226_vm10, %vm16225_vm9  ;;  %vm16274_vm9 = vnez %v16089_v43  ;;  %v16283_v43 = vmov 0  ;;  %v8691_v46 = vpop.permute.xlu1 %8690 }
 0x6e0   : > { %vm15532_vm5 = vmor %vm16270_vm11, %vm8728_vm2  ;;  %v8700_v56 = vpop.permute.xlu0 %8699 }
 0x6e1   : > { %v16272_v22 = vsel %vm15532_vm5, 4294967295, %v16271_v22  ;;  %vm8727_vm4 = vmand %vm16273_vm1, %vm8711_vm14  ;;  %vm16280_vm5 = vcmp.eq.s32.totalorder %v14879_v49, %v15161_v40  ;;  %v16288_v40 = vmov 0 }
 0x6e2   : > { %vm16275_vm2 = vmor %vm15318_vm8, %vm16274_vm9  ;;  %vm16282_vm8 = vcmp.eq.s32.totalorder %v14879_v49, 0  ;;  %vm8652_vm9 = vcmp.eq.s32.totalorder %v14879_v49, %v15222_v63  ;;  %v7764_v63 = vmax.f32 %v10099_v45, %v7732_v38 }
 0x6e3   : > { %vm15548_vm11 = vmor %vm16275_vm2, %vm8727_vm4  ;;  %vm16285_vm2 = vnez %v16203_v58  ;;  %v7779_v58 = vpack.c.bf16 %v7763_v13, %v7761_v39 }
 0x6e4   : > { %v16277_v15 = vsel %vm15548_vm11, 4294967295, %v16276_v15  ;;  %vm8730_vm10 = vmand %vm16280_vm5, %vm8714_vm13  ;;  %vm8713_vm13 = vcmp.eq.s32.totalorder %v8685_v30, 1 }
 0x6e5   : > { %vm15563_vm4 = vmor %vm16282_vm8, %vm16281_vm12  ;;  %vm16290_vm12 = vcmp.eq.s32.totalorder %v14879_v49, %v15212_v48  ;;  %vm8716_vm8 = vcmp.eq.s32.totalorder %v8694_v62, 1  ;;  %v7780_v48 = vpack.c.bf16 %v7764_v63, %v7762_v21 }
 0x6e6   : > { %v16284_v43 = vsel %vm15563_vm4, 4294967295, %v16283_v43  ;;  %vm16287_vm11 = vmor %vm16285_vm2, %vm16286_vm3  ;;  %vm8651_vm4 = vcmp.eq.s32.totalorder %v14879_v49, %v15259_v57  ;;  %vm8654_vm2 = vcmp.eq.s32.totalorder %v14879_v49, %v15270_v24  ;;  %v16297_v57 = vmov 0 }
 0x6e7   : > { %vm15574_vm14 = vmor %vm16287_vm11, %vm8730_vm10  ;;  %8004 = vmatprep.mubr.bf16.mxu1 %v7780_v48 }
 0x6e8   : > { %v16289_v40 = vsel %vm15574_vm14, 4294967295, %v16288_v40  ;;  %vm8729_vm5 = vmand %vm16290_vm12, %vm8713_vm13  ;;  %vm16294_vm13 = vnez %v16103_v41  ;;  %vm16295_vm12 = vnez %v16109_v51  ;;  %8005 = vmatmul.mubr.bf16.gmra.mrb[188].mxu1 %v7779_v58  ;;  %v8697_v51 = vpop.permute.xlu1 %8696 }
 0x6e9   : > { %vm16291_vm3 = vmor %vm16255_vm0, %vm16254_vm7  ;;  %vm8715_vm7 = vcmp.eq.s32.totalorder %v8691_v46, 1 }
 0x6ea   : > { %vm15588_vm10 = vmor %vm16291_vm3, %vm8729_vm5  ;;  %vm8718_vm5 = vcmp.eq.s32.totalorder %v8700_v56, 1 }
 0x6eb   : > { %vm8732_vm11 = vmand %vm8652_vm9, %vm8716_vm8  ;;  %vm8653_vm9 = vcmp.eq.s32.totalorder %v14879_v49, %v15308_v54  ;;  %v11105_v54 = vld [vmem:[%s15866_s3 + $0xc8] sm:$0xff]  }
 0x6ec   : > { %vm16296_vm14 = vmor %vm16294_vm13, %vm16295_vm12 }
 0x6ed   : > { %vm15599_vm1 = vmor %vm16296_vm14, %vm8732_vm11  ;;  %vm16302_vm11 = vnez %v16107_v33  ;;  %v8703_v33 = vpop.permute.xlu1 %8702 }
 0x6ee   : > { %v16298_v57 = vsel %vm15599_vm1, 4294967295, %v16297_v57  ;;  %vm8731_vm0 = vmand %vm8651_vm4, %vm8715_vm7  ;;  %vm16303_vm4 = vnez %v16113_v47  ;;  %vm8717_vm7 = vcmp.eq.s32.totalorder %v8697_v51, 1  ;;  %v16314_v47 = vmov 0 }
 0x6ef   : > { %vm16299_vm8 = vmor %vm16268_vm6, %vm16267_vm15  ;;  %vm8655_vm15 = vcmp.eq.s32.totalorder %v14879_v49, %v15356_v7  ;;  %vm16307_vm6 = vnez %v16239_v20  ;;  %v11106_v7 = vld [vmem:[%s15866_s3 + $0xd0] sm:$0xff]  }
 0x6f0   : > { %vm15610_vm3 = vmor %vm16299_vm8, %vm8731_vm0  ;;  %vm16308_vm0 = vnez %v16111_v6  ;;  %vm16312_vm8 = vnez %v16115_v52  ;;  %v11103_v6 = vld [vmem:[%s15866_s3 + $0xb8] sm:$0xff]   ;;  %v11104_v52 = vld [vmem:[%s15866_s3 + $0xc0] sm:$0xff]  }
 0x6f1   : > { %vm8734_vm14 = vmand %vm8654_vm2, %vm8718_vm5  ;;  %9850 = vmatprep.subr.bf16.mxu1 %v11103_v6  ;;  %v15660_v20 = vld [vmem:[%s15865_s2 + $0x15] ss:$0 sm:$0xff] }
 0x6f2   : > { %vm16304_vm13 = vmor %vm16302_vm11, %vm16303_vm4  ;;  %vm8719_vm4 = vcmp.eq.s32.totalorder %v8703_v33, 1  ;;  %9851 = vmatpush3.bf16.msra.mxu1 %v11103_v6 }
 0x6f3   : > { %vm15619_vm12 = vmor %vm16304_vm13, %vm8734_vm14  ;;  %vm16313_vm14 = vnez %v16284_v43  ;;  %9852 = vmatprep.subr.bf16.mxu1 %v11104_v52 }
 0x6f4   : > { %vm8733_vm1 = vmand %vm8653_vm9, %vm8717_vm7 }
 0x6f5   : > { %vm16309_vm2 = vmor %vm16307_vm6, %vm16308_vm0 }
 0x6f6   : > { %vm15630_vm5 = vmor %vm16309_vm2, %vm8733_vm1  ;;  %9853 = vmatpush3.bf16.msra.mxu1 %v11104_v52 }
 0x6f7   : > { %v16311_v5 = vsel %vm15630_vm5, 4294967295, %v16310_v5  ;;  %vm8591_vm11 = vmor %vm16313_vm14, %vm16312_vm8  ;;  %9854 = vmatprep.subr.bf16.mxu1 %v11105_v54 }
 0x6f8   : > { %vm8735_vm9 = vmand %vm8655_vm15, %vm8719_vm4 }
 0x6f9   : > { %vm15638_vm13 = vmor %vm8591_vm11, %vm8735_vm9 }
 0x6fa   : > { %v16315_v47 = vsel %vm15638_vm13, 4294967295, %v16314_v47  ;;  %9855 = vmatpush3.bf16.msra.mxu1 %v11105_v54  ;;  %vm16330_vm13 = vnez %v16261_v8 }
 0x6fb   : > { %9856 = vmatprep.subr.bf16.mxu1 %v11106_v7 }
 0x6fe   : > { %9857 = vmatpush3.bf16.msra.mxu1 %v11106_v7 }
 0x6ff   : > { %9858 = vmatprep.subr.bf16.mxu1 %v11107_v50 }
 0x702   : > { %9859 = vmatpush3.bf16.msra.mxu1 %v11107_v50 }
 0x77b   : > { %v9756_v19 = vpop.f32.mrb[160].mxu1 }
 0x77c   : > { %v9757_v10 = vpop.f32.mrb[161].mxu1 }
 0x77d   : > { %v9758_v60 = vadd.f32 %v9757_v10, %v9756_v19  ;;  %v9759_v26 = vpop.f32.mrb[162].mxu1 }
 0x77e   : > { %v9760_v59 = vpop.f32.mrb[163].mxu1 }
 0x77f   : > { %v7951_v55 = vadd.f32 %v9758_v60, %v15660_v20  ;;  %v9761_v12 = vadd.f32 %v9760_v59, %v9759_v26 }
 0x781   : > { %v8013_v31 = vmul.f32 0.01, %v7951_v55  ;;  %v7954_v29 = vadd.f32 %v9761_v12, %v15660_v20 }
 0x783   : > { %v8014_v0 = vmul.f32 0.01, %v7954_v29  ;;  %v9762_v53 = vpop.f32.mrb[164].mxu1  ;;  %v8029_v25 = vmax.f32 %v7951_v55, %v8013_v31 }
 0x784   : > { %v9763_v14 = vpop.f32.mrb[165].mxu1 }
 0x785   : > { %v8030_v61 = vmax.f32 %v7954_v29, %v8014_v0  ;;  %v9764_v1 = vadd.f32 %v9763_v14, %v9762_v53  ;;  %v9765_v35 = vpop.f32.mrb[166].mxu1 }
 0x786   : > { %v9766_v4 = vpop.f32.mrb[167].mxu1 }
 0x787   : > { %v7959_v37 = vadd.f32 %v9764_v1, %v15660_v20  ;;  %v9767_v27 = vadd.f32 %v9766_v4, %v9765_v35  ;;  %v8045_v17 = vpack.c.bf16 %v8030_v61, %v8029_v25 }
 0x789   : > { %v8015_v28 = vmul.f32 0.01, %v7959_v37  ;;  %v7962_v11 = vadd.f32 %v9767_v27, %v15660_v20  ;;  %9860 = vmatprep.mubr.bf16.mxu1 %v8045_v17 }
 0x78b   : > { %v8016_v9 = vmul.f32 0.01, %v7962_v11  ;;  %v9768_v23 = vpop.f32.mrb[168].mxu1  ;;  %v8031_v45 = vmax.f32 %v7959_v37, %v8015_v28 }
 0x78c   : > { %v9769_v34 = vpop.f32.mrb[169].mxu1 }
 0x78d   : > { %v8032_v36 = vmax.f32 %v7962_v11, %v8016_v9  ;;  %v9770_v30 = vadd.f32 %v9769_v34, %v9768_v23  ;;  %v9771_v38 = vpop.f32.mrb[170].mxu1 }
 0x78e   : > { %v9772_v43 = vpop.f32.mrb[171].mxu1 }
 0x78f   : > { %v8046_v62 = vpack.c.bf16 %v8032_v36, %v8031_v45  ;;  %v7967_v39 = vadd.f32 %v9770_v30, %v15660_v20  ;;  %v9773_v13 = vadd.f32 %v9772_v43, %v9771_v38 }
 0x791   : > { %v8017_v21 = vmul.f32 0.01, %v7967_v39  ;;  %v7970_v63 = vadd.f32 %v9773_v13, %v15660_v20  ;;  %9861 = vmatmul.mubr.bf16.vlgmr.msra.gmra.mrb[192].mxu1 %v8046_v62 }
 0x793   : > { %v8018_v58 = vmul.f32 0.01, %v7970_v63  ;;  %v9774_v46 = vpop.f32.mrb[172].mxu1  ;;  %v8033_v56 = vmax.f32 %v7967_v39, %v8017_v21 }
 0x794   : > { %v9775_v48 = vpop.f32.mrb[173].mxu1 }
 0x795   : > { %v8034_v51 = vmax.f32 %v7970_v63, %v8018_v58  ;;  %v9776_v33 = vadd.f32 %v9775_v48, %v9774_v46  ;;  %v9777_v6 = vpop.f32.mrb[174].mxu1 }
 0x796   : > { %v9778_v52 = vpop.f32.mrb[175].mxu1 }
 0x797   : > { %v7975_v54 = vadd.f32 %v9776_v33, %v15660_v20  ;;  %v9779_v7 = vadd.f32 %v9778_v52, %v9777_v6  ;;  %v8047_v50 = vpack.c.bf16 %v8034_v51, %v8033_v56 }
 0x799   : > { %v8019_v19 = vmul.f32 0.01, %v7975_v54  ;;  %v7978_v10 = vadd.f32 %v9779_v7, %v15660_v20  ;;  %9864 = vmatprep.mubr.bf16.mxu1 %v8047_v50 }
 0x79b   : > { %v8020_v60 = vmul.f32 0.01, %v7978_v10  ;;  %v9780_v26 = vpop.f32.mrb[176].mxu1  ;;  %v8035_v55 = vmax.f32 %v7975_v54, %v8019_v19 }
 0x79c   : > { %v9781_v59 = vpop.f32.mrb[177].mxu1 }
 0x79d   : > { %v8036_v12 = vmax.f32 %v7978_v10, %v8020_v60  ;;  %v9782_v31 = vadd.f32 %v9781_v59, %v9780_v26  ;;  %v9783_v29 = vpop.f32.mrb[178].mxu1 }
 0x79e   : > { %v9784_v0 = vpop.f32.mrb[179].mxu1 }
 0x79f   : > { %v7983_v53 = vadd.f32 %v9782_v31, %v15660_v20  ;;  %v9785_v14 = vadd.f32 %v9784_v0, %v9783_v29  ;;  %v8048_v25 = vpack.c.bf16 %v8036_v12, %v8035_v55 }
 0x7a1   : > { %v8021_v61 = vmul.f32 0.01, %v7983_v53  ;;  %v7986_v1 = vadd.f32 %v9785_v14, %v15660_v20  ;;  %9865 = vmatmul.mubr.bf16.gmra.mrb[196].mxu1 %v8048_v25  ;;  %v8757_v25 = vpop.permute.xlu1 %8756 }
 0x7a2   : > { %vm8801_vm1 = vcmp.eq.s32.totalorder %v14879_v49, %v8757_v25 }
 0x7a3   : > { %v8022_v35 = vmul.f32 0.01, %v7986_v1  ;;  %v8037_v27 = vmax.f32 %v7983_v53, %v8021_v61  ;;  %v8754_v61 = vpop.permute.xlu0 %8753 }
 0x7a4   : > { %v9786_v4 = vpop.f32.mrb[180].mxu1  ;;  %vm8800_vm0 = vcmp.eq.s32.totalorder %v14879_v49, %v8754_v61 }
 0x7a5   : > { %v9787_v37 = vpop.f32.mrb[181].mxu1  ;;  %v8038_v17 = vmax.f32 %v7986_v1, %v8022_v35  ;;  %v8760_v1 = vpop.permute.xlu1 %8759 }
 0x7a6   : > { %v9788_v28 = vadd.f32 %v9787_v37, %v9786_v4  ;;  %v9789_v11 = vpop.f32.mrb[182].mxu1  ;;  %vm8802_vm15 = vcmp.eq.s32.totalorder %v14879_v49, %v8760_v1 }
 0x7a7   : > { %v9790_v9 = vpop.f32.mrb[183].mxu1  ;;  %v8049_v45 = vpack.c.bf16 %v8038_v17, %v8037_v27  ;;  %v8763_v35 = vpop.permute.xlu0 %8762 }
 0x7a8   : > { %v7991_v23 = vadd.f32 %v9788_v28, %v15660_v20  ;;  %v9791_v34 = vadd.f32 %v9790_v9, %v9789_v11  ;;  %vm8803_vm8 = vcmp.eq.s32.totalorder %v14879_v49, %v8763_v35 }
 0x7a9   : > { %9868 = vmatprep.mubr.bf16.mxu1 %v8049_v45  ;;  %v15678_v4 = vpop.permute.xlu1 %8765 }
 0x7aa   : > { %v8023_v36 = vmul.f32 0.01, %v7991_v23  ;;  %v7994_v30 = vadd.f32 %v9791_v34, %v15660_v20 }
 0x7ab   : > { %v8769_v37 = vpop.permute.xlu0 %8768 }
 0x7ac   : > { %v8024_v38 = vmul.f32 0.01, %v7994_v30  ;;  %v8039_v39 = vmax.f32 %v7991_v23, %v8023_v36 }
 0x7ad   : > { %v8772_v27 = vpop.permute.xlu1 %8771 }
 0x7ae   : > { %v8040_v13 = vmax.f32 %v7994_v30, %v8024_v38 }
 0x7af   : > { %v9792_v43 = vpop.f32.mrb[184].mxu1  ;;  %v15680_v17 = vpop.permute.xlu0 %8774 }
 0x7b0   : > { %v9793_v62 = vpop.f32.mrb[185].mxu1  ;;  %v8050_v56 = vpack.c.bf16 %v8040_v13, %v8039_v39  ;;  %v15709_v13 = vld [vmem:[%s15865_s2 + $0x16] ss:$0 sm:$0xff] }
 0x7b1   : > { %v9794_v21 = vadd.f32 %v9793_v62, %v9792_v43  ;;  %v9795_v63 = vpop.f32.mrb[186].mxu1  ;;  %v15682_v28 = vpop.permute.xlu1 %8777 }
 0x7b2   : > { %v9796_v58 = vpop.f32.mrb[187].mxu1  ;;  %9869 = vmatmul.mubr.bf16.gmra.mrb[200].mxu1 %v8050_v56 }
 0x7b3   : > { %v7999_v46 = vadd.f32 %v9794_v21, %v15660_v20  ;;  %v9797_v48 = vadd.f32 %v9796_v58, %v9795_v63  ;;  %v15684_v11 = vpop.permute.xlu0 %8780 }
 0x7b5   : > { %v8025_v51 = vmul.f32 0.01, %v7999_v46  ;;  %v8002_v33 = vadd.f32 %v9797_v48, %v15660_v20 }
 0x7b7   : > { %v8026_v6 = vmul.f32 0.01, %v8002_v33  ;;  %v8041_v7 = vmax.f32 %v7999_v46, %v8025_v51  ;;  %v15688_v9 = vpop.permute.xlu0 %8786 }
 0x7b9   : > { %v8042_v50 = vmax.f32 %v8002_v33, %v8026_v6 }
 0x7bb   : > { %v9798_v52 = vpop.f32.mrb[188].mxu1  ;;  %v8051_v55 = vpack.c.bf16 %v8042_v50, %v8041_v7  ;;  %v15692_v34 = vpop.permute.xlu0 %8792 }
 0x7bc   : > { %v9799_v54 = vpop.f32.mrb[189].mxu1 }
 0x7bd   : > { %v9800_v19 = vadd.f32 %v9799_v54, %v9798_v52  ;;  %v9801_v10 = vpop.f32.mrb[190].mxu1  ;;  %9872 = vmatprep.mubr.bf16.mxu1 %v8051_v55 }
 0x7be   : > { %v9802_v60 = vpop.f32.mrb[191].mxu1 }
 0x7bf   : > { %v8007_v26 = vadd.f32 %v9800_v19, %v15660_v20  ;;  %v9803_v59 = vadd.f32 %v9802_v60, %v9801_v10  ;;  %v15696_v36 = vpop.permute.xlu0 %8798 }
 0x7c1   : > { %v8027_v12 = vmul.f32 0.01, %v8007_v26  ;;  %v8010_v31 = vadd.f32 %v9803_v59, %v15660_v20  ;;  %v15686_v20 = vpop.permute.xlu1 %8783 }
 0x7c3   : > { %v8028_v29 = vmul.f32 0.01, %v8010_v31  ;;  %v8043_v0 = vmax.f32 %v8007_v26, %v8027_v12  ;;  %v8821_v38 = vpop.permute.xlu0 %8820 }
 0x7c4   : > { %vm8865_vm7 = vcmp.eq.s32.totalorder %v8821_v38, 1 }
 0x7c5   : > { %v8044_v53 = vmax.f32 %v8010_v31, %v8028_v29  ;;  %v15690_v23 = vpop.permute.xlu1 %8789  ;;  %vm15702_vm14 = vmand %vm8801_vm1, %vm8865_vm7  ;;  %vm16322_vm1 = vnez %v16217_v32 }
 0x7c7   : > { %v8052_v14 = vpack.c.bf16 %v8044_v53, %v8043_v0  ;;  %v8827_v62 = vpop.permute.xlu0 %8826 }
 0x7c8   : > { %vm8867_vm11 = vcmp.eq.s32.totalorder %v8827_v62, 1 }
 0x7c9   : > { %9873 = vmatmul.mubr.bf16.gmra.mrb[204].mxu1 %v8052_v14  ;;  %v15694_v45 = vpop.permute.xlu1 %8795  ;;  %vm15715_vm5 = vmand %vm8803_vm8, %vm8867_vm11  ;;  %vm16325_vm8 = vnez %v16233_v42 }
 0x7ca   : > { %vm8897_vm11 = vmor %vm16325_vm8, %vm15702_vm14  ;;  %vm8807_vm14 = vcmp.eq.s32.totalorder %v14879_v49, %v15680_v17 }
 0x7cb   : > { %v8833_v19 = vpop.permute.xlu0 %8832 }
 0x7cd   : > { %v8818_v30 = vpop.permute.xlu1 %8817 }
 0x7ce   : > { %vm8864_vm2 = vcmp.eq.s32.totalorder %v8818_v30, 1 }
 0x7cf   : > { %vm15711_vm9 = vmand %vm8800_vm0, %vm8864_vm2  ;;  %vm16324_vm0 = vnez %v16253_v44  ;;  %v8839_v10 = vpop.permute.xlu0 %8838 }
 0x7d0   : > { %vm8899_vm2 = vmor %vm16324_vm0, %vm15715_vm5  ;;  %vm8806_vm5 = vcmp.eq.s32.totalorder %v14879_v49, %v8772_v27  ;;  %vm8871_vm0 = vcmp.eq.s32.totalorder %v8839_v10, 1 }
 0x7d1   : > { %v8824_v43 = vpop.permute.xlu1 %8823 }
 0x7d2   : > { %vm8866_vm6 = vcmp.eq.s32.totalorder %v8824_v43, 1 }
 0x7d3   : > { %vm8882_vm4 = vmand %vm8802_vm15, %vm8866_vm6  ;;  %vm16323_vm15 = vnez %v16207_v3  ;;  %v8845_v1 = vpop.permute.xlu0 %8844 }
 0x7d4   : > { %vm8898_vm7 = vmor %vm16322_vm1, %vm8882_vm4  ;;  %vm8805_vm4 = vcmp.eq.s32.totalorder %v14879_v49, %v8769_v37 }
 0x7d5   : > { %vm8896_vm6 = vmor %vm16323_vm15, %vm15711_vm9  ;;  %v8830_v3 = vpop.permute.xlu1 %8829  ;;  %vm8869_vm9 = vcmp.eq.s32.totalorder %v8833_v19, 1 }
 0x7d6   : > { %vm8868_vm15 = vcmp.eq.s32.totalorder %v8830_v3, 1 }
 0x7d9   : > { %v8836_v44 = vpop.permute.xlu1 %8835 }
 0x7da   : > { %vm8870_vm1 = vcmp.eq.s32.totalorder %v8836_v44, 1 }
 0x864   : > { %v9862_v63 = vpop.f32.mrb[192].mxu1 }
 0x865   : > { %v8167_v46 = vadd.f32 %v9862_v63, %v15709_v13  ;;  %v8158_v48 = vpop.f32.mrb[193].mxu1 }
 0x866   : > { %v8159_v56 = vadd.f32 %v15709_v13, %v8158_v48  ;;  %v9863_v51 = vpop.f32.mrb[194].mxu1 }
 0x867   : > { %v8914_v33 = vsel %vm8898_vm7, -100.0, %v8167_v46  ;;  %v8170_v6 = vadd.f32 %v9863_v51, %v15709_v13  ;;  %v8161_v52 = vpop.f32.mrb[195].mxu1  ;;  %vm8804_vm7 = vcmp.eq.s32.totalorder %v14879_v49, %v15678_v4 }
 0x868   : > { %8930 = vst [vmem:[%s15724_s25 + $0x10] sm:$0xff] %v8914_v33  ;;  %v8912_v32 = vsel %vm8896_vm6, -100.0, %v8159_v56  ;;  %v8162_v54 = vadd.f32 %v15709_v13, %v8161_v52  ;;  %vm15754_vm6 = vmand %vm8805_vm4, %vm8869_vm9  ;;  %vm16331_vm9 = vnez %v16242_v2  ;;  %v8842_v2 = vpop.permute.xlu1 %8841 }
 0x869   : > { %8928 = vst [vmem:[%s15724_s25] sm:$0xff] %v8912_v32  ;;  %v8915_v7 = vsel %vm8899_vm2, -100.0, %v8170_v6  ;;  %vm8886_vm2 = vmand %vm8806_vm5, %vm8870_vm1  ;;  %vm16332_vm1 = vnez %v16277_v15 }
 0x86a   : > { %8931 = vst [vmem:[%s15724_s25 + $0x18] sm:$0xff] %v8915_v7  ;;  %v8913_v50 = vsel %vm8897_vm11, -100.0, %v8162_v54  ;;  %vm8884_vm8 = vmand %vm8804_vm7, %vm8868_vm15 }
 0x86b   : > { %8929 = vst [vmem:[%s15724_s25 + $0x8] sm:$0xff] %v8913_v50  ;;  %vm15758_vm11 = vmand %vm8807_vm14, %vm8871_vm0  ;;  %vm8809_vm14 = vcmp.eq.s32.totalorder %v14879_v49, %v15684_v11  ;;  %vm8873_vm0 = vcmp.eq.s32.totalorder %v8845_v1, 1 }
 0x86c   : > { %vm8902_vm4 = vmor %vm16330_vm13, %vm8886_vm2  ;;  %vm16333_vm13 = vnez %v16266_v18  ;;  %v8848_v15 = vpop.permute.xlu1 %8847  ;;  %vm8810_vm2 = vcmp.eq.s32.totalorder %v14879_v49, %v15686_v20  ;;  %v8851_v18 = vpop.permute.xlu0 %8850 }
 0x86d   : > { %vm8900_vm5 = vmor %vm16331_vm9, %vm8884_vm8  ;;  %vm8874_vm8 = vcmp.eq.s32.totalorder %v8848_v15, 1 }
 0x86e   : > { %vm8903_vm7 = vmor %vm16332_vm1, %vm15758_vm11  ;;  %vm8808_vm11 = vcmp.eq.s32.totalorder %v14879_v49, %v15682_v28 }
 0x86f   : > { %vm8901_vm15 = vmor %vm16333_vm13, %vm15754_vm6  ;;  %vm8872_vm6 = vcmp.eq.s32.totalorder %v8842_v2, 1 }
 0x870   : > { %vm15790_vm9 = vmand %vm8809_vm14, %vm8873_vm0  ;;  %vm16341_vm0 = vnez %v16272_v22  ;;  %v8857_v22 = vpop.permute.xlu0 %8856 }
 0x871   : > { %vm8890_vm1 = vmand %vm8810_vm2, %vm8874_vm8 }
 0x874   : > { %v9866_v60 = vpop.f32.mrb[196].mxu1  ;;  %v8863_v41 = vpop.permute.xlu0 %8862 }
 0x875   : > { %v8183_v59 = vadd.f32 %v9866_v60, %v15709_v13  ;;  %v8174_v55 = vpop.f32.mrb[197].mxu1 }
 0x876   : > { %v8175_v12 = vadd.f32 %v15709_v13, %v8174_v55  ;;  %v9867_v31 = vpop.f32.mrb[198].mxu1 }
 0x877   : > { %v8918_v29 = vsel %vm8902_vm4, -100.0, %v8183_v59  ;;  %v8186_v0 = vadd.f32 %v9867_v31, %v15709_v13  ;;  %v8177_v53 = vpop.f32.mrb[199].mxu1  ;;  %vm8811_vm4 = vcmp.eq.s32.totalorder %v14879_v49, %v15688_v9  ;;  %v8854_v9 = vpop.permute.xlu1 %8853 }
 0x878   : > { %8934 = vst [vmem:[%s15724_s25 + $0x30] sm:$0xff] %v8918_v29  ;;  %v8916_v8 = vsel %vm8900_vm5, -100.0, %v8175_v12  ;;  %v8178_v14 = vadd.f32 %v15709_v13, %v8177_v53  ;;  %vm8875_vm5 = vcmp.eq.s32.totalorder %v8851_v18, 1 }
 0x879   : > { %8932 = vst [vmem:[%s15724_s25 + $0x20] sm:$0xff] %v8916_v8  ;;  %v8919_v25 = vsel %vm8903_vm7, -100.0, %v8186_v0  ;;  %vm15794_vm7 = vmand %vm8808_vm11, %vm8872_vm6  ;;  %vm8813_vm6 = vcmp.eq.s32.totalorder %v14879_v49, %v15692_v34 }
 0x87a   : > { %8935 = vst [vmem:[%s15724_s25 + $0x38] sm:$0xff] %v8919_v25  ;;  %v8917_v61 = vsel %vm8901_vm15, -100.0, %v8178_v14  ;;  %vm15798_vm13 = vmand %vm8811_vm4, %vm8875_vm5  ;;  %vm16340_vm15 = vnez %v16289_v40  ;;  %vm8814_vm4 = vcmp.eq.s32.totalorder %v14879_v49, %v15694_v45 }
 0x87b   : > { %8933 = vst [vmem:[%s15724_s25 + $0x28] sm:$0xff] %v8917_v61  ;;  %vm8906_vm14 = vmor %vm16340_vm15, %vm8890_vm1  ;;  %v8860_v63 = vpop.permute.xlu1 %8859  ;;  %vm8812_vm1 = vcmp.eq.s32.totalorder %v14879_v49, %v15690_v23 }
 0x87c   : > { %vm8904_vm2 = vmor %vm16341_vm0, %vm15794_vm7  ;;  %vm8878_vm5 = vcmp.eq.s32.totalorder %v8860_v63, 1 }
 0x87d   : > { %vm8907_vm8 = vmor %vm15610_vm3, %vm15798_vm13  ;;  %vm8877_vm3 = vcmp.eq.s32.totalorder %v8857_v22, 1  ;;  %vm8879_vm13 = vcmp.eq.s32.totalorder %v8863_v41, 1 }
 0x87e   : > { %vm8905_vm11 = vmor %vm15588_vm10, %vm15790_vm9  ;;  %vm8876_vm10 = vcmp.eq.s32.totalorder %v8854_v9, 1  ;;  %vm8815_vm9 = vcmp.eq.s32.totalorder %v14879_v49, %v15696_v36 }
 0x87f   : > { %vm15832_vm7 = vmand %vm8813_vm6, %vm8877_vm3  ;;  %vm16347_vm6 = vnez %v16315_v47 }
 0x880   : > { %vm8894_vm15 = vmand %vm8814_vm4, %vm8878_vm5 }
 0x881   : > { %vm15836_vm0 = vmand %vm8815_vm9, %vm8879_vm13 }
 0x882   : > { %vm8911_vm3 = vmor %vm16347_vm6, %vm15836_vm0 }
 0x885   : > { %v9870_v37 = vpop.f32.mrb[200].mxu1 }
 0x886   : > { %v8199_v17 = vadd.f32 %v9870_v37, %v15709_v13  ;;  %v8190_v28 = vpop.f32.mrb[201].mxu1 }
 0x887   : > { %v8191_v11 = vadd.f32 %v15709_v13, %v8190_v28  ;;  %v9871_v20 = vpop.f32.mrb[202].mxu1 }
 0x888   : > { %v8922_v30 = vsel %vm8906_vm14, -100.0, %v8199_v17  ;;  %v8202_v38 = vadd.f32 %v9871_v20, %v15709_v13  ;;  %v8193_v43 = vpop.f32.mrb[203].mxu1  ;;  %vm8892_vm14 = vmand %vm8812_vm1, %vm8876_vm10 }
 0x889   : > { %8938 = vst [vmem:[%s15724_s25 + $0x50] sm:$0xff] %v8922_v30  ;;  %v8920_v40 = vsel %vm8904_vm2, -100.0, %v8191_v11  ;;  %v8194_v62 = vadd.f32 %v15709_v13, %v8193_v43  ;;  %vm8910_vm2 = vmor %vm15619_vm12, %vm8894_vm15  ;;  %vm16348_vm12 = vnez %v16311_v5 }
 0x88a   : > { %8936 = vst [vmem:[%s15724_s25 + $0x40] sm:$0xff] %v8920_v40  ;;  %v8923_v39 = vsel %vm8907_vm8, -100.0, %v8202_v38  ;;  %vm16346_vm8 = vnez %v16298_v57  ;;  %vm8909_vm4 = vmor %vm16348_vm12, %vm15832_vm7 }
 0x88b   : > { %8939 = vst [vmem:[%s15724_s25 + $0x58] sm:$0xff] %v8923_v39  ;;  %v8921_v21 = vsel %vm8905_vm11, -100.0, %v8194_v62  ;;  %vm8908_vm11 = vmor %vm16346_vm8, %vm8892_vm14 }
 0x88c   : > { %8937 = vst [vmem:[%s15724_s25 + $0x48] sm:$0xff] %v8921_v21 }
 0x89c   : > { %v9874_v34 = vpop.f32.mrb[204].mxu1 }
 0x89d   : > { %v8215_v23 = vadd.f32 %v9874_v34, %v15709_v13  ;;  %v8206_v58 = vpop.f32.mrb[205].mxu1 }
 0x89e   : > { %v8207_v49 = vadd.f32 %v15709_v13, %v8206_v58  ;;  %v9875_v36 = vpop.f32.mrb[206].mxu1 }
 0x89f   : > { %v8926_v46 = vsel %vm8910_vm2, -100.0, %v8215_v23  ;;  %v8218_v48 = vadd.f32 %v9875_v36, %v15709_v13  ;;  %v8209_v56 = vpop.f32.mrb[207].mxu1 }
 0x8a0   : > { %8942 = vst [vmem:[%s15724_s25 + $0x70] sm:$0xff] %v8926_v46  ;;  %v8924_v51 = vsel %vm8908_vm11, -100.0, %v8207_v49  ;;  %v8210_v24 = vadd.f32 %v15709_v13, %v8209_v56 }
 0x8a1   : > { %8940 = vst [vmem:[%s15724_s25 + $0x60] sm:$0xff] %v8924_v51  ;;  %v8927_v57 = vsel %vm8911_vm3, -100.0, %v8218_v48 }
 0x8a2   : > { %8943 = vst [vmem:[%s15724_s25 + $0x78] sm:$0xff] %v8927_v57  ;;  %v8925_v33 = vsel %vm8909_vm4, -100.0, %v8210_v24 }
 0x8a3   : > { %8941 = vst [vmem:[%s15724_s25 + $0x68] sm:$0xff] %v8925_v33 }
 0x8a4 PF: > { %s17_s24 = sadd.s32 1, %s11121_s24  }
 0x8a5   : > { %p14_p4 = scmp.ge.s32.totalorder %s17_s24, 4  }
 0x8a7   :  { %16 = sbr.rel (!%p14_p4) target bundleno = 1 (0x1), region = 81 }

</bundles_post_ra>
